<compile_context>
chip_gen: v7x
topology: tpu7x:2x2x1
jax: 0.10.0
libtpu: 0.0.40
codegen_flags: <defaults>
</compile_context>

<pallas_src>
import functools

import jax
import jax.numpy as jnp
from jax.experimental import pallas as pl
from jax.experimental.pallas import tpu as pltpu


# ---------------------------------------------------------------------------
# helpers
# ---------------------------------------------------------------------------
def _layernorm(x, g, b, eps):
    mu = jnp.mean(x, axis=-1, keepdims=True)
    xc = x - mu
    var = jnp.mean(xc * xc, axis=-1, keepdims=True)
    return xc * jax.lax.rsqrt(var + eps) * g + b


# ---------------------------------------------------------------------------
# Fused encoder stack kernel: grid = (batch_block, layer)
#   QKV + attention + out-proj + LN1 + FFN + LN2, activation resident in VMEM.
# ---------------------------------------------------------------------------
def _encoder_stack_kernel(
    x_ref, bias_ref, emb_g_ref, emb_b_ref,
    wqkv_ref, bqkv_ref, wo_ref, bo_ref, ln1_g_ref, ln1_b_ref,
    wf1_ref, bf1_ref, wf2_ref, bf2_ref, ln2_g_ref, ln2_b_ref,
    hs_ref, act_ref,
    *, num_heads, eps,
):
    layer = pl.program_id(1)
    BB, S, D = x_ref.shape
    M = BB * S
    Dh = D // num_heads

    # Layer 0 of each batch block: load embeddings + fused embedding LayerNorm.
    @pl.when(layer == 0)
    def _():
        x0 = x_ref[...].astype(jnp.float32).reshape(M, D)
        act_ref[...] = _layernorm(x0, emb_g_ref[...], emb_b_ref[...], eps)

    x = act_ref[...]                                        # (M, D) f32 residual stream

    # ---- fused QKV projection: one MXU pass at M = BLOCK_B*S ----
    xb = x.astype(jnp.bfloat16)
    qkv = jnp.dot(xb, wqkv_ref[...], preferred_element_type=jnp.float32) + bqkv_ref[...]
    q = qkv[:, :D].reshape(BB, S, D)                        # scale already folded into Wq
    k = qkv[:, D:2 * D].reshape(BB, S, D)
    v = qkv[:, 2 * D:].reshape(BB, S, D)
    bias = bias_ref[...][:, None, :]                        # (BB, 1, S) additive key mask

    # ---- per-head attention, batched over the batch block; out-proj hoisted out ----
    ctx_parts = []
    for h in range(num_heads):                              # static, small head count
        sl = slice(h * Dh, (h + 1) * Dh)
        qh = q[:, :, sl].astype(jnp.bfloat16)
        kh = k[:, :, sl].astype(jnp.bfloat16)
        vh = v[:, :, sl].astype(jnp.bfloat16)
        sc = jnp.einsum('bqd,bkd->bqk', qh, kh,
                        preferred_element_type=jnp.float32) + bias
        sc = sc - jnp.max(sc, axis=-1, keepdims=True)       # softmax in f32
        p = jnp.exp(sc)
        p = p * pl.reciprocal(jnp.sum(p, axis=-1, keepdims=True), approx=True)
        ctx_parts.append(jnp.einsum('bqk,bkd->bqd', p.astype(jnp.bfloat16), vh,
                                    preferred_element_type=jnp.float32))
    ctx = jnp.concatenate(ctx_parts, axis=-1).reshape(M, D)

    # single output projection pass (K = D, M = BLOCK_B*S)
    attn = jnp.dot(ctx.astype(jnp.bfloat16), wo_ref[...],
                   preferred_element_type=jnp.float32) + bo_ref[...]
    x1 = _layernorm(x + attn, ln1_g_ref[...], ln1_b_ref[...], eps)

    # ---- FFN (bf16 MXU, M = BLOCK_B*S) + residual + LayerNorm2 ----
    h1 = jnp.dot(x1.astype(jnp.bfloat16), wf1_ref[...],
                 preferred_element_type=jnp.float32) + bf1_ref[...]
    h1 = jax.nn.gelu(h1, approximate=True)
    h2 = jnp.dot(h1.astype(jnp.bfloat16), wf2_ref[...],
                 preferred_element_type=jnp.float32) + bf2_ref[...]
    y = _layernorm(x1 + h2, ln2_g_ref[...], ln2_b_ref[...], eps)

    act_ref[...] = y                                        # stays resident for layer+1
    hs_ref[...] = y.reshape(BB, S, D).astype(hs_ref.dtype)  # bf16 hidden-state slot


def encoder_stack(x_emb, bias, base_p, *, block_b):
    B, S, D = x_emb.shape
    L = base_p["wqkv"].shape[0]
    assert B % block_b == 0
    nb = B // block_b

    layer_names = ["wqkv", "bqkv", "wo", "bo", "ln1_g", "ln1_b",
                   "wf1", "bf1", "wf2", "bf2", "ln2_g", "ln2_b"]

    const2 = lambda b, l: (0, 0)
    per_layer = lambda b, l: (l, 0, 0)

    in_specs = [
        pl.BlockSpec((block_b, S, D), lambda b, l: (b, 0, 0)),   # embeddings (bf16)
        pl.BlockSpec((block_b, S), lambda b, l: (b, 0)),         # additive key mask
        pl.BlockSpec((1, D), const2),                            # embedding LN gamma
        pl.BlockSpec((1, D), const2),                            # embedding LN beta
    ]
    for name in layer_names:                                     # per-layer stacked params
        arr = base_p[name]
        in_specs.append(pl.BlockSpec((None,) + arr.shape[1:], per_layer))

    return pl.pallas_call(
        functools.partial(_encoder_stack_kernel, num_heads=base_p["heads"], eps=1e-12),
        out_shape=jax.ShapeDtypeStruct((B, L, S, D), jnp.bfloat16),
        grid=(nb, L),
        in_specs=in_specs,
        out_specs=pl.BlockSpec((block_b, None, S, D), lambda b, l: (b, l, 0, 0)),
        scratch_shapes=[pltpu.VMEM((block_b * S, D), jnp.float32)],
        compiler_params=pltpu.CompilerParams(
            dimension_semantics=("parallel", "arbitrary"),
            vmem_limit_bytes=32 * 1024 * 1024),
    )(x_emb, bias, base_p["ln_emb_g"], base_p["ln_emb_b"],
      *[base_p[n] for n in layer_names])


# ---------------------------------------------------------------------------
# Fused SCSE + mean-over-layers + linear + flatten + out head kernel
#   (batch-blocked: all matmuls run with M = BLOCK_B)
# ---------------------------------------------------------------------------
def _scse_head_kernel(
    hs_ref,
    wc1_ref, bc1_ref, wc2_ref, bc2_ref, ws_ref, bs_ref,
    wlin_ref, blin_ref, wout_ref, bout_ref,
    o_ref,
):
    x = hs_ref[...].astype(jnp.float32)                     # (BB, L, S, D)
    BB, L, S, D = x.shape
    HP = wlin_ref.shape[1]
    NP = o_ref.shape[1]

    # cSE: channels = tokens (S); global average pool over spatial (L, D).
    z = jnp.mean(jnp.mean(x, axis=1), axis=-1)              # (BB, S)
    c1 = jnp.maximum(
        jnp.dot(z, wc1_ref[...], preferred_element_type=jnp.float32) + bc1_ref[...], 0.0)
    cgate = jax.nn.sigmoid(
        jnp.dot(c1, wc2_ref[...], preferred_element_type=jnp.float32) + bc2_ref[...])

    # sSE: 1x1 "conv" over the token axis -> sigmoid spatial gate over (L, D).
    smap = jax.nn.sigmoid(
        jnp.sum(x * ws_ref[...][None, None, :, :], axis=2) + bs_ref[...])   # (BB, L, D)

    y = x * cgate[:, None, :, None] + x * smap[:, :, None, :]               # SCSE output
    ym = jnp.mean(y, axis=1)                                # mean over layers -> (BB, S, D)

    # Linear(D -> hidden_size), lane-padded weights, M = BB*S.
    lin = jnp.dot(ym.reshape(BB * S, D).astype(jnp.bfloat16), wlin_ref[...],
                  preferred_element_type=jnp.float32) + blin_ref[...]       # (BB*S, HP)
    lin3 = lin.reshape(BB, S, HP)

    # flatten(S*hidden_size) @ W_out as a per-token accumulation with M = BB.
    # TODO(synk): a single K=S*HP contraction needs a lane-merging (BB,S,HP)->(BB,S*HP)
    #             reshape in-kernel; kept as S matmuls (M=BB each) for robust lowering.
    acc = jnp.zeros((BB, NP), jnp.float32)
    for s in range(S):                                      # static, S == max_len
        acc = acc + jnp.dot(lin3[:, s, :].astype(jnp.bfloat16), wout_ref[s],
                            preferred_element_type=jnp.float32)
    o_ref[...] = acc + bout_ref[...]


def scse_head(hs, scse_p, head_p, *, block_b):
    B, L, S, D = hs.shape
    NP = head_p["bout"].shape[1]
    assert B % block_b == 0
    nb = B // block_b

    params = [scse_p["wc1"], scse_p["bc1"], scse_p["wc2"], scse_p["bc2"],
              scse_p["ws"], scse_p["bs"],
              head_p["wlin"], head_p["blin"], head_p["wout"], head_p["bout"]]

    def const_spec(arr):
        n = arr.ndim
        return pl.BlockSpec(arr.shape, lambda *args, _n=n: (0,) * _n)

    in_specs = [pl.BlockSpec((block_b, L, S, D), lambda b: (b, 0, 0, 0))] + \
               [const_spec(a) for a in params]

    return pl.pallas_call(
        _scse_head_kernel,
        out_shape=jax.ShapeDtypeStruct((B, NP), jnp.float32),
        grid=(nb,),
        in_specs=in_specs,
        out_specs=pl.BlockSpec((block_b, NP), lambda b: (b, 0)),
        compiler_params=pltpu.CompilerParams(
            dimension_semantics=("parallel",),
            vmem_limit_bytes=32 * 1024 * 1024),
    )(hs, *params)


# ---------------------------------------------------------------------------
# Synthetic BERT-like base model (deterministic weights), layer-stacked params
# ---------------------------------------------------------------------------
def init_base_model(key, vocab_size, max_pos, hidden, heads, num_layers, ffn_mult=4):
    D, F = hidden, ffn_mult * hidden
    Dh = D // heads
    s = 0.02
    k = jax.random.split(key, 7)

    wqkv = s * jax.random.normal(k[3], (num_layers, D, 3 * D), jnp.float32)
    wqkv = wqkv.at[:, :, :D].multiply(1.0 / (Dh ** 0.5))    # fold attention scale into Wq

    return {
        "word_emb": s * jax.random.normal(k[0], (vocab_size, D), jnp.float32),
        "pos_emb": s * jax.random.normal(k[1], (max_pos, D), jnp.float32),
        "type_emb": s * jax.random.normal(k[2], (2, D), jnp.float32),
        "ln_emb_g": jnp.ones((1, D), jnp.float32),
        "ln_emb_b": jnp.zeros((1, D), jnp.float32),
        "heads": heads,
        # weights in bf16 (f32 accumulation in-kernel); biases / LN params in f32
        "wqkv": wqkv.astype(jnp.bfloat16),
        "bqkv": jnp.zeros((num_layers, 1, 3 * D), jnp.float32),
        "wo": (s * jax.random.normal(k[4], (num_layers, D, D), jnp.float32)).astype(jnp.bfloat16),
        "bo": jnp.zeros((num_layers, 1, D), jnp.float32),
        "ln1_g": jnp.ones((num_layers, 1, D), jnp.float32),
        "ln1_b": jnp.zeros((num_layers, 1, D), jnp.float32),
        "wf1": (s * jax.random.normal(k[5], (num_layers, D, F), jnp.float32)).astype(jnp.bfloat16),
        "bf1": jnp.zeros((num_layers, 1, F), jnp.float32),
        "wf2": (s * jax.random.normal(k[6], (num_layers, F, D), jnp.float32)).astype(jnp.bfloat16),
        "bf2": jnp.zeros((num_layers, 1, D), jnp.float32),
        "ln2_g": jnp.ones((num_layers, 1, D), jnp.float32),
        "ln2_b": jnp.zeros((num_layers, 1, D), jnp.float32),
    }


def init_scse_head(key, max_len, r, hidden, hidden_size, n_out):
    ks = jax.random.split(key, 5)
    s = 0.02
    S = max_len
    SR = max(1, S // r)
    SRP = ((SR + 127) // 128) * 128            # lane-pad the cSE bottleneck width
    HP = ((hidden_size + 127) // 128) * 128    # lane-pad per-token head width
    NP = ((n_out + 127) // 128) * 128          # lane-pad n_out (unmasked stores)

    wc1 = jnp.zeros((S, SRP), jnp.float32).at[:, :SR].set(
        s * jax.random.normal(ks[0], (S, SR), jnp.float32))
    wc2 = jnp.zeros((SRP, S), jnp.float32).at[:SR, :].set(
        s * jax.random.normal(ks[1], (SR, S), jnp.float32))
    ws = s * jax.random.normal(ks[2], (S, 1), jnp.float32)

    wlin = jnp.zeros((hidden, HP), jnp.float32).at[:, :hidden_size].set(
        s * jax.random.normal(ks[3], (hidden, hidden_size), jnp.float32))
    wout = jnp.zeros((S, HP, NP), jnp.float32).at[:, :hidden_size, :n_out].set(
        s * jax.random.normal(ks[4], (S, hidden_size, n_out), jnp.float32))

    scse_p = {"wc1": wc1, "bc1": jnp.zeros((1, SRP), jnp.float32),
              "wc2": wc2, "bc2": jnp.zeros((1, S), jnp.float32),
              "ws": ws, "bs": jnp.zeros((1, 1), jnp.float32)}
    head_p = {"wlin": wlin.astype(jnp.bfloat16), "blin": jnp.zeros((1, HP), jnp.float32),
              "wout": wout.astype(jnp.bfloat16), "bout": jnp.zeros((1, NP), jnp.float32),
              "n_out": n_out}
    return scse_p, head_p


# ---------------------------------------------------------------------------
# Module forward
# ---------------------------------------------------------------------------
def transformer_scse_forward(base_p, scse_p, head_p, ids, mask, token_type_ids,
                             *, block_b_enc, block_b_head):
    B, S = ids.shape
    # embedding gathers + adds stay as one fused XLA op feeding the encoder kernel
    emb = (base_p["word_emb"][ids]
           + base_p["pos_emb"][None, :S, :]
           + base_p["type_emb"][token_type_ids]).astype(jnp.bfloat16)   # (B, S, D)
    bias = (1.0 - mask.astype(jnp.float32)) * -1e4                      # (B, S) key mask
    # fused encoder stack: per-layer hidden states written straight into (B, L, S, D)
    hs = encoder_stack(emb, bias, base_p, block_b=block_b_enc)          # bf16
    # SCSE + mean over layers + linear + flatten + drop(identity) + out, all fused:
    out_padded = scse_head(hs, scse_p, head_p, block_b=block_b_head)    # (B, NP)
    return out_padded[:, :head_p["n_out"]]                              # (B, n_out)


# ---------------------------------------------------------------------------
# Demo
# ---------------------------------------------------------------------------
if __name__ == "__main__":
    key = jax.random.PRNGKey(0)
    k_base, k_head, k_ids = jax.random.split(key, 3)

    B, MAX_LEN = 16, 8
    VOCAB = 64
    HIDDEN, HEADS, LAYERS = 128, 4, 2            # lane-dense hidden dim
    R, HIDDEN_SIZE, N_OUT = 8, 48, 1             # TransformerModelSCSE defaults
    BLOCK_B_ENC = 8                              # M = BLOCK_B_ENC * MAX_LEN = 64 rows/MXU pass
    BLOCK_B_HEAD = 8                             # >= 2 grid steps on both kernels

    base_p = init_base_model(k_base, VOCAB, MAX_LEN, HIDDEN, HEADS, LAYERS)
    scse_p, head_p = init_scse_head(k_head, MAX_LEN, R, HIDDEN, HIDDEN_SIZE, N_OUT)

    ids = jax.random.randint(k_ids, (B, MAX_LEN), 0, VOCAB, dtype=jnp.int32)
    mask = jnp.ones((B, MAX_LEN), jnp.int32).at[:, -2:].set(0)          # last two tokens padded
    token_type_ids = jnp.zeros((B, MAX_LEN), jnp.int32).at[:, MAX_LEN // 2:].set(1)

    fwd = jax.jit(functools.partial(transformer_scse_forward, base_p, scse_p, head_p,
                                    block_b_enc=BLOCK_B_ENC, block_b_head=BLOCK_B_HEAD))
    out = jax.block_until_ready(fwd(ids, mask, token_type_ids))

    assert out.shape == (B, N_OUT), out.shape
    assert bool(jnp.all(jnp.isfinite(out)))
    print("KERNEL_OK")
</pallas_src>

<mosaic_0001>
module attributes {stable_mosaic.version = 11 : i64} {
  func.func @_scse_head_kernel(%arg0: i32, %arg1: memref<8x2x8x128xbf16, #tpu.memory_space<vmem>>, %arg2: memref<8x128xf32, #tpu.memory_space<vmem>>, %arg3: memref<1x128xf32, #tpu.memory_space<vmem>>, %arg4: memref<128x8xf32, #tpu.memory_space<vmem>>, %arg5: memref<1x8xf32, #tpu.memory_space<vmem>>, %arg6: memref<8x1xf32, #tpu.memory_space<vmem>>, %arg7: memref<1x1xf32, #tpu.memory_space<vmem>>, %arg8: memref<128x128xbf16, #tpu.memory_space<vmem>>, %arg9: memref<1x128xf32, #tpu.memory_space<vmem>>, %arg10: memref<8x128x128xbf16, #tpu.memory_space<vmem>>, %arg11: memref<1x128xf32, #tpu.memory_space<vmem>>, %arg12: memref<8x128xf32, #tpu.memory_space<vmem>>) attributes {dimension_semantics = [#tpu.dimension_semantics<parallel>], iteration_bounds = array<i64: 2>, scalar_prefetch = 0 : i64, scratch_operands = 0 : i64, tpu.core_type = #tpu.core_type<tc>, window_params = [{transform_indices = @transform_0, window_bounds = array<i64: 8, 2, 8, 128>}, {pipeline_mode = #tpu.pipeline_mode<synchronous>, transform_indices = @transform_1, window_bounds = array<i64: 8, 128>}, {pipeline_mode = #tpu.pipeline_mode<synchronous>, transform_indices = @transform_2, window_bounds = array<i64: 1, 128>}, {pipeline_mode = #tpu.pipeline_mode<synchronous>, transform_indices = @transform_3, window_bounds = array<i64: 128, 8>}, {pipeline_mode = #tpu.pipeline_mode<synchronous>, transform_indices = @transform_4, window_bounds = array<i64: 1, 8>}, {pipeline_mode = #tpu.pipeline_mode<synchronous>, transform_indices = @transform_5, window_bounds = array<i64: 8, 1>}, {pipeline_mode = #tpu.pipeline_mode<synchronous>, transform_indices = @transform_6, window_bounds = array<i64: 1, 1>}, {pipeline_mode = #tpu.pipeline_mode<synchronous>, transform_indices = @transform_7, window_bounds = array<i64: 128, 128>}, {pipeline_mode = #tpu.pipeline_mode<synchronous>, transform_indices = @transform_8, window_bounds = array<i64: 1, 128>}, {pipeline_mode = #tpu.pipeline_mode<synchronous>, transform_indices = @transform_9, window_bounds = array<i64: 8, 128, 128>}, {pipeline_mode = #tpu.pipeline_mode<synchronous>, transform_indices = @transform_10, window_bounds = array<i64: 1, 128>}, {transform_indices = @transform_11, window_bounds = array<i64: 8, 128>}]} {
    %c0 = arith.constant 0 : index
    %c0_0 = arith.constant 0 : index
    %c0_1 = arith.constant 0 : index
    %c0_2 = arith.constant 0 : index
    %0 = vector.load %arg1[%c0, %c0_0, %c0_1, %c0_2] : memref<8x2x8x128xbf16, #tpu.memory_space<vmem>>, vector<8x2x8x128xbf16>
    %1 = arith.extf %0 : vector<8x2x8x128xbf16> to vector<8x2x8x128xf32>
    %cst = arith.constant dense<0.000000e+00> : vector<8x8x128xf32>
    %2 = vector.multi_reduction <add>, %1, %cst [1] : vector<8x2x8x128xf32> to vector<8x8x128xf32>
    %cst_3 = arith.constant 2.000000e+00 : f32
    %3 = vector.broadcast %cst_3 : f32 to vector<8x8x128xf32>
    %4 = arith.divf %2, %3 : vector<8x8x128xf32>
    %cst_4 = arith.constant dense<0.000000e+00> : vector<8x8xf32>
    %5 = vector.multi_reduction <add>, %4, %cst_4 [2] : vector<8x8x128xf32> to vector<8x8xf32>
    %cst_5 = arith.constant 1.280000e+02 : f32
    %6 = vector.broadcast %cst_5 : f32 to vector<8x8xf32>
    %7 = arith.divf %5, %6 : vector<8x8xf32>
    %c0_6 = arith.constant 0 : index
    %c0_7 = arith.constant 0 : index
    %8 = vector.load %arg2[%c0_6, %c0_7] : memref<8x128xf32, #tpu.memory_space<vmem>>, vector<8x128xf32>
    %cst_8 = arith.constant dense<0.000000e+00> : vector<8x128xf32>
    %9 = tpu.matmul %7, %8, %cst_8 {dimension_numbers = #tpu.dot_dimension_numbers<[1], [0], [0], [1], [0, 0, 1, 1], [], []>} : vector<8x8xf32>, vector<8x128xf32>, vector<8x128xf32> -> vector<8x128xf32>
    %c0_9 = arith.constant 0 : index
    %c0_10 = arith.constant 0 : index
    %10 = vector.load %arg3[%c0_9, %c0_10] : memref<1x128xf32, #tpu.memory_space<vmem>>, vector<1x128xf32>
    %11 = vector.broadcast %10 : vector<1x128xf32> to vector<8x128xf32>
    %12 = arith.addf %9, %11 : vector<8x128xf32>
    %cst_11 = arith.constant 0.000000e+00 : f32
    %13 = vector.broadcast %cst_11 : f32 to vector<8x128xf32>
    %14 = arith.maximumf %12, %13 : vector<8x128xf32>
    %c0_12 = arith.constant 0 : index
    %c0_13 = arith.constant 0 : index
    %15 = vector.load %arg4[%c0_12, %c0_13] : memref<128x8xf32, #tpu.memory_space<vmem>>, vector<128x8xf32>
    %cst_14 = arith.constant dense<0.000000e+00> : vector<8x8xf32>
    %16 = tpu.matmul %14, %15, %cst_14 {dimension_numbers = #tpu.dot_dimension_numbers<[1], [0], [0], [1], [0, 0, 1, 1], [], []>} : vector<8x128xf32>, vector<128x8xf32>, vector<8x8xf32> -> vector<8x8xf32>
    %c0_15 = arith.constant 0 : index
    %c0_16 = arith.constant 0 : index
    %17 = vector.load %arg5[%c0_15, %c0_16] : memref<1x8xf32, #tpu.memory_space<vmem>>, vector<1x8xf32>
    %18 = vector.broadcast %17 : vector<1x8xf32> to vector<8x8xf32>
    %19 = arith.addf %16, %18 : vector<8x8xf32>
    %20 = arith.negf %19 : vector<8x8xf32>
    %21 = math.exp %20 : vector<8x8xf32>
    %cst_17 = arith.constant 1.000000e+00 : f32
    %22 = vector.broadcast %cst_17 : f32 to vector<8x8xf32>
    %23 = arith.addf %22, %21 : vector<8x8xf32>
    %24 = arith.divf %22, %23 : vector<8x8xf32>
    %c0_18 = arith.constant 0 : index
    %c0_19 = arith.constant 0 : index
    %25 = vector.load %arg6[%c0_18, %c0_19] : memref<8x1xf32, #tpu.memory_space<vmem>>, vector<8x1xf32>
    %26 = vector.shape_cast %25 : vector<8x1xf32> to vector<1x1x8x1xf32>
    %27 = vector.broadcast %26 : vector<1x1x8x1xf32> to vector<8x2x8x128xf32>
    %28 = arith.mulf %1, %27 : vector<8x2x8x128xf32>
    %cst_20 = arith.constant dense<0.000000e+00> : vector<8x2x128xf32>
    %29 = vector.multi_reduction <add>, %28, %cst_20 [2] : vector<8x2x8x128xf32> to vector<8x2x128xf32>
    %c0_21 = arith.constant 0 : index
    %c0_22 = arith.constant 0 : index
    %30 = vector.load %arg7[%c0_21, %c0_22] : memref<1x1xf32, #tpu.memory_space<vmem>>, vector<1x1xf32>
    %31 = vector.shape_cast %30 : vector<1x1xf32> to vector<1x1x1xf32>
    %32 = vector.broadcast %31 : vector<1x1x1xf32> to vector<8x2x128xf32>
    %33 = arith.addf %29, %32 : vector<8x2x128xf32>
    %34 = arith.negf %33 : vector<8x2x128xf32>
    %35 = math.exp %34 : vector<8x2x128xf32>
    %cst_23 = arith.constant 1.000000e+00 : f32
    %36 = vector.broadcast %cst_23 : f32 to vector<8x2x128xf32>
    %37 = arith.addf %36, %35 : vector<8x2x128xf32>
    %38 = arith.divf %36, %37 : vector<8x2x128xf32>
    %39 = vector.shape_cast %24 : vector<8x8xf32> to vector<8x1x8x1xf32>
    %40 = vector.broadcast %39 : vector<8x1x8x1xf32> to vector<8x2x8x128xf32>
    %41 = arith.mulf %1, %40 : vector<8x2x8x128xf32>
    %42 = vector.shape_cast %38 : vector<8x2x128xf32> to vector<8x2x1x128xf32>
    %43 = vector.broadcast %42 : vector<8x2x1x128xf32> to vector<8x2x8x128xf32>
    %44 = arith.mulf %1, %43 : vector<8x2x8x128xf32>
    %45 = arith.addf %41, %44 : vector<8x2x8x128xf32>
    %cst_24 = arith.constant dense<0.000000e+00> : vector<8x8x128xf32>
    %46 = vector.multi_reduction <add>, %45, %cst_24 [1] : vector<8x2x8x128xf32> to vector<8x8x128xf32>
    %cst_25 = arith.constant 2.000000e+00 : f32
    %47 = vector.broadcast %cst_25 : f32 to vector<8x8x128xf32>
    %48 = arith.divf %46, %47 : vector<8x8x128xf32>
    %49 = vector.shape_cast %48 : vector<8x8x128xf32> to vector<64x128xf32>
    %50 = arith.truncf %49 : vector<64x128xf32> to vector<64x128xbf16>
    %c0_26 = arith.constant 0 : index
    %c0_27 = arith.constant 0 : index
    %51 = vector.load %arg8[%c0_26, %c0_27] : memref<128x128xbf16, #tpu.memory_space<vmem>>, vector<128x128xbf16>
    %cst_28 = arith.constant dense<0.000000e+00> : vector<64x128xf32>
    %52 = tpu.matmul %50, %51, %cst_28 {dimension_numbers = #tpu.dot_dimension_numbers<[1], [0], [0], [1], [0, 0, 1, 1], [], []>} : vector<64x128xbf16>, vector<128x128xbf16>, vector<64x128xf32> -> vector<64x128xf32>
    %c0_29 = arith.constant 0 : index
    %c0_30 = arith.constant 0 : index
    %53 = vector.load %arg9[%c0_29, %c0_30] : memref<1x128xf32, #tpu.memory_space<vmem>>, vector<1x128xf32>
    %54 = vector.broadcast %53 : vector<1x128xf32> to vector<64x128xf32>
    %55 = arith.addf %52, %54 : vector<64x128xf32>
    %56 = vector.shape_cast %55 : vector<64x128xf32> to vector<8x8x128xf32>
    %cst_31 = arith.constant 0.000000e+00 : f32
    %57 = vector.broadcast %cst_31 : f32 to vector<8x128xf32>
    %58 = vector.extract_strided_slice %56 {offsets = [0, 0, 0], sizes = [8, 1, 128], strides = [1, 1, 1]} : vector<8x8x128xf32> to vector<8x1x128xf32>
    %59 = vector.shape_cast %58 : vector<8x1x128xf32> to vector<8x128xf32>
    %60 = arith.truncf %59 : vector<8x128xf32> to vector<8x128xbf16>
    %c0_32 = arith.constant 0 : index
    %c0_33 = arith.constant 0 : index
    %c0_34 = arith.constant 0 : index
    %61 = vector.load %arg10[%c0_32, %c0_33, %c0_34] : memref<8x128x128xbf16, #tpu.memory_space<vmem>>, vector<1x128x128xbf16>
    %62 = vector.shape_cast %61 : vector<1x128x128xbf16> to vector<128x128xbf16>
    %cst_35 = arith.constant dense<0.000000e+00> : vector<8x128xf32>
    %63 = tpu.matmul %60, %62, %cst_35 {dimension_numbers = #tpu.dot_dimension_numbers<[1], [0], [0], [1], [0, 0, 1, 1], [], []>} : vector<8x128xbf16>, vector<128x128xbf16>, vector<8x128xf32> -> vector<8x128xf32>
    %64 = arith.addf %57, %63 : vector<8x128xf32>
    %65 = vector.extract_strided_slice %56 {offsets = [0, 1, 0], sizes = [8, 1, 128], strides = [1, 1, 1]} : vector<8x8x128xf32> to vector<8x1x128xf32>
    %66 = vector.shape_cast %65 : vector<8x1x128xf32> to vector<8x128xf32>
    %67 = arith.truncf %66 : vector<8x128xf32> to vector<8x128xbf16>
    %c1 = arith.constant 1 : index
    %c0_36 = arith.constant 0 : index
    %c0_37 = arith.constant 0 : index
    %68 = vector.load %arg10[%c1, %c0_36, %c0_37] : memref<8x128x128xbf16, #tpu.memory_space<vmem>>, vector<1x128x128xbf16>
    %69 = vector.shape_cast %68 : vector<1x128x128xbf16> to vector<128x128xbf16>
    %cst_38 = arith.constant dense<0.000000e+00> : vector<8x128xf32>
    %70 = tpu.matmul %67, %69, %cst_38 {dimension_numbers = #tpu.dot_dimension_numbers<[1], [0], [0], [1], [0, 0, 1, 1], [], []>} : vector<8x128xbf16>, vector<128x128xbf16>, vector<8x128xf32> -> vector<8x128xf32>
    %71 = arith.addf %64, %70 : vector<8x128xf32>
    %72 = vector.extract_strided_slice %56 {offsets = [0, 2, 0], sizes = [8, 1, 128], strides = [1, 1, 1]} : vector<8x8x128xf32> to vector<8x1x128xf32>
    %73 = vector.shape_cast %72 : vector<8x1x128xf32> to vector<8x128xf32>
    %74 = arith.truncf %73 : vector<8x128xf32> to vector<8x128xbf16>
    %c2 = arith.constant 2 : index
    %c0_39 = arith.constant 0 : index
    %c0_40 = arith.constant 0 : index
    %75 = vector.load %arg10[%c2, %c0_39, %c0_40] : memref<8x128x128xbf16, #tpu.memory_space<vmem>>, vector<1x128x128xbf16>
    %76 = vector.shape_cast %75 : vector<1x128x128xbf16> to vector<128x128xbf16>
    %cst_41 = arith.constant dense<0.000000e+00> : vector<8x128xf32>
    %77 = tpu.matmul %74, %76, %cst_41 {dimension_numbers = #tpu.dot_dimension_numbers<[1], [0], [0], [1], [0, 0, 1, 1], [], []>} : vector<8x128xbf16>, vector<128x128xbf16>, vector<8x128xf32> -> vector<8x128xf32>
    %78 = arith.addf %71, %77 : vector<8x128xf32>
    %79 = vector.extract_strided_slice %56 {offsets = [0, 3, 0], sizes = [8, 1, 128], strides = [1, 1, 1]} : vector<8x8x128xf32> to vector<8x1x128xf32>
    %80 = vector.shape_cast %79 : vector<8x1x128xf32> to vector<8x128xf32>
    %81 = arith.truncf %80 : vector<8x128xf32> to vector<8x128xbf16>
    %c3 = arith.constant 3 : index
    %c0_42 = arith.constant 0 : index
    %c0_43 = arith.constant 0 : index
    %82 = vector.load %arg10[%c3, %c0_42, %c0_43] : memref<8x128x128xbf16, #tpu.memory_space<vmem>>, vector<1x128x128xbf16>
    %83 = vector.shape_cast %82 : vector<1x128x128xbf16> to vector<128x128xbf16>
    %cst_44 = arith.constant dense<0.000000e+00> : vector<8x128xf32>
    %84 = tpu.matmul %81, %83, %cst_44 {dimension_numbers = #tpu.dot_dimension_numbers<[1], [0], [0], [1], [0, 0, 1, 1], [], []>} : vector<8x128xbf16>, vector<128x128xbf16>, vector<8x128xf32> -> vector<8x128xf32>
    %85 = arith.addf %78, %84 : vector<8x128xf32>
    %86 = vector.extract_strided_slice %56 {offsets = [0, 4, 0], sizes = [8, 1, 128], strides = [1, 1, 1]} : vector<8x8x128xf32> to vector<8x1x128xf32>
    %87 = vector.shape_cast %86 : vector<8x1x128xf32> to vector<8x128xf32>
    %88 = arith.truncf %87 : vector<8x128xf32> to vector<8x128xbf16>
    %c4 = arith.constant 4 : index
    %c0_45 = arith.constant 0 : index
    %c0_46 = arith.constant 0 : index
    %89 = vector.load %arg10[%c4, %c0_45, %c0_46] : memref<8x128x128xbf16, #tpu.memory_space<vmem>>, vector<1x128x128xbf16>
    %90 = vector.shape_cast %89 : vector<1x128x128xbf16> to vector<128x128xbf16>
    %cst_47 = arith.constant dense<0.000000e+00> : vector<8x128xf32>
    %91 = tpu.matmul %88, %90, %cst_47 {dimension_numbers = #tpu.dot_dimension_numbers<[1], [0], [0], [1], [0, 0, 1, 1], [], []>} : vector<8x128xbf16>, vector<128x128xbf16>, vector<8x128xf32> -> vector<8x128xf32>
    %92 = arith.addf %85, %91 : vector<8x128xf32>
    %93 = vector.extract_strided_slice %56 {offsets = [0, 5, 0], sizes = [8, 1, 128], strides = [1, 1, 1]} : vector<8x8x128xf32> to vector<8x1x128xf32>
    %94 = vector.shape_cast %93 : vector<8x1x128xf32> to vector<8x128xf32>
    %95 = arith.truncf %94 : vector<8x128xf32> to vector<8x128xbf16>
    %c5 = arith.constant 5 : index
    %c0_48 = arith.constant 0 : index
    %c0_49 = arith.constant 0 : index
    %96 = vector.load %arg10[%c5, %c0_48, %c0_49] : memref<8x128x128xbf16, #tpu.memory_space<vmem>>, vector<1x128x128xbf16>
    %97 = vector.shape_cast %96 : vector<1x128x128xbf16> to vector<128x128xbf16>
    %cst_50 = arith.constant dense<0.000000e+00> : vector<8x128xf32>
    %98 = tpu.matmul %95, %97, %cst_50 {dimension_numbers = #tpu.dot_dimension_numbers<[1], [0], [0], [1], [0, 0, 1, 1], [], []>} : vector<8x128xbf16>, vector<128x128xbf16>, vector<8x128xf32> -> vector<8x128xf32>
    %99 = arith.addf %92, %98 : vector<8x128xf32>
    %100 = vector.extract_strided_slice %56 {offsets = [0, 6, 0], sizes = [8, 1, 128], strides = [1, 1, 1]} : vector<8x8x128xf32> to vector<8x1x128xf32>
    %101 = vector.shape_cast %100 : vector<8x1x128xf32> to vector<8x128xf32>
    %102 = arith.truncf %101 : vector<8x128xf32> to vector<8x128xbf16>
    %c6 = arith.constant 6 : index
    %c0_51 = arith.constant 0 : index
    %c0_52 = arith.constant 0 : index
    %103 = vector.load %arg10[%c6, %c0_51, %c0_52] : memref<8x128x128xbf16, #tpu.memory_space<vmem>>, vector<1x128x128xbf16>
    %104 = vector.shape_cast %103 : vector<1x128x128xbf16> to vector<128x128xbf16>
    %cst_53 = arith.constant dense<0.000000e+00> : vector<8x128xf32>
    %105 = tpu.matmul %102, %104, %cst_53 {dimension_numbers = #tpu.dot_dimension_numbers<[1], [0], [0], [1], [0, 0, 1, 1], [], []>} : vector<8x128xbf16>, vector<128x128xbf16>, vector<8x128xf32> -> vector<8x128xf32>
    %106 = arith.addf %99, %105 : vector<8x128xf32>
    %107 = vector.extract_strided_slice %56 {offsets = [0, 7, 0], sizes = [8, 1, 128], strides = [1, 1, 1]} : vector<8x8x128xf32> to vector<8x1x128xf32>
    %108 = vector.shape_cast %107 : vector<8x1x128xf32> to vector<8x128xf32>
    %109 = arith.truncf %108 : vector<8x128xf32> to vector<8x128xbf16>
    %c7 = arith.constant 7 : index
    %c0_54 = arith.constant 0 : index
    %c0_55 = arith.constant 0 : index
    %110 = vector.load %arg10[%c7, %c0_54, %c0_55] : memref<8x128x128xbf16, #tpu.memory_space<vmem>>, vector<1x128x128xbf16>
    %111 = vector.shape_cast %110 : vector<1x128x128xbf16> to vector<128x128xbf16>
    %cst_56 = arith.constant dense<0.000000e+00> : vector<8x128xf32>
    %112 = tpu.matmul %109, %111, %cst_56 {dimension_numbers = #tpu.dot_dimension_numbers<[1], [0], [0], [1], [0, 0, 1, 1], [], []>} : vector<8x128xbf16>, vector<128x128xbf16>, vector<8x128xf32> -> vector<8x128xf32>
    %113 = arith.addf %106, %112 : vector<8x128xf32>
    %c0_57 = arith.constant 0 : index
    %c0_58 = arith.constant 0 : index
    %114 = vector.load %arg11[%c0_57, %c0_58] : memref<1x128xf32, #tpu.memory_space<vmem>>, vector<1x128xf32>
    %115 = vector.broadcast %114 : vector<1x128xf32> to vector<8x128xf32>
    %116 = arith.addf %113, %115 : vector<8x128xf32>
    %c0_59 = arith.constant 0 : index
    %c0_60 = arith.constant 0 : index
    %117 = vector.load %arg12[%c0_59, %c0_60] : memref<8x128xf32, #tpu.memory_space<vmem>>, vector<8x128xf32>
    tpu.vector_store %arg12[%c0_59, %c0_60], %116 {strides = array<i32>} : memref<8x128xf32, #tpu.memory_space<vmem>>, vector<8x128xf32>,
    return
  }
  func.func @transform_0(%arg0: i32) -> (i32, i32, i32, i32) {
    %c0_i32 = arith.constant 0 : i32
    %c0_i32_0 = arith.constant 0 : i32
    %c0_i32_1 = arith.constant 0 : i32
    %c0_i32_2 = arith.constant 0 : i32
    return %arg0, %c0_i32, %c0_i32_0, %c0_i32_1 : i32, i32, i32, i32
  }
  func.func @transform_1(%arg0: i32) -> (i32, i32) {
    %c0_i32 = arith.constant 0 : i32
    %c0_i32_0 = arith.constant 0 : i32
    %c0_i32_1 = arith.constant 0 : i32
    return %c0_i32, %c0_i32_0 : i32, i32
  }
  func.func @transform_2(%arg0: i32) -> (i32, i32) {
    %c0_i32 = arith.constant 0 : i32
    %c0_i32_0 = arith.constant 0 : i32
    %c0_i32_1 = arith.constant 0 : i32
    return %c0_i32, %c0_i32_0 : i32, i32
  }
  func.func @transform_3(%arg0: i32) -> (i32, i32) {
    %c0_i32 = arith.constant 0 : i32
    %c0_i32_0 = arith.constant 0 : i32
    %c0_i32_1 = arith.constant 0 : i32
    return %c0_i32, %c0_i32_0 : i32, i32
  }
  func.func @transform_4(%arg0: i32) -> (i32, i32) {
    %c0_i32 = arith.constant 0 : i32
    %c0_i32_0 = arith.constant 0 : i32
    %c0_i32_1 = arith.constant 0 : i32
    return %c0_i32, %c0_i32_0 : i32, i32
  }
  func.func @transform_5(%arg0: i32) -> (i32, i32) {
    %c0_i32 = arith.constant 0 : i32
    %c0_i32_0 = arith.constant 0 : i32
    %c0_i32_1 = arith.constant 0 : i32
    return %c0_i32, %c0_i32_0 : i32, i32
  }
  func.func @transform_6(%arg0: i32) -> (i32, i32) {
    %c0_i32 = arith.constant 0 : i32
    %c0_i32_0 = arith.constant 0 : i32
    %c0_i32_1 = arith.constant 0 : i32
    return %c0_i32, %c0_i32_0 : i32, i32
  }
  func.func @transform_7(%arg0: i32) -> (i32, i32) {
    %c0_i32 = arith.constant 0 : i32
    %c0_i32_0 = arith.constant 0 : i32
    %c0_i32_1 = arith.constant 0 : i32
    return %c0_i32, %c0_i32_0 : i32, i32
  }
  func.func @transform_8(%arg0: i32) -> (i32, i32) {
    %c0_i32 = arith.constant 0 : i32
    %c0_i32_0 = arith.constant 0 : i32
    %c0_i32_1 = arith.constant 0 : i32
    return %c0_i32, %c0_i32_0 : i32, i32
  }
  func.func @transform_9(%arg0: i32) -> (i32, i32, i32) {
    %c0_i32 = arith.constant 0 : i32
    %c0_i32_0 = arith.constant 0 : i32
    %c0_i32_1 = arith.constant 0 : i32
    %c0_i32_2 = arith.constant 0 : i32
    return %c0_i32, %c0_i32_0, %c0_i32_1 : i32, i32, i32
  }
  func.func @transform_10(%arg0: i32) -> (i32, i32) {
    %c0_i32 = arith.constant 0 : i32
    %c0_i32_0 = arith.constant 0 : i32
    %c0_i32_1 = arith.constant 0 : i32
    return %c0_i32, %c0_i32_0 : i32, i32
  }
  func.func @transform_11(%arg0: i32) -> (i32, i32) {
    %c0_i32 = arith.constant 0 : i32
    %c0_i32_0 = arith.constant 0 : i32
    return %arg0, %c0_i32 : i32, i32
  }
}

module attributes {stable_mosaic.version = 11 : i64} {
  func.func @_encoder_stack_kernel(%arg0: i32, %arg1: i32, %arg2: memref<8x8x128xbf16, #tpu.memory_space<vmem>>, %arg3: memref<8x8xf32, #tpu.memory_space<vmem>>, %arg4: memref<1x128xf32, #tpu.memory_space<vmem>>, %arg5: memref<1x128xf32, #tpu.memory_space<vmem>>, %arg6: memref<1x128x384xbf16, #tpu.memory_space<vmem>>, %arg7: memref<1x1x384xf32, #tpu.memory_space<vmem>>, %arg8: memref<1x128x128xbf16, #tpu.memory_space<vmem>>, %arg9: memref<1x1x128xf32, #tpu.memory_space<vmem>>, %arg10: memref<1x1x128xf32, #tpu.memory_space<vmem>>, %arg11: memref<1x1x128xf32, #tpu.memory_space<vmem>>, %arg12: memref<1x128x512xbf16, #tpu.memory_space<vmem>>, %arg13: memref<1x1x512xf32, #tpu.memory_space<vmem>>, %arg14: memref<1x512x128xbf16, #tpu.memory_space<vmem>>, %arg15: memref<1x1x128xf32, #tpu.memory_space<vmem>>, %arg16: memref<1x1x128xf32, #tpu.memory_space<vmem>>, %arg17: memref<1x1x128xf32, #tpu.memory_space<vmem>>, %arg18: memref<8x1x8x128xbf16, #tpu.memory_space<vmem>>, %arg19: memref<64x128xf32, #tpu.memory_space<vmem>>) attributes {dimension_semantics = [#tpu.dimension_semantics<parallel>, #tpu.dimension_semantics<arbitrary>], iteration_bounds = array<i64: 2, 2>, scalar_prefetch = 0 : i64, scratch_operands = 1 : i64, tpu.core_type = #tpu.core_type<tc>, window_params = [{transform_indices = @transform_0, window_bounds = array<i64: 8, 8, 128>}, {transform_indices = @transform_1, window_bounds = array<i64: 8, 8>}, {pipeline_mode = #tpu.pipeline_mode<synchronous>, transform_indices = @transform_2, window_bounds = array<i64: 1, 128>}, {pipeline_mode = #tpu.pipeline_mode<synchronous>, transform_indices = @transform_3, window_bounds = array<i64: 1, 128>}, {transform_indices = @transform_4, window_bounds = array<i64: 1, 128, 384>}, {transform_indices = @transform_5, window_bounds = array<i64: 1, 1, 384>}, {transform_indices = @transform_6, window_bounds = array<i64: 1, 128, 128>}, {transform_indices = @transform_7, window_bounds = array<i64: 1, 1, 128>}, {transform_indices = @transform_8, window_bounds = array<i64: 1, 1, 128>}, {transform_indices = @transform_9, window_bounds = array<i64: 1, 1, 128>}, {transform_indices = @transform_10, window_bounds = array<i64: 1, 128, 512>}, {transform_indices = @transform_11, window_bounds = array<i64: 1, 1, 512>}, {transform_indices = @transform_12, window_bounds = array<i64: 1, 512, 128>}, {transform_indices = @transform_13, window_bounds = array<i64: 1, 1, 128>}, {transform_indices = @transform_14, window_bounds = array<i64: 1, 1, 128>}, {transform_indices = @transform_15, window_bounds = array<i64: 1, 1, 128>}, {transform_indices = @transform_16, window_bounds = array<i64: 8, 1, 8, 128>}]} {
    %c0_i32 = arith.constant 0 : i32
    %0 = arith.cmpi eq, %arg1, %c0_i32 : i32
    %1 = arith.extui %0 : i1 to i32
    %c0_i32_0 = arith.constant 0 : i32
    %2 = arith.cmpi ne, %1, %c0_i32_0 : i32
    scf.if %2 {
      %c0_79 = arith.constant 0 : index
      %c0_80 = arith.constant 0 : index
      %c0_81 = arith.constant 0 : index
      %199 = vector.load %arg2[%c0_79, %c0_80, %c0_81] : memref<8x8x128xbf16, #tpu.memory_space<vmem>>, vector<8x8x128xbf16>
      %200 = arith.extf %199 : vector<8x8x128xbf16> to vector<8x8x128xf32>
      %201 = vector.shape_cast %200 : vector<8x8x128xf32> to vector<64x128xf32>
      %c0_82 = arith.constant 0 : index
      %c0_83 = arith.constant 0 : index
      %202 = vector.load %arg4[%c0_82, %c0_83] : memref<1x128xf32, #tpu.memory_space<vmem>>, vector<1x128xf32>
      %c0_84 = arith.constant 0 : index
      %c0_85 = arith.constant 0 : index
      %203 = vector.load %arg5[%c0_84, %c0_85] : memref<1x128xf32, #tpu.memory_space<vmem>>, vector<1x128xf32>
      %cst_86 = arith.constant dense<0.000000e+00> : vector<64xf32>
      %204 = vector.multi_reduction <add>, %201, %cst_86 [1] : vector<64x128xf32> to vector<64xf32>
      %205 = vector.shape_cast %204 : vector<64xf32> to vector<64x1xf32>
      %cst_87 = arith.constant 1.280000e+02 : f32
      %206 = vector.broadcast %cst_87 : f32 to vector<64x1xf32>
      %207 = arith.divf %205, %206 : vector<64x1xf32>
      %208 = vector.broadcast %207 : vector<64x1xf32> to vector<64x128xf32>
      %209 = arith.subf %201, %208 : vector<64x128xf32>
      %210 = arith.mulf %209, %209 : vector<64x128xf32>
      %cst_88 = arith.constant dense<0.000000e+00> : vector<64xf32>
      %211 = vector.multi_reduction <add>, %210, %cst_88 [1] : vector<64x128xf32> to vector<64xf32>
      %212 = vector.shape_cast %211 : vector<64xf32> to vector<64x1xf32>
      %cst_89 = arith.constant 1.280000e+02 : f32
      %213 = vector.broadcast %cst_89 : f32 to vector<64x1xf32>
      %214 = arith.divf %212, %213 : vector<64x1xf32>
      %cst_90 = arith.constant 9.99999996E-13 : f32
      %215 = vector.broadcast %cst_90 : f32 to vector<64x1xf32>
      %216 = arith.addf %214, %215 : vector<64x1xf32>
      %217 = math.rsqrt %216 : vector<64x1xf32>
      %218 = vector.broadcast %217 : vector<64x1xf32> to vector<64x128xf32>
      %219 = arith.mulf %209, %218 : vector<64x128xf32>
      %220 = vector.broadcast %202 : vector<1x128xf32> to vector<64x128xf32>
      %221 = arith.mulf %219, %220 : vector<64x128xf32>
      %222 = vector.broadcast %203 : vector<1x128xf32> to vector<64x128xf32>
      %223 = arith.addf %221, %222 : vector<64x128xf32>
      %c0_91 = arith.constant 0 : index
      %c0_92 = arith.constant 0 : index
      %224 = vector.load %arg19[%c0_91, %c0_92] : memref<64x128xf32, #tpu.memory_space<vmem>>, vector<64x128xf32>
      tpu.vector_store %arg19[%c0_91, %c0_92], %223 {strides = array<i32>} : memref<64x128xf32, #tpu.memory_space<vmem>>, vector<64x128xf32>,
    } else {
    }
    %c0 = arith.constant 0 : index
    %c0_1 = arith.constant 0 : index
    %3 = vector.load %arg19[%c0, %c0_1] : memref<64x128xf32, #tpu.memory_space<vmem>>, vector<64x128xf32>
    %4 = arith.truncf %3 : vector<64x128xf32> to vector<64x128xbf16>
    %c0_2 = arith.constant 0 : index
    %c0_3 = arith.constant 0 : index
    %c0_4 = arith.constant 0 : index
    %5 = vector.load %arg6[%c0_2, %c0_3, %c0_4] : memref<1x128x384xbf16, #tpu.memory_space<vmem>>, vector<1x128x384xbf16>
    %6 = vector.shape_cast %5 : vector<1x128x384xbf16> to vector<128x384xbf16>
    %cst = arith.constant dense<0.000000e+00> : vector<64x384xf32>
    %7 = tpu.matmul %4, %6, %cst {dimension_numbers = #tpu.dot_dimension_numbers<[1], [0], [0], [1], [0, 0, 1, 1], [], []>} : vector<64x128xbf16>, vector<128x384xbf16>, vector<64x384xf32> -> vector<64x384xf32>
    %c0_5 = arith.constant 0 : index
    %c0_6 = arith.constant 0 : index
    %c0_7 = arith.constant 0 : index
    %8 = vector.load %arg7[%c0_5, %c0_6, %c0_7] : memref<1x1x384xf32, #tpu.memory_space<vmem>>, vector<1x1x384xf32>
    %9 = vector.shape_cast %8 : vector<1x1x384xf32> to vector<1x384xf32>
    %10 = vector.broadcast %9 : vector<1x384xf32> to vector<64x384xf32>
    %11 = arith.addf %7, %10 : vector<64x384xf32>
    %12 = vector.extract_strided_slice %11 {offsets = [0, 0], sizes = [64, 128], strides = [1, 1]} : vector<64x384xf32> to vector<64x128xf32>
    %13 = vector.shape_cast %12 : vector<64x128xf32> to vector<8x8x128xf32>
    %14 = vector.extract_strided_slice %11 {offsets = [0, 128], sizes = [64, 128], strides = [1, 1]} : vector<64x384xf32> to vector<64x128xf32>
    %15 = vector.shape_cast %14 : vector<64x128xf32> to vector<8x8x128xf32>
    %16 = vector.extract_strided_slice %11 {offsets = [0, 256], sizes = [64, 128], strides = [1, 1]} : vector<64x384xf32> to vector<64x128xf32>
    %17 = vector.shape_cast %16 : vector<64x128xf32> to vector<8x8x128xf32>
    %c0_8 = arith.constant 0 : index
    %c0_9 = arith.constant 0 : index
    %18 = vector.load %arg3[%c0_8, %c0_9] : memref<8x8xf32, #tpu.memory_space<vmem>>, vector<8x8xf32>
    %19 = vector.shape_cast %18 : vector<8x8xf32> to vector<8x1x8xf32>
    %20 = vector.extract_strided_slice %13 {offsets = [0, 0, 0], sizes = [8, 8, 32], strides = [1, 1, 1]} : vector<8x8x128xf32> to vector<8x8x32xf32>
    %21 = arith.truncf %20 : vector<8x8x32xf32> to vector<8x8x32xbf16>
    %22 = vector.extract_strided_slice %15 {offsets = [0, 0, 0], sizes = [8, 8, 32], strides = [1, 1, 1]} : vector<8x8x128xf32> to vector<8x8x32xf32>
    %23 = arith.truncf %22 : vector<8x8x32xf32> to vector<8x8x32xbf16>
    %24 = vector.extract_strided_slice %17 {offsets = [0, 0, 0], sizes = [8, 8, 32], strides = [1, 1, 1]} : vector<8x8x128xf32> to vector<8x8x32xf32>
    %25 = arith.truncf %24 : vector<8x8x32xf32> to vector<8x8x32xbf16>
    "tpu.trace_start"() <{level = 10 : i32, message = "bqd,bkd->bqk"}> : () -> ()
    %cst_10 = arith.constant dense<0.000000e+00> : vector<8x8x8xf32>
    %26 = tpu.matmul %21, %23, %cst_10 {dimension_numbers = #tpu.dot_dimension_numbers<[2], [2], [1], [1], [0, 0, 0, 1, 1, 1], [0], [0]>} : vector<8x8x32xbf16>, vector<8x8x32xbf16>, vector<8x8x8xf32> -> vector<8x8x8xf32>
    "tpu.trace_stop"() : () -> ()
    %27 = vector.broadcast %19 : vector<8x1x8xf32> to vector<8x8x8xf32>
    %28 = arith.addf %26, %27 : vector<8x8x8xf32>
    %cst_11 = arith.constant dense<0xFF800000> : vector<8x8xf32>
    %29 = vector.multi_reduction <maximumf>, %28, %cst_11 [2] : vector<8x8x8xf32> to vector<8x8xf32>
    %30 = vector.shape_cast %29 : vector<8x8xf32> to vector<8x8x1xf32>
    %31 = vector.broadcast %30 : vector<8x8x1xf32> to vector<8x8x8xf32>
    %32 = arith.subf %28, %31 : vector<8x8x8xf32>
    %33 = math.exp %32 : vector<8x8x8xf32>
    %cst_12 = arith.constant dense<0.000000e+00> : vector<8x8xf32>
    %34 = vector.multi_reduction <add>, %33, %cst_12 [2] : vector<8x8x8xf32> to vector<8x8xf32>
    %35 = vector.shape_cast %34 : vector<8x8xf32> to vector<8x8x1xf32>
    %36 = tpu.reciprocal %35 {approx = true} : vector<8x8x1xf32> -> vector<8x8x1xf32>
    %37 = vector.broadcast %36 : vector<8x8x1xf32> to vector<8x8x8xf32>
    %38 = arith.mulf %33, %37 : vector<8x8x8xf32>
    %39 = arith.truncf %38 : vector<8x8x8xf32> to vector<8x8x8xbf16>
    "tpu.trace_start"() <{level = 10 : i32, message = "bqk,bkd->bqd"}> : () -> ()
    %cst_13 = arith.constant dense<0.000000e+00> : vector<8x8x32xf32>
    %40 = tpu.matmul %39, %25, %cst_13 {dimension_numbers = #tpu.dot_dimension_numbers<[2], [1], [1], [2], [0, 0, 0, 1, 1, 2], [0], [0]>} : vector<8x8x8xbf16>, vector<8x8x32xbf16>, vector<8x8x32xf32> -> vector<8x8x32xf32>
    "tpu.trace_stop"() : () -> ()
    %41 = vector.extract_strided_slice %13 {offsets = [0, 0, 32], sizes = [8, 8, 32], strides = [1, 1, 1]} : vector<8x8x128xf32> to vector<8x8x32xf32>
    %42 = arith.truncf %41 : vector<8x8x32xf32> to vector<8x8x32xbf16>
    %43 = vector.extract_strided_slice %15 {offsets = [0, 0, 32], sizes = [8, 8, 32], strides = [1, 1, 1]} : vector<8x8x128xf32> to vector<8x8x32xf32>
    %44 = arith.truncf %43 : vector<8x8x32xf32> to vector<8x8x32xbf16>
    %45 = vector.extract_strided_slice %17 {offsets = [0, 0, 32], sizes = [8, 8, 32], strides = [1, 1, 1]} : vector<8x8x128xf32> to vector<8x8x32xf32>
    %46 = arith.truncf %45 : vector<8x8x32xf32> to vector<8x8x32xbf16>
    "tpu.trace_start"() <{level = 10 : i32, message = "bqd,bkd->bqk"}> : () -> ()
    %cst_14 = arith.constant dense<0.000000e+00> : vector<8x8x8xf32>
    %47 = tpu.matmul %42, %44, %cst_14 {dimension_numbers = #tpu.dot_dimension_numbers<[2], [2], [1], [1], [0, 0, 0, 1, 1, 1], [0], [0]>} : vector<8x8x32xbf16>, vector<8x8x32xbf16>, vector<8x8x8xf32> -> vector<8x8x8xf32>
    "tpu.trace_stop"() : () -> ()
    %48 = vector.broadcast %19 : vector<8x1x8xf32> to vector<8x8x8xf32>
    %49 = arith.addf %47, %48 : vector<8x8x8xf32>
    %cst_15 = arith.constant dense<0xFF800000> : vector<8x8xf32>
    %50 = vector.multi_reduction <maximumf>, %49, %cst_15 [2] : vector<8x8x8xf32> to vector<8x8xf32>
    %51 = vector.shape_cast %50 : vector<8x8xf32> to vector<8x8x1xf32>
    %52 = vector.broadcast %51 : vector<8x8x1xf32> to vector<8x8x8xf32>
    %53 = arith.subf %49, %52 : vector<8x8x8xf32>
    %54 = math.exp %53 : vector<8x8x8xf32>
    %cst_16 = arith.constant dense<0.000000e+00> : vector<8x8xf32>
    %55 = vector.multi_reduction <add>, %54, %cst_16 [2] : vector<8x8x8xf32> to vector<8x8xf32>
    %56 = vector.shape_cast %55 : vector<8x8xf32> to vector<8x8x1xf32>
    %57 = tpu.reciprocal %56 {approx = true} : vector<8x8x1xf32> -> vector<8x8x1xf32>
    %58 = vector.broadcast %57 : vector<8x8x1xf32> to vector<8x8x8xf32>
    %59 = arith.mulf %54, %58 : vector<8x8x8xf32>
    %60 = arith.truncf %59 : vector<8x8x8xf32> to vector<8x8x8xbf16>
    "tpu.trace_start"() <{level = 10 : i32, message = "bqk,bkd->bqd"}> : () -> ()
    %cst_17 = arith.constant dense<0.000000e+00> : vector<8x8x32xf32>
    %61 = tpu.matmul %60, %46, %cst_17 {dimension_numbers = #tpu.dot_dimension_numbers<[2], [1], [1], [2], [0, 0, 0, 1, 1, 2], [0], [0]>} : vector<8x8x8xbf16>, vector<8x8x32xbf16>, vector<8x8x32xf32> -> vector<8x8x32xf32>
    "tpu.trace_stop"() : () -> ()
    %62 = vector.extract_strided_slice %13 {offsets = [0, 0, 64], sizes = [8, 8, 32], strides = [1, 1, 1]} : vector<8x8x128xf32> to vector<8x8x32xf32>
    %63 = arith.truncf %62 : vector<8x8x32xf32> to vector<8x8x32xbf16>
    %64 = vector.extract_strided_slice %15 {offsets = [0, 0, 64], sizes = [8, 8, 32], strides = [1, 1, 1]} : vector<8x8x128xf32> to vector<8x8x32xf32>
    %65 = arith.truncf %64 : vector<8x8x32xf32> to vector<8x8x32xbf16>
    %66 = vector.extract_strided_slice %17 {offsets = [0, 0, 64], sizes = [8, 8, 32], strides = [1, 1, 1]} : vector<8x8x128xf32> to vector<8x8x32xf32>
    %67 = arith.truncf %66 : vector<8x8x32xf32> to vector<8x8x32xbf16>
    "tpu.trace_start"() <{level = 10 : i32, message = "bqd,bkd->bqk"}> : () -> ()
    %cst_18 = arith.constant dense<0.000000e+00> : vector<8x8x8xf32>
    %68 = tpu.matmul %63, %65, %cst_18 {dimension_numbers = #tpu.dot_dimension_numbers<[2], [2], [1], [1], [0, 0, 0, 1, 1, 1], [0], [0]>} : vector<8x8x32xbf16>, vector<8x8x32xbf16>, vector<8x8x8xf32> -> vector<8x8x8xf32>
    "tpu.trace_stop"() : () -> ()
    %69 = vector.broadcast %19 : vector<8x1x8xf32> to vector<8x8x8xf32>
    %70 = arith.addf %68, %69 : vector<8x8x8xf32>
    %cst_19 = arith.constant dense<0xFF800000> : vector<8x8xf32>
    %71 = vector.multi_reduction <maximumf>, %70, %cst_19 [2] : vector<8x8x8xf32> to vector<8x8xf32>
    %72 = vector.shape_cast %71 : vector<8x8xf32> to vector<8x8x1xf32>
    %73 = vector.broadcast %72 : vector<8x8x1xf32> to vector<8x8x8xf32>
    %74 = arith.subf %70, %73 : vector<8x8x8xf32>
    %75 = math.exp %74 : vector<8x8x8xf32>
    %cst_20 = arith.constant dense<0.000000e+00> : vector<8x8xf32>
    %76 = vector.multi_reduction <add>, %75, %cst_20 [2] : vector<8x8x8xf32> to vector<8x8xf32>
    %77 = vector.shape_cast %76 : vector<8x8xf32> to vector<8x8x1xf32>
    %78 = tpu.reciprocal %77 {approx = true} : vector<8x8x1xf32> -> vector<8x8x1xf32>
    %79 = vector.broadcast %78 : vector<8x8x1xf32> to vector<8x8x8xf32>
    %80 = arith.mulf %75, %79 : vector<8x8x8xf32>
    %81 = arith.truncf %80 : vector<8x8x8xf32> to vector<8x8x8xbf16>
    "tpu.trace_start"() <{level = 10 : i32, message = "bqk,bkd->bqd"}> : () -> ()
    %cst_21 = arith.constant dense<0.000000e+00> : vector<8x8x32xf32>
    %82 = tpu.matmul %81, %67, %cst_21 {dimension_numbers = #tpu.dot_dimension_numbers<[2], [1], [1], [2], [0, 0, 0, 1, 1, 2], [0], [0]>} : vector<8x8x8xbf16>, vector<8x8x32xbf16>, vector<8x8x32xf32> -> vector<8x8x32xf32>
    "tpu.trace_stop"() : () -> ()
    %83 = vector.extract_strided_slice %13 {offsets = [0, 0, 96], sizes = [8, 8, 32], strides = [1, 1, 1]} : vector<8x8x128xf32> to vector<8x8x32xf32>
    %84 = arith.truncf %83 : vector<8x8x32xf32> to vector<8x8x32xbf16>
    %85 = vector.extract_strided_slice %15 {offsets = [0, 0, 96], sizes = [8, 8, 32], strides = [1, 1, 1]} : vector<8x8x128xf32> to vector<8x8x32xf32>
    %86 = arith.truncf %85 : vector<8x8x32xf32> to vector<8x8x32xbf16>
    %87 = vector.extract_strided_slice %17 {offsets = [0, 0, 96], sizes = [8, 8, 32], strides = [1, 1, 1]} : vector<8x8x128xf32> to vector<8x8x32xf32>
    %88 = arith.truncf %87 : vector<8x8x32xf32> to vector<8x8x32xbf16>
    "tpu.trace_start"() <{level = 10 : i32, message = "bqd,bkd->bqk"}> : () -> ()
    %cst_22 = arith.constant dense<0.000000e+00> : vector<8x8x8xf32>
    %89 = tpu.matmul %84, %86, %cst_22 {dimension_numbers = #tpu.dot_dimension_numbers<[2], [2], [1], [1], [0, 0, 0, 1, 1, 1], [0], [0]>} : vector<8x8x32xbf16>, vector<8x8x32xbf16>, vector<8x8x8xf32> -> vector<8x8x8xf32>
    "tpu.trace_stop"() : () -> ()
    %90 = vector.broadcast %19 : vector<8x1x8xf32> to vector<8x8x8xf32>
    %91 = arith.addf %89, %90 : vector<8x8x8xf32>
    %cst_23 = arith.constant dense<0xFF800000> : vector<8x8xf32>
    %92 = vector.multi_reduction <maximumf>, %91, %cst_23 [2] : vector<8x8x8xf32> to vector<8x8xf32>
    %93 = vector.shape_cast %92 : vector<8x8xf32> to vector<8x8x1xf32>
    %94 = vector.broadcast %93 : vector<8x8x1xf32> to vector<8x8x8xf32>
    %95 = arith.subf %91, %94 : vector<8x8x8xf32>
    %96 = math.exp %95 : vector<8x8x8xf32>
    %cst_24 = arith.constant dense<0.000000e+00> : vector<8x8xf32>
    %97 = vector.multi_reduction <add>, %96, %cst_24 [2] : vector<8x8x8xf32> to vector<8x8xf32>
    %98 = vector.shape_cast %97 : vector<8x8xf32> to vector<8x8x1xf32>
    %99 = tpu.reciprocal %98 {approx = true} : vector<8x8x1xf32> -> vector<8x8x1xf32>
    %100 = vector.broadcast %99 : vector<8x8x1xf32> to vector<8x8x8xf32>
    %101 = arith.mulf %96, %100 : vector<8x8x8xf32>
    %102 = arith.truncf %101 : vector<8x8x8xf32> to vector<8x8x8xbf16>
    "tpu.trace_start"() <{level = 10 : i32, message = "bqk,bkd->bqd"}> : () -> ()
    %cst_25 = arith.constant dense<0.000000e+00> : vector<8x8x32xf32>
    %103 = tpu.matmul %102, %88, %cst_25 {dimension_numbers = #tpu.dot_dimension_numbers<[2], [1], [1], [2], [0, 0, 0, 1, 1, 2], [0], [0]>} : vector<8x8x8xbf16>, vector<8x8x32xbf16>, vector<8x8x32xf32> -> vector<8x8x32xf32>
    "tpu.trace_stop"() : () -> ()
    %104 = tpu.concatenate %40, %61, %82, %103 in 2 : vector<8x8x32xf32>, vector<8x8x32xf32>, vector<8x8x32xf32>, vector<8x8x32xf32> -> vector<8x8x128xf32>
    %105 = vector.shape_cast %104 : vector<8x8x128xf32> to vector<64x128xf32>
    %106 = arith.truncf %105 : vector<64x128xf32> to vector<64x128xbf16>
    %c0_26 = arith.constant 0 : index
    %c0_27 = arith.constant 0 : index
    %c0_28 = arith.constant 0 : index
    %107 = vector.load %arg8[%c0_26, %c0_27, %c0_28] : memref<1x128x128xbf16, #tpu.memory_space<vmem>>, vector<1x128x128xbf16>
    %108 = vector.shape_cast %107 : vector<1x128x128xbf16> to vector<128x128xbf16>
    %cst_29 = arith.constant dense<0.000000e+00> : vector<64x128xf32>
    %109 = tpu.matmul %106, %108, %cst_29 {dimension_numbers = #tpu.dot_dimension_numbers<[1], [0], [0], [1], [0, 0, 1, 1], [], []>} : vector<64x128xbf16>, vector<128x128xbf16>, vector<64x128xf32> -> vector<64x128xf32>
    %c0_30 = arith.constant 0 : index
    %c0_31 = arith.constant 0 : index
    %c0_32 = arith.constant 0 : index
    %110 = vector.load %arg9[%c0_30, %c0_31, %c0_32] : memref<1x1x128xf32, #tpu.memory_space<vmem>>, vector<1x1x128xf32>
    %111 = vector.shape_cast %110 : vector<1x1x128xf32> to vector<1x128xf32>
    %112 = vector.broadcast %111 : vector<1x128xf32> to vector<64x128xf32>
    %113 = arith.addf %109, %112 : vector<64x128xf32>
    %114 = arith.addf %3, %113 : vector<64x128xf32>
    %c0_33 = arith.constant 0 : index
    %c0_34 = arith.constant 0 : index
    %c0_35 = arith.constant 0 : index
    %115 = vector.load %arg10[%c0_33, %c0_34, %c0_35] : memref<1x1x128xf32, #tpu.memory_space<vmem>>, vector<1x1x128xf32>
    %116 = vector.shape_cast %115 : vector<1x1x128xf32> to vector<1x128xf32>
    %c0_36 = arith.constant 0 : index
    %c0_37 = arith.constant 0 : index
    %c0_38 = arith.constant 0 : index
    %117 = vector.load %arg11[%c0_36, %c0_37, %c0_38] : memref<1x1x128xf32, #tpu.memory_space<vmem>>, vector<1x1x128xf32>
    %118 = vector.shape_cast %117 : vector<1x1x128xf32> to vector<1x128xf32>
    %cst_39 = arith.constant dense<0.000000e+00> : vector<64xf32>
    %119 = vector.multi_reduction <add>, %114, %cst_39 [1] : vector<64x128xf32> to vector<64xf32>
    %120 = vector.shape_cast %119 : vector<64xf32> to vector<64x1xf32>
    %cst_40 = arith.constant 1.280000e+02 : f32
    %121 = vector.broadcast %cst_40 : f32 to vector<64x1xf32>
    %122 = arith.divf %120, %121 : vector<64x1xf32>
    %123 = vector.broadcast %122 : vector<64x1xf32> to vector<64x128xf32>
    %124 = arith.subf %114, %123 : vector<64x128xf32>
    %125 = arith.mulf %124, %124 : vector<64x128xf32>
    %cst_41 = arith.constant dense<0.000000e+00> : vector<64xf32>
    %126 = vector.multi_reduction <add>, %125, %cst_41 [1] : vector<64x128xf32> to vector<64xf32>
    %127 = vector.shape_cast %126 : vector<64xf32> to vector<64x1xf32>
    %cst_42 = arith.constant 1.280000e+02 : f32
    %128 = vector.broadcast %cst_42 : f32 to vector<64x1xf32>
    %129 = arith.divf %127, %128 : vector<64x1xf32>
    %cst_43 = arith.constant 9.99999996E-13 : f32
    %130 = vector.broadcast %cst_43 : f32 to vector<64x1xf32>
    %131 = arith.addf %129, %130 : vector<64x1xf32>
    %132 = math.rsqrt %131 : vector<64x1xf32>
    %133 = vector.broadcast %132 : vector<64x1xf32> to vector<64x128xf32>
    %134 = arith.mulf %124, %133 : vector<64x128xf32>
    %135 = vector.broadcast %116 : vector<1x128xf32> to vector<64x128xf32>
    %136 = arith.mulf %134, %135 : vector<64x128xf32>
    %137 = vector.broadcast %118 : vector<1x128xf32> to vector<64x128xf32>
    %138 = arith.addf %136, %137 : vector<64x128xf32>
    %139 = arith.truncf %138 : vector<64x128xf32> to vector<64x128xbf16>
    %c0_44 = arith.constant 0 : index
    %c0_45 = arith.constant 0 : index
    %c0_46 = arith.constant 0 : index
    %140 = vector.load %arg12[%c0_44, %c0_45, %c0_46] : memref<1x128x512xbf16, #tpu.memory_space<vmem>>, vector<1x128x512xbf16>
    %141 = vector.shape_cast %140 : vector<1x128x512xbf16> to vector<128x512xbf16>
    %cst_47 = arith.constant dense<0.000000e+00> : vector<64x512xf32>
    %142 = tpu.matmul %139, %141, %cst_47 {dimension_numbers = #tpu.dot_dimension_numbers<[1], [0], [0], [1], [0, 0, 1, 1], [], []>} : vector<64x128xbf16>, vector<128x512xbf16>, vector<64x512xf32> -> vector<64x512xf32>
    %c0_48 = arith.constant 0 : index
    %c0_49 = arith.constant 0 : index
    %c0_50 = arith.constant 0 : index
    %143 = vector.load %arg13[%c0_48, %c0_49, %c0_50] : memref<1x1x512xf32, #tpu.memory_space<vmem>>, vector<1x1x512xf32>
    %144 = vector.shape_cast %143 : vector<1x1x512xf32> to vector<1x512xf32>
    %145 = vector.broadcast %144 : vector<1x512xf32> to vector<64x512xf32>
    %146 = arith.addf %142, %145 : vector<64x512xf32>
    %147 = arith.mulf %146, %146 : vector<64x512xf32>
    %148 = arith.mulf %146, %147 : vector<64x512xf32>
    %cst_51 = arith.constant 4.471500e-02 : f32
    %149 = vector.broadcast %cst_51 : f32 to vector<64x512xf32>
    %150 = arith.mulf %149, %148 : vector<64x512xf32>
    %151 = arith.addf %146, %150 : vector<64x512xf32>
    %cst_52 = arith.constant 0.797884583 : f32
    %152 = vector.broadcast %cst_52 : f32 to vector<64x512xf32>
    %153 = arith.mulf %152, %151 : vector<64x512xf32>
    %154 = math.tanh %153 : vector<64x512xf32>
    %cst_53 = arith.constant 1.000000e+00 : f32
    %155 = vector.broadcast %cst_53 : f32 to vector<64x512xf32>
    %156 = arith.addf %155, %154 : vector<64x512xf32>
    %cst_54 = arith.constant 5.000000e-01 : f32
    %157 = vector.broadcast %cst_54 : f32 to vector<64x512xf32>
    %158 = arith.mulf %157, %156 : vector<64x512xf32>
    %159 = arith.mulf %146, %158 : vector<64x512xf32>
    %160 = arith.truncf %159 : vector<64x512xf32> to vector<64x512xbf16>
    %c0_55 = arith.constant 0 : index
    %c0_56 = arith.constant 0 : index
    %c0_57 = arith.constant 0 : index
    %161 = vector.load %arg14[%c0_55, %c0_56, %c0_57] : memref<1x512x128xbf16, #tpu.memory_space<vmem>>, vector<1x512x128xbf16>
    %162 = vector.shape_cast %161 : vector<1x512x128xbf16> to vector<512x128xbf16>
    %cst_58 = arith.constant dense<0.000000e+00> : vector<64x128xf32>
    %163 = tpu.matmul %160, %162, %cst_58 {dimension_numbers = #tpu.dot_dimension_numbers<[1], [0], [0], [1], [0, 0, 1, 1], [], []>} : vector<64x512xbf16>, vector<512x128xbf16>, vector<64x128xf32> -> vector<64x128xf32>
    %c0_59 = arith.constant 0 : index
    %c0_60 = arith.constant 0 : index
    %c0_61 = arith.constant 0 : index
    %164 = vector.load %arg15[%c0_59, %c0_60, %c0_61] : memref<1x1x128xf32, #tpu.memory_space<vmem>>, vector<1x1x128xf32>
    %165 = vector.shape_cast %164 : vector<1x1x128xf32> to vector<1x128xf32>
    %166 = vector.broadcast %165 : vector<1x128xf32> to vector<64x128xf32>
    %167 = arith.addf %163, %166 : vector<64x128xf32>
    %168 = arith.addf %138, %167 : vector<64x128xf32>
    %c0_62 = arith.constant 0 : index
    %c0_63 = arith.constant 0 : index
    %c0_64 = arith.constant 0 : index
    %169 = vector.load %arg16[%c0_62, %c0_63, %c0_64] : memref<1x1x128xf32, #tpu.memory_space<vmem>>, vector<1x1x128xf32>
    %170 = vector.shape_cast %169 : vector<1x1x128xf32> to vector<1x128xf32>
    %c0_65 = arith.constant 0 : index
    %c0_66 = arith.constant 0 : index
    %c0_67 = arith.constant 0 : index
    %171 = vector.load %arg17[%c0_65, %c0_66, %c0_67] : memref<1x1x128xf32, #tpu.memory_space<vmem>>, vector<1x1x128xf32>
    %172 = vector.shape_cast %171 : vector<1x1x128xf32> to vector<1x128xf32>
    %cst_68 = arith.constant dense<0.000000e+00> : vector<64xf32>
    %173 = vector.multi_reduction <add>, %168, %cst_68 [1] : vector<64x128xf32> to vector<64xf32>
    %174 = vector.shape_cast %173 : vector<64xf32> to vector<64x1xf32>
    %cst_69 = arith.constant 1.280000e+02 : f32
    %175 = vector.broadcast %cst_69 : f32 to vector<64x1xf32>
    %176 = arith.divf %174, %175 : vector<64x1xf32>
    %177 = vector.broadcast %176 : vector<64x1xf32> to vector<64x128xf32>
    %178 = arith.subf %168, %177 : vector<64x128xf32>
    %179 = arith.mulf %178, %178 : vector<64x128xf32>
    %cst_70 = arith.constant dense<0.000000e+00> : vector<64xf32>
    %180 = vector.multi_reduction <add>, %179, %cst_70 [1] : vector<64x128xf32> to vector<64xf32>
    %181 = vector.shape_cast %180 : vector<64xf32> to vector<64x1xf32>
    %cst_71 = arith.constant 1.280000e+02 : f32
    %182 = vector.broadcast %cst_71 : f32 to vector<64x1xf32>
    %183 = arith.divf %181, %182 : vector<64x1xf32>
    %cst_72 = arith.constant 9.99999996E-13 : f32
    %184 = vector.broadcast %cst_72 : f32 to vector<64x1xf32>
    %185 = arith.addf %183, %184 : vector<64x1xf32>
    %186 = math.rsqrt %185 : vector<64x1xf32>
    %187 = vector.broadcast %186 : vector<64x1xf32> to vector<64x128xf32>
    %188 = arith.mulf %178, %187 : vector<64x128xf32>
    %189 = vector.broadcast %170 : vector<1x128xf32> to vector<64x128xf32>
    %190 = arith.mulf %188, %189 : vector<64x128xf32>
    %191 = vector.broadcast %172 : vector<1x128xf32> to vector<64x128xf32>
    %192 = arith.addf %190, %191 : vector<64x128xf32>
    %c0_73 = arith.constant 0 : index
    %c0_74 = arith.constant 0 : index
    %193 = vector.load %arg19[%c0_73, %c0_74] : memref<64x128xf32, #tpu.memory_space<vmem>>, vector<64x128xf32>
    tpu.vector_store %arg19[%c0_73, %c0_74], %192 {strides = array<i32>} : memref<64x128xf32, #tpu.memory_space<vmem>>, vector<64x128xf32>,
    %194 = vector.shape_cast %192 : vector<64x128xf32> to vector<8x8x128xf32>
    %195 = arith.truncf %194 : vector<8x8x128xf32> to vector<8x8x128xbf16>
    %c0_75 = arith.constant 0 : index
    %c0_76 = arith.constant 0 : index
    %c0_77 = arith.constant 0 : index
    %c0_78 = arith.constant 0 : index
    %196 = vector.load %arg18[%c0_75, %c0_76, %c0_77, %c0_78] : memref<8x1x8x128xbf16, #tpu.memory_space<vmem>>, vector<8x1x8x128xbf16>
    %197 = vector.shape_cast %196 : vector<8x1x8x128xbf16> to vector<8x8x128xbf16>
    %198 = vector.shape_cast %195 : vector<8x8x128xbf16> to vector<8x1x8x128xbf16>
    tpu.vector_store %arg18[%c0_75, %c0_76, %c0_77, %c0_78], %198 {strides = array<i32>} : memref<8x1x8x128xbf16, #tpu.memory_space<vmem>>, vector<8x1x8x128xbf16>,
    return
  }
  func.func @transform_0(%arg0: i32, %arg1: i32) -> (i32, i32, i32) {
    %c0_i32 = arith.constant 0 : i32
    %c0_i32_0 = arith.constant 0 : i32
    %c0_i32_1 = arith.constant 0 : i32
    return %arg0, %c0_i32, %c0_i32_0 : i32, i32, i32
  }
  func.func @transform_1(%arg0: i32, %arg1: i32) -> (i32, i32) {
    %c0_i32 = arith.constant 0 : i32
    %c0_i32_0 = arith.constant 0 : i32
    return %arg0, %c0_i32 : i32, i32
  }
  func.func @transform_2(%arg0: i32, %arg1: i32) -> (i32, i32) {
    %c0_i32 = arith.constant 0 : i32
    %c0_i32_0 = arith.constant 0 : i32
    %c0_i32_1 = arith.constant 0 : i32
    return %c0_i32, %c0_i32_0 : i32, i32
  }
  func.func @transform_3(%arg0: i32, %arg1: i32) -> (i32, i32) {
    %c0_i32 = arith.constant 0 : i32
    %c0_i32_0 = arith.constant 0 : i32
    %c0_i32_1 = arith.constant 0 : i32
    return %c0_i32, %c0_i32_0 : i32, i32
  }
  func.func @transform_4(%arg0: i32, %arg1: i32) -> (i32, i32, i32) {
    %c0_i32 = arith.constant 0 : i32
    %c0_i32_0 = arith.constant 0 : i32
    %c0_i32_1 = arith.constant 0 : i32
    return %arg1, %c0_i32, %c0_i32_0 : i32, i32, i32
  }
  func.func @transform_5(%arg0: i32, %arg1: i32) -> (i32, i32, i32) {
    %c0_i32 = arith.constant 0 : i32
    %c0_i32_0 = arith.constant 0 : i32
    %c0_i32_1 = arith.constant 0 : i32
    return %arg1, %c0_i32, %c0_i32_0 : i32, i32, i32
  }
  func.func @transform_6(%arg0: i32, %arg1: i32) -> (i32, i32, i32) {
    %c0_i32 = arith.constant 0 : i32
    %c0_i32_0 = arith.constant 0 : i32
    %c0_i32_1 = arith.constant 0 : i32
    return %arg1, %c0_i32, %c0_i32_0 : i32, i32, i32
  }
  func.func @transform_7(%arg0: i32, %arg1: i32) -> (i32, i32, i32) {
    %c0_i32 = arith.constant 0 : i32
    %c0_i32_0 = arith.constant 0 : i32
    %c0_i32_1 = arith.constant 0 : i32
    return %arg1, %c0_i32, %c0_i32_0 : i32, i32, i32
  }
  func.func @transform_8(%arg0: i32, %arg1: i32) -> (i32, i32, i32) {
    %c0_i32 = arith.constant 0 : i32
    %c0_i32_0 = arith.constant 0 : i32
    %c0_i32_1 = arith.constant 0 : i32
    return %arg1, %c0_i32, %c0_i32_0 : i32, i32, i32
  }
  func.func @transform_9(%arg0: i32, %arg1: i32) -> (i32, i32, i32) {
    %c0_i32 = arith.constant 0 : i32
    %c0_i32_0 = arith.constant 0 : i32
    %c0_i32_1 = arith.constant 0 : i32
    return %arg1, %c0_i32, %c0_i32_0 : i32, i32, i32
  }
  func.func @transform_10(%arg0: i32, %arg1: i32) -> (i32, i32, i32) {
    %c0_i32 = arith.constant 0 : i32
    %c0_i32_0 = arith.constant 0 : i32
    %c0_i32_1 = arith.constant 0 : i32
    return %arg1, %c0_i32, %c0_i32_0 : i32, i32, i32
  }
  func.func @transform_11(%arg0: i32, %arg1: i32) -> (i32, i32, i32) {
    %c0_i32 = arith.constant 0 : i32
    %c0_i32_0 = arith.constant 0 : i32
    %c0_i32_1 = arith.constant 0 : i32
    return %arg1, %c0_i32, %c0_i32_0 : i32, i32, i32
  }
  func.func @transform_12(%arg0: i32, %arg1: i32) -> (i32, i32, i32) {
    %c0_i32 = arith.constant 0 : i32
    %c0_i32_0 = arith.constant 0 : i32
    %c0_i32_1 = arith.constant 0 : i32
    return %arg1, %c0_i32, %c0_i32_0 : i32, i32, i32
  }
  func.func @transform_13(%arg0: i32, %arg1: i32) -> (i32, i32, i32) {
    %c0_i32 = arith.constant 0 : i32
    %c0_i32_0 = arith.constant 0 : i32
    %c0_i32_1 = arith.constant 0 : i32
    return %arg1, %c0_i32, %c0_i32_0 : i32, i32, i32
  }
  func.func @transform_14(%arg0: i32, %arg1: i32) -> (i32, i32, i32) {
    %c0_i32 = arith.constant 0 : i32
    %c0_i32_0 = arith.constant 0 : i32
    %c0_i32_1 = arith.constant 0 : i32
    return %arg1, %c0_i32, %c0_i32_0 : i32, i32, i32
  }
  func.func @transform_15(%arg0: i32, %arg1: i32) -> (i32, i32, i32) {
    %c0_i32 = arith.constant 0 : i32
    %c0_i32_0 = arith.constant 0 : i32
    %c0_i32_1 = arith.constant 0 : i32
    return %arg1, %c0_i32, %c0_i32_0 : i32, i32, i32
  }
  func.func @transform_16(%arg0: i32, %arg1: i32) -> (i32, i32, i32, i32) {
    %c0_i32 = arith.constant 0 : i32
    %c0_i32_0 = arith.constant 0 : i32
    %c0_i32_1 = arith.constant 0 : i32
    return %arg0, %arg1, %c0_i32, %c0_i32_0 : i32, i32, i32, i32
  }
}

</mosaic_0001>

<bundles_post_ra>
// kernel: transformer_scse_forward.3
= control target key start
LH: loop header
LB: loop body
LE: loop exit
PB: predicated region body
PF: predicated region fallthrough
CT: control target
= control target key end

     0   :  { %s3101_s19 = smov 0   ;;  %s3800_s0 = inlined_call_operand.vmem [shape: bf16[16,2,8,128], index: 0, kind: input, shape index: {}]   ;;  %s3801_s1 = inlined_call_operand.vmem [shape: f32[8,128], index: 1, kind: input, shape index: {}]   ;;  %s3802_s2 = inlined_call_operand.vmem [shape: f32[1,128], index: 2, kind: input, shape index: {}, may-alias: {2,8,10}]   ;;  %s3803_s3 = inlined_call_operand.vmem [shape: f32[128,8], index: 3, kind: input, shape index: {}]   ;;  %s3804_s4 = inlined_call_operand.vmem [shape: f32[1,8], index: 4, kind: input, shape index: {}]   ;;  %s3805_s5 = inlined_call_operand.vmem [shape: f32[8,1], index: 5, kind: input, shape index: {}]   ;;  %s3806_s6 = inlined_call_operand.<no memory space> [shape: f32[1,1], index: 6, kind: input, shape index: {}]   ;;  %s3807_s7 = inlined_call_operand.vmem [shape: bf16[128,128], index: 7, kind: input, shape index: {}]   ;;  %s3808_s8 = inlined_call_operand.vmem [shape: f32[1,128], index: 8, kind: input, shape index: {}, may-alias: {2,8,10}]   ;;  %s3809_s9 = inlined_call_operand.vmem [shape: bf16[8,128,128], index: 9, kind: input, shape index: {}]   ;;  %s3810_s10 = inlined_call_operand.vmem [shape: f32[1,128], index: 10, kind: input, shape index: {}, may-alias: {2,8,10}]   ;;  %s3811_s11 = inlined_call_operand.vmem [shape: f32[16,128], index: 11, kind: output, shape index: {}]  }
   0x1   :  { %v16_v0 = vstv %s3806_s6 }
   0x2   :  { %17 = vst [vmem:[#allocation2] sm:$0x1] %v16_v0 }
   0x3 LB: > { %s3107_s20 = sadd.s32 4294967295, %s3032_s19   ;;  %p2267_p0 = scmp.ge.s32.totalorder %s3032_s19, 1  ;;  %s3032_s19 = sphi %s3101_s19, %s23_s19  }
   0x4   : > { %p341_p1 = scmp.lt.s32.totalorder %s3032_s19, 3 }
   0x6   : > { %p342_p2 = pnand %p2267_p0, %p341_p1 }
   0x7   : > { %s2268_s21 = sshll.u32 (!%p342_p2), %s3107_s20, 3  ;;  %v467_v41 = vld [vmem:[%s3801_s1] sm:$0xff] (!%p342_p2)  ;;  %v3034_v42 = vmov (!%p342_p2), 0.0   ;;  %vm3035_vm0 = vmmov (!%p342_p2), 0   ;;  %v606_v44 = vld [vmem:[%s3803_s3 + $0x8] sm:$0xff] (!%p342_p2)  ;;  %v607_v45 = vld [vmem:[%s3803_s3 + $0x10] sm:$0xff] (!%p342_p2) }
   0x8   : > { %345 = sbr.rel (%p342_p2) target bundleno = 1335 (0x537), region = 64  ;;  %p382_p3 = scmp.lt.s32.totalorder (!%p342_p2), %s2268_s21, 15  ;;  %2624 = vmatprep.subr.mxu0 (!%p342_p2), %v3034_v42  ;;  %2626 = vmatprep.mubr.msk.f32.mxu0 (!%p342_p2), %vm3035_vm0, %v3034_v42  ;;  %v605_v43 = vld [vmem:[%s3803_s3] sm:$0xff] (!%p342_p2)  ;;  %v3036_v46 = vmov (!%p342_p2), 0.0|0.0   ;;  %v608_v48 = vld [vmem:[%s3803_s3 + $0x18] sm:$0xff] (!%p342_p2)  ;;  %v610_v51 = vld [vmem:[%s3803_s3 + $0x28] sm:$0xff] (!%p342_p2) }
   0x9   : > { %2625 = vmatpush3.msra.mxu0 (!%p342_p2), %v467_v41  ;;  %2661 = vmatprep.mubr.msk.f32.mxu1 (!%p342_p2), %vm3035_vm0, %v3034_v42  ;;  %v2849_v47 = vpack.c.bf16 (!%p342_p2), %v606_v44, %v605_v43  ;;  %v2852_v49 = vpack.c.bf16 (!%p342_p2), %v608_v48, %v607_v45  ;;  %v609_v50 = vld [vmem:[%s3803_s3 + $0x20] sm:$0xff] (!%p342_p2)  ;;  %v611_v52 = vld [vmem:[%s3803_s3 + $0x30] sm:$0xff] (!%p342_p2)  ;;  %v612_v53 = vld [vmem:[%s3803_s3 + $0x38] sm:$0xff] (!%p342_p2)  ;;  %vm517_vm1 = vcmask (!%p342_p2), 1041409   ;;  %vm519_vm2 = vcmask (!%p342_p2), 1042434   ;;  %p388_p4 = scmp.lt.s32.totalorder (!%p342_p2), %s3107_s20, 1 }
   0xa   : > { %2848 = vmatprep.subr.bf16.mxu1 (!%p342_p2), %v3036_v46  ;;  %v2855_v54 = vpack.c.bf16 (!%p342_p2), %v610_v51, %v609_v50  ;;  %v613_v55 = vld [vmem:[%s3803_s3 + $0x40] sm:$0xff] (!%p342_p2)  ;;  %v614_v56 = vld [vmem:[%s3803_s3 + $0x48] sm:$0xff] (!%p342_p2)  ;;  %v2858_v57 = vpack.c.bf16 (!%p342_p2), %v612_v53, %v611_v52  ;;  %v615_v59 = vld [vmem:[%s3803_s3 + $0x50] sm:$0xff] (!%p342_p2)  ;;  %vm521_vm3 = vcmask (!%p342_p2), 1043459   ;;  %vm523_vm4 = vcmask (!%p342_p2), 1044484  }
   0xb   : > { %2850 = vmatpush3.bf16.msra.mxu1 (!%p342_p2), %v2849_v47  ;;  %v2861_v58 = vpack.c.bf16 (!%p342_p2), %v614_v56, %v613_v55  ;;  %v616_v60 = vld [vmem:[%s3803_s3 + $0x58] sm:$0xff] (!%p342_p2)  ;;  %v617_v62 = vld [vmem:[%s3803_s3 + $0x60] sm:$0xff] (!%p342_p2)  ;;  %v618_v63 = vld [vmem:[%s3803_s3 + $0x68] sm:$0xff] (!%p342_p2)  ;;  %vm525_vm5 = vcmask (!%p342_p2), 1045509   ;;  %vm527_vm6 = vcmask (!%p342_p2), 1046534   ;;  %vm529_vm7 = vcmask (!%p342_p2), 1047559  }
   0xc   : > { %2851 = vmatprep.subr.bf16.mxu1 (!%p342_p2), %v3036_v46  ;;  %v2864_v61 = vpack.c.bf16 (!%p342_p2), %v616_v60, %v615_v59  ;;  %v2867_v0 = vpack.c.bf16 (!%p342_p2), %v618_v63, %v617_v62  ;;  %vm531_vm8 = vcmask (!%p342_p2), 64512   ;;  %v619_v53 = vld [vmem:[%s3803_s3 + $0x70] sm:$0xff] (!%p342_p2)  ;;  %v704_v56 = vld [vmem:[%s3805_s5] sm:$0xff] (!%p342_p2) }
   0xd   : > { %v2272_v59 = vld [vmem:[%s3802_s2] ss:$0 sm:$0xff] (!%p342_p2) }
   0xf   : > { %s3813_s21 = smov (!%p382_p3, %s2268_s21), 15  ;;  %2853 = vmatpush3.bf16.msra.mxu1 %v2852_v49  ;;  %s3815_s20 = smov (!%p388_p4, %s3107_s20), 1 }
  0x10   : > { %s2481_s6 = sshll.u32 %s3813_s21, 3  ;;  %2854 = vmatprep.subr.bf16.mxu1 %v3036_v46  ;;  %s2271_s12 = sshll.u32 %s3815_s20, 3 }
  0x11   : > { %s386_s24 = scalar_lea.vmem %s3800_s0, %s2481_s6  ;;  %s391_s17 = scalar_lea.vmem %s3811_s11, %s2271_s12 }
  0x12   : > { %v2483_v1 = vld [vmem:[%s386_s24] sm:$0xff]   ;;  %v2515_v2 = vld [vmem:[%s386_s24 + $0x10] sm:$0xff]   ;;  %v2514_v3 = vld [vmem:[%s386_s24 + $0x8] sm:$0xff]  }
  0x13   : > { %v3115_v4 = vunpack.c.l.bf16 %v2483_v1  ;;  %v3117_v5 = vunpack.c.h.bf16 %v2483_v1  ;;  %v3119_v6 = vunpack.c.l.bf16 %v2515_v2  ;;  %v3121_v7 = vunpack.c.h.bf16 %v2515_v2  ;;  %v2516_v8 = vld [vmem:[%s386_s24 + $0x18] sm:$0xff]   ;;  %v2517_v9 = vld [vmem:[%s386_s24 + $0x20] sm:$0xff]   ;;  %v2518_v10 = vld [vmem:[%s386_s24 + $0x28] sm:$0xff]   ;;  %2856 = vmatpush3.bf16.msra.mxu1 %v2855_v54 }
  0x14   : > { %v3123_v11 = vunpack.c.l.bf16 %v2514_v3  ;;  %v3125_v12 = vunpack.c.h.bf16 %v2514_v3  ;;  %v3127_v13 = vunpack.c.l.bf16 %v2516_v8  ;;  %v3129_v14 = vunpack.c.h.bf16 %v2516_v8  ;;  %v2519_v15 = vld [vmem:[%s386_s24 + $0x30] sm:$0xff]   ;;  %v2520_v16 = vld [vmem:[%s386_s24 + $0x38] sm:$0xff]   ;;  %2857 = vmatprep.subr.bf16.mxu1 %v3036_v46 }
  0x15   : > { %v425_v17 = vadd.f32 %v3117_v5, %v3115_v4  ;;  %v427_v18 = vadd.f32 %v3121_v7, %v3119_v6  ;;  %v3135_v19 = vunpack.c.l.bf16 %v2517_v9  ;;  %v3137_v20 = vunpack.c.h.bf16 %v2517_v9  ;;  %v620_v54 = vld [vmem:[%s3803_s3 + $0x78] sm:$0xff] }
  0x16   : > { %v426_v21 = vadd.f32 %v3125_v12, %v3123_v11  ;;  %v428_v22 = vadd.f32 %v3129_v14, %v3127_v13  ;;  %v3143_v23 = vunpack.c.l.bf16 %v2518_v10  ;;  %v3145_v24 = vunpack.c.h.bf16 %v2518_v10 }
  0x17   : > { %v434_v25 = vmul.f32 0.5, %v425_v17  ;;  %v436_v26 = vmul.f32 0.5, %v427_v18  ;;  %v3147_v27 = vunpack.c.l.bf16 %v2519_v15  ;;  %v429_v28 = vadd.f32 %v3137_v20, %v3135_v19  ;;  %2859 = vmatpush3.bf16.msra.mxu1 %v2858_v57  ;;  %v2276_v57 = vld [vmem:[#allocation2] ss:$0 sm:$0xff] }
  0x18   : > { %v430_v29 = vadd.f32 %v3145_v24, %v3143_v23  ;;  %v3153_v30 = vunpack.c.h.bf16 %v2519_v15  ;;  %v435_v31 = vmul.f32 0.5, %v426_v21  ;;  %v437_v32 = vmul.f32 0.5, %v428_v22  ;;  %2860 = vmatprep.subr.bf16.mxu1 %v3036_v46 }
  0x19   : > { %442 = vadd.xlane.f32.xlu0 %v434_v25  ;;  %446 = vadd.xlane.f32.xlu1 %v436_v26  ;;  %v3155_v33 = vunpack.c.l.bf16 %v2520_v16  ;;  %v3157_v34 = vunpack.c.h.bf16 %v2520_v16  ;;  %v438_v37 = vmul.f32 0.5, %v429_v28  ;;  %v483_v1 = vlaneseq }
  0x1a   : > { %v431_v35 = vadd.f32 %v3153_v30, %v3147_v27  ;;  %v439_v38 = vmul.f32 0.5, %v430_v29  ;;  %v2870_v55 = vpack.c.bf16 %v620_v54, %v619_v53 }
  0x1b   : > { %v432_v36 = vadd.f32 %v3157_v34, %v3155_v33  ;;  %2862 = vmatpush3.bf16.msra.mxu1 %v2861_v58  ;;  %v484_v2 = vand.u32 127, %v483_v1  ;;  %v3213_v3 = vshrl.u32 %v483_v1, 7  ;;  %v3037_v58 = vmov 0   ;;  %v2887_v1 = vld [vmem:[%s3807_s7 + $0x8] sm:$0xff]  }
  0x1c   : > { %v440_v39 = vmul.f32 0.5, %v431_v35  ;;  %2863 = vmatprep.subr.bf16.mxu1 %v3036_v46  ;;  %2884 = vset.pattern.permute.xlu0 %v3037_v58 }
  0x1d   : > { %444 = vadd.xlane.f32.xlu0 %v435_v31  ;;  %448 = vadd.xlane.f32.xlu1 %v437_v32  ;;  %v441_v40 = vmul.f32 0.5, %v432_v36  ;;  %v487_v10 = vsub.s32 %v484_v2, %v3213_v3  ;;  %v2888_v2 = vld [vmem:[%s3807_s7 + $0x10] sm:$0xff]  }
  0x1e   : > { %2885 = vset.pattern.permute.xlu1 %v3037_v58 }
  0x1f   : > { %2865 = vmatpush3.bf16.msra.mxu1 %v2864_v61 }
  0x20   : > { %2866 = vmatprep.subr.bf16.mxu1 %v3036_v46 }
  0x21   : > { %450 = vadd.xlane.f32.xlu0 %v438_v37  ;;  %452 = vadd.xlane.f32.xlu1 %v439_v38 }
  0x23   : > { %2868 = vmatpush3.bf16.msra.mxu1 %v2867_v0  ;;  %v2886_v0 = vld [vmem:[%s3807_s7] sm:$0xff]  }
  0x24   : > { %2869 = vmatprep.subr.bf16.mxu1 %v3036_v46  ;;  %2664 = vmatprep.subr.bf16.mxu0 %v2886_v0 }
  0x25   : > { %454 = vadd.xlane.f32.xlu0 %v440_v39  ;;  %456 = vadd.xlane.f32.xlu1 %v441_v40 }
  0x27   : > { %2871 = vmatpush3.bf16.msra.mxu1 %v2870_v55 }
  0x28   : > { %2688 = vmatprep.subr.bf16.mxu1 %v3034_v42 }
  0x36   : > { %829 = vperm.xlu1 %2885, %v2276_v57  }
  0x3b   : > { %707 = vperm.xlu0 %2884, %v704_v56  }
  0xa6   : > { %v443_v8 = vpop.xlane.xlu0 %442  ;;  %v447_v9 = vpop.xlane.xlu1 %446 }
  0xa7   : > { %v459_v15 = vmul.f32 0.0078125, %v443_v8  ;;  %v461_v16 = vmul.f32 0.0078125, %v447_v9  ;;  %v2274_v8 = vld [vmem:[%s3804_s4] ss:$0 sm:$0xff] }
  0xa9   : > { %v488_v25 = vrot.slane %v459_v15, %v487_v10  ;;  %v496_v29 = vrot.slane %v461_v16, %v487_v10 }
  0xaa   : > { %v445_v17 = vpop.xlane.xlu0 %444  ;;  %v449_v18 = vpop.xlane.xlu1 %448 }
  0xab   : > { %v460_v21 = vmul.f32 0.0078125, %v445_v17  ;;  %v462_v22 = vmul.f32 0.0078125, %v449_v18 }
  0xad   : > { %v492_v26 = vrot.slane %v460_v21, %v487_v10  ;;  %v500_v28 = vrot.slane %v462_v22, %v487_v10  ;;  %v2889_v21 = vld [vmem:[%s3807_s7 + $0x18] sm:$0xff]   ;;  %v2890_v22 = vld [vmem:[%s3807_s7 + $0x20] sm:$0xff]  }
  0xae   : > { %v451_v31 = vpop.xlane.xlu0 %450  ;;  %v453_v32 = vpop.xlane.xlu1 %452 }
  0xaf   : > { %v518_v35 = vsel %vm517_vm1, %v492_v26, %v488_v25  ;;  %v463_v36 = vmul.f32 0.0078125, %v451_v31  ;;  %v464_v37 = vmul.f32 0.0078125, %v453_v32  ;;  %v995_v25 = vsub.s32 7, %v3213_v3 }
  0xb0   : > { %v520_v38 = vsel %vm519_vm2, %v496_v29, %v518_v35  ;;  %v946_v26 = vsub.s32 0, %v3213_v3  ;;  %v953_v35 = vsub.s32 1, %v3213_v3 }
  0xb1   : > { %v522_v39 = vsel %vm521_vm3, %v500_v28, %v520_v38  ;;  %v504_v40 = vrot.slane %v463_v36, %v487_v10  ;;  %v508_v41 = vrot.slane %v464_v37, %v487_v10  ;;  %v2891_v28 = vld [vmem:[%s3807_s7 + $0x28] sm:$0xff]   ;;  %v2892_v36 = vld [vmem:[%s3807_s7 + $0x30] sm:$0xff]   ;;  %v960_v38 = vsub.s32 2, %v3213_v3 }
  0xb2   : > { %v455_v43 = vpop.xlane.xlu0 %454  ;;  %v457_v44 = vpop.xlane.xlu1 %456 }
  0xb3   : > { %v524_v45 = vsel %vm523_vm4, %v504_v40, %v522_v39  ;;  %v465_v46 = vmul.f32 0.0078125, %v455_v43  ;;  %v466_v47 = vmul.f32 0.0078125, %v457_v44  ;;  %v2893_v39 = vld [vmem:[%s3807_s7 + $0x38] sm:$0xff]   ;;  %v974_v44 = vsub.s32 4, %v3213_v3 }
  0xb4   : > { %v526_v50 = vsel %vm525_vm5, %v508_v41, %v524_v45  ;;  %v967_v41 = vsub.s32 3, %v3213_v3 }
  0xb5   : > { %v512_v48 = vrot.slane %v465_v46, %v487_v10  ;;  %v516_v49 = vrot.slane %v466_v47, %v487_v10  ;;  %v981_v46 = vsub.s32 5, %v3213_v3 }
  0xb7   : > { %v528_v51 = vsel %vm527_vm6, %v512_v48, %v526_v50  ;;  %v988_v48 = vsub.s32 6, %v3213_v3 }
  0xb8   : > { %v530_v52 = vsel %vm529_vm7, %v516_v49, %v528_v51  ;;  %v2894_v49 = vld [vmem:[%s3809_s9 + $0x40] sm:$0xff]  }
  0xb9   : > { %2627 = vmatmul.mubr.msk.f32.vlgmr.msra.gmra.mrb[0].mxu0 %vm531_vm8, %v530_v52 }
  0xba   : > { %2665 = vmatpush3.bf16.msra.mxu0 %v2886_v0  ;;  %v3278_v51 = vpop.permute.xlu0 %707 }
  0xbb   : > { %2666 = vmatprep.subr.bf16.mxu0 %v2887_v1  ;;  %v710_v52 = vmul.f32 %v3115_v4, %v3278_v51  ;;  %v711_v53 = vmul.f32 %v3117_v5, %v3278_v51  ;;  %v712_v3 = vmul.f32 %v3123_v11, %v3278_v51  ;;  %v713_v56 = vmul.f32 %v3125_v12, %v3278_v51 }
  0xbd   : > { %v726_v54 = vrot.slane %v710_v52, 4  ;;  %v732_v55 = vrot.slane %v711_v53, 4  ;;  %v738_v58 = vrot.slane %v712_v3, 4 }
  0xbe   : > { %2667 = vmatpush3.bf16.msra.mxu0 %v2887_v1 }
  0xbf   : > { %2668 = vmatprep.subr.bf16.mxu0 %v2888_v2  ;;  %v727_v57 = vadd.f32 %v726_v54, %v710_v52  ;;  %v739_v0 = vadd.f32 %v738_v58, %v712_v3 }
  0xc2   : > { %2669 = vmatpush3.bf16.msra.mxu0 %v2888_v2 }
  0xc3   : > { %2670 = vmatprep.subr.bf16.mxu0 %v2889_v21 }
  0xc6   : > { %2671 = vmatpush3.bf16.msra.mxu0 %v2889_v21 }
  0xc7   : > { %2672 = vmatprep.subr.bf16.mxu0 %v2890_v22 }
  0xca   : > { %2673 = vmatpush3.bf16.msra.mxu0 %v2890_v22 }
  0xcb   : > { %2674 = vmatprep.subr.bf16.mxu0 %v2891_v28 }
  0xce   : > { %2675 = vmatpush3.bf16.msra.mxu0 %v2891_v28  ;;  %v716_v28 = vmul.f32 %v3127_v13, %v3278_v51 }
  0xcf   : > { %2676 = vmatprep.subr.bf16.mxu0 %v2892_v36 }
  0xd2   : > { %2677 = vmatpush3.bf16.msra.mxu0 %v2892_v36 }
  0xd3   : > { %2678 = vmatprep.subr.bf16.mxu0 %v2893_v39 }
  0xd6   : > { %2679 = vmatpush3.bf16.msra.mxu0 %v2893_v39 }
  0xd7   : > { %2708 = vmatprep.subr.bf16.mxu0 %v3034_v42 }
 0x18c   : > { %v600_v60 = vpop.f32.mrb[0].mxu0 }
 0x18d   : > { %v601_v61 = vadd.f32 %v2272_v59, %v600_v60  ;;  %v2628_v62 = vpop.f32.mrb[1].mxu0  ;;  %v714_v59 = vmul.f32 %v3119_v6, %v3278_v51  ;;  %v733_v60 = vadd.f32 %v732_v55, %v711_v53 }
 0x18e   : > { %v715_v62 = vmul.f32 %v3121_v7, %v3278_v51 }
 0x18f   : > { %v604_v63 = vmax.f32 %v601_v61, 0.0  ;;  %v744_v61 = vrot.slane %v713_v56, 4  ;;  %v750_v1 = vrot.slane %v714_v59, 4  ;;  %v734_v2 = vrot.slane %v733_v60, 2 }
 0x191   : > { %2662 = vmatmul.mubr.f32.vlgmr.msra.gmra.mrb[0].mxu1 %v604_v63  ;;  %v728_v63 = vrot.slane %v727_v57, 2  ;;  %v735_v21 = vadd.f32 %v734_v2, %v733_v60  ;;  %v721_v60 = vmul.f32 %v3145_v24, %v3278_v51 }
 0x192   : > { %2704 = vmatprep.mubr.msk.bf16.mxu1 %vm3035_vm0, %v3034_v42  ;;  %2689 = vmatpush3.bf16.msra.mxu1 %v2894_v49 }
 0x193   : > { %2690 = vmatprep.subr.bf16.mxu1 %v3034_v42 }
 0x264   : > { %v694_v9 = vpop.f32.mrb[0].mxu1 }
 0x265   : > { %v695_v10 = vadd.f32 %v2274_v8, %v694_v9  ;;  %v2663_v15 = vpop.f32.mrb[1].mxu1  ;;  %v724_v8 = vmul.f32 %v3155_v33, %v3278_v51  ;;  %v745_v9 = vadd.f32 %v744_v61, %v713_v56 }
 0x266   : > { %v729_v15 = vadd.f32 %v728_v63, %v727_v57  ;;  %v720_v57 = vmul.f32 %v3143_v23, %v3278_v51 }
 0x267   : > { %v2275_v16 = vmul.f32 -1.442695, %v695_v10  ;;  %v756_v10 = vrot.slane %v715_v62, 4  ;;  %v810_v22 = vrot.slane %v724_v8, 4 }
 0x269   : > { %2958 = vpow2.f32 %v2275_v16  ;;  %v725_v16 = vmul.f32 %v3157_v34, %v3278_v51 }
 0x273   : > { %v2959_v17 = vpop.eup %2958 }
 0x274   : > { %v701_v18 = vadd.f32 1.0, %v2959_v17  ;;  %v740_v17 = vrot.slane %v739_v0, 2 }
 0x276   : > { %2960 = vrcp.f32 %v701_v18  ;;  %v751_v18 = vadd.f32 %v750_v1, %v714_v59 }
 0x278   : > { %v752_v36 = vrot.slane %v751_v18, 2 }
 0x27a   : > { %v753_v49 = vadd.f32 %v752_v36, %v751_v18 }
 0x280   : > { %v2961_v29 = vpop.eup %2960 }
 0x281   : > { %v996_v31 = vrot.slane %v2961_v29, %v995_v25  ;;  %v947_v32 = vrot.slane %v2961_v29, %v946_v26  ;;  %v954_v37 = vrot.slane %v2961_v29, %v953_v35  ;;  %v961_v40 = vrot.slane %v2961_v29, %v960_v38 }
 0x282   : > { %v968_v43 = vrot.slane %v2961_v29, %v967_v41  ;;  %v975_v45 = vrot.slane %v2961_v29, %v974_v44  ;;  %v982_v47 = vrot.slane %v2961_v29, %v981_v46  ;;  %v989_v50 = vrot.slane %v2961_v29, %v988_v48 }
 0x283   : > { %998 = vbcast.lane.b32.xlu0 %v996_v31, 256  ;;  %949 = vbcast.lane.b32.xlu1 %v947_v32, 256  ;;  %v746_v25 = vrot.slane %v745_v9, 2  ;;  %v757_v26 = vadd.f32 %v756_v10, %v715_v62  ;;  %v717_v29 = vmul.f32 %v3129_v14, %v3278_v51  ;;  %v730_v31 = vrot.slane %v729_v15, 1 }
 0x284   : > { %v816_v32 = vrot.slane %v725_v16, 4  ;;  %v741_v35 = vadd.f32 %v740_v17, %v739_v0  ;;  %v811_v38 = vadd.f32 %v810_v22, %v724_v8  ;;  %v762_v41 = vrot.slane %v716_v28, 4 }
 0x285   : > { %v747_v39 = vadd.f32 %v746_v25, %v745_v9  ;;  %v768_v44 = vrot.slane %v717_v29, 4  ;;  %v731_v46 = vadd.f32 %v730_v31, %v729_v15  ;;  %v754_v0 = vrot.slane %v753_v49, 1 }
 0x286   : > { %v742_v48 = vrot.slane %v741_v35, 1  ;;  %v812_v53 = vrot.slane %v811_v38, 2  ;;  %v763_v55 = vadd.f32 %v762_v41, %v716_v28  ;;  %v722_v9 = vmul.f32 %v3147_v27, %v3278_v51 }
 0x287   : > { %956 = vbcast.lane.b32.xlu1 %v954_v37, 256  ;;  %v736_v37 = vrot.slane %v735_v21, 1  ;;  %v748_v54 = vrot.slane %v747_v39, 1  ;;  %v769_v58 = vadd.f32 %v768_v44, %v717_v29  ;;  %v786_v17 = vrot.slane %v720_v57, 4 }
 0x288   : > { %v743_v63 = vadd.f32 %v742_v48, %v741_v35  ;;  %v813_v2 = vadd.f32 %v812_v53, %v811_v38  ;;  %v764_v15 = vrot.slane %v763_v55, 2  ;;  %v792_v22 = vrot.slane %v721_v60, 4 }
 0x289   : > { %v737_v52 = vadd.f32 %v736_v37, %v735_v21  ;;  %v749_v8 = vadd.f32 %v748_v54, %v747_v39  ;;  %v770_v18 = vrot.slane %v769_v58, 2  ;;  %v723_v25 = vmul.f32 %v3153_v30, %v3278_v51 }
 0x28a   : > { %v755_v31 = vadd.f32 %v754_v0, %v753_v49  ;;  %v814_v35 = vrot.slane %v813_v2, 1  ;;  %v798_v37 = vrot.slane %v722_v9, 4  ;;  %v765_v39 = vadd.f32 %v764_v15, %v763_v55 }
 0x28b   : > { %963 = vbcast.lane.b32.xlu1 %v961_v40, 256  ;;  %v758_v40 = vrot.slane %v757_v26, 2  ;;  %v787_v41 = vadd.f32 %v786_v17, %v720_v57 }
 0x28c   : > { %v815_v49 = vadd.f32 %v814_v35, %v813_v2  ;;  %v799_v53 = vadd.f32 %v798_v37, %v722_v9 }
 0x28d   : > { %v759_v3 = vadd.f32 %v758_v40, %v757_v26  ;;  %v788_v55 = vrot.slane %v787_v41, 2 }
 0x28e   : > { %v800_v0 = vrot.slane %v799_v53, 2 }
 0x28f   : > { %970 = vbcast.lane.b32.xlu1 %v968_v43, 256  ;;  %v718_v43 = vmul.f32 %v3135_v19, %v3278_v51  ;;  %v760_v10 = vrot.slane %v759_v3, 1  ;;  %v789_v9 = vadd.f32 %v788_v55, %v787_v41 }
 0x291   : > { %v774_v56 = vrot.slane %v718_v43, 4  ;;  %v761_v38 = vadd.f32 %v760_v10, %v759_v3 }
 0x293   : > { %977 = vbcast.lane.b32.xlu1 %v975_v45, 256  ;;  %v719_v45 = vmul.f32 %v3137_v20, %v3278_v51 }
 0x295   : > { %v780_v59 = vrot.slane %v719_v45, 4 }
 0x297   : > { %984 = vbcast.lane.b32.xlu1 %v982_v47, 256  ;;  %v817_v47 = vadd.f32 %v816_v32, %v725_v16  ;;  %v775_v16 = vadd.f32 %v774_v56, %v718_v43  ;;  %v781_v21 = vadd.f32 %v780_v59, %v719_v45  ;;  %v771_v43 = vadd.f32 %v770_v18, %v769_v58 }
 0x298   : > { %v793_v45 = vadd.f32 %v792_v22, %v721_v60  ;;  %v766_v56 = vrot.slane %v765_v39, 1  ;;  %v801_v22 = vadd.f32 %v800_v0, %v799_v53 }
 0x299   : > { %v818_v62 = vrot.slane %v817_v47, 2  ;;  %v776_v40 = vrot.slane %v775_v16, 2  ;;  %v782_v44 = vrot.slane %v781_v21, 2  ;;  %v772_v59 = vrot.slane %v771_v43, 1 }
 0x29a   : > { %v794_v58 = vrot.slane %v793_v45, 2  ;;  %v767_v2 = vadd.f32 %v766_v56, %v765_v39 }
 0x29b   : > { %991 = vbcast.lane.b32.xlu1 %v989_v50, 256  ;;  %v3304_v50 = vpop.permute.xlu1 %829  ;;  %v819_v28 = vadd.f32 %v818_v62, %v817_v47  ;;  %v777_v3 = vadd.f32 %v776_v40, %v775_v16  ;;  %v783_v57 = vadd.f32 %v782_v44, %v781_v21  ;;  %v773_v10 = vadd.f32 %v772_v59, %v771_v43 }
 0x29c   : > { %v832_v61 = vadd.f32 %v3304_v50, %v731_v46  ;;  %v833_v1 = vadd.f32 %v3304_v50, %v737_v52  ;;  %v834_v29 = vadd.f32 %v3304_v50, %v743_v63  ;;  %v835_v36 = vadd.f32 %v3304_v50, %v749_v8 }
 0x29d   : > { %v804_v46 = vrot.slane %v723_v25, 4  ;;  %v820_v51 = vrot.slane %v819_v28, 1  ;;  %v836_v47 = vadd.f32 %v3304_v50, %v755_v31  ;;  %v837_v54 = vadd.f32 %v3304_v50, %v761_v38 }
 0x29e   : > { %v2277_v26 = vmul.f32 -1.442695, %v832_v61  ;;  %v2278_v32 = vmul.f32 -1.442695, %v833_v1  ;;  %v2279_v48 = vmul.f32 -1.442695, %v834_v29  ;;  %v846_v63 = vadd.f32 %v3304_v50, %v815_v49 }
 0x29f   : > { %v2280_v52 = vmul.f32 -1.442695, %v835_v36  ;;  %v805_v61 = vadd.f32 %v804_v46, %v723_v25  ;;  %v821_v60 = vadd.f32 %v820_v51, %v819_v28  ;;  %v2281_v62 = vmul.f32 -1.442695, %v836_v47 }
 0x2a0   : > { %2962 = vpow2.f32 %v2277_v26  ;;  %v2282_v1 = vmul.f32 -1.442695, %v837_v54  ;;  %v778_v8 = vrot.slane %v777_v3, 1  ;;  %v784_v15 = vrot.slane %v783_v57, 1 }
 0x2a1   : > { %2964 = vpow2.f32 %v2278_v32  ;;  %v795_v17 = vadd.f32 %v794_v58, %v793_v45  ;;  %v806_v16 = vrot.slane %v805_v61, 2  ;;  %v847_v18 = vadd.f32 %v3304_v50, %v821_v60 }
 0x2a2   : > { %2966 = vpow2.f32 %v2279_v48  ;;  %v2291_v21 = vmul.f32 -1.442695, %v846_v63  ;;  %v838_v26 = vadd.f32 %v3304_v50, %v767_v2  ;;  %v779_v28 = vadd.f32 %v778_v8, %v777_v3 }
 0x2a3   : > { %2968 = vpow2.f32 %v2280_v52  ;;  %v790_v29 = vrot.slane %v789_v9, 1  ;;  %v839_v32 = vadd.f32 %v3304_v50, %v773_v10  ;;  %v785_v35 = vadd.f32 %v784_v15, %v783_v57 }
 0x2a4   : > { %2970 = vpow2.f32 %v2281_v62  ;;  %v796_v36 = vrot.slane %v795_v17, 1  ;;  %v807_v37 = vadd.f32 %v806_v16, %v805_v61  ;;  %v2292_v38 = vmul.f32 -1.442695, %v847_v18 }
 0x2a5   : > { %2972 = vpow2.f32 %v2282_v1  ;;  %v802_v40 = vrot.slane %v801_v22, 1  ;;  %v2283_v43 = vmul.f32 -1.442695, %v838_v26  ;;  %v840_v44 = vadd.f32 %v3304_v50, %v779_v28 }
 0x2a6   : > { %2974 = vpow2.f32 %v2291_v21  ;;  %v791_v45 = vadd.f32 %v790_v29, %v789_v9  ;;  %v2284_v51 = vmul.f32 -1.442695, %v839_v32  ;;  %v841_v48 = vadd.f32 %v3304_v50, %v785_v35 }
 0x2a7   : > { %v797_v47 = vadd.f32 %v796_v36, %v795_v17  ;;  %v808_v49 = vrot.slane %v807_v37, 1  ;;  %2976 = vpow2.f32 %v2292_v38  ;;  %v803_v54 = vadd.f32 %v802_v40, %v801_v22 }
 0x2a8   : > { %v2285_v3 = vmul.f32 -1.442695, %v840_v44  ;;  %v842_v55 = vadd.f32 %v3304_v50, %v791_v45  ;;  %v2286_v59 = vmul.f32 -1.442695, %v841_v48 }
 0x2a9   : > { %v843_v57 = vadd.f32 %v3304_v50, %v797_v47  ;;  %v809_v58 = vadd.f32 %v808_v49, %v807_v37  ;;  %v844_v63 = vadd.f32 %v3304_v50, %v803_v54 }
 0x2aa   : > { %v2963_v25 = vpop.eup %2962  ;;  %v2287_v0 = vmul.f32 -1.442695, %v842_v55 }
 0x2ab   : > { %v2965_v31 = vpop.eup %2964  ;;  %v896_v39 = vadd.f32 1.0, %v2963_v25  ;;  %v2288_v1 = vmul.f32 -1.442695, %v843_v57  ;;  %v845_v2 = vadd.f32 %v3304_v50, %v809_v58  ;;  %v2289_v10 = vmul.f32 -1.442695, %v844_v63 }
 0x2ac   : > { %v2967_v41 = vpop.eup %2966  ;;  %v897_v52 = vadd.f32 1.0, %v2965_v31 }
 0x2ad   : > { %v2969_v46 = vpop.eup %2968  ;;  %2978 = vrcp.f32 %v896_v39  ;;  %v898_v53 = vadd.f32 1.0, %v2967_v41  ;;  %v2290_v16 = vmul.f32 -1.442695, %v845_v2 }
 0x2ae   : > { %v2971_v56 = vpop.eup %2970  ;;  %2980 = vpow2.f32 %v2283_v43  ;;  %v899_v60 = vadd.f32 1.0, %v2969_v46 }
 0x2af   : > { %2982 = vpow2.f32 %v2284_v51  ;;  %v2973_v61 = vpop.eup %2972  ;;  %v900_v62 = vadd.f32 1.0, %v2971_v56 }
 0x2b0   : > { %2984 = vrcp.f32 %v897_v52  ;;  %v2975_v8 = vpop.eup %2974  ;;  %v901_v9 = vadd.f32 1.0, %v2973_v61 }
 0x2b1   : > { %2986 = vrcp.f32 %v898_v53  ;;  %v2977_v15 = vpop.eup %2976  ;;  %v910_v32 = vadd.f32 1.0, %v2975_v8 }
 0x2b2   : > { %2988 = vpow2.f32 %v2285_v3  ;;  %v911_v46 = vadd.f32 1.0, %v2977_v15 }
 0x2b3   : > { %2990 = vpow2.f32 %v2286_v59 }
 0x2b4   : > { %2992 = vrcp.f32 %v899_v60 }
 0x2b5   : > { %2994 = vrcp.f32 %v900_v62 }
 0x2b6   : > { %2996 = vpow2.f32 %v2287_v0 }
 0x2b7   : > { %v2979_v17 = vpop.eup %2978  ;;  %2998 = vpow2.f32 %v2288_v1 }
 0x2b8   : > { %v2981_v18 = vpop.eup %2980  ;;  %3000 = vrcp.f32 %v901_v9  ;;  %v1016_v36 = vmul.f32 %v2979_v17, %v3115_v4 }
 0x2b9   : > { %v2983_v21 = vpop.eup %2982  ;;  %3002 = vpow2.f32 %v2289_v10  ;;  %v902_v26 = vadd.f32 1.0, %v2981_v18 }
 0x2ba   : > { %v2985_v22 = vpop.eup %2984  ;;  %3004 = vpow2.f32 %v2290_v16  ;;  %v903_v50 = vadd.f32 1.0, %v2983_v21 }
 0x2bb   : > { %v2987_v25 = vpop.eup %2986  ;;  %v1017_v37 = vmul.f32 %v2985_v22, %v3117_v5  ;;  %3006 = vrcp.f32 %v902_v26 }
 0x2bc   : > { %v2989_v28 = vpop.eup %2988  ;;  %3008 = vrcp.f32 %v903_v50  ;;  %v1018_v48 = vmul.f32 %v2987_v25, %v3123_v11 }
 0x2bd   : > { %v2991_v29 = vpop.eup %2990  ;;  %v904_v38 = vadd.f32 1.0, %v2989_v28  ;;  %3010 = vrcp.f32 %v910_v32 }
 0x2be   : > { %v2993_v31 = vpop.eup %2992  ;;  %v905_v41 = vadd.f32 1.0, %v2991_v29 }
 0x2bf   : > { %v2995_v35 = vpop.eup %2994  ;;  %v1019_v47 = vmul.f32 %v2993_v31, %v3125_v12  ;;  %3012 = vrcp.f32 %v904_v38 }
 0x2c0   : > { %v2997_v39 = vpop.eup %2996  ;;  %3014 = vrcp.f32 %v905_v41  ;;  %v1020_v59 = vmul.f32 %v2995_v35, %v3119_v6 }
 0x2c1   : > { %v2999_v43 = vpop.eup %2998  ;;  %v906_v54 = vadd.f32 1.0, %v2997_v39  ;;  %3016 = vrcp.f32 %v911_v46 }
 0x2c2   : > { %v3001_v51 = vpop.eup %3000  ;;  %v907_v3 = vadd.f32 1.0, %v2999_v43 }
 0x2c3   : > { %v3003_v49 = vpop.eup %3002  ;;  %v1021_v57 = vmul.f32 %v3001_v51, %v3121_v7  ;;  %3018 = vrcp.f32 %v906_v54 }
 0x2c4   : > { %v3005_v55 = vpop.eup %3004  ;;  %v908_v58 = vadd.f32 1.0, %v3003_v49  ;;  %3020 = vrcp.f32 %v907_v3 }
 0x2c5   : > { %v909_v0 = vadd.f32 1.0, %v3005_v55  ;;  %v3007_v1 = vpop.eup %3006 }
 0x2c6   : > { %v3009_v9 = vpop.eup %3008  ;;  %3022 = vrcp.f32 %v908_v58  ;;  %v1022_v21 = vmul.f32 %v3007_v1, %v3127_v13 }
 0x2c7   : > { %v3011_v16 = vpop.eup %3010  ;;  %3024 = vrcp.f32 %v909_v0 }
 0x2c8   : > { %v1030_v43 = vmul.f32 %v3011_v16, %v3155_v33  ;;  %v2899_v16 = vld [vmem:[%s3809_s9 + $0x10] sm:$0xff]  }
 0x2c9   : > { %v3013_v22 = vpop.eup %3012 }
 0x2f5   : > { %v950_v40 = vpop.permute.xlu1 %949  ;;  %v999_v29 = vpop.permute.xlu0 %998 }
 0x2f6   : > { %v1000_v44 = vmul.f32 %v3115_v4, %v950_v40  ;;  %v1001_v45 = vmul.f32 %v3117_v5, %v950_v40  ;;  %v1015_v46 = vmul.f32 %v3157_v34, %v999_v29 }
 0x2f8   : > { %v1032_v52 = vadd.f32 %v1016_v36, %v1000_v44  ;;  %v1033_v53 = vadd.f32 %v1017_v37, %v1001_v45  ;;  %v1024_v37 = vmul.f32 %v3013_v22, %v3135_v19  ;;  %v1014_v45 = vmul.f32 %v3155_v33, %v999_v29  ;;  %v2902_v22 = vld [vmem:[%s3809_s9 + $0x60] sm:$0xff]   ;;  %v2909_v29 = vld [vmem:[%s3809_s9 + $0x38] sm:$0xff]  }
 0x2f9   : > { %v957_v56 = vpop.permute.xlu1 %956 }
 0x2fa   : > { %v1002_v4 = vmul.f32 %v3123_v11, %v957_v56  ;;  %v1003_v5 = vmul.f32 %v3125_v12, %v957_v56  ;;  %v1048_v61 = vadd.f32 %v1033_v53, %v1032_v52  ;;  %v1046_v55 = vadd.f32 %v1030_v43, %v1014_v45 }
 0x2fc   : > { %v1034_v60 = vadd.f32 %v1018_v48, %v1002_v4  ;;  %v1035_v62 = vadd.f32 %v1019_v47, %v1003_v5  ;;  %v1056_v15 = vmul.f32 0.5, %v1048_v61 }
 0x2fd   : > { %v964_v63 = vpop.permute.xlu1 %963 }
 0x2fe   : > { %v1049_v2 = vadd.f32 %v1035_v62, %v1034_v60  ;;  %v1004_v8 = vmul.f32 %v3119_v6, %v964_v63  ;;  %v1005_v11 = vmul.f32 %v3121_v7, %v964_v63  ;;  %v1023_v6 = vmul.f32 %v3009_v9, %v3129_v14  ;;  %v3015_v7 = vpop.eup %3014 }
 0x2ff   : > { %v3017_v50 = vpop.eup %3016  ;;  %v1025_v41 = vmul.f32 %v3015_v7, %v3137_v20  ;;  %v2907_v7 = vld [vmem:[%s3809_s9 + $0x30] sm:$0xff]  }
 0x300   : > { %v1036_v12 = vadd.f32 %v1020_v59, %v1004_v8  ;;  %v1037_v10 = vadd.f32 %v1021_v57, %v1005_v11  ;;  %v1057_v17 = vmul.f32 0.5, %v1049_v2  ;;  %v3019_v38 = vpop.eup %3018  ;;  %v1031_v44 = vmul.f32 %v3017_v50, %v3157_v34  ;;  %v2908_v50 = vld [vmem:[%s3809_s9 + $0x78] sm:$0xff]  }
 0x301   : > { %v971_v18 = vpop.permute.xlu1 %970 }
 0x302   : > { %v1006_v25 = vmul.f32 %v3127_v13, %v971_v18  ;;  %v1007_v26 = vmul.f32 %v3129_v14, %v971_v18  ;;  %v1064_v28 = vpack.c.bf16 %v1057_v17, %v1056_v15  ;;  %v1050_v31 = vadd.f32 %v1037_v10, %v1036_v12  ;;  %v3021_v14 = vpop.eup %3020  ;;  %v2898_v17 = vld [vmem:[%s3809_s9 + $0x50] sm:$0xff]   ;;  %v2900_v18 = vld [vmem:[%s3809_s9 + $0x58] sm:$0xff]  }
 0x303   : > { %v3023_v52 = vpop.eup %3022  ;;  %v1027_v33 = vmul.f32 %v3021_v14, %v3145_v24  ;;  %v1047_v4 = vadd.f32 %v1031_v44, %v1015_v46 }
 0x304   : > { %v1038_v32 = vadd.f32 %v1022_v21, %v1006_v25  ;;  %v1039_v35 = vadd.f32 %v1023_v6, %v1007_v26  ;;  %2680 = vmatprep.mubr.bf16.mxu0 %v1064_v28  ;;  %v1058_v51 = vmul.f32 0.5, %v1050_v31  ;;  %v3025_v34 = vpop.eup %3024  ;;  %v1028_v61 = vmul.f32 %v3023_v52, %v3147_v27  ;;  %v2901_v21 = vld [vmem:[%s3809_s9 + $0x18] sm:$0xff]   ;;  %v2903_v25 = vld [vmem:[%s3809_s9 + $0x20] sm:$0xff]   ;;  %v2904_v26 = vld [vmem:[%s3809_s9 + $0x68] sm:$0xff]  }
 0x305   : > { %v978_v36 = vpop.permute.xlu1 %977  ;;  %v1029_v63 = vmul.f32 %v3025_v34, %v3153_v30  ;;  %v2905_v6 = vld [vmem:[%s3809_s9 + $0x28] sm:$0xff]   ;;  %v2906_v28 = vld [vmem:[%s3809_s9 + $0x70] sm:$0xff]   ;;  %v2293_v31 = vld [vmem:[%s3808_s8] ss:$0 sm:$0xff] }
 0x306   : > { %v1051_v39 = vadd.f32 %v1039_v35, %v1038_v32  ;;  %v1008_v40 = vmul.f32 %v3135_v19, %v978_v36  ;;  %v1009_v13 = vmul.f32 %v3137_v20, %v978_v36  ;;  %v1026_v19 = vmul.f32 %v3019_v38, %v3143_v23  ;;  %v2895_v20 = vld [vmem:[%s3809_s9] sm:$0xff]  }
 0x308   : > { %v1059_v48 = vmul.f32 0.5, %v1051_v39  ;;  %v1040_v47 = vadd.f32 %v1024_v37, %v1008_v40  ;;  %v1041_v49 = vadd.f32 %v1025_v41, %v1009_v13 }
 0x309   : > { %v985_v53 = vpop.permute.xlu1 %984 }
 0x30a   : > { %v1010_v54 = vmul.f32 %v3143_v23, %v985_v53  ;;  %v1011_v56 = vmul.f32 %v3145_v24, %v985_v53  ;;  %v1065_v3 = vpack.c.bf16 %v1059_v48, %v1058_v51  ;;  %v1052_v5 = vadd.f32 %v1041_v49, %v1040_v47 }
 0x30b   : > { %v1055_v24 = vadd.f32 %v1047_v4, %v1046_v55 }
 0x30c   : > { %v1042_v59 = vadd.f32 %v1026_v19, %v1010_v54  ;;  %v1043_v57 = vadd.f32 %v1027_v33, %v1011_v56  ;;  %2681 = vmatmul.mubr.bf16.vlgmr.msra.gmra.mrb[4].mxu0 %v1065_v3  ;;  %v1060_v2 = vmul.f32 0.5, %v1052_v5 }
 0x30d   : > { %v992_v58 = vpop.permute.xlu1 %991  ;;  %2709 = vmatpush3.bf16.msra.mxu0 %v2895_v20  ;;  %v1063_v12 = vmul.f32 0.5, %v1055_v24 }
 0x30e   : > { %v1053_v60 = vadd.f32 %v1043_v57, %v1042_v59  ;;  %v1012_v62 = vmul.f32 %v3147_v27, %v992_v58  ;;  %v1013_v23 = vmul.f32 %v3153_v30, %v992_v58  ;;  %2710 = vmatprep.subr.bf16.mxu0 %v3034_v42  ;;  %v2896_v27 = vld [vmem:[%s3809_s9 + $0x48] sm:$0xff]  }
 0x30f   : > { %v2897_v30 = vld [vmem:[%s3809_s9 + $0x8] sm:$0xff]   ;;  %2691 = vmatpush3.bf16.msra.mxu1 %v2896_v27 }
 0x310   : > { %v1044_v0 = vadd.f32 %v1028_v61, %v1012_v62  ;;  %v1045_v1 = vadd.f32 %v1029_v63, %v1013_v23  ;;  %v1061_v8 = vmul.f32 0.5, %v1053_v60  ;;  %2692 = vmatprep.subr.bf16.mxu1 %v3034_v42 }
 0x311   : > { %2711 = vmatpush3.bf16.msra.mxu0 %v2897_v30 }
 0x312   : > { %v1054_v11 = vadd.f32 %v1045_v1, %v1044_v0  ;;  %v1066_v9 = vpack.c.bf16 %v1061_v8, %v1060_v2  ;;  %2712 = vmatprep.subr.bf16.mxu0 %v3034_v42 }
 0x313   : > { %2693 = vmatpush3.bf16.msra.mxu1 %v2898_v17 }
 0x314   : > { %v1062_v10 = vmul.f32 0.5, %v1054_v11  ;;  %2684 = vmatprep.mubr.bf16.mxu0 %v1066_v9  ;;  %2694 = vmatprep.subr.bf16.mxu1 %v3034_v42 }
 0x315   : > { %2713 = vmatpush3.bf16.msra.mxu0 %v2899_v16 }
 0x316   : > { %v1067_v15 = vpack.c.bf16 %v1063_v12, %v1062_v10  ;;  %2714 = vmatprep.subr.bf16.mxu0 %v3034_v42 }
 0x317   : > { %2695 = vmatpush3.bf16.msra.mxu1 %v2900_v18 }
 0x318   : > { %2685 = vmatmul.mubr.bf16.gmra.mrb[8].mxu0 %v1067_v15  ;;  %2696 = vmatprep.subr.bf16.mxu1 %v3034_v42 }
 0x319   : > { %2724 = vmatprep.mubr.msk.bf16.mxu0 %vm3035_vm0, %v3034_v42  ;;  %2715 = vmatpush3.bf16.msra.mxu0 %v2901_v21 }
 0x31a   : > { %2716 = vmatprep.subr.bf16.mxu0 %v3034_v42 }
 0x31b   : > { %2697 = vmatpush3.bf16.msra.mxu1 %v2902_v22 }
 0x31c   : > { %2698 = vmatprep.subr.bf16.mxu1 %v3034_v42 }
 0x31d   : > { %2717 = vmatpush3.bf16.msra.mxu0 %v2903_v25 }
 0x31e   : > { %2718 = vmatprep.subr.bf16.mxu0 %v3034_v42 }
 0x31f   : > { %2699 = vmatpush3.bf16.msra.mxu1 %v2904_v26 }
 0x320   : > { %2700 = vmatprep.subr.bf16.mxu1 %v3034_v42 }
 0x321   : > { %2719 = vmatpush3.bf16.msra.mxu0 %v2905_v6 }
 0x322   : > { %2720 = vmatprep.subr.bf16.mxu0 %v3034_v42 }
 0x323   : > { %2701 = vmatpush3.bf16.msra.mxu1 %v2906_v28 }
 0x324   : > { %2702 = vmatprep.subr.bf16.mxu1 %v3034_v42 }
 0x325   : > { %2721 = vmatpush3.bf16.msra.mxu0 %v2907_v7 }
 0x326   : > { %2722 = vmatprep.subr.bf16.mxu0 %v3034_v42 }
 0x327   : > { %2703 = vmatpush3.bf16.msra.mxu1 %v2908_v50 }
 0x328   : > { %2728 = vmatprep.subr.bf16.mxu1 %v3034_v42 }
 0x329   : > { %2723 = vmatpush3.bf16.msra.mxu0 %v2909_v29 }
 0x32a   : > { %2748 = vmatprep.subr.bf16.mxu0 %v3034_v42 }
 0x3df   : > { %v2682_v32 = vpop.f32.mrb[4].mxu0 }
 0x3e0   : > { %v1182_v35 = vadd.f32 %v2682_v32, %v2293_v31  ;;  %v1173_v36 = vpop.f32.mrb[5].mxu0 }
 0x3e1   : > { %v1174_v37 = vadd.f32 %v2293_v31, %v1173_v36  ;;  %v2683_v38 = vpop.f32.mrb[6].mxu0 }
 0x3e2   : > { %v1206_v39 = vpack.c.bf16 %v1182_v35, %v1182_v35  ;;  %v1185_v40 = vadd.f32 %v2683_v38, %v2293_v31  ;;  %v1176_v13 = vpop.f32.mrb[7].mxu0 }
 0x3e3   : > { %v1204_v41 = vpack.c.bf16 %v1174_v37, %v1174_v37  ;;  %v1177_v14 = vadd.f32 %v2293_v31, %v1176_v13 }
 0x3e4   : > { %v3427_v43 = vunpack.c.l.b16 %v1206_v39  ;;  %v1207_v44 = vpack.c.bf16 %v1185_v40, %v1185_v40 }
 0x3e5   : > { %v3429_v45 = vunpack.c.l.b16 %v1204_v41  ;;  %v1205_v46 = vpack.c.bf16 %v1177_v14, %v1177_v14 }
 0x3e6   : > { %v3431_v51 = vunpack.c.l.b16 %v1207_v44  ;;  %v1263_v48 = vrot.slane %v3427_v43, 7  ;;  %v1367_v47 = vrot.slane %v3427_v43, 6  ;;  %v1611_v49 = vrot.slane %v3427_v43, 1 }
 0x3e7   : > { %v3436_v52 = vunpack.c.l.b16 %v1205_v46  ;;  %v1261_v53 = vrot.slane %v3429_v45, 1  ;;  %v1486_v19 = vrot.slane %v3429_v45, 2  ;;  %v1608_v20 = vrot.slane %v3429_v45, 3 }
 0x3e8   : > { %v1265_v54 = vrot.slane %v3431_v51, 6  ;;  %v1369_v56 = vrot.slane %v3431_v51, 5  ;;  %v1490_v33 = vrot.slane %v3431_v51, 7  ;;  %v1730_v3 = vrot.slane %v3429_v45, 4 }
 0x3e9   : > { %v1262_v34 = vsel %vm517_vm1, %v3436_v52, %v1261_v53  ;;  %v1365_v55 = vrot.slane %v3436_v52, 7  ;;  %v1487_v4 = vrot.slane %v3436_v52, 1  ;;  %v1609_v5 = vrot.slane %v3436_v52, 2 }
 0x3ea   : > { %v1264_v59 = vsel %vm519_vm2, %v1263_v48, %v1262_v34  ;;  %v1731_v57 = vrot.slane %v3436_v52, 3  ;;  %v1733_v58 = vrot.slane %v3427_v43, 2  ;;  %v1735_v61 = vrot.slane %v3431_v51, 1 }
 0x3eb   : > { %v2686_v60 = vpop.f32.mrb[8].mxu0  ;;  %v1266_v62 = vsel %vm521_vm3, %v1265_v54, %v1264_v59  ;;  %v1366_v23 = vsel %vm517_vm1, %v1365_v55, %v3429_v45  ;;  %v1488_v63 = vsel %vm517_vm1, %v1487_v4, %v1486_v19  ;;  %v1610_v24 = vsel %vm517_vm1, %v1609_v5, %v1608_v20 }
 0x3ec   : > { %v1198_v0 = vadd.f32 %v2686_v60, %v2293_v31  ;;  %v1189_v1 = vpop.f32.mrb[9].mxu0  ;;  %v1368_v2 = vsel %vm519_vm2, %v1367_v47, %v1366_v23  ;;  %v1489_v8 = vsel %vm519_vm2, %v3427_v43, %v1488_v63  ;;  %v1612_v11 = vsel %vm519_vm2, %v1611_v49, %v1610_v24  ;;  %v2910_v23 = vld [vmem:[%s3809_s9 + $0x80] sm:$0xff]  }
 0x3ed   : > { %v1190_v9 = vadd.f32 %v2293_v31, %v1189_v1  ;;  %v2687_v12 = vpop.f32.mrb[10].mxu0  ;;  %v1370_v10 = vsel %vm521_vm3, %v1369_v56, %v1368_v2  ;;  %v1491_v15 = vsel %vm521_vm3, %v1490_v33, %v1489_v8  ;;  %v1613_v27 = vsel %vm521_vm3, %v3431_v51, %v1612_v11  ;;  %v2911_v63 = vld [vmem:[%s3809_s9 + $0xc0] sm:$0xff]  }
 0x3ee   : > { %v1210_v30 = vpack.c.bf16 %v1198_v0, %v1198_v0  ;;  %v1201_v17 = vadd.f32 %v2687_v12, %v2293_v31  ;;  %v1192_v16 = vpop.f32.mrb[11].mxu0  ;;  %v1732_v18 = vsel %vm517_vm1, %v1731_v57, %v1730_v3  ;;  %v1852_v21 = vrot.slane %v3429_v45, 5 }
 0x3ef   : > { %v1208_v22 = vpack.c.bf16 %v1190_v9, %v1190_v9  ;;  %v1193_v25 = vadd.f32 %v2293_v31, %v1192_v16  ;;  %v1734_v26 = vsel %vm519_vm2, %v1733_v58, %v1732_v18  ;;  %v1853_v6 = vrot.slane %v3436_v52, 4  ;;  %v2913_v16 = vld [vmem:[%s3809_s9 + $0xc8] sm:$0xff]  }
 0x3f0   : > { %v3471_v28 = vunpack.c.l.b16 %v1210_v30  ;;  %v1211_v7 = vpack.c.bf16 %v1201_v17, %v1201_v17  ;;  %v1736_v50 = vsel %vm521_vm3, %v1735_v61, %v1734_v26  ;;  %v1855_v36 = vrot.slane %v3427_v43, 3  ;;  %v2912_v17 = vld [vmem:[%s3809_s9 + $0x88] sm:$0xff]  }
 0x3f1   : > { %v3474_v29 = vunpack.c.l.b16 %v1208_v22  ;;  %v1209_v32 = vpack.c.bf16 %v1193_v25, %v1193_v25  ;;  %v1854_v35 = vsel %vm517_vm1, %v1853_v6, %v1852_v21 }
 0x3f2   : > { %v3478_v37 = vunpack.c.l.b16 %v1211_v7  ;;  %v1271_v31 = vrot.slane %v3471_v28, 3  ;;  %v1375_v38 = vrot.slane %v3471_v28, 2  ;;  %v1496_v39 = vrot.slane %v3471_v28, 4 }
 0x3f3   : > { %v3483_v40 = vunpack.c.l.b16 %v1209_v32  ;;  %v1267_v13 = vrot.slane %v3474_v29, 5  ;;  %v1371_v41 = vrot.slane %v3474_v29, 4  ;;  %v1492_v14 = vrot.slane %v3474_v29, 6 }
 0x3f4   : > { %v1273_v44 = vrot.slane %v3478_v37, 2  ;;  %v1377_v46 = vrot.slane %v3478_v37, 1  ;;  %v1498_v48 = vrot.slane %v3478_v37, 3  ;;  %v1614_v47 = vrot.slane %v3474_v29, 7 }
 0x3f5   : > { %v1268_v49 = vsel %vm523_vm4, %v1267_v13, %v1266_v62  ;;  %v1269_v53 = vrot.slane %v3483_v40, 4  ;;  %v1372_v19 = vsel %vm523_vm4, %v1371_v41, %v1370_v10  ;;  %v1373_v20 = vrot.slane %v3483_v40, 3 }
 0x3f6   : > { %v1493_v54 = vsel %vm523_vm4, %v1492_v14, %v1491_v15  ;;  %v1494_v56 = vrot.slane %v3483_v40, 5  ;;  %v1615_v33 = vsel %vm523_vm4, %v1614_v47, %v1613_v27  ;;  %v1616_v3 = vrot.slane %v3483_v40, 6  ;;  %v2914_v14 = vld [vmem:[%s3809_s9 + $0x90] sm:$0xff]  }
 0x3f7   : > { %v1270_v34 = vsel %vm525_vm5, %v1269_v53, %v1268_v49  ;;  %v1374_v55 = vsel %vm525_vm5, %v1373_v20, %v1372_v19  ;;  %v1618_v4 = vrot.slane %v3471_v28, 5  ;;  %v1620_v5 = vrot.slane %v3478_v37, 4 }
 0x3f8   : > { %v1272_v59 = vsel %vm527_vm6, %v1271_v31, %v1270_v34  ;;  %v1376_v57 = vsel %vm527_vm6, %v1375_v38, %v1374_v55  ;;  %v1495_v58 = vsel %vm525_vm5, %v1494_v56, %v1493_v54  ;;  %v1617_v61 = vsel %vm525_vm5, %v1616_v3, %v1615_v33 }
 0x3f9   : > { %v1274_v60 = vsel %vm529_vm7, %v1273_v44, %v1272_v59  ;;  %v1378_v62 = vsel %vm529_vm7, %v1377_v46, %v1376_v57  ;;  %v1497_v24 = vsel %vm527_vm6, %v1496_v39, %v1495_v58  ;;  %v1619_v0 = vsel %vm527_vm6, %v1618_v4, %v1617_v61  ;;  %v2915_v44 = vld [vmem:[%s3809_s9 + $0xd0] sm:$0xff]   ;;  %v2918_v58 = vld [vmem:[%s3809_s9 + $0xa0] sm:$0xff]  }
 0x3fa   : > { %v1275_v1 = vpack.c.b16 %v1274_v60, %v1274_v60  ;;  %v1379_v2 = vpack.c.b16 %v1378_v62, %v1378_v62  ;;  %v3519_v8 = vsel %vm529_vm7, %v1498_v48, %v1497_v24  ;;  %v3522_v11 = vsel %vm529_vm7, %v1620_v5, %v1619_v0  ;;  %v2919_v61 = vld [vmem:[%s3809_s9 + $0xe0] sm:$0xff]   ;;  %v2920_v62 = vld [vmem:[%s3809_s9 + $0xa8] sm:$0xff]   ;;  %v2924_v24 = vld [vmem:[%s3809_s9 + $0xb8] sm:$0xff]  }
 0x3fb   : > { %v1737_v9 = vsel %vm523_vm4, %v3474_v29, %v1736_v50  ;;  %v1738_v12 = vrot.slane %v3483_v40, 7  ;;  %v1857_v10 = vrot.slane %v3431_v51, 2  ;;  %v1740_v15 = vrot.slane %v3471_v28, 6  ;;  %v2925_v0 = vld [vmem:[%s3809_s9 + $0xf8] sm:$0xff]  }
 0x3fc   : > { %2705 = vmatmul.mubr.bf16.vlgmr.msra.gmra.mrb[4].mxu1 %v1275_v1  ;;  %2725 = vmatmul.mubr.bf16.vlgmr.msra.gmra.mrb[12].mxu0 %v1379_v2  ;;  %v1856_v27 = vsel %vm519_vm2, %v1855_v36, %v1854_v35  ;;  %v1859_v30 = vrot.slane %v3474_v29, 1  ;;  %v1742_v21 = vrot.slane %v3478_v37, 5  ;;  %v1862_v25 = vrot.slane %v3471_v28, 7  ;;  %v2926_v1 = vld [vmem:[%s3809_s9 + $0x100] sm:$0xff]  }
 0x3fd   : > { %2729 = vmatpush3.bf16.msra.mxu1 %v2910_v23  ;;  %2749 = vmatpush3.bf16.msra.mxu0 %v2911_v63  ;;  %v1739_v18 = vsel %vm525_vm5, %v1738_v12, %v1737_v9  ;;  %v1858_v22 = vsel %vm521_vm3, %v1857_v10, %v1856_v27  ;;  %v1974_v7 = vrot.slane %v3429_v45, 6  ;;  %v1975_v50 = vrot.slane %v3436_v52, 5  ;;  %v2921_v23 = vld [vmem:[%s3809_s9 + $0xe8] sm:$0xff]   ;;  %v2923_v63 = vld [vmem:[%s3809_s9 + $0xf0] sm:$0xff]   ;;  %v2927_v2 = vld [vmem:[%s3809_s9 + $0x140] sm:$0xff]  }
 0x3fe   : > { %2730 = vmatprep.subr.bf16.mxu1 %v3034_v42  ;;  %2750 = vmatprep.subr.bf16.mxu0 %v3034_v42  ;;  %v1741_v26 = vsel %vm527_vm6, %v1740_v15, %v1739_v18  ;;  %v1860_v6 = vsel %vm523_vm4, %v1859_v30, %v1858_v22  ;;  %v1864_v36 = vrot.slane %v3478_v37, 6  ;;  %v1977_v31 = vrot.slane %v3427_v43, 4  ;;  %v2928_v10 = vld [vmem:[%s3809_s9 + $0x108] sm:$0xff]   ;;  %v2932_v27 = vld [vmem:[%s3809_s9 + $0x118] sm:$0xff]   ;;  %v2938_v22 = vld [vmem:[%s3809_s9 + $0x130] sm:$0xff]  }
 0x3ff   : > { %2744 = vmatprep.mubr.msk.bf16.mxu1 %vm3035_vm0, %v3034_v42  ;;  %2764 = vmatprep.mubr.msk.bf16.mxu0 %vm3035_vm0, %v3034_v42  ;;  %v3552_v32 = vsel %vm529_vm7, %v1742_v21, %v1741_v26  ;;  %v1861_v35 = vsel %vm525_vm5, %v3483_v40, %v1860_v6  ;;  %v1976_v39 = vsel %vm517_vm1, %v1975_v50, %v1974_v7  ;;  %v1979_v13 = vrot.slane %v3431_v51, 3  ;;  %v2929_v15 = vld [vmem:[%s3809_s9 + $0x148] sm:$0xff]   ;;  %v2933_v30 = vld [vmem:[%s3809_s9 + $0x158] sm:$0xff]   ;;  %v2942_v7 = vld [vmem:[%s3809_s9 + $0x180] sm:$0xff]  }
 0x400   : > { %v1863_v38 = vsel %vm527_vm6, %v1862_v25, %v1861_v35  ;;  %v1981_v41 = vrot.slane %v3474_v29, 2  ;;  %v1978_v48 = vsel %vm519_vm2, %v1977_v31, %v1976_v39  ;;  %v1983_v47 = vrot.slane %v3483_v40, 1  ;;  %v2936_v18 = vld [vmem:[%s3809_s9 + $0x128] sm:$0xff]   ;;  %v2939_v25 = vld [vmem:[%s3809_s9 + $0x170] sm:$0xff]   ;;  %v2940_v26 = vld [vmem:[%s3809_s9 + $0x138] sm:$0xff]  }
 0x401   : > { %2731 = vmatpush3.bf16.msra.mxu1 %v2912_v17  ;;  %2751 = vmatpush3.bf16.msra.mxu0 %v2913_v16  ;;  %v3569_v46 = vsel %vm529_vm7, %v1864_v36, %v1863_v38  ;;  %v1980_v49 = vsel %vm521_vm3, %v1979_v13, %v1978_v48  ;;  %v2096_v53 = vrot.slane %v3429_v45, 7  ;;  %v2097_v19 = vrot.slane %v3436_v52, 6  ;;  %v2916_v45 = vld [vmem:[%s3809_s9 + $0x98] sm:$0xff]   ;;  %v2934_v17 = vld [vmem:[%s3809_s9 + $0x120] sm:$0xff]   ;;  %v2937_v21 = vld [vmem:[%s3809_s9 + $0x168] sm:$0xff]  }
 0x402   : > { %2732 = vmatprep.subr.bf16.mxu1 %v3034_v42  ;;  %2752 = vmatprep.subr.bf16.mxu0 %v3034_v42  ;;  %v1982_v20 = vsel %vm523_vm4, %v1981_v41, %v1980_v49  ;;  %v1986_v54 = vrot.slane %v3478_v37, 7  ;;  %v2099_v56 = vrot.slane %v3427_v43, 5  ;;  %v2103_v33 = vrot.slane %v3474_v29, 3  ;;  %v2917_v43 = vld [vmem:[%s3809_s9 + $0xd8] sm:$0xff]   ;;  %v2935_v16 = vld [vmem:[%s3809_s9 + $0x160] sm:$0xff]   ;;  %v2944_v31 = vld [vmem:[%s3809_s9 + $0x188] sm:$0xff]  }
 0x403   : > { %v1984_v3 = vsel %vm525_vm5, %v1983_v47, %v1982_v20  ;;  %v2098_v34 = vsel %vm517_vm1, %v2097_v19, %v2096_v53  ;;  %v2101_v55 = vrot.slane %v3431_v51, 4  ;;  %v2105_v4 = vrot.slane %v3483_v40, 2  ;;  %v2941_v6 = vld [vmem:[%s3809_s9 + $0x178] sm:$0xff]   ;;  %v2943_v50 = vld [vmem:[%s3809_s9 + $0x1c0] sm:$0xff]   ;;  %v2945_v38 = vld [vmem:[%s3809_s9 + $0x1c8] sm:$0xff]  }
 0x404   : > { %v1985_v52 = vsel %vm527_vm6, %v3471_v28, %v1984_v3  ;;  %v2100_v29 = vsel %vm519_vm2, %v2099_v56, %v2098_v34  ;;  %v2107_v59 = vrot.slane %v3471_v28, 1  ;;  %v1500_v9 = vpack.c.b16 %v3519_v8, %v3519_v8  ;;  %v2930_v8 = vld [vmem:[%s3809_s9 + $0x110] sm:$0xff]   ;;  %v2948_v13 = vld [vmem:[%s3809_s9 + $0x198] sm:$0xff]   ;;  %v2953_v48 = vld [vmem:[%s3809_s9 + $0x1e8] sm:$0xff]  }
 0x405   : > { %2733 = vmatpush3.bf16.msra.mxu1 %v2914_v14  ;;  %2753 = vmatpush3.bf16.msra.mxu0 %v2915_v44  ;;  %v3598_v51 = vsel %vm529_vm7, %v1986_v54, %v1985_v52  ;;  %v2102_v40 = vsel %vm521_vm3, %v2101_v55, %v2100_v29  ;;  %v1622_v12 = vpack.c.b16 %v3522_v11, %v3522_v11  ;;  %v2931_v11 = vld [vmem:[%s3809_s9 + $0x150] sm:$0xff]   ;;  %v2949_v41 = vld [vmem:[%s3809_s9 + $0x1d8] sm:$0xff]   ;;  %v2950_v14 = vld [vmem:[%s3809_s9 + $0x1a0] sm:$0xff]  }
 0x406   : > { %2734 = vmatprep.subr.bf16.mxu1 %v3034_v42  ;;  %2754 = vmatprep.subr.bf16.mxu0 %v3034_v42  ;;  %v2104_v5 = vsel %vm523_vm4, %v2103_v33, %v2102_v40  ;;  %v1744_v35 = vpack.c.b16 %v3552_v32, %v3552_v32  ;;  %v1866_v36 = vpack.c.b16 %v3569_v46, %v3569_v46  ;;  %v2946_v32 = vld [vmem:[%s3809_s9 + $0x190] sm:$0xff]   ;;  %v2951_v44 = vld [vmem:[%s3809_s9 + $0x1e0] sm:$0xff]   ;;  %v2952_v46 = vld [vmem:[%s3809_s9 + $0x1a8] sm:$0xff]  }
 0x407   : > { %v2106_v57 = vsel %vm525_vm5, %v2105_v4, %v2104_v5  ;;  %v2947_v39 = vld [vmem:[%s3809_s9 + $0x1d0] sm:$0xff]   ;;  %v2956_v53 = vld [vmem:[%s3809_s9 + $0x1b8] sm:$0xff]   ;;  %v1988_v20 = vpack.c.b16 %v3598_v51, %v3598_v51 }
 0x408   : > { %v2108_v60 = vsel %vm527_vm6, %v2107_v59, %v2106_v57  ;;  %v2954_v47 = vld [vmem:[%s3809_s9 + $0x1b0] sm:$0xff]   ;;  %v2957_v19 = vld [vmem:[%s3809_s9 + $0x1f8] sm:$0xff]  }
 0x409   : > { %2735 = vmatpush3.bf16.msra.mxu1 %v2916_v45  ;;  %2755 = vmatpush3.bf16.msra.mxu0 %v2917_v43  ;;  %v3615_v28 = vsel %vm529_vm7, %v3478_v37, %v2108_v60  ;;  %v2922_v37 = vld [vmem:[%s3809_s9 + $0xb0] sm:$0xff]  }
 0x40a   : > { %2736 = vmatprep.subr.bf16.mxu1 %v3034_v42  ;;  %2756 = vmatprep.subr.bf16.mxu0 %v3034_v42  ;;  %v2955_v49 = vld [vmem:[%s3809_s9 + $0x1f0] sm:$0xff]   ;;  %v2110_v54 = vpack.c.b16 %v3615_v28, %v3615_v28 }
 0x40d   : > { %2737 = vmatpush3.bf16.msra.mxu1 %v2918_v58  ;;  %2757 = vmatpush3.bf16.msra.mxu0 %v2919_v61 }
 0x40e   : > { %2738 = vmatprep.subr.bf16.mxu1 %v3034_v42  ;;  %2758 = vmatprep.subr.bf16.mxu0 %v3034_v42 }
 0x411   : > { %2739 = vmatpush3.bf16.msra.mxu1 %v2920_v62  ;;  %2759 = vmatpush3.bf16.msra.mxu0 %v2921_v23 }
 0x412   : > { %2740 = vmatprep.subr.bf16.mxu1 %v3034_v42  ;;  %2760 = vmatprep.subr.bf16.mxu0 %v3034_v42 }
 0x415   : > { %2741 = vmatpush3.bf16.msra.mxu1 %v2922_v37  ;;  %2761 = vmatpush3.bf16.msra.mxu0 %v2923_v63 }
 0x416   : > { %2742 = vmatprep.subr.bf16.mxu1 %v3034_v42  ;;  %2762 = vmatprep.subr.bf16.mxu0 %v3034_v42 }
 0x419   : > { %2743 = vmatpush3.bf16.msra.mxu1 %v2924_v24  ;;  %2763 = vmatpush3.bf16.msra.mxu0 %v2925_v0 }
 0x41a   : > { %2768 = vmatprep.subr.bf16.mxu1 %v3034_v42  ;;  %2788 = vmatprep.subr.bf16.mxu0 %v3034_v42 }
 0x41c   : > { %2745 = vmatmul.mubr.bf16.vlgmr.msra.gmra.mrb[8].mxu1 %v1500_v9  ;;  %2765 = vmatmul.mubr.bf16.vlgmr.msra.gmra.mrb[16].mxu0 %v1622_v12 }
 0x41d   : > { %2769 = vmatpush3.bf16.msra.mxu1 %v2926_v1  ;;  %2789 = vmatpush3.bf16.msra.mxu0 %v2927_v2 }
 0x41e   : > { %2770 = vmatprep.subr.bf16.mxu1 %v3034_v42  ;;  %2790 = vmatprep.subr.bf16.mxu0 %v3034_v42 }
 0x41f   : > { %2784 = vmatprep.mubr.msk.bf16.mxu1 %vm3035_vm0, %v3034_v42  ;;  %2804 = vmatprep.mubr.msk.bf16.mxu0 %vm3035_vm0, %v3034_v42 }
 0x421   : > { %2771 = vmatpush3.bf16.msra.mxu1 %v2928_v10  ;;  %2791 = vmatpush3.bf16.msra.mxu0 %v2929_v15 }
 0x422   : > { %2772 = vmatprep.subr.bf16.mxu1 %v3034_v42  ;;  %2792 = vmatprep.subr.bf16.mxu0 %v3034_v42 }
 0x425   : > { %2773 = vmatpush3.bf16.msra.mxu1 %v2930_v8  ;;  %2793 = vmatpush3.bf16.msra.mxu0 %v2931_v11 }
 0x426   : > { %2774 = vmatprep.subr.bf16.mxu1 %v3034_v42  ;;  %2794 = vmatprep.subr.bf16.mxu0 %v3034_v42 }
 0x429   : > { %2775 = vmatpush3.bf16.msra.mxu1 %v2932_v27  ;;  %2795 = vmatpush3.bf16.msra.mxu0 %v2933_v30  ;;  %v2478_v27 = vld [vmem:[%s3810_s10] ss:$0 sm:$0xff] }
 0x42a   : > { %2776 = vmatprep.subr.bf16.mxu1 %v3034_v42  ;;  %2796 = vmatprep.subr.bf16.mxu0 %v3034_v42 }
 0x42d   : > { %2777 = vmatpush3.bf16.msra.mxu1 %v2934_v17  ;;  %2797 = vmatpush3.bf16.msra.mxu0 %v2935_v16 }
 0x42e   : > { %2778 = vmatprep.subr.bf16.mxu1 %v3034_v42  ;;  %2798 = vmatprep.subr.bf16.mxu0 %v3034_v42 }
 0x431   : > { %2779 = vmatpush3.bf16.msra.mxu1 %v2936_v18  ;;  %2799 = vmatpush3.bf16.msra.mxu0 %v2937_v21 }
 0x432   : > { %2780 = vmatprep.subr.bf16.mxu1 %v3034_v42  ;;  %2800 = vmatprep.subr.bf16.mxu0 %v3034_v42 }
 0x435   : > { %2781 = vmatpush3.bf16.msra.mxu1 %v2938_v22  ;;  %2801 = vmatpush3.bf16.msra.mxu0 %v2939_v25 }
 0x436   : > { %2782 = vmatprep.subr.bf16.mxu1 %v3034_v42  ;;  %2802 = vmatprep.subr.bf16.mxu0 %v3034_v42 }
 0x439   : > { %2783 = vmatpush3.bf16.msra.mxu1 %v2940_v26  ;;  %2803 = vmatpush3.bf16.msra.mxu0 %v2941_v6 }
 0x43a   : > { %2808 = vmatprep.subr.bf16.mxu1 %v3034_v42  ;;  %2828 = vmatprep.subr.bf16.mxu0 %v3034_v42 }
 0x43c   : > { %2785 = vmatmul.mubr.bf16.vlgmr.msra.gmra.mrb[12].mxu1 %v1744_v35  ;;  %2805 = vmatmul.mubr.bf16.vlgmr.msra.gmra.mrb[20].mxu0 %v1866_v36 }
 0x43d   : > { %2809 = vmatpush3.bf16.msra.mxu1 %v2942_v7  ;;  %2829 = vmatpush3.bf16.msra.mxu0 %v2943_v50 }
 0x43e   : > { %2810 = vmatprep.subr.bf16.mxu1 %v3034_v42  ;;  %2830 = vmatprep.subr.bf16.mxu0 %v3034_v42 }
 0x43f   : > { %2824 = vmatprep.mubr.msk.bf16.mxu1 %vm3035_vm0, %v3034_v42  ;;  %2844 = vmatprep.mubr.msk.bf16.mxu0 %vm3035_vm0, %v3034_v42 }
 0x441   : > { %2811 = vmatpush3.bf16.msra.mxu1 %v2944_v31  ;;  %2831 = vmatpush3.bf16.msra.mxu0 %v2945_v38 }
 0x442   : > { %2812 = vmatprep.subr.bf16.mxu1 %v3034_v42  ;;  %2832 = vmatprep.subr.bf16.mxu0 %v3034_v42 }
 0x445   : > { %2813 = vmatpush3.bf16.msra.mxu1 %v2946_v32  ;;  %2833 = vmatpush3.bf16.msra.mxu0 %v2947_v39 }
 0x446   : > { %2814 = vmatprep.subr.bf16.mxu1 %v3034_v42  ;;  %2834 = vmatprep.subr.bf16.mxu0 %v3034_v42 }
 0x449   : > { %2815 = vmatpush3.bf16.msra.mxu1 %v2948_v13  ;;  %2835 = vmatpush3.bf16.msra.mxu0 %v2949_v41 }
 0x44a   : > { %2816 = vmatprep.subr.bf16.mxu1 %v3034_v42  ;;  %2836 = vmatprep.subr.bf16.mxu0 %v3034_v42 }
 0x44d   : > { %2817 = vmatpush3.bf16.msra.mxu1 %v2950_v14  ;;  %2837 = vmatpush3.bf16.msra.mxu0 %v2951_v44 }
 0x44e   : > { %2818 = vmatprep.subr.bf16.mxu1 %v3034_v42  ;;  %2838 = vmatprep.subr.bf16.mxu0 %v3034_v42 }
 0x451   : > { %2819 = vmatpush3.bf16.msra.mxu1 %v2952_v46  ;;  %2839 = vmatpush3.bf16.msra.mxu0 %v2953_v48 }
 0x452   : > { %2820 = vmatprep.subr.bf16.mxu1 %v3034_v42  ;;  %2840 = vmatprep.subr.bf16.mxu0 %v3034_v42 }
 0x455   : > { %2821 = vmatpush3.bf16.msra.mxu1 %v2954_v47  ;;  %2841 = vmatpush3.bf16.msra.mxu0 %v2955_v49 }
 0x456   : > { %2822 = vmatprep.subr.bf16.mxu1 %v3034_v42  ;;  %2842 = vmatprep.subr.bf16.mxu0 %v3034_v42 }
 0x459   : > { %2823 = vmatpush3.bf16.msra.mxu1 %v2956_v53  ;;  %2843 = vmatpush3.bf16.msra.mxu0 %v2957_v19 }
 0x45c   : > { %2825 = vmatmul.mubr.bf16.vlgmr.msra.gmra.mrb[16].mxu1 %v1988_v20  ;;  %2845 = vmatmul.mubr.bf16.vlgmr.msra.gmra.mrb[24].mxu0 %v2110_v54 }
 0x4cf   : > { %v1359_v56 = vpop.f32.mrb[4].mxu1  ;;  %v1463_v33 = vpop.f32.mrb[12].mxu0 }
 0x4d0   : > { %v1464_v3 = vadd.f32 %v1463_v33, %v1359_v56  ;;  %v2706_v34 = vpop.f32.mrb[5].mxu1  ;;  %v2726_v55 = vpop.f32.mrb[13].mxu0 }
 0x4d1   : > { %v1362_v4 = vpop.f32.mrb[6].mxu1  ;;  %v1466_v45 = vpop.f32.mrb[14].mxu0 }
 0x4d2   : > { %v2707_v43 = vpop.f32.mrb[7].mxu1  ;;  %v2727_v52 = vpop.f32.mrb[15].mxu0 }
 0x4ef   : > { %v1584_v42 = vpop.f32.mrb[8].mxu1  ;;  %v1706_v29 = vpop.f32.mrb[16].mxu0 }
 0x4f0   : > { %v1590_v40 = vadd.f32 %v1584_v42, %v1464_v3  ;;  %v2746_v5 = vpop.f32.mrb[9].mxu1  ;;  %v2766_v59 = vpop.f32.mrb[17].mxu0 }
 0x4f1   : > { %v1587_v51 = vpop.f32.mrb[10].mxu1  ;;  %v1709_v57 = vpop.f32.mrb[18].mxu0 }
 0x4f2   : > { %v1712_v58 = vadd.f32 %v1706_v29, %v1590_v40  ;;  %v2747_v61 = vpop.f32.mrb[11].mxu1  ;;  %v2767_v60 = vpop.f32.mrb[19].mxu0 }
 0x50f   : > { %v1828_v28 = vpop.f32.mrb[12].mxu1  ;;  %v1950_v62 = vpop.f32.mrb[20].mxu0 }
 0x510   : > { %v1834_v23 = vadd.f32 %v1828_v28, %v1712_v58  ;;  %v2786_v37 = vpop.f32.mrb[13].mxu1  ;;  %v2806_v63 = vpop.f32.mrb[21].mxu0 }
 0x511   : > { %v1831_v24 = vpop.f32.mrb[14].mxu1  ;;  %v1953_v0 = vpop.f32.mrb[22].mxu0 }
 0x512   : > { %v1956_v1 = vadd.f32 %v1950_v62, %v1834_v23  ;;  %v2787_v2 = vpop.f32.mrb[15].mxu1  ;;  %v2807_v9 = vpop.f32.mrb[23].mxu0 }
 0x52f   : > { %v2072_v12 = vpop.f32.mrb[16].mxu1  ;;  %v2194_v10 = vpop.f32.mrb[24].mxu0 }
 0x530   : > { %v2078_v15 = vadd.f32 %v2072_v12, %v1956_v1  ;;  %v2826_v8 = vpop.f32.mrb[17].mxu1  ;;  %v2846_v11 = vpop.f32.mrb[25].mxu0 }
 0x531   : > { %v2075_v30 = vpop.f32.mrb[18].mxu1  ;;  %v2197_v17 = vpop.f32.mrb[26].mxu0 }
 0x532   : > { %v2200_v16 = vadd.f32 %v2194_v10, %v2078_v15  ;;  %v2827_v18 = vpop.f32.mrb[19].mxu1  ;;  %v2847_v21 = vpop.f32.mrb[27].mxu0 }
 0x534   : > { %v2208_v22 = vadd.f32 %v2478_v27, %v2200_v16 }
 0x536   : > { %2209 = vst [vmem:[%s391_s17] sm:$0xff] %v2208_v22 }
 0x537 PF: > { %s23_s19 = sadd.s32 1, %s3032_s19  }
 0x538   : > { %p20_p5 = scmp.ge.s32.totalorder %s23_s19, 4  }
 0x53a   :  { %22 = sbr.rel (!%p20_p5) target bundleno = 3 (0x3), region = 101 }

// kernel: transformer_scse_forward.2
= control target key start
LH: loop header
LB: loop body
LE: loop exit
PB: predicated region body
PF: predicated region fallthrough
CT: control target
= control target key end

     0   :  { %s10278_s0 = inlined_call_operand.vmem [shape: bf16[16,8,128], index: 0, kind: input, shape index: {}]   ;;  %s10279_s1 = inlined_call_operand.vmem [shape: f32[16,8], index: 1, kind: input, shape index: {}]   ;;  %s10280_s2 = inlined_call_operand.vmem [shape: f32[1,128], index: 2, kind: input, shape index: {}]   ;;  %s10281_s3 = inlined_call_operand.vmem [shape: f32[1,128], index: 3, kind: input, shape index: {}]   ;;  %s10282_s4 = inlined_call_operand.vmem [shape: bf16[2,128,384], index: 4, kind: input, shape index: {}]   ;;  %s10283_s5 = inlined_call_operand.vmem [shape: f32[2,1,384], index: 5, kind: input, shape index: {}]   ;;  %s10284_s6 = inlined_call_operand.vmem [shape: bf16[2,128,128], index: 6, kind: input, shape index: {}]   ;;  %s10285_s7 = inlined_call_operand.vmem [shape: f32[2,1,128], index: 7, kind: input, shape index: {}, may-alias: {7,9,13,15}]   ;;  %s10286_s8 = inlined_call_operand.vmem [shape: f32[2,1,128], index: 8, kind: input, shape index: {}, may-alias: {8,14}]   ;;  %s10287_s9 = inlined_call_operand.vmem [shape: f32[2,1,128], index: 9, kind: input, shape index: {}, may-alias: {7,9,13,15}]   ;;  %s10288_s10 = inlined_call_operand.vmem [shape: bf16[2,128,512], index: 10, kind: input, shape index: {}]   ;;  %s10289_s11 = inlined_call_operand.vmem [shape: f32[2,1,512], index: 11, kind: input, shape index: {}]   ;;  %s10290_s12 = inlined_call_operand.vmem [shape: bf16[2,512,128], index: 12, kind: input, shape index: {}]   ;;  %s10291_s13 = inlined_call_operand.vmem [shape: f32[2,1,128], index: 13, kind: input, shape index: {}, may-alias: {7,9,13,15}]   ;;  %s10292_s14 = inlined_call_operand.vmem [shape: f32[2,1,128], index: 14, kind: input, shape index: {}, may-alias: {8,14}]   ;;  %s10293_s15 = inlined_call_operand.vmem [shape: f32[2,1,128], index: 15, kind: input, shape index: {}, may-alias: {7,9,13,15}]   ;;  %s10294_s16 = inlined_call_operand.vmem [shape: bf16[16,2,8,128], index: 16, kind: output, shape index: {}]  }
   0x1   :  { %10340 = sst [smem:[#allocation42_spill]] %s10278_s0 }
   0x2   :  { %10341 = sst [smem:[#allocation43_spill]] %s10279_s1 }
   0x3   :  { %10342 = sst [smem:[#allocation44_spill]] %s10280_s2 }
   0x4   :  { %10343 = sst [smem:[#allocation45_spill]] %s10281_s3 }
   0x5   :  { %10344 = sst [smem:[#allocation46_spill]] %s10282_s4 }
   0x6   :  { %10345 = sst [smem:[#allocation47_spill]] %s10283_s5 }
   0x7   :  { %10346 = sst [smem:[#allocation48_spill]] %s10284_s6 }
   0x8   :  { %10347 = sst [smem:[#allocation49_spill]] %s10288_s10 }
   0x9   :  { %10348 = sst [smem:[#allocation50_spill]] %s10294_s16 }
   0xa   :  { %s8278_s21 = smov 0   ;;  %s8280_s22 = smov 0  }
   0xb   :  { %s8282_s23 = smov 0   ;;  %s8284_s24 = smov 0  }
   0xc   :  { %s8286_s25 = smov 0   ;;  %s8288_s26 = smov 0  }
   0xd   :  { %s8290_s27 = smov 0  }
   0xe LB: > { %10349 = sst [smem:[#allocation4_spill]] %s8164_s22  ;;  %s35_s28 = sadd.s32 1, %s8176_s25  ;;  %s8184_s27 = sphi %s8290_s27, %s26_s27   ;;  %s8180_s26 = sphi %s8288_s26, %s10466_s26   ;;  %s8176_s25 = sphi %s8286_s25, %s10465_s25   ;;  %s8172_s24 = sphi %s8284_s24, %s10464_s24   ;;  %s8168_s23 = sphi %s8282_s23, %s10463_s23   ;;  %s8164_s22 = sphi %s8280_s22, %s10462_s22   ;;  %s8160_s21 = sphi %s8278_s21, %s10461_s21  }
   0xf   : > { %10350 = sst [smem:[#allocation5_spill]] %s8168_s23  ;;  %p36_p0 = scmp.ge.s32.totalorder %s35_s28, 2 }
  0x10   : > { %10351 = sst [smem:[#allocation6_spill]] %s8172_s24  ;;  %s38_s29 = sadd.s32 1, %s8180_s26 }
  0x11   : > { %10352 = sst [smem:[#allocation7_spill]] %s8176_s25  ;;  %s6718_s30 = sadd.s32 4294967295, %s8184_s27  }
  0x12   : > { %10353 = sst [smem:[#allocation8_spill]] %s8180_s26  ;;  %p463_p1 = scmp.ne.s32.totalorder %s8164_s22, %s8160_s21 }
  0x13   : > { %10354 = sst [smem:[#allocation9_spill]] %s8184_s27  ;;  %s10468_s28 = smov (%p36_p0, %s35_s28), 0 }
  0x14   : > { %10355 = sst [smem:[#allocation10_spill]] %s10468_s28  ;;  %s10470_s29 = smov (!%p36_p0, %s38_s29), %s8180_s26 }
  0x15   : > { %s449_s0 = ssub.s32 %s8176_s25, %s10468_s28  ;;  %p464_p2 = scmp.eq.s32.totalorder %s6718_s30, 3 }
  0x16   : > { %p40_p3 = scmp.ge.s32.totalorder %s10470_s29, 2  ;;  %p6722_p4 = scmp.ge.s32.totalorder %s8184_s27, 1 }
  0x17   : > { %p8324_p5 = por %p464_p2, %p463_p1  ;;  %p592_p6 = scmp.lt.s32.totalorder %s8184_s27, 5 }
  0x18   : > { %s10472_s29 = smov (%p40_p3, %s10470_s29), 0  ;;  %s453_s20 = sadd.s32 1, %s8164_s22 }
  0x19   : > { %s10356_s17 = scalar_select %p8324_p5, 1, 0 }
  0x1a   : > { %10358 = sst [smem:[#allocation12_spill]] %s10472_s29  ;;  %p593_p7 = pnand %p6722_p4, %p592_p6 }
  0x1b   : > { %10357 = sst [smem:[#allocation11_spill]] %s10356_s17  ;;  %s448_s18 = ssub.s32 %s8180_s26, %s10472_s29 }
  0x1c   : > { %s450_s19 = sor.u32 %s449_s0, %s448_s18  ;;  %596 = sbr.rel (%p593_p7) target bundleno = 4891 (0x131b), region = 84 }
  0x1d   : > { %p451_p8 = scmp.eq.s32.totalorder %s450_s19, 0 }
  0x1f   : > { %s8335_s16 = scalar_select %p451_p8, %s8164_s22, %s453_s20  }
  0x21   : > { %10359 = sst [smem:[#allocation13_spill]] %s8335_s16 }
  0x23   : > { %s688_s30 = sand.u32 1, %s8160_s21   ;;  %s6724_s28 = sshll.u32 %s8172_s24, 3 }
  0x24   : > { %s6723_s25 = sshll.u32 %s688_s30, 5  ;;  %p692_p9 = scmp.lt.s32.totalorder %s6724_s28, 15 }
  0x25   : > { %p697_p10 = scmp.lt.s32.totalorder %s8172_s24, 1  ;;  %p701_p11 = scmp.lt.s32.totalorder %s8168_s23, 1 }
  0x26   : > { %s10474_s28 = smov (!%p692_p9, %s6724_s28), 15  ;;  %s10360_s19 = sld [smem:[#allocation42_spill]] }
  0x27   : > { %s698_s27 = scalar_select %p697_p10, %s8172_s24, 1 }
  0x28   : > { %s6725_s29 = sshll.u32 %s10474_s28, 2  ;;  %s10362_s1 = sld [smem:[#allocation43_spill]] }
  0x29   : > { %s6726_s26 = sshll.u32 %s698_s27, 3  ;;  %s10364_s6 = sld [smem:[#allocation48_spill]] }
  0x2a   : > { %s8353_s21 = scalar_select %p701_p11, %s8168_s23, 1 }
  0x2b   : > { %s10365_s4 = sld [smem:[#allocation46_spill]]  ;;  %s10366_s5 = sld [smem:[#allocation47_spill]] }
  0x2c   : > { %s8345_s20 = scalar_lea.vmem %s10360_s19, %s6725_s29  ;;  %s7636_s28 = smul.u32 192, %s8353_s21 }
  0x2d   : > { %10361 = sst [smem:[#allocation14_spill]] %s8345_s20  ;;  %s6910_s27 = sshll.u32 %s8353_s21, 6 }
  0x2e   : > { %s8350_s17 = scalar_lea.vmem %s10362_s1, %s6726_s26  ;;  %s7637_s29 = smul.u32 3, %s8353_s21 }
  0x2f   : > { %10363 = sst [smem:[#allocation15_spill]] %s8350_s17  ;;  %s8361_s22 = scalar_lea.vmem %s10364_s6, %s6910_s27 }
  0x30   : > { %s6911_s26 = sshll.u32 %s8353_s21, 8  ;;  %s10367_s10 = sld [smem:[#allocation49_spill]] }
  0x31   : > { %s8366_s18 = scalar_lea.vmem %s10365_s4, %s7636_s28  ;;  %s8375_s2 = scalar_lea.vmem %s10366_s5, %s7637_s29 }
  0x32   : > { %s6732_s1 = sshll.u32 %s8353_s21, 2  ;;  %s8400_s23 = scalar_lea.vmem %s10290_s12, %s6911_s26 }
  0x33   : > { %s8395_s3 = scalar_lea.vmem %s10289_s11, %s6732_s1  ;;  %s740_s16 = scalar_lea.vmem %s10291_s13, %s8353_s21 }
  0x34   : > { %s743_s28 = scalar_lea.vmem %s10292_s14, %s8353_s21  ;;  %s8414_s24 = scalar_lea.vmem [#allocation3], %s6723_s25 }
  0x35   : > { %s10368_s1 = sld [smem:[#allocation5_spill]] }
  0x36   : > { %s8389_s4 = scalar_lea.vmem %s10367_s10, %s6911_s26  ;;  %s746_s10 = scalar_lea.vmem %s10293_s15, %s8353_s21 }
  0x3b   : > { %p6735_p12 = scmp.ne.s32.totalorder %s10368_s1, 0 }
  0x3c   : > { %s10369_s19 = sld [smem:[#allocation14_spill]] (!%p6735_p12)  ;;  %s10370_s25 = sld [smem:[#allocation44_spill]] (!%p6735_p12) }
  0x3d   : > { %752 = sbr.rel (%p6735_p12) target bundleno = 397 (0x18d), region = 88  ;;  %s10371_s17 = sld [smem:[#allocation45_spill]] (!%p6735_p12) }
  0x42   : > { %v6915_v0 = vld [vmem:[%s10369_s19] sm:$0xff] (!%p6735_p12)   ;;  %v6950_v1 = vld [vmem:[%s10369_s19 + $0x8] sm:$0xff] (!%p6735_p12)   ;;  %v6951_v6 = vld [vmem:[%s10369_s19 + $0x10] sm:$0xff] (!%p6735_p12)  }
  0x43   : > { %v6916_v2 = vunpack.c.l.bf16 (!%p6735_p12), %v6915_v0  ;;  %v6920_v3 = vunpack.c.l.bf16 (!%p6735_p12), %v6950_v1  ;;  %v6917_v4 = vunpack.c.h.bf16 (!%p6735_p12), %v6915_v0  ;;  %v6921_v5 = vunpack.c.h.bf16 (!%p6735_p12), %v6950_v1  ;;  %v6952_v9 = vld [vmem:[%s10369_s19 + $0x18] sm:$0xff] (!%p6735_p12)   ;;  %v6736_v0 = vld [vmem:[%s10370_s25] ss:$0 sm:$0xff] (!%p6735_p12) }
  0x44   : > { %v6924_v7 = vunpack.c.l.bf16 %v6951_v6  ;;  %v6925_v8 = vunpack.c.h.bf16 %v6951_v6  ;;  %v6928_v10 = vunpack.c.l.bf16 %v6952_v9  ;;  %v6929_v11 = vunpack.c.h.bf16 %v6952_v9 }
  0x45   : > { %771 = vadd.xlane.f32.xlu0 %v6916_v2  ;;  %775 = vadd.xlane.f32.xlu1 %v6920_v3 }
  0x49   : > { %773 = vadd.xlane.f32.xlu0 %v6917_v4  ;;  %777 = vadd.xlane.f32.xlu1 %v6921_v5 }
  0x4d   : > { %779 = vadd.xlane.f32.xlu0 %v6924_v7  ;;  %781 = vadd.xlane.f32.xlu1 %v6925_v8 }
  0x51   : > { %783 = vadd.xlane.f32.xlu0 %v6928_v10  ;;  %785 = vadd.xlane.f32.xlu1 %v6929_v11 }
  0xd2   : > { %v772_v12 = vpop.xlane.xlu0 %771  ;;  %v776_v13 = vpop.xlane.xlu1 %775 }
  0xd3   : > { %v788_v14 = vmul.f32 0.0078125, %v772_v12  ;;  %v790_v15 = vmul.f32 0.0078125, %v776_v13 }
  0xd5   : > { %v8421_v16 = vsub.f32 %v6916_v2, %v788_v14  ;;  %v8423_v17 = vsub.f32 %v6920_v3, %v790_v15 }
  0xd6   : > { %v774_v18 = vpop.xlane.xlu0 %773  ;;  %v778_v19 = vpop.xlane.xlu1 %777 }
  0xd7   : > { %v789_v20 = vmul.f32 0.0078125, %v774_v18  ;;  %v804_v21 = vmul.f32 %v8421_v16, %v8421_v16  ;;  %v791_v22 = vmul.f32 0.0078125, %v778_v19  ;;  %v806_v25 = vmul.f32 %v8423_v17, %v8423_v17 }
  0xd9   : > { %v8427_v23 = vsub.f32 %v6917_v4, %v789_v20  ;;  %812 = vadd.xlane.f32.xlu0 %v804_v21  ;;  %v8429_v24 = vsub.f32 %v6921_v5, %v791_v22  ;;  %v6737_v5 = vld [vmem:[%s10371_s17] ss:$0 sm:$0xff] }
  0xda   : > { %v780_v26 = vpop.xlane.xlu0 %779  ;;  %v782_v27 = vpop.xlane.xlu1 %781 }
  0xdb   : > { %v792_v28 = vmul.f32 0.0078125, %v780_v26  ;;  %v805_v29 = vmul.f32 %v8427_v23, %v8427_v23  ;;  %v793_v30 = vmul.f32 0.0078125, %v782_v27  ;;  %v807_v33 = vmul.f32 %v8429_v24, %v8429_v24 }
  0xdd   : > { %v8435_v31 = vsub.f32 %v6924_v7, %v792_v28  ;;  %816 = vadd.xlane.f32.xlu0 %v806_v25  ;;  %814 = vadd.xlane.f32.xlu1 %v805_v29  ;;  %v8437_v32 = vsub.f32 %v6925_v8, %v793_v30 }
  0xde   : > { %v784_v34 = vpop.xlane.xlu0 %783  ;;  %v786_v35 = vpop.xlane.xlu1 %785 }
  0xdf   : > { %v794_v36 = vmul.f32 0.0078125, %v784_v34  ;;  %v808_v37 = vmul.f32 %v8435_v31, %v8435_v31  ;;  %v795_v38 = vmul.f32 0.0078125, %v786_v35  ;;  %v809_v41 = vmul.f32 %v8437_v32, %v8437_v32 }
  0xe1   : > { %v8443_v39 = vsub.f32 %v6928_v10, %v794_v36  ;;  %818 = vadd.xlane.f32.xlu1 %v807_v33  ;;  %820 = vadd.xlane.f32.xlu0 %v808_v37  ;;  %v8445_v40 = vsub.f32 %v6929_v11, %v795_v38 }
  0xe3   : > { %v810_v42 = vmul.f32 %v8443_v39, %v8443_v39  ;;  %v811_v43 = vmul.f32 %v8445_v40, %v8445_v40 }
  0xe5   : > { %822 = vadd.xlane.f32.xlu1 %v809_v41  ;;  %824 = vadd.xlane.f32.xlu0 %v810_v42 }
  0xe9   : > { %826 = vadd.xlane.f32.xlu1 %v811_v43 }
 0x166   : > { %v813_v44 = vpop.xlane.xlu0 %812 }
 0x167   : > { %v828_v45 = vmul.f32 0.0078125, %v813_v44 }
 0x169   : > { %v836_v46 = vadd.f32 1e-12, %v828_v45 }
 0x16a   : > { %v815_v47 = vpop.xlane.xlu1 %814  ;;  %v817_v48 = vpop.xlane.xlu0 %816 }
 0x16b   : > { %7701 = vrsqrt.f32 %v836_v46  ;;  %v829_v49 = vmul.f32 0.0078125, %v815_v47  ;;  %v830_v50 = vmul.f32 0.0078125, %v817_v48 }
 0x16d   : > { %v837_v51 = vadd.f32 1e-12, %v829_v49  ;;  %v838_v52 = vadd.f32 1e-12, %v830_v50 }
 0x16e   : > { %v819_v53 = vpop.xlane.xlu1 %818  ;;  %v821_v54 = vpop.xlane.xlu0 %820 }
 0x16f   : > { %7703 = vrsqrt.f32 %v837_v51  ;;  %v831_v55 = vmul.f32 0.0078125, %v819_v53  ;;  %v832_v56 = vmul.f32 0.0078125, %v821_v54 }
 0x170   : > { %7705 = vrsqrt.f32 %v838_v52 }
 0x171   : > { %v839_v57 = vadd.f32 1e-12, %v831_v55  ;;  %v840_v58 = vadd.f32 1e-12, %v832_v56 }
 0x172   : > { %v823_v59 = vpop.xlane.xlu1 %822  ;;  %v825_v60 = vpop.xlane.xlu0 %824 }
 0x173   : > { %7707 = vrsqrt.f32 %v839_v57  ;;  %v833_v61 = vmul.f32 0.0078125, %v823_v59  ;;  %v834_v62 = vmul.f32 0.0078125, %v825_v60 }
 0x174   : > { %7709 = vrsqrt.f32 %v840_v58 }
 0x175   : > { %v7702_v63 = vpop.eup %7701  ;;  %v841_v1 = vadd.f32 1e-12, %v833_v61  ;;  %v842_v2 = vadd.f32 1e-12, %v834_v62 }
 0x176   : > { %v852_v3 = vmul.f32 %v7702_v63, %v8421_v16  ;;  %v827_v4 = vpop.xlane.xlu1 %826 }
 0x177   : > { %7711 = vrsqrt.f32 %v841_v1  ;;  %v835_v6 = vmul.f32 0.0078125, %v827_v4 }
 0x178   : > { %v866_v7 = vmul.f32 %v6736_v0, %v852_v3  ;;  %7713 = vrsqrt.f32 %v842_v2 }
 0x179   : > { %v7704_v8 = vpop.eup %7703  ;;  %v843_v9 = vadd.f32 1e-12, %v835_v6 }
 0x17a   : > { %v7706_v10 = vpop.eup %7705  ;;  %v880_v11 = vadd.f32 %v6737_v5, %v866_v7  ;;  %v853_v12 = vmul.f32 %v7704_v8, %v8427_v23 }
 0x17b   : > { %v854_v13 = vmul.f32 %v7706_v10, %v8423_v17  ;;  %7715 = vrsqrt.f32 %v843_v9 }
 0x17c   : > { %888 = vst [vmem:[#allocation2] sm:$0xff] %v880_v11  ;;  %v867_v14 = vmul.f32 %v6736_v0, %v853_v12 }
 0x17d   : > { %v7708_v15 = vpop.eup %7707  ;;  %v868_v16 = vmul.f32 %v6736_v0, %v854_v13 }
 0x17e   : > { %v7710_v18 = vpop.eup %7709  ;;  %v881_v19 = vadd.f32 %v6737_v5, %v867_v14  ;;  %v855_v20 = vmul.f32 %v7708_v15, %v8429_v24 }
 0x17f   : > { %v882_v21 = vadd.f32 %v6737_v5, %v868_v16  ;;  %v856_v22 = vmul.f32 %v7710_v18, %v8435_v31 }
 0x180   : > { %889 = vst [vmem:[#allocation2 + $0x8] sm:$0xff] %v881_v19  ;;  %v869_v25 = vmul.f32 %v6736_v0, %v855_v20 }
 0x181   : > { %v7712_v26 = vpop.eup %7711  ;;  %890 = vst [vmem:[#allocation2 + $0x10] sm:$0xff] %v882_v21  ;;  %v870_v27 = vmul.f32 %v6736_v0, %v856_v22 }
 0x182   : > { %v7714_v23 = vpop.eup %7713  ;;  %v883_v28 = vadd.f32 %v6737_v5, %v869_v25  ;;  %v857_v17 = vmul.f32 %v7712_v26, %v8437_v32 }
 0x183   : > { %v884_v29 = vadd.f32 %v6737_v5, %v870_v27  ;;  %v858_v30 = vmul.f32 %v7714_v23, %v8443_v39 }
 0x184   : > { %891 = vst [vmem:[#allocation2 + $0x18] sm:$0xff] %v883_v28  ;;  %v871_v33 = vmul.f32 %v6736_v0, %v857_v17 }
 0x185   : > { %v7716_v34 = vpop.eup %7715  ;;  %892 = vst [vmem:[#allocation2 + $0x20] sm:$0xff] %v884_v29  ;;  %v872_v24 = vmul.f32 %v6736_v0, %v858_v30 }
 0x186   : > { %v885_v35 = vadd.f32 %v6737_v5, %v871_v33  ;;  %v859_v31 = vmul.f32 %v7716_v34, %v8445_v40 }
 0x187   : > { %v886_v36 = vadd.f32 %v6737_v5, %v872_v24 }
 0x188   : > { %893 = vst [vmem:[#allocation2 + $0x28] sm:$0xff] %v885_v35  ;;  %v873_v37 = vmul.f32 %v6736_v0, %v859_v31 }
 0x189   : > { %894 = vst [vmem:[#allocation2 + $0x30] sm:$0xff] %v886_v36 }
 0x18a   : > { %v887_v38 = vadd.f32 %v6737_v5, %v873_v37 }
 0x18c   : > { %895 = vst [vmem:[#allocation2 + $0x38] sm:$0xff] %v887_v38 }
 0x18d PF: > { %v7777_v32 = vld [vmem:[%s8366_s18 + $0x4] ss:$12 sps:$4 sm:$0xff]   ;;  %v7779_v39 = vld [vmem:[%s8366_s18] ss:$12 sps:$4 sm:$0xff]   ;;  %v10307_v41 = vmov 0   ;;  %v899_v2 = vld [vmem:[#allocation2 + $0x18] sm:$0xff]  ;;  %v942_v12 = vlaneseq  ;;  %s10395_s0 = scalar_lea.vmem %s10285_s7, %s8353_s21  ;;  %s10396_s19 = scalar_lea.vmem %s10286_s8, %s8353_s21 }
 0x18e   : > { %1117 = vmatprep.mubr.bf16.mxu0 %v10307_v41  ;;  %1085 = vmatprep.subr.bf16.mxu0 %v7777_v32  ;;  %v7780_v40 = vld [vmem:[%s8366_s18 + $0x1c] ss:$12 sps:$4 sm:$0xff]   ;;  %v7782_v42 = vld [vmem:[%s8366_s18 + $0x18] ss:$12 sps:$4 sm:$0xff]   ;;  %v7783_v43 = vld [vmem:[%s8366_s18 + $0x34] ss:$12 sps:$4 sm:$0xff]   ;;  %s10397_s25 = scalar_lea.vmem %s10287_s9, %s8353_s21 }
 0x18f   : > { %1086 = vmatpush1.bf16.msra.mxu0 %v7779_v39  ;;  %v7785_v44 = vld [vmem:[%s8366_s18 + $0x30] ss:$12 sps:$4 sm:$0xff]   ;;  %v7786_v45 = vld [vmem:[%s8366_s18 + $0x4c] ss:$12 sps:$4 sm:$0xff]   ;;  %v896_v46 = vld [vmem:[#allocation2] sm:$0xff]  ;;  %v10309_v11 = vmov 0.0  }
 0x190   : > { %1087 = vmatprep.subr.bf16.mxu0 %v7780_v40  ;;  %v7788_v47 = vld [vmem:[%s8366_s18 + $0x48] ss:$12 sps:$4 sm:$0xff]   ;;  %v7789_v49 = vld [vmem:[%s8366_s18 + $0x64] ss:$12 sps:$4 sm:$0xff]   ;;  %v7791_v51 = vld [vmem:[%s8366_s18 + $0x60] ss:$12 sps:$4 sm:$0xff]  }
 0x191   : > { %v897_v48 = vld [vmem:[#allocation2 + $0x8] sm:$0xff]  ;;  %v7803_v55 = vld [vmem:[%s8366_s18 + $0x38] ss:$12 sps:$4 sm:$0xff]   ;;  %v7795_v57 = vld [vmem:[%s8366_s18 + $0x94] ss:$12 sps:$4 sm:$0xff]   ;;  %vm8188_vm0 = vmmov 0  }
 0x192   : > { %v904_v50 = vpack.c.bf16 %v897_v48, %v896_v46  ;;  %v7801_v52 = vld [vmem:[%s8366_s18 + $0x8] ss:$12 sps:$4 sm:$0xff]   ;;  %v7802_v53 = vld [vmem:[%s8366_s18 + $0x20] ss:$12 sps:$4 sm:$0xff]   ;;  %v7794_v56 = vld [vmem:[%s8366_s18 + $0x78] ss:$12 sps:$4 sm:$0xff]  }
 0x193   : > { %1088 = vmatpush1.bf16.msra.mxu0 %v7782_v42  ;;  %v7792_v54 = vld [vmem:[%s8366_s18 + $0x7c] ss:$12 sps:$4 sm:$0xff]   ;;  %7188 = vmatprep.subr.bf16.mxu1 %v7801_v52  ;;  %v7798_v60 = vld [vmem:[%s8366_s18 + $0xac] ss:$12 sps:$4 sm:$0xff]   ;;  %v898_v1 = vld [vmem:[#allocation2 + $0x10] sm:$0xff]  ;;  %v8501_v13 = vshrl.u32 %v942_v12, 7 }
 0x194   : > { %1089 = vmatprep.subr.bf16.mxu0 %v7783_v43  ;;  %7204 = vmatprep.mubr.bf16.mxu1 %v904_v50  ;;  %v7797_v58 = vld [vmem:[%s8366_s18 + $0x90] ss:$12 sps:$4 sm:$0xff]   ;;  %v7805_v61 = vld [vmem:[%s8366_s18 + $0x68] ss:$12 sps:$4 sm:$0xff]   ;;  %v7806_v63 = vld [vmem:[%s8366_s18 + $0x80] ss:$12 sps:$4 sm:$0xff]   ;;  %v905_v4 = vpack.c.bf16 %v899_v2, %v898_v1 }
 0x195   : > { %7189 = vmatpush3.bf16.msra.mxu1 %v7801_v52  ;;  %v7804_v59 = vld [vmem:[%s8366_s18 + $0x50] ss:$12 sps:$4 sm:$0xff]   ;;  %v7800_v62 = vld [vmem:[%s8366_s18 + $0xa8] ss:$12 sps:$4 sm:$0xff]   ;;  %v7807_v0 = vld [vmem:[%s8366_s18 + $0x98] ss:$12 sps:$4 sm:$0xff]  }
 0x196   : > { %7190 = vmatprep.subr.bf16.mxu1 %v7802_v53  ;;  %v7808_v3 = vld [vmem:[%s8366_s18 + $0xb0] ss:$12 sps:$4 sm:$0xff]   ;;  %v900_v5 = vld [vmem:[#allocation2 + $0x20] sm:$0xff]  ;;  %v901_v6 = vld [vmem:[#allocation2 + $0x28] sm:$0xff]  ;;  %10372 = vst [vmem:[#allocation16_spill] sm:$0xff] %v8501_v13  ;;  %v10305_v14 = vsub.s32 1, %v8501_v13 }
 0x197   : > { %1090 = vmatpush1.bf16.msra.mxu0 %v7785_v44  ;;  %v906_v7 = vpack.c.bf16 %v901_v6, %v900_v5  ;;  %v902_v8 = vld [vmem:[#allocation2 + $0x30] sm:$0xff]  ;;  %v903_v9 = vld [vmem:[#allocation2 + $0x38] sm:$0xff]  ;;  %v940_v15 = vld [vmem:[%s8375_s2] sm:$0x7]  ;;  %v8510_v18 = vsub.s32 0, %v8501_v13  ;;  %vm1338_vm1 = vcmask 261120  }
 0x198   : > { %1091 = vmatprep.subr.bf16.mxu0 %v7786_v45  ;;  %v907_v10 = vpack.c.bf16 %v903_v9, %v902_v8  ;;  %v8507_v16 = vrot.slane %v940_v15, %v10305_v14  ;;  %v10306_v17 = vsub.s32 2, %v8501_v13  ;;  %s10374_s2 = sld [smem:[#allocation15_spill]]  ;;  %vm1807_vm2 = vcmask 1043456   ;;  %s8190_s18 = smov 96  }
 0x199   : > { %7191 = vmatpush3.bf16.msra.mxu1 %v7802_v53  ;;  %10373 = vst [vmem:[#allocation17_spill] sm:$0xff] %v8510_v18  ;;  %v8514_v26 = vrot.slane %v940_v15, %v8510_v18  ;;  %vm1707_vm3 = vcmask 64512   ;;  %s8191_s29 = smov 64   ;;  %s8192_s20 = smov 32   ;;  %vm4941_vm4 = vcmask 523264   ;;  %vm4950_vm5 = vcmask 785408  }
 0x19a   : > { %7192 = vmatprep.subr.bf16.mxu1 %v7803_v55  ;;  %v8529_v36 = vrot.slane %v940_v15, %v10306_v17  ;;  %s10457_s21 = sld [smem:[#allocation6_spill]] (%p8324_p5)  ;;  %s10459_s27 = sld [smem:[#allocation50_spill]] (%p8324_p5) }
 0x19b   : > { %1092 = vmatpush1.bf16.msra.mxu0 %v7788_v47 }
 0x19c   : > { %1093 = vmatprep.subr.bf16.mxu0 %v7789_v49 }
 0x19d   : > { %7193 = vmatpush3.bf16.msra.mxu1 %v7803_v55 }
 0x19e   : > { %7194 = vmatprep.subr.bf16.mxu1 %v7804_v59 }
 0x19f   : > { %1094 = vmatpush1.bf16.msra.mxu0 %v7791_v51 }
 0x1a0   : > { %1095 = vmatprep.subr.bf16.mxu0 %v7792_v54 }
 0x1a1   : > { %7195 = vmatpush3.bf16.msra.mxu1 %v7804_v59 }
 0x1a2   : > { %7196 = vmatprep.subr.bf16.mxu1 %v7805_v61 }
 0x1a3   : > { %1096 = vmatpush1.bf16.msra.mxu0 %v7794_v56 }
 0x1a4   : > { %1097 = vmatprep.subr.bf16.mxu0 %v7795_v57 }
 0x1a5   : > { %7197 = vmatpush3.bf16.msra.mxu1 %v7805_v61 }
 0x1a6   : > { %7198 = vmatprep.subr.bf16.mxu1 %v7806_v63 }
 0x1a7   : > { %1098 = vmatpush1.bf16.msra.mxu0 %v7797_v58 }
 0x1a8   : > { %1099 = vmatprep.subr.bf16.mxu0 %v7798_v60 }
 0x1a9   : > { %7199 = vmatpush3.bf16.msra.mxu1 %v7806_v63 }
 0x1aa   : > { %7200 = vmatprep.subr.bf16.mxu1 %v7807_v0 }
 0x1ab   : > { %1100 = vmatpush1.bf16.msra.mxu0 %v7800_v62 }
 0x1ac   : > { %7224 = vmatprep.subr.bf16.mxu0 %v10309_v11 }
 0x1ad   : > { %7201 = vmatpush3.bf16.msra.mxu1 %v7807_v0 }
 0x1ae   : > { %1118 = vmatmul.mubr.bf16.vlgmr.msra.gmra.mrb[0].mxu0 %v904_v50  ;;  %7202 = vmatprep.subr.bf16.mxu1 %v7808_v3 }
 0x1af   : > { %1127 = vmatprep.mubr.bf16.mxu0 %v10307_v41 }
 0x1b1   : > { %7203 = vmatpush3.bf16.msra.mxu1 %v7808_v3 }
 0x1b2   : > { %7212 = vmatprep.subr.bf16.mxu1 %v10309_v11 }
 0x1b4   : > { %7205 = vmatmul.mubr.bf16.vlgmr.msra.gmra.mrb[0].mxu1 %v905_v4 }
 0x1b5   : > { %7208 = vmatprep.mubr.bf16.mxu1 %v906_v7 }
 0x1b6   : > { %1128 = vmatmul.mubr.bf16.gmra.mrb[4].mxu0 %v905_v4 }
 0x1b7   : > { %1137 = vmatprep.mubr.bf16.mxu0 %v10307_v41 }
 0x1bc   : > { %7209 = vmatmul.mubr.bf16.gmra.mrb[4].mxu1 %v907_v10 }
 0x1bd   : > { %7214 = vmatprep.mubr.msk.bf16.mxu1 %vm8188_vm0, %v10309_v11 }
 0x1be   : > { %1138 = vmatmul.mubr.bf16.gmra.mrb[8].mxu0 %v906_v7 }
 0x1bf   : > { %1147 = vmatprep.mubr.bf16.mxu0 %v10307_v41 }
 0x1c6   : > { %1148 = vmatmul.mubr.bf16.gmra.mrb[12].mxu0 %v907_v10 }
 0x1c7   : > { %7226 = vmatprep.mubr.msk.bf16.mxu0 %vm8188_vm0, %v10309_v11 }
 0x281   : > { %v1119_v19 = vpop.f32.mrb[0].mxu0 }
 0x282   : > { %v1121_v20 = vpop.f32.mrb[1].mxu0  ;;  %v1120_v29 = vadd.f32 %v1119_v19, %v8514_v26 }
 0x283   : > { %v1122_v21 = vadd.f32 %v1121_v20, %v8507_v16  ;;  %v1123_v22 = vpop.f32.mrb[2].mxu0 }
 0x284   : > { %v1125_v25 = vpop.f32.mrb[3].mxu0  ;;  %v8531_v37 = vpack.c.bf16 %v1120_v29, %v1120_v29  ;;  %v1124_v45 = vadd.f32 %v1123_v22, %v8514_v26 }
 0x285   : > { %v8516_v27 = vpack.c.bf16 %v1122_v21, %v1122_v21  ;;  %v1126_v23 = vadd.f32 %v1125_v25, %v8507_v16 }
 0x286   : > { %v8561_v56 = vpack.c.bf16 %v1124_v45, %v1124_v45 }
 0x287   : > { %v1343_v28 = vsel %vm1338_vm1, %v8516_v27, 0  ;;  %v8524_v34 = vpack.c.bf16 %v1126_v23, %v1126_v23  ;;  %v7206_v42 = vpop.f32.mrb[0].mxu1 }
 0x288   : > { %7213 = vmatpush3.bf16.xpose.msra.mxu1 %v1343_v28  ;;  %v8543_v43 = vadd.f32 %v7206_v42, %v8529_v36  ;;  %v8545_v44 = vpop.f32.mrb[1].mxu1 }
 0x289   : > { %v1129_v30 = vpop.f32.mrb[4].mxu0  ;;  %7218 = vmatprep.subr.bf16.mxu1 %v10309_v11  ;;  %v1389_v39 = vsel %vm1338_vm1, %v8524_v34, 0  ;;  %v7207_v48 = vpop.f32.mrb[2].mxu1 }
 0x28a   : > { %v1131_v33 = vpop.f32.mrb[5].mxu0  ;;  %v1130_v46 = vadd.f32 %v1129_v30, %v8514_v26  ;;  %v8554_v50 = vadd.f32 %v7207_v48, %v8529_v36  ;;  %v8556_v51 = vpop.f32.mrb[3].mxu1 }
 0x28b   : > { %v1132_v24 = vadd.f32 %v1131_v33, %v8507_v16  ;;  %v1133_v35 = vpop.f32.mrb[6].mxu0 }
 0x28c   : > { %v1135_v31 = vpop.f32.mrb[7].mxu0  ;;  %v8563_v57 = vpack.c.bf16 %v1130_v46, %v1130_v46  ;;  %v1134_v1 = vadd.f32 %v1133_v35, %v8514_v26 }
 0x28d   : > { %v8533_v38 = vpack.c.bf16 %v1132_v24, %v1132_v24  ;;  %v1136_v32 = vadd.f32 %v1135_v31, %v8507_v16 }
 0x28e   : > { %v8599_v20 = vpack.c.bf16 %v1134_v1, %v1134_v1 }
 0x28f   : > { %7215 = vmatmul.mubr.msk.bf16.vlgmr.msra.gmra.mrb[8].mxu1 %vm1338_vm1, %v8531_v37  ;;  %v1435_v40 = vsel %vm1338_vm1, %v8533_v38, 0  ;;  %v8558_v52 = vpack.c.bf16 %v1136_v32, %v1136_v32  ;;  %v7210_v62 = vpop.f32.mrb[4].mxu1 }
 0x290   : > { %7219 = vmatpush3.bf16.xpose.msra.mxu1 %v1389_v39  ;;  %7225 = vmatpush3.bf16.xpose.msra.mxu0 %v1435_v40  ;;  %v8577_v63 = vadd.f32 %v7210_v62, %v8529_v36  ;;  %v1208_v0 = vpop.f32.mrb[5].mxu1  ;;  %v1196_v39 = vadd.f32 %v8556_v51, %v8529_v36 }
 0x291   : > { %v1139_v47 = vpop.f32.mrb[8].mxu0  ;;  %7220 = vmatprep.mubr.msk.bf16.mxu1 %vm8188_vm0, %v10309_v11  ;;  %7230 = vmatprep.subr.bf16.mxu1 %v10309_v11  ;;  %v1481_v60 = vsel %vm1338_vm1, %v8558_v52, 0  ;;  %v8586_v4 = vadd.f32 %v1208_v0, %v8529_v36  ;;  %v7211_v5 = vpop.f32.mrb[6].mxu1 }
 0x292   : > { %v1141_v49 = vpop.f32.mrb[9].mxu0  ;;  %7236 = vmatprep.subr.bf16.mxu0 %v10309_v11  ;;  %v1140_v2 = vadd.f32 %v1139_v47, %v8514_v26  ;;  %v8591_v7 = vadd.f32 %v7211_v5, %v8529_v36  ;;  %v1211_v8 = vpop.f32.mrb[7].mxu1  ;;  %v8652_v42 = vpack.c.bf16 %v1196_v39, %v1196_v39 }
 0x293   : > { %v1142_v53 = vadd.f32 %v1141_v49, %v8507_v16  ;;  %v1143_v54 = vpop.f32.mrb[10].mxu0  ;;  %v8597_v15 = vadd.f32 %v1211_v8, %v8529_v36  ;;  %v1223_v49 = vld [vmem:[%s10374_s2] sm:$0xff]  ;;  %s6913_s2 = sshll.u32 (%p8324_p5), %s10457_s21, 4 }
 0x294   : > { %v1145_v55 = vpop.f32.mrb[11].mxu0  ;;  %v8601_v21 = vpack.c.bf16 %v1140_v2, %v1140_v2  ;;  %v1144_v30 = vadd.f32 %v1143_v54, %v8514_v26  ;;  %v1855_v46 = vsel %vm1807_vm2, %v8652_v42, 0  ;;  %v1225_v1 = vcombine.high %v1223_v49, %v1223_v49 }
 0x295   : > { %v8565_v58 = vpack.c.bf16 %v1142_v53, %v1142_v53  ;;  %v1146_v59 = vadd.f32 %v1145_v55, %v8507_v16 }
 0x296   : > { %v8626_v24 = vpack.c.bf16 %v1144_v30, %v1144_v30 }
 0x297   : > { %7221 = vmatmul.mubr.msk.bf16.vlgmr.msra.gmra.mrb[12].mxu1 %vm1338_vm1, %v8561_v56  ;;  %7227 = vmatmul.mubr.msk.bf16.vlgmr.msra.gmra.mrb[16].mxu0 %vm1338_vm1, %v8563_v57  ;;  %v1527_v61 = vsel %vm1338_vm1, %v8565_v58, 0  ;;  %v8593_v9 = vpack.c.bf16 %v1146_v59, %v1146_v59 }
 0x298   : > { %7231 = vmatpush3.bf16.xpose.msra.mxu1 %v1481_v60  ;;  %7237 = vmatpush3.bf16.xpose.msra.mxu0 %v1527_v61 }
 0x299   : > { %v1149_v3 = vpop.f32.mrb[12].mxu0  ;;  %7232 = vmatprep.mubr.msk.bf16.mxu1 %vm8188_vm0, %v10309_v11  ;;  %7238 = vmatprep.mubr.msk.bf16.mxu0 %vm8188_vm0, %v10309_v11  ;;  %v1573_v28 = vsel %vm1338_vm1, %v8593_v9, 0 }
 0x29a   : > { %v1151_v6 = vpop.f32.mrb[13].mxu0  ;;  %7242 = vmatprep.subr.bf16.mxu1 %v10309_v11  ;;  %7248 = vmatprep.subr.bf16.mxu0 %v10309_v11  ;;  %v1150_v23 = vadd.f32 %v1149_v3, %v8514_v26 }
 0x29b   : > { %v1152_v10 = vadd.f32 %v1151_v6, %v8507_v16  ;;  %v1153_v12 = vpop.f32.mrb[14].mxu0 }
 0x29c   : > { %v1155_v19 = vpop.f32.mrb[15].mxu0  ;;  %v1154_v31 = vadd.f32 %v1153_v12, %v8514_v26  ;;  %v1193_v26 = vadd.f32 %v8545_v44, %v8529_v36  ;;  %v8189_v44 = vmov 1966171168  }
 0x29d   : > { %v8603_v22 = vpack.c.bf16 %v1152_v10, %v1152_v10  ;;  %v1156_v25 = vadd.f32 %v1155_v19, %v8507_v16  ;;  %v8624_v16 = vpack.c.bf16 %v1150_v23, %v1150_v23  ;;  %v1227_v47 = vunpack.c.l.s4 %v8189_v44 }
 0x29e   : > { %v8640_v32 = vpack.c.bf16 %v1154_v31, %v1154_v31  ;;  %v8650_v40 = vpack.c.bf16 %v1193_v26, %v1193_v26 }
 0x29f   : > { %7233 = vmatmul.mubr.msk.bf16.vlgmr.msra.gmra.mrb[16].mxu1 %vm1338_vm1, %v8599_v20  ;;  %7239 = vmatmul.mubr.msk.bf16.vlgmr.msra.gmra.mrb[20].mxu0 %vm1338_vm1, %v8601_v21  ;;  %v1619_v29 = vsel %vm1338_vm1, %v8603_v22, 0  ;;  %v8616_v33 = vpack.c.bf16 %v1156_v25, %v1156_v25  ;;  %v1228_v36 = vunpack.c.0.s8 %v1227_v47 }
 0x2a0   : > { %7243 = vmatpush3.bf16.xpose.msra.mxu1 %v1573_v28  ;;  %7249 = vmatpush3.bf16.xpose.msra.mxu0 %v1619_v29  ;;  %v1809_v45 = vsel %vm1807_vm2, %v8650_v40, 0 }
 0x2a1   : > { %7244 = vmatprep.mubr.msk.bf16.mxu1 %vm8188_vm0, %v10309_v11  ;;  %7250 = vmatprep.mubr.msk.bf16.mxu0 %vm8188_vm0, %v10309_v11  ;;  %v1665_v35 = vsel %vm1338_vm1, %v8616_v33, 0  ;;  %v1231_v48 = vsub.s32 %v1228_v36, %v8501_v13 }
 0x2a2   : > { %7254 = vmatprep.subr.bf16.mxu1 %v10309_v11  ;;  %7260 = vmatprep.subr.bf16.mxu0 %v10309_v11 }
 0x2a3   : > { %v1232_v51 = vrot.slane %v1223_v49, %v1231_v48  ;;  %v1239_v10 = vrot.slane %v1225_v1, %v1231_v48 }
 0x2a5   : > { %v1248_v53 = vrot.slane %v1232_v51, %v1231_v48  ;;  %v1240_v55 = vcombine.high %v1232_v51, %v1232_v51  ;;  %v1241_v49 = vcombine.high %v1239_v10, %v1239_v10 }
 0x2a7   : > { %7245 = vmatmul.mubr.msk.bf16.vlgmr.msra.gmra.mrb[20].mxu1 %vm1338_vm1, %v8626_v24  ;;  %7251 = vmatmul.mubr.msk.bf16.vlgmr.msra.gmra.mrb[24].mxu0 %vm1338_vm1, %v8624_v16  ;;  %v8663_v54 = vrot.slane %v1248_v53, %v8510_v18  ;;  %v1262_v62 = vrot.slane %v1240_v55, %v1231_v48  ;;  %v1270_v0 = vcombine.high %v1248_v53, %v1248_v53 }
 0x2a8   : > { %7255 = vmatpush3.bf16.xpose.msra.mxu1 %v1665_v35  ;;  %7256 = vmatprep.mubr.msk.bf16.mxu1 %vm8188_vm0, %v10309_v11  ;;  %v1255_v35 = vrot.slane %v1239_v10, %v1231_v48 }
 0x2a9   : > { %7266 = vmatprep.subr.bf16.mxu1 %v10309_v11  ;;  %7262 = vmatprep.mubr.msk.bf16.mxu0 %vm8188_vm0, %v10309_v11  ;;  %v8671_v6 = vrot.slane %v1262_v62, %v8510_v18  ;;  %v8674_v8 = vrot.slane %v1270_v0, %v8510_v18  ;;  %v1272_v30 = vcombine.high %v1262_v62, %v1262_v62 }
 0x2aa   : > { %7261 = vmatpush3.bf16.msra.mxu0 %v1809_v45  ;;  %v8690_v36 = vrot.slane %v1255_v35, %v8510_v18  ;;  %v1269_v0 = vrot.slane %v1241_v49, %v1231_v48  ;;  %v1271_v1 = vcombine.high %v1255_v35, %v1255_v35 }
 0x2ab   : > { %7272 = vmatprep.subr.bf16.mxu0 %v10309_v11  ;;  %v8687_v47 = vrot.slane %v1272_v30, %v8510_v18 }
 0x2ac   : > { %v8697_v10 = vrot.slane %v1269_v0, %v8510_v18 }
 0x2af   : > { %7257 = vmatmul.mubr.msk.bf16.vlgmr.msra.gmra.mrb[24].mxu1 %vm1338_vm1, %v8640_v32 }
 0x2b0   : > { %7268 = vmatprep.mubr.msk.bf16.mxu1 %vm8188_vm0, %v10309_v11  ;;  %7267 = vmatpush3.bf16.msra.mxu1 %v1855_v46 }
 0x2b1   : > { %7278 = vmatprep.subr.bf16.mxu1 %v10309_v11 }
 0x362   : > { %v1379_v59 = vpop.f32.mrb[8].mxu1 }
 0x363   : > { %v8666_v60 = vadd.f32 %v1379_v59, %v8663_v54  ;;  %v7216_v61 = vpop.f32.mrb[9].mxu1 }
 0x364   : > { %v1382_v2 = vpop.f32.mrb[10].mxu1 }
 0x365   : > { %v7217_v3 = vpop.f32.mrb[11].mxu1  ;;  %v1708_v5 = vsel %vm1707_vm3, %v8666_v60, -inf }
 0x366   : > { %1709 = vmax.xlane.f32.xlu0 %v1708_v5 }
 0x36a   : > { %v1425_v12 = vpop.f32.mrb[12].mxu1  ;;  %v1471_v19 = vpop.f32.mrb[16].mxu0 }
 0x36b   : > { %v8677_v25 = vadd.f32 %v1425_v12, %v8671_v6  ;;  %v8680_v23 = vadd.f32 %v1471_v19, %v8674_v8  ;;  %v7222_v28 = vpop.f32.mrb[13].mxu1  ;;  %v7228_v29 = vpop.f32.mrb[17].mxu0 }
 0x36c   : > { %v1428_v31 = vpop.f32.mrb[14].mxu1  ;;  %v1474_v26 = vpop.f32.mrb[18].mxu0  ;;  %v8700_v29 = vrot.slane %v1271_v1, %v8510_v18 }
 0x36d   : > { %v7223_v39 = vpop.f32.mrb[15].mxu1  ;;  %v7229_v45 = vpop.f32.mrb[19].mxu0  ;;  %v1714_v46 = vsel %vm1707_vm3, %v8680_v23, -inf  ;;  %v1711_v44 = vsel %vm1707_vm3, %v8677_v25, -inf }
 0x36e   : > { %1715 = vmax.xlane.f32.xlu1 %v1714_v46  ;;  %1712 = vmax.xlane.f32.xlu0 %v1711_v44  ;;  %v1273_v39 = vcombine.high %v1269_v0, %v1269_v0 }
 0x372   : > { %v1517_v51 = vpop.f32.mrb[16].mxu1  ;;  %v1563_v53 = vpop.f32.mrb[20].mxu0 }
 0x373   : > { %v1518_v55 = vadd.f32 %v1517_v51, %v8687_v47  ;;  %v1564_v59 = vadd.f32 %v1563_v53, %v8690_v36  ;;  %v7234_v61 = vpop.f32.mrb[17].mxu1  ;;  %v7240_v62 = vpop.f32.mrb[21].mxu0 }
 0x374   : > { %v1520_v2 = vpop.f32.mrb[18].mxu1  ;;  %v1566_v3 = vpop.f32.mrb[22].mxu0  ;;  %v8707_v62 = vrot.slane %v1273_v39, %v8510_v18 }
 0x375   : > { %v7235_v5 = vpop.f32.mrb[19].mxu1  ;;  %v1720_v12 = vsel %vm1707_vm3, %v1564_v59, -inf  ;;  %v1717_v19 = vsel %vm1707_vm3, %v1518_v55, -inf  ;;  %v7241_v28 = vpop.f32.mrb[23].mxu0 }
 0x376   : > { %1721 = vmax.xlane.f32.xlu0 %v1720_v12  ;;  %1718 = vmax.xlane.f32.xlu1 %v1717_v19 }
 0x37a   : > { %v1609_v30 = vpop.f32.mrb[20].mxu1  ;;  %v1655_v31 = vpop.f32.mrb[24].mxu0 }
 0x37b   : > { %v1610_v48 = vadd.f32 %v1609_v30, %v8697_v10  ;;  %v1656_v35 = vadd.f32 %v1655_v31, %v8700_v29  ;;  %v7246_v26 = vpop.f32.mrb[21].mxu1  ;;  %v7252_v45 = vpop.f32.mrb[25].mxu0 }
 0x37c   : > { %v1612_v46 = vpop.f32.mrb[22].mxu1  ;;  %v1658_v44 = vpop.f32.mrb[26].mxu0 }
 0x37d   : > { %v1726_v49 = vsel %vm1707_vm3, %v1656_v35, -inf  ;;  %v1723_v51 = vsel %vm1707_vm3, %v1610_v48, -inf  ;;  %v7247_v53 = vpop.f32.mrb[23].mxu1  ;;  %v7253_v61 = vpop.f32.mrb[27].mxu0 }
 0x37e   : > { %1727 = vmax.xlane.f32.xlu0 %v1726_v49  ;;  %1724 = vmax.xlane.f32.xlu1 %v1723_v51 }
 0x382   : > { %v1701_v1 = vpop.f32.mrb[24].mxu1 }
 0x383   : > { %v8710_v2 = vadd.f32 %v1701_v1, %v8707_v62  ;;  %v7258_v3 = vpop.f32.mrb[25].mxu1 }
 0x384   : > { %v1704_v0 = vpop.f32.mrb[26].mxu1 }
 0x385   : > { %v1729_v5 = vsel %vm1707_vm3, %v8710_v2, -inf  ;;  %v7259_v12 = vpop.f32.mrb[27].mxu1 }
 0x386   : > { %1730 = vmax.xlane.f32.xlu1 %v1729_v5 }
 0x3f3   : > { %v1710_v19 = vpop.xlane.xlu0 %1709 }
 0x3f4   : > { %v1732_v28 = vsub.f32 %v8666_v60, %v1710_v19 }
 0x3f6   : > { %v1740_v30 = vmul.f32 1.442695, %v1732_v28 }
 0x3f8   : > { %7898 = vpow2.f32 %v1740_v30 }
 0x3fb   : > { %v1716_v31 = vpop.xlane.xlu1 %1715  ;;  %v1713_v26 = vpop.xlane.xlu0 %1712 }
 0x3fc   : > { %v1734_v39 = vsub.f32 %v8680_v23, %v1716_v31  ;;  %v1733_v45 = vsub.f32 %v8677_v25, %v1713_v26 }
 0x3fe   : > { %v1744_v46 = vmul.f32 1.442695, %v1734_v39  ;;  %v1742_v44 = vmul.f32 1.442695, %v1733_v45 }
 0x400   : > { %7900 = vpow2.f32 %v1744_v46 }
 0x401   : > { %7902 = vpow2.f32 %v1742_v44 }
 0x402   : > { %v8717_v49 = vpop.eup %7898 }
 0x403   : > { %v1722_v51 = vpop.xlane.xlu0 %1721  ;;  %v1719_v53 = vpop.xlane.xlu1 %1718  ;;  %v1756_v61 = vsel %vm1707_vm3, %v8717_v49, 0.0 }
 0x404   : > { %v1736_v60 = vsub.f32 %v1564_v59, %v1722_v51  ;;  %v1735_v1 = vsub.f32 %v1518_v55, %v1719_v53  ;;  %1757 = vadd.xlane.f32.xlu0 %v1756_v61 }
 0x406   : > { %v1748_v3 = vmul.f32 1.442695, %v1736_v60  ;;  %v1746_v0 = vmul.f32 1.442695, %v1735_v1 }
 0x408   : > { %7904 = vpow2.f32 %v1748_v3 }
 0x409   : > { %7906 = vpow2.f32 %v1746_v0  ;;  %v8794_v0 = vpack.c.bf16 %v8554_v50, %v8554_v50 }
 0x40a   : > { %v8721_v23 = vpop.eup %7900 }
 0x40b   : > { %v8723_v25 = vpop.eup %7902  ;;  %v1728_v5 = vpop.xlane.xlu0 %1727  ;;  %v1762_v19 = vsel %vm1707_vm3, %v8721_v23, 0.0 }
 0x40c   : > { %v1725_v12 = vpop.xlane.xlu1 %1724  ;;  %v1738_v28 = vsub.f32 %v1656_v35, %v1728_v5  ;;  %1763 = vadd.xlane.f32.xlu0 %v1762_v19  ;;  %v1759_v55 = vsel %vm1707_vm3, %v8723_v25, 0.0 }
 0x40d   : > { %v1737_v30 = vsub.f32 %v1610_v48, %v1725_v12  ;;  %1760 = vadd.xlane.f32.xlu1 %v1759_v55 }
 0x40e   : > { %v1752_v59 = vmul.f32 1.442695, %v1738_v28 }
 0x40f   : > { %v1750_v31 = vmul.f32 1.442695, %v1737_v30 }
 0x410   : > { %7908 = vpow2.f32 %v1752_v59 }
 0x411   : > { %7910 = vpow2.f32 %v1750_v31 }
 0x412   : > { %v8729_v26 = vpop.eup %7904 }
 0x413   : > { %v8731_v39 = vpop.eup %7906  ;;  %v1768_v45 = vsel %vm1707_vm3, %v8729_v26, 0.0  ;;  %v1731_v53 = vpop.xlane.xlu1 %1730 }
 0x414   : > { %1769 = vadd.xlane.f32.xlu0 %v1768_v45  ;;  %v1765_v48 = vsel %vm1707_vm3, %v8731_v39, 0.0  ;;  %v1739_v61 = vsub.f32 %v8710_v2, %v1731_v53  ;;  %v8788_v2 = vpack.c.bf16 %v8543_v43, %v8543_v43 }
 0x415   : > { %1766 = vadd.xlane.f32.xlu1 %v1765_v48 }
 0x416   : > { %v1754_v60 = vmul.f32 1.442695, %v1739_v61  ;;  %v1901_v55 = vsel %vm1807_vm2, %v8788_v2, 0 }
 0x418   : > { %7912 = vpow2.f32 %v1754_v60 }
 0x41a   : > { %v8737_v35 = vpop.eup %7908 }
 0x41b   : > { %v8739_v46 = vpop.eup %7910  ;;  %v1774_v44 = vsel %vm1707_vm3, %v8737_v35, 0.0 }
 0x41c   : > { %1775 = vadd.xlane.f32.xlu0 %v1774_v44  ;;  %v1771_v51 = vsel %vm1707_vm3, %v8739_v46, 0.0 }
 0x41d   : > { %1772 = vadd.xlane.f32.xlu1 %v1771_v51 }
 0x422   : > { %v8766_v1 = vpop.eup %7912 }
 0x423   : > { %v1777_v3 = vsel %vm1707_vm3, %v8766_v1, 0.0 }
 0x42e   : > { %2229 = vrot.lane.b32.xlu1 %v8524_v34, %s8190_s18 }
 0x432   : > { %2174 = vrot.lane.b32.xlu1 %v8531_v37, %s8190_s18  ;;  %2177 = vrot.lane.b32.xlu0 %v8516_v27, %s8190_s18 }
 0x436   : > { %2281 = vrot.lane.b32.xlu0 %v8533_v38, %s8190_s18 }
 0x43a   : > { %2278 = vrot.lane.b32.xlu0 %v8563_v57, %s8190_s18 }
 0x43e   : > { %2385 = vrot.lane.b32.xlu0 %v8565_v58, %s8190_s18 }
 0x442   : > { %2382 = vrot.lane.b32.xlu0 %v8601_v21, %s8190_s18 }
 0x446   : > { %2489 = vrot.lane.b32.xlu0 %v8603_v22, %s8190_s18 }
 0x44a   : > { %2486 = vrot.lane.b32.xlu0 %v8624_v16, %s8190_s18 }
 0x44e   : > { %2686 = vrot.lane.b32.xlu0 %v8650_v40, %s8190_s18 }
 0x456   : > { %1778 = vadd.xlane.f32.xlu1 %v1777_v3 }
 0x467   : > { %2226 = vrot.lane.b32.xlu1 %v8561_v56, %s8190_s18 }
 0x46b   : > { %2333 = vrot.lane.b32.xlu1 %v8558_v52, %s8190_s18 }
 0x46f   : > { %2330 = vrot.lane.b32.xlu1 %v8599_v20, %s8190_s18 }
 0x473   : > { %2437 = vrot.lane.b32.xlu1 %v8593_v9, %s8190_s18 }
 0x477   : > { %2434 = vrot.lane.b32.xlu1 %v8626_v24, %s8190_s18 }
 0x47b   : > { %2541 = vrot.lane.b32.xlu1 %v8616_v33, %s8190_s18 }
 0x47f   : > { %2538 = vrot.lane.b32.xlu1 %v8640_v32, %s8190_s18 }
 0x483   : > { %2735 = vrot.lane.b32.xlu1 %v8652_v42, %s8190_s18 }
 0x487   : > { %2784 = vrot.lane.b32.xlu1 %v8788_v2, %s8190_s18 }
 0x48b   : > { %2833 = vrot.lane.b32.xlu1 %v8794_v0, %s8190_s18 }
 0x491   : > { %v1758_v5 = vpop.xlane.xlu0 %1757 }
 0x492   : > { %7914 = vrcp.f32 %v1758_v5  ;;  %v8824_v5 = vpack.c.bf16 %v8577_v63, %v8577_v63 }
 0x499   : > { %v1764_v12 = vpop.xlane.xlu0 %1763 }
 0x49a   : > { %7916 = vrcp.f32 %v1764_v12  ;;  %v1761_v19 = vpop.xlane.xlu1 %1760 }
 0x49b   : > { %7918 = vrcp.f32 %v1761_v19 }
 0x49c   : > { %v7915_v28 = vpop.eup %7914 }
 0x49d   : > { %v1788_v43 = vmul.f32 %v7915_v28, %v8717_v49  ;;  %v8807_v49 = vpack.c.bf16 %v8586_v4, %v8586_v4  ;;  %v1947_v4 = vsel %vm1807_vm2, %v8794_v0, 0  ;;  %v8830_v28 = vpack.c.bf16 %v8597_v15, %v8597_v15 }
 0x49f   : > { %v1796_v30 = vpack.c.bf16 %v1788_v43, %v1788_v43  ;;  %v1993_v61 = vsel %vm1807_vm2, %v8807_v49, 0  ;;  %v2039_v63 = vsel %vm1807_vm2, %v8830_v28, 0 }
 0x4a1   : > { %7263 = vmatmul.mubr.msk.bf16.vlgmr.msra.gmra.mrb[28].mxu0 %vm1707_vm3, %v1796_v30  ;;  %v1770_v50 = vpop.xlane.xlu0 %1769 }
 0x4a2   : > { %7273 = vmatpush3.bf16.msra.mxu0 %v1901_v55  ;;  %7920 = vrcp.f32 %v1770_v50  ;;  %v1767_v59 = vpop.xlane.xlu1 %1766  ;;  %7274 = vmatprep.mubr.msk.bf16.mxu0 %vm8188_vm0, %v10309_v11  ;;  %v2085_v50 = vsel %vm1807_vm2, %v8824_v5, 0 }
 0x4a3   : > { %7922 = vrcp.f32 %v1767_v59  ;;  %7284 = vmatprep.subr.bf16.mxu0 %v10309_v11 }
 0x4a4   : > { %v7917_v31 = vpop.eup %7916 }
 0x4a5   : > { %v7919_v45 = vpop.eup %7918  ;;  %v1790_v48 = vmul.f32 %v7917_v31, %v8721_v23  ;;  %v8848_v31 = vpack.c.bf16 %v8591_v7, %v8591_v7 }
 0x4a6   : > { %v1789_v44 = vmul.f32 %v7919_v45, %v8723_v25 }
 0x4a7   : > { %v1798_v51 = vpack.c.bf16 %v1790_v48, %v1790_v48 }
 0x4a8   : > { %v1797_v53 = vpack.c.bf16 %v1789_v44, %v1789_v44 }
 0x4a9   : > { %7275 = vmatmul.mubr.msk.bf16.vlgmr.msra.gmra.mrb[32].mxu0 %vm1707_vm3, %v1798_v51  ;;  %v1776_v60 = vpop.xlane.xlu0 %1775 }
 0x4aa   : > { %7285 = vmatpush3.bf16.msra.mxu0 %v1993_v61  ;;  %7924 = vrcp.f32 %v1776_v60  ;;  %7269 = vmatmul.mubr.msk.bf16.vlgmr.msra.gmra.mrb[28].mxu1 %vm1707_vm3, %v1797_v53  ;;  %v1773_v3 = vpop.xlane.xlu1 %1772 }
 0x4ab   : > { %7279 = vmatpush3.bf16.msra.mxu1 %v1947_v4  ;;  %7926 = vrcp.f32 %v1773_v3  ;;  %7280 = vmatprep.mubr.msk.bf16.mxu1 %vm8188_vm0, %v10309_v11 }
 0x4ac   : > { %v7921_v23 = vpop.eup %7920  ;;  %7286 = vmatprep.mubr.msk.bf16.mxu0 %vm8188_vm0, %v10309_v11  ;;  %7290 = vmatprep.subr.bf16.mxu1 %v10309_v11 }
 0x4ad   : > { %v7923_v25 = vpop.eup %7922  ;;  %v2178_v12 = vpop.permute.xlu0 %2177  ;;  %7296 = vmatprep.subr.bf16.mxu0 %v10309_v11  ;;  %v1792_v19 = vmul.f32 %v7921_v23, %v8729_v26 }
 0x4ae   : > { %v1791_v43 = vmul.f32 %v7923_v25, %v8731_v39  ;;  %v2183_v53 = vsel %vm1338_vm1, %v2178_v12, 0  ;;  %v2230_v61 = vpop.permute.xlu1 %2229 }
 0x4af   : > { %v1800_v30 = vpack.c.bf16 %v1792_v19, %v1792_v19 }
 0x4b0   : > { %v1799_v55 = vpack.c.bf16 %v1791_v43, %v1791_v43 }
 0x4b1   : > { %7287 = vmatmul.mubr.msk.bf16.vlgmr.msra.gmra.mrb[36].mxu0 %vm1707_vm3, %v1800_v30  ;;  %v2282_v26 = vpop.permute.xlu0 %2281 }
 0x4b2   : > { %7297 = vmatpush3.bf16.msra.mxu0 %v2085_v50  ;;  %7281 = vmatmul.mubr.msk.bf16.vlgmr.msra.gmra.mrb[32].mxu1 %vm1707_vm3, %v1799_v55  ;;  %v2287_v60 = vsel %vm1338_vm1, %v2282_v26, 0 }
 0x4b3   : > { %7291 = vmatpush3.bf16.msra.mxu1 %v2039_v63  ;;  %7292 = vmatprep.mubr.msk.bf16.mxu1 %vm8188_vm0, %v10309_v11 }
 0x4b4   : > { %v7925_v15 = vpop.eup %7924  ;;  %7298 = vmatprep.mubr.msk.bf16.mxu0 %vm8188_vm0, %v10309_v11  ;;  %7302 = vmatprep.subr.bf16.mxu1 %v10309_v11 }
 0x4b5   : > { %v7927_v39 = vpop.eup %7926  ;;  %v1794_v59 = vmul.f32 %v7925_v15, %v8737_v35  ;;  %7308 = vmatprep.subr.bf16.mxu0 %v10309_v11  ;;  %v2279_v51 = vpop.permute.xlu0 %2278  ;;  %v2131_v35 = vsel %vm1807_vm2, %v8848_v31, 0 }
 0x4b6   : > { %v1793_v45 = vmul.f32 %v7927_v39, %v8739_v46  ;;  %v2175_v46 = vpop.permute.xlu1 %2174 }
 0x4b7   : > { %v1802_v48 = vpack.c.bf16 %v1794_v59, %v1794_v59  ;;  %v2235_v59 = vsel %vm1338_vm1, %v2230_v61, 0 }
 0x4b8   : > { %v1801_v44 = vpack.c.bf16 %v1793_v45, %v1793_v45 }
 0x4b9   : > { %7299 = vmatmul.mubr.msk.bf16.vlgmr.msra.gmra.mrb[40].mxu0 %vm1707_vm3, %v1802_v48  ;;  %v2386_v7 = vpop.permute.xlu0 %2385 }
 0x4ba   : > { %7293 = vmatmul.mubr.msk.bf16.vlgmr.msra.gmra.mrb[36].mxu1 %vm1707_vm3, %v1801_v44  ;;  %7310 = vmatprep.mubr.msk.bf16.mxu0 %vm8188_vm0, %v10309_v11  ;;  %v2391_v3 = vsel %vm1338_vm1, %v2386_v7, 0 }
 0x4bb   : > { %7303 = vmatpush3.bf16.msra.mxu1 %v2131_v35  ;;  %7309 = vmatpush3.bf16.xpose.msra.mxu0 %v2183_v53 }
 0x4bc   : > { %7320 = vmatprep.subr.bf16.mxu0 %v10309_v11  ;;  %7304 = vmatprep.mubr.msk.bf16.mxu1 %vm8188_vm0, %v10309_v11 }
 0x4bd   : > { %7314 = vmatprep.subr.bf16.mxu1 %v10309_v11  ;;  %v2383_v4 = vpop.permute.xlu0 %2382 }
 0x4c1   : > { %v2490_v23 = vpop.permute.xlu0 %2489 }
 0x4c2   : > { %7311 = vmatmul.mubr.msk.bf16.vlgmr.msra.gmra.mrb[44].mxu0 %vm1338_vm1, %v2175_v46  ;;  %v2495_v12 = vsel %vm1338_vm1, %v2490_v23, 0 }
 0x4c3   : > { %7321 = vmatpush3.bf16.xpose.msra.mxu0 %v2287_v60  ;;  %7322 = vmatprep.mubr.msk.bf16.mxu0 %vm8188_vm0, %v10309_v11 }
 0x4c4   : > { %7332 = vmatprep.subr.bf16.mxu0 %v10309_v11 }
 0x4c5   : > { %v2487_v25 = vpop.permute.xlu0 %2486 }
 0x4c9   : > { %v2687_v19 = vpop.permute.xlu0 %2686 }
 0x4ca   : > { %7323 = vmatmul.mubr.msk.bf16.vlgmr.msra.gmra.mrb[48].mxu0 %vm1338_vm1, %v2279_v51  ;;  %v2692_v43 = vsel %vm1807_vm2, %v2687_v19, 0 }
 0x4cb   : > { %7333 = vmatpush3.bf16.xpose.msra.mxu0 %v2391_v3  ;;  %7334 = vmatprep.mubr.msk.bf16.mxu0 %vm8188_vm0, %v10309_v11 }
 0x4cc   : > { %7344 = vmatprep.subr.bf16.mxu0 %v10309_v11 }
 0x4d2   : > { %7335 = vmatmul.mubr.msk.bf16.vlgmr.msra.gmra.mrb[52].mxu0 %vm1338_vm1, %v2383_v4 }
 0x4d3   : > { %7345 = vmatpush3.bf16.xpose.msra.mxu0 %v2495_v12  ;;  %7346 = vmatprep.mubr.msk.bf16.mxu0 %vm8188_vm0, %v10309_v11 }
 0x4d4   : > { %7356 = vmatprep.subr.bf16.mxu0 %v10309_v11 }
 0x4da   : > { %7347 = vmatmul.mubr.msk.bf16.vlgmr.msra.gmra.mrb[56].mxu0 %vm1338_vm1, %v2487_v25 }
 0x4db   : > { %7357 = vmatpush3.bf16.msra.mxu0 %v2692_v43  ;;  %7358 = vmatprep.mubr.msk.bf16.mxu0 %vm8188_vm0, %v10309_v11 }
 0x4dc   : > { %7368 = vmatprep.subr.bf16.mxu0 %v10309_v11 }
 0x4e3   : > { %v1779_v30 = vpop.xlane.xlu1 %1778 }
 0x4e4   : > { %7928 = vrcp.f32 %v1779_v30 }
 0x4e7   : > { %v2227_v55 = vpop.permute.xlu1 %2226 }
 0x4eb   : > { %v2334_v50 = vpop.permute.xlu1 %2333 }
 0x4ec   : > { %v2339_v48 = vsel %vm1338_vm1, %v2334_v50, 0 }
 0x4ee   : > { %v7929_v63 = vpop.eup %7928 }
 0x4ef   : > { %v1795_v26 = vmul.f32 %v7929_v63, %v8766_v1  ;;  %v2331_v39 = vpop.permute.xlu1 %2330 }
 0x4f1   : > { %v1803_v15 = vpack.c.bf16 %v1795_v26, %v1795_v26 }
 0x4f3   : > { %7305 = vmatmul.mubr.msk.bf16.vlgmr.msra.gmra.mrb[40].mxu1 %vm1707_vm3, %v1803_v15  ;;  %v2438_v45 = vpop.permute.xlu1 %2437 }
 0x4f4   : > { %7315 = vmatpush3.bf16.xpose.msra.mxu1 %v2235_v59  ;;  %7316 = vmatprep.mubr.msk.bf16.mxu1 %vm8188_vm0, %v10309_v11  ;;  %v2443_v44 = vsel %vm1338_vm1, %v2438_v45, 0 }
 0x4f5   : > { %7326 = vmatprep.subr.bf16.mxu1 %v10309_v11 }
 0x4f7   : > { %v2435_v1 = vpop.permute.xlu1 %2434 }
 0x4fb   : > { %7317 = vmatmul.mubr.msk.bf16.vlgmr.msra.gmra.mrb[44].mxu1 %vm1338_vm1, %v2227_v55  ;;  %v2542_v51 = vpop.permute.xlu1 %2541 }
 0x4fc   : > { %7327 = vmatpush3.bf16.xpose.msra.mxu1 %v2339_v48  ;;  %7328 = vmatprep.mubr.msk.bf16.mxu1 %vm8188_vm0, %v10309_v11  ;;  %v2547_v35 = vsel %vm1338_vm1, %v2542_v51, 0 }
 0x4fd   : > { %7338 = vmatprep.subr.bf16.mxu1 %v10309_v11 }
 0x4ff   : > { %v2539_v53 = vpop.permute.xlu1 %2538 }
 0x503   : > { %7329 = vmatmul.mubr.msk.bf16.vlgmr.msra.gmra.mrb[48].mxu1 %vm1338_vm1, %v2331_v39  ;;  %v2736_v61 = vpop.permute.xlu1 %2735 }
 0x504   : > { %7339 = vmatpush3.bf16.xpose.msra.mxu1 %v2443_v44  ;;  %7340 = vmatprep.mubr.msk.bf16.mxu1 %vm8188_vm0, %v10309_v11  ;;  %v2741_v7 = vsel %vm1807_vm2, %v2736_v61, 0 }
 0x505   : > { %7350 = vmatprep.subr.bf16.mxu1 %v10309_v11 }
 0x50b   : > { %7341 = vmatmul.mubr.msk.bf16.vlgmr.msra.gmra.mrb[52].mxu1 %vm1338_vm1, %v2435_v1 }
 0x50c   : > { %7351 = vmatpush3.bf16.xpose.msra.mxu1 %v2547_v35  ;;  %7352 = vmatprep.mubr.msk.bf16.mxu1 %vm8188_vm0, %v10309_v11 }
 0x50d   : > { %7362 = vmatprep.subr.bf16.mxu1 %v10309_v11 }
 0x513   : > { %7353 = vmatmul.mubr.msk.bf16.vlgmr.msra.gmra.mrb[56].mxu1 %vm1338_vm1, %v2539_v53 }
 0x514   : > { %7363 = vmatpush3.bf16.msra.mxu1 %v2741_v7  ;;  %7364 = vmatprep.mubr.msk.bf16.mxu1 %vm8188_vm0, %v10309_v11 }
 0x515   : > { %7374 = vmatprep.subr.bf16.mxu1 %v10309_v11 }
 0x574   : > { %v8908_v46 = vpop.f32.mrb[28].mxu0 }
 0x575   : > { %10375 = vst [vmem:[#allocation18_spill] sm:$0xff] %v8908_v46  ;;  %v7264_v60 = vpop.f32.mrb[29].mxu0 }
 0x576   : > { %v1848_v4 = vpop.f32.mrb[30].mxu0 }
 0x577   : > { %v7265_v3 = vpop.f32.mrb[31].mxu0 }
 0x57c   : > { %v8910_v23 = vpop.f32.mrb[32].mxu0 }
 0x57d   : > { %10376 = vst [vmem:[#allocation19_spill] sm:$0xff] %v8910_v23  ;;  %v8912_v25 = vpop.f32.mrb[28].mxu1  ;;  %v7276_v12 = vpop.f32.mrb[33].mxu0 }
 0x57e   : > { %v7270_v19 = vpop.f32.mrb[29].mxu1  ;;  %v1940_v43 = vpop.f32.mrb[34].mxu0 }
 0x57f   : > { %v1894_v30 = vpop.f32.mrb[30].mxu1  ;;  %v7277_v55 = vpop.f32.mrb[35].mxu0 }
 0x580   : > { %v7271_v50 = vpop.f32.mrb[31].mxu1 }
 0x584   : > { %v8914_v63 = vpop.f32.mrb[36].mxu0 }
 0x585   : > { %10377 = vst [vmem:[#allocation20_spill] sm:$0xff] %v8914_v63  ;;  %v8916_v26 = vpop.f32.mrb[32].mxu1  ;;  %v7288_v15 = vpop.f32.mrb[37].mxu0 }
 0x586   : > { %10378 = vst [vmem:[#allocation21_spill] sm:$0xff] %v8916_v26  ;;  %v7282_v39 = vpop.f32.mrb[33].mxu1  ;;  %v2032_v59 = vpop.f32.mrb[38].mxu0 }
 0x587   : > { %v1986_v45 = vpop.f32.mrb[34].mxu1  ;;  %v7289_v48 = vpop.f32.mrb[39].mxu0 }
 0x588   : > { %v7283_v1 = vpop.f32.mrb[35].mxu1 }
 0x58c   : > { %v8918_v44 = vpop.f32.mrb[40].mxu0 }
 0x58d   : > { %10379 = vst [vmem:[#allocation22_spill] sm:$0xff] %v8918_v44  ;;  %v8920_v51 = vpop.f32.mrb[36].mxu1  ;;  %v7300_v53 = vpop.f32.mrb[41].mxu0 }
 0x58e   : > { %10380 = vst [vmem:[#allocation23_spill] sm:$0xff] %v8920_v51  ;;  %v7294_v35 = vpop.f32.mrb[37].mxu1  ;;  %v2124_v61 = vpop.f32.mrb[42].mxu0 }
 0x58f   : > { %v2078_v7 = vpop.f32.mrb[38].mxu1  ;;  %v7301_v60 = vpop.f32.mrb[43].mxu0 }
 0x590   : > { %v7295_v4 = vpop.f32.mrb[39].mxu1 }
 0x595   : > { %v2219_v3 = vpop.f32.mrb[44].mxu0 }
 0x596   : > { %v8923_v12 = vadd.f32 %v2219_v3, %v8663_v54  ;;  %v7312_v19 = vpop.f32.mrb[45].mxu0 }
 0x597   : > { %v2222_v43 = vpop.f32.mrb[46].mxu0 }
 0x598   : > { %v7313_v30 = vpop.f32.mrb[47].mxu0  ;;  %v2589_v55 = vsel %vm1707_vm3, %v8923_v12, -inf }
 0x599   : > { %2590 = vmax.xlane.f32.xlu0 %v2589_v55 }
 0x59d   : > { %v2323_v50 = vpop.f32.mrb[48].mxu0 }
 0x59e   : > { %v2324_v15 = vadd.f32 %v2323_v50, %v8674_v8  ;;  %v7324_v39 = vpop.f32.mrb[49].mxu0 }
 0x59f   : > { %v2326_v59 = vpop.f32.mrb[50].mxu0 }
 0x5a0   : > { %v7325_v45 = vpop.f32.mrb[51].mxu0  ;;  %v2595_v48 = vsel %vm1707_vm3, %v2324_v15, -inf }
 0x5a1   : > { %2596 = vmax.xlane.f32.xlu0 %v2595_v48 }
 0x5a5   : > { %v2427_v1 = vpop.f32.mrb[52].mxu0 }
 0x5a6   : > { %v7336_v53 = vpop.f32.mrb[53].mxu0 }
 0x5a7   : > { %v2430_v35 = vpop.f32.mrb[54].mxu0 }
 0x5a8   : > { %v7337_v61 = vpop.f32.mrb[55].mxu0 }
 0x5ad   : > { %v2531_v7 = vpop.f32.mrb[56].mxu0 }
 0x5ae   : > { %v7348_v60 = vpop.f32.mrb[57].mxu0 }
 0x5af   : > { %v2534_v4 = vpop.f32.mrb[58].mxu0 }
 0x5b0   : > { %v7349_v3 = vpop.f32.mrb[59].mxu0  ;;  %v2428_v4 = vadd.f32 %v2427_v1, %v8690_v36 }
 0x5c6   : > { %v8929_v19 = vpop.f32.mrb[40].mxu1 }
 0x5c7   : > { %10381 = vst [vmem:[#allocation24_spill] sm:$0xff] %v8929_v19  ;;  %v7306_v43 = vpop.f32.mrb[41].mxu1 }
 0x5c8   : > { %v2170_v30 = vpop.f32.mrb[42].mxu1 }
 0x5c9   : > { %v7307_v55 = vpop.f32.mrb[43].mxu1  ;;  %v8937_v30 = vadd.f32 %v2531_v7, %v8700_v29 }
 0x5ca   : > { %v2601_v55 = vsel %vm1707_vm3, %v2428_v4, -inf }
 0x5ce   : > { %v2271_v50 = vpop.f32.mrb[44].mxu1 }
 0x5cf   : > { %v2272_v39 = vadd.f32 %v2271_v50, %v8671_v6  ;;  %v7318_v59 = vpop.f32.mrb[45].mxu1 }
 0x5d0   : > { %v2274_v45 = vpop.f32.mrb[46].mxu1 }
 0x5d1   : > { %v7319_v14 = vpop.f32.mrb[47].mxu1  ;;  %v2592_v48 = vsel %vm1707_vm3, %v2272_v39, -inf }
 0x5d2   : > { %2593 = vmax.xlane.f32.xlu1 %v2592_v48 }
 0x5d6   : > { %v2375_v53 = vpop.f32.mrb[48].mxu1 }
 0x5d7   : > { %v2376_v35 = vadd.f32 %v2375_v53, %v8687_v47  ;;  %v7330_v61 = vpop.f32.mrb[49].mxu1  ;;  %v2607_v53 = vsel %vm1707_vm3, %v8937_v30, -inf }
 0x5d8   : > { %v2378_v60 = vpop.f32.mrb[50].mxu1 }
 0x5d9   : > { %v7331_v3 = vpop.f32.mrb[51].mxu1  ;;  %v2598_v43 = vsel %vm1707_vm3, %v2376_v35, -inf }
 0x5da   : > { %2599 = vmax.xlane.f32.xlu0 %v2598_v43 }
 0x5de   : > { %2602 = vmax.xlane.f32.xlu0 %v2601_v55  ;;  %v2479_v14 = vpop.f32.mrb[52].mxu1 }
 0x5df   : > { %v2480_v50 = vadd.f32 %v2479_v14, %v8697_v10  ;;  %v7342_v59 = vpop.f32.mrb[53].mxu1 }
 0x5e0   : > { %v2482_v45 = vpop.f32.mrb[54].mxu1 }
 0x5e1   : > { %v7343_v48 = vpop.f32.mrb[55].mxu1  ;;  %v2604_v1 = vsel %vm1707_vm3, %v2480_v50, -inf }
 0x5e2   : > { %2608 = vmax.xlane.f32.xlu0 %v2607_v53  ;;  %2605 = vmax.xlane.f32.xlu1 %v2604_v1 }
 0x5e6   : > { %v2583_v61 = vpop.f32.mrb[56].mxu1 }
 0x5e7   : > { %v7354_v60 = vpop.f32.mrb[57].mxu1  ;;  %v8949_v43 = vadd.f32 %v2583_v61, %v8707_v62 }
 0x5e8   : > { %v2586_v7 = vpop.f32.mrb[58].mxu1 }
 0x5e9   : > { %v7355_v3 = vpop.f32.mrb[59].mxu1  ;;  %v2610_v55 = vsel %vm1707_vm3, %v8949_v43, -inf }
 0x5f3   : > { %2931 = vrot.lane.b32.xlu1 %v8830_v28, %s8190_s18 }
 0x5f8   : > { %2882 = vrot.lane.b32.xlu0 %v8807_v49, %s8190_s18 }
 0x617   : > { %2611 = vmax.xlane.f32.xlu1 %v2610_v55  ;;  %v2785_v55 = vpop.permute.xlu1 %2784 }
 0x61b   : > { %v8959_v17 = vpop.permute.xlu1 %2833 }
 0x626   : > { %v2591_v14 = vpop.xlane.xlu0 %2590 }
 0x627   : > { %v2613_v59 = vsub.f32 %v8923_v12, %v2591_v14 }
 0x629   : > { %v2621_v45 = vmul.f32 1.442695, %v2613_v59 }
 0x62b   : > { %7930 = vpow2.f32 %v2621_v45 }
 0x62e   : > { %v2597_v48 = vpop.xlane.xlu0 %2596 }
 0x62f   : > { %v2615_v53 = vsub.f32 %v2324_v15, %v2597_v48 }
 0x631   : > { %v2625_v1 = vmul.f32 1.442695, %v2615_v53 }
 0x633   : > { %7932 = vpow2.f32 %v2625_v1 }
 0x635   : > { %v7931_v60 = vpop.eup %7930 }
 0x636   : > { %v2637_v7 = vsel %vm1707_vm3, %v7931_v60, 0.0 }
 0x637   : > { %2638 = vadd.xlane.f32.xlu0 %v2637_v7 }
 0x63d   : > { %v8955_v3 = vpop.eup %7932 }
 0x63e   : > { %v2643_v61 = vsel %vm1707_vm3, %v8955_v3, 0.0 }
 0x63f   : > { %2644 = vadd.xlane.f32.xlu0 %v2643_v61 }
 0x65f   : > { %v2594_v12 = vpop.xlane.xlu1 %2593 }
 0x660   : > { %v2614_v14 = vsub.f32 %v2272_v39, %v2594_v12 }
 0x662   : > { %v2623_v59 = vmul.f32 1.442695, %v2614_v14 }
 0x664   : > { %7934 = vpow2.f32 %v2623_v59 }
 0x667   : > { %v2600_v15 = vpop.xlane.xlu0 %2599 }
 0x668   : > { %v2616_v45 = vsub.f32 %v2376_v35, %v2600_v15 }
 0x66a   : > { %v2627_v48 = vmul.f32 1.442695, %v2616_v45 }
 0x66b   : > { %v2603_v53 = vpop.xlane.xlu0 %2602 }
 0x66c   : > { %7936 = vpow2.f32 %v2627_v48  ;;  %v2617_v1 = vsub.f32 %v2428_v4, %v2603_v53 }
 0x66e   : > { %v8961_v7 = vpop.eup %7934  ;;  %v2629_v41 = vmul.f32 1.442695, %v2617_v1 }
 0x66f   : > { %v2640_v11 = vsel %vm1707_vm3, %v8961_v7, 0.0  ;;  %v2609_v4 = vpop.xlane.xlu0 %2608 }
 0x670   : > { %7938 = vpow2.f32 %v2629_v41  ;;  %2641 = vadd.xlane.f32.xlu1 %v2640_v11  ;;  %v2606_v41 = vpop.xlane.xlu1 %2605  ;;  %v2619_v14 = vsub.f32 %v8937_v30, %v2609_v4 }
 0x671   : > { %v2618_v11 = vsub.f32 %v2480_v50, %v2606_v41 }
 0x672   : > { %v2633_v15 = vmul.f32 1.442695, %v2619_v14 }
 0x673   : > { %v2631_v59 = vmul.f32 1.442695, %v2618_v11  ;;  %v2883_v30 = vpop.permute.xlu0 %2882 }
 0x675   : > { %7940 = vpow2.f32 %v2631_v59 }
 0x676   : > { %v8965_v61 = vpop.eup %7936  ;;  %7942 = vpow2.f32 %v2633_v15 }
 0x677   : > { %v2646_v39 = vsel %vm1707_vm3, %v8965_v61, 0.0 }
 0x678   : > { %2647 = vadd.xlane.f32.xlu1 %v2646_v39  ;;  %v8988_v39 = vpop.permute.xlu1 %2931 }
 0x67a   : > { %v8969_v12 = vpop.eup %7938 }
 0x67b   : > { %v2649_v35 = vsel %vm1707_vm3, %v8969_v12, 0.0 }
 0x67c   : > { %2650 = vadd.xlane.f32.xlu0 %v2649_v35 }
 0x67f   : > { %v8978_v45 = vpop.eup %7940 }
 0x680   : > { %v2652_v48 = vsel %vm1707_vm3, %v8978_v45, 0.0  ;;  %v8982_v53 = vpop.eup %7942 }
 0x681   : > { %v2655_v1 = vsel %vm1707_vm3, %v8982_v53, 0.0 }
 0x689   : > { %3029 = vrot.lane.b32.xlu1 %v8848_v31, %s8190_s18 }
 0x692   : > { %2980 = vrot.lane.b32.xlu0 %v8824_v5, %s8190_s18 }
 0x6a4   : > { %v2612_v35 = vpop.xlane.xlu1 %2611 }
 0x6a5   : > { %v2620_v41 = vsub.f32 %v8949_v43, %v2612_v35 }
 0x6a7   : > { %v2635_v14 = vmul.f32 1.442695, %v2620_v41 }
 0x6ad   : > { %2653 = vadd.xlane.f32.xlu1 %v2652_v48  ;;  %v2790_v48 = vsel %vm1807_vm2, %v2785_v55, 0  ;;  %v2888_v55 = vsel %vm1807_vm2, %v2883_v30, 0 }
 0x6b1   : > { %2656 = vadd.xlane.f32.xlu0 %v2655_v1  ;;  %v10382_v1 = vmov 0.0  }
 0x6be   : > { %3129 = vrot.lane.b32.xlu1 %v8524_v34, %s8191_s29 }
 0x6c4   : > { %v2639_v50 = vpop.xlane.xlu0 %2638 }
 0x6c5   : > { %7944 = vrcp.f32 %v2639_v50 }
 0x6c7   : > { %3079 = vrot.lane.b32.xlu0 %v8516_v27, %s8191_s29 }
 0x6cb   : > { %3077 = vrot.lane.b32.xlu0 %v8531_v37, %s8191_s29 }
 0x6cc   : > { %v2645_v11 = vpop.xlane.xlu0 %2644 }
 0x6cd   : > { %7946 = vrcp.f32 %v2645_v11 }
 0x6ce   : > { %7948 = vpow2.f32 %v2635_v14 }
 0x6cf   : > { %v7945_v4 = vpop.eup %7944  ;;  %3179 = vrot.lane.b32.xlu0 %v8533_v38, %s8191_s29 }
 0x6d0   : > { %v2669_v59 = vmul.f32 %v7945_v4, %v7931_v60 }
 0x6d2   : > { %v2677_v15 = vpack.c.bf16 %v2669_v59, %v2669_v59 }
 0x6d3   : > { %3177 = vrot.lane.b32.xlu0 %v8563_v57, %s8191_s29 }
 0x6d4   : > { %7359 = vmatmul.mubr.msk.bf16.vlgmr.msra.gmra.mrb[60].mxu0 %vm1707_vm3, %v2677_v15  ;;  %v2839_v15 = vsel %vm1807_vm2, %v8959_v17, 0  ;;  %v2937_v17 = vsel %vm1807_vm2, %v8988_v39, 0 }
 0x6d5   : > { %7369 = vmatpush3.bf16.msra.mxu0 %v2790_v48  ;;  %7370 = vmatprep.mubr.msk.bf16.mxu0 %vm8188_vm0, %v10382_v1 }
 0x6d6   : > { %7380 = vmatprep.subr.bf16.mxu0 %v10382_v1 }
 0x6d7   : > { %v7947_v43 = vpop.eup %7946  ;;  %3279 = vrot.lane.b32.xlu0 %v8565_v58, %s8191_s29 }
 0x6d8   : > { %v2671_v60 = vmul.f32 %v7947_v43, %v8955_v3  ;;  %v9013_v35 = vpop.eup %7948 }
 0x6d9   : > { %v2658_v3 = vsel %vm1707_vm3, %v9013_v35, 0.0 }
 0x6da   : > { %v2679_v50 = vpack.c.bf16 %v2671_v60, %v2671_v60 }
 0x6db   : > { %3277 = vrot.lane.b32.xlu0 %v8601_v21, %s8191_s29 }
 0x6dc   : > { %7371 = vmatmul.mubr.msk.bf16.vlgmr.msra.gmra.mrb[64].mxu0 %vm1707_vm3, %v2679_v50 }
 0x6dd   : > { %7381 = vmatpush3.bf16.msra.mxu0 %v2888_v55  ;;  %7382 = vmatprep.mubr.msk.bf16.mxu0 %vm8188_vm0, %v10382_v1 }
 0x6de   : > { %7392 = vmatprep.subr.bf16.mxu0 %v10382_v1 }
 0x6df   : > { %3379 = vrot.lane.b32.xlu0 %v8603_v22, %s8191_s29 }
 0x6e2   : > { %2659 = vadd.xlane.f32.xlu1 %v2658_v3 }
 0x6e3   : > { %3377 = vrot.lane.b32.xlu0 %v8624_v16, %s8191_s29 }
 0x6e7   : > { %3573 = vrot.lane.b32.xlu0 %v8650_v40, %s8191_s29 }
 0x6f3   : > { %3127 = vrot.lane.b32.xlu1 %v8561_v56, %s8191_s29 }
 0x6f7   : > { %3229 = vrot.lane.b32.xlu1 %v8558_v52, %s8191_s29 }
 0x6fb   : > { %3227 = vrot.lane.b32.xlu1 %v8599_v20, %s8191_s29 }
 0x6fd   : > { %v2642_v30 = vpop.xlane.xlu1 %2641 }
 0x6fe   : > { %7950 = vrcp.f32 %v2642_v30 }
 0x6ff   : > { %3329 = vrot.lane.b32.xlu1 %v8593_v9, %s8191_s29 }
 0x703   : > { %3327 = vrot.lane.b32.xlu1 %v8626_v24, %s8191_s29 }
 0x705   : > { %v2648_v41 = vpop.xlane.xlu1 %2647 }
 0x706   : > { %7952 = vrcp.f32 %v2648_v41 }
 0x707   : > { %3429 = vrot.lane.b32.xlu1 %v8616_v33, %s8191_s29 }
 0x708   : > { %v7951_v11 = vpop.eup %7950 }
 0x709   : > { %v2651_v4 = vpop.xlane.xlu0 %2650  ;;  %v2670_v14 = vmul.f32 %v7951_v11, %v8961_v7 }
 0x70a   : > { %7954 = vrcp.f32 %v2651_v4 }
 0x70b   : > { %3427 = vrot.lane.b32.xlu1 %v8640_v32, %s8191_s29  ;;  %v2678_v59 = vpack.c.bf16 %v2670_v14, %v2670_v14 }
 0x70d   : > { %7365 = vmatmul.mubr.msk.bf16.vlgmr.msra.gmra.mrb[60].mxu1 %vm1707_vm3, %v2678_v59  ;;  %v2981_v55 = vpop.permute.xlu0 %2980 }
 0x70e   : > { %7375 = vmatpush3.bf16.msra.mxu1 %v2839_v15  ;;  %7376 = vmatprep.mubr.msk.bf16.mxu1 %vm8188_vm0, %v10382_v1  ;;  %v2986_v3 = vsel %vm1807_vm2, %v2981_v55, 0 }
 0x70f   : > { %3621 = vrot.lane.b32.xlu1 %v8652_v42, %s8191_s29  ;;  %7386 = vmatprep.subr.bf16.mxu1 %v10382_v1 }
 0x710   : > { %v7953_v7 = vpop.eup %7952 }
 0x711   : > { %v2672_v48 = vmul.f32 %v7953_v7, %v8965_v61 }
 0x713   : > { %3669 = vrot.lane.b32.xlu1 %v8788_v2, %s8191_s29  ;;  %v2680_v43 = vpack.c.bf16 %v2672_v48, %v2672_v48 }
 0x714   : > { %v7955_v60 = vpop.eup %7954 }
 0x715   : > { %7377 = vmatmul.mubr.msk.bf16.vlgmr.msra.gmra.mrb[64].mxu1 %vm1707_vm3, %v2680_v43  ;;  %v2673_v50 = vmul.f32 %v7955_v60, %v8969_v12  ;;  %v3030_v12 = vpop.permute.xlu1 %3029 }
 0x716   : > { %7387 = vmatpush3.bf16.msra.mxu1 %v2937_v17  ;;  %7388 = vmatprep.mubr.msk.bf16.mxu1 %vm8188_vm0, %v10382_v1  ;;  %v3035_v7 = vsel %vm1807_vm2, %v3030_v12, 0 }
 0x717   : > { %3717 = vrot.lane.b32.xlu1 %v8794_v0, %s8191_s29  ;;  %v2681_v61 = vpack.c.bf16 %v2673_v50, %v2673_v50  ;;  %7398 = vmatprep.subr.bf16.mxu1 %v10382_v1 }
 0x719   : > { %7383 = vmatmul.mubr.msk.bf16.vlgmr.msra.gmra.mrb[68].mxu0 %vm1707_vm3, %v2681_v61 }
 0x71a   : > { %7393 = vmatpush3.bf16.msra.mxu0 %v2986_v3  ;;  %7394 = vmatprep.mubr.msk.bf16.mxu0 %vm8188_vm0, %v10382_v1 }
 0x71b   : > { %7404 = vmatprep.subr.bf16.mxu0 %v10382_v1 }
 0x73a   : > { %v2654_v39 = vpop.xlane.xlu1 %2653 }
 0x73b   : > { %7956 = vrcp.f32 %v2654_v39 }
 0x73e   : > { %v2657_v30 = vpop.xlane.xlu0 %2656 }
 0x73f   : > { %7958 = vrcp.f32 %v2657_v30  ;;  %v3130_v30 = vpop.permute.xlu1 %3129 }
 0x742   : > { %v3080_v41 = vpop.permute.xlu0 %3079 }
 0x743   : > { %v3085_v17 = vsel %vm1338_vm1, %v3080_v41, 0 }
 0x745   : > { %v7957_v11 = vpop.eup %7956 }
 0x746   : > { %v3078_v4 = vpop.permute.xlu0 %3077  ;;  %v2674_v14 = vmul.f32 %v7957_v11, %v8978_v45 }
 0x748   : > { %v2682_v59 = vpack.c.bf16 %v2674_v14, %v2674_v14 }
 0x749   : > { %v7959_v15 = vpop.eup %7958 }
 0x74a   : > { %v3180_v48 = vpop.permute.xlu0 %3179  ;;  %7389 = vmatmul.mubr.msk.bf16.vlgmr.msra.gmra.mrb[68].mxu1 %vm1707_vm3, %v2682_v59  ;;  %v2675_v43 = vmul.f32 %v7959_v15, %v8982_v53 }
 0x74b   : > { %7399 = vmatpush3.bf16.msra.mxu1 %v3035_v7  ;;  %7400 = vmatprep.mubr.msk.bf16.mxu1 %vm8188_vm0, %v10382_v1  ;;  %v3185_v53 = vsel %vm1338_vm1, %v3180_v48, 0 }
 0x74c   : > { %v2683_v60 = vpack.c.bf16 %v2675_v43, %v2675_v43  ;;  %7410 = vmatprep.subr.bf16.mxu1 %v10382_v1 }
 0x74e   : > { %7395 = vmatmul.mubr.msk.bf16.vlgmr.msra.gmra.mrb[72].mxu0 %vm1707_vm3, %v2683_v60  ;;  %v3178_v45 = vpop.permute.xlu0 %3177  ;;  %v3135_v60 = vsel %vm1338_vm1, %v3130_v30, 0 }
 0x74f   : > { %7405 = vmatpush3.bf16.xpose.msra.mxu0 %v3085_v17  ;;  %7406 = vmatprep.mubr.msk.bf16.mxu0 %vm8188_vm0, %v10382_v1 }
 0x750   : > { %7416 = vmatprep.subr.bf16.mxu0 %v10382_v1 }
 0x752   : > { %v3280_v50 = vpop.permute.xlu0 %3279 }
 0x753   : > { %v3285_v61 = vsel %vm1338_vm1, %v3280_v50, 0 }
 0x756   : > { %7407 = vmatmul.mubr.msk.bf16.vlgmr.msra.gmra.mrb[76].mxu0 %vm1338_vm1, %v3078_v4  ;;  %v3278_v55 = vpop.permute.xlu0 %3277 }
 0x757   : > { %7417 = vmatpush3.bf16.xpose.msra.mxu0 %v3185_v53  ;;  %7418 = vmatprep.mubr.msk.bf16.mxu0 %vm8188_vm0, %v10382_v1 }
 0x758   : > { %7428 = vmatprep.subr.bf16.mxu0 %v10382_v1 }
 0x75a   : > { %v3380_v3 = vpop.permute.xlu0 %3379 }
 0x75b   : > { %v3385_v39 = vsel %vm1338_vm1, %v3380_v3, 0 }
 0x75e   : > { %7419 = vmatmul.mubr.msk.bf16.vlgmr.msra.gmra.mrb[80].mxu0 %vm1338_vm1, %v3178_v45  ;;  %v3378_v12 = vpop.permute.xlu0 %3377 }
 0x75f   : > { %7429 = vmatpush3.bf16.xpose.msra.mxu0 %v3285_v61  ;;  %7430 = vmatprep.mubr.msk.bf16.mxu0 %vm8188_vm0, %v10382_v1 }
 0x760   : > { %7440 = vmatprep.subr.bf16.mxu0 %v10382_v1 }
 0x762   : > { %v3574_v41 = vpop.permute.xlu0 %3573 }
 0x763   : > { %v3579_v11 = vsel %vm1807_vm2, %v3574_v41, 0 }
 0x766   : > { %7431 = vmatmul.mubr.msk.bf16.vlgmr.msra.gmra.mrb[84].mxu0 %vm1338_vm1, %v3278_v55 }
 0x767   : > { %7441 = vmatpush3.bf16.xpose.msra.mxu0 %v3385_v39  ;;  %7442 = vmatprep.mubr.msk.bf16.mxu0 %vm8188_vm0, %v10382_v1 }
 0x768   : > { %7452 = vmatprep.subr.bf16.mxu0 %v10382_v1 }
 0x76e   : > { %7443 = vmatmul.mubr.msk.bf16.vlgmr.msra.gmra.mrb[88].mxu0 %vm1338_vm1, %v3378_v12 }
 0x76f   : > { %7453 = vmatpush3.bf16.msra.mxu0 %v3579_v11  ;;  %v2660_v4 = vpop.xlane.xlu1 %2659  ;;  %7454 = vmatprep.mubr.msk.bf16.mxu0 %vm8188_vm0, %v10382_v1 }
 0x770   : > { %7960 = vrcp.f32 %v2660_v4  ;;  %7464 = vmatprep.subr.bf16.mxu0 %v10382_v1 }
 0x773   : > { %v3128_v14 = vpop.permute.xlu1 %3127 }
 0x777   : > { %v3230_v59 = vpop.permute.xlu1 %3229 }
 0x778   : > { %v3235_v45 = vsel %vm1338_vm1, %v3230_v59, 0 }
 0x77a   : > { %v7961_v15 = vpop.eup %7960 }
 0x77b   : > { %v2676_v7 = vmul.f32 %v7961_v15, %v9013_v35  ;;  %v3228_v43 = vpop.permute.xlu1 %3227 }
 0x77d   : > { %v2684_v48 = vpack.c.bf16 %v2676_v7, %v2676_v7 }
 0x77f   : > { %7401 = vmatmul.mubr.msk.bf16.vlgmr.msra.gmra.mrb[72].mxu1 %vm1707_vm3, %v2684_v48  ;;  %v3330_v17 = vpop.permute.xlu1 %3329 }
 0x780   : > { %7411 = vmatpush3.bf16.xpose.msra.mxu1 %v3135_v60  ;;  %7412 = vmatprep.mubr.msk.bf16.mxu1 %vm8188_vm0, %v10382_v1  ;;  %v3335_v50 = vsel %vm1338_vm1, %v3330_v17, 0 }
 0x781   : > { %7422 = vmatprep.subr.bf16.mxu1 %v10382_v1 }
 0x783   : > { %v3328_v35 = vpop.permute.xlu1 %3327 }
 0x787   : > { %7413 = vmatmul.mubr.msk.bf16.vlgmr.msra.gmra.mrb[76].mxu1 %vm1338_vm1, %v3128_v14  ;;  %v3430_v53 = vpop.permute.xlu1 %3429 }
 0x788   : > { %7423 = vmatpush3.bf16.xpose.msra.mxu1 %v3235_v45  ;;  %7424 = vmatprep.mubr.msk.bf16.mxu1 %vm8188_vm0, %v10382_v1  ;;  %v3435_v61 = vsel %vm1338_vm1, %v3430_v53, 0 }
 0x789   : > { %7434 = vmatprep.subr.bf16.mxu1 %v10382_v1 }
 0x78b   : > { %v3428_v55 = vpop.permute.xlu1 %3427 }
 0x78f   : > { %7425 = vmatmul.mubr.msk.bf16.vlgmr.msra.gmra.mrb[80].mxu1 %vm1338_vm1, %v3228_v43  ;;  %v3622_v3 = vpop.permute.xlu1 %3621 }
 0x790   : > { %7435 = vmatpush3.bf16.xpose.msra.mxu1 %v3335_v50  ;;  %7436 = vmatprep.mubr.msk.bf16.mxu1 %vm8188_vm0, %v10382_v1  ;;  %v3627_v12 = vsel %vm1807_vm2, %v3622_v3, 0 }
 0x791   : > { %7446 = vmatprep.subr.bf16.mxu1 %v10382_v1 }
 0x797   : > { %7437 = vmatmul.mubr.msk.bf16.vlgmr.msra.gmra.mrb[84].mxu1 %vm1338_vm1, %v3328_v35 }
 0x798   : > { %7447 = vmatpush3.bf16.xpose.msra.mxu1 %v3435_v61  ;;  %7448 = vmatprep.mubr.msk.bf16.mxu1 %vm8188_vm0, %v10382_v1 }
 0x799   : > { %7458 = vmatprep.subr.bf16.mxu1 %v10382_v1 }
 0x79f   : > { %7449 = vmatmul.mubr.msk.bf16.vlgmr.msra.gmra.mrb[88].mxu1 %vm1338_vm1, %v3428_v55 }
 0x7a0   : > { %7459 = vmatpush3.bf16.msra.mxu1 %v3627_v12  ;;  %7460 = vmatprep.mubr.msk.bf16.mxu1 %vm8188_vm0, %v10382_v1 }
 0x7a1   : > { %7470 = vmatprep.subr.bf16.mxu1 %v10382_v1 }
 0x7a7   : > { %v9122_v39 = vpop.f32.mrb[60].mxu0 }
 0x7a8   : > { %v7360_v30 = vpop.f32.mrb[61].mxu0 }
 0x7a9   : > { %v2731_v41 = vpop.f32.mrb[62].mxu0 }
 0x7aa   : > { %v7361_v11 = vpop.f32.mrb[63].mxu0 }
 0x7af   : > { %v9124_v4 = vpop.f32.mrb[64].mxu0 }
 0x7b0   : > { %v7372_v14 = vpop.f32.mrb[65].mxu0 }
 0x7b1   : > { %v2829_v59 = vpop.f32.mrb[66].mxu0 }
 0x7b2   : > { %v7373_v15 = vpop.f32.mrb[67].mxu0 }
 0x7e0   : > { %v9126_v7 = vpop.f32.mrb[60].mxu1 }
 0x7e1   : > { %v7366_v43 = vpop.f32.mrb[61].mxu1 }
 0x7e2   : > { %v2780_v60 = vpop.f32.mrb[62].mxu1 }
 0x7e3   : > { %v7367_v17 = vpop.f32.mrb[63].mxu1 }
 0x7e8   : > { %v9130_v45 = vpop.f32.mrb[64].mxu1 }
 0x7e9   : > { %v7378_v50 = vpop.f32.mrb[65].mxu1 }
 0x7ea   : > { %v2878_v53 = vpop.f32.mrb[66].mxu1 }
 0x7eb   : > { %v7379_v55 = vpop.f32.mrb[67].mxu1 }
 0x7ec   : > { %v9134_v61 = vpop.f32.mrb[68].mxu0 }
 0x7ed   : > { %v7384_v3 = vpop.f32.mrb[69].mxu0 }
 0x7ee   : > { %v2927_v12 = vpop.f32.mrb[70].mxu0 }
 0x7ef   : > { %v7385_v30 = vpop.f32.mrb[71].mxu0 }
 0x81d   : > { %v9136_v41 = vpop.f32.mrb[68].mxu1 }
 0x81e   : > { %v7390_v14 = vpop.f32.mrb[69].mxu1 }
 0x81f   : > { %v2976_v59 = vpop.f32.mrb[70].mxu1 }
 0x820   : > { %v7391_v15 = vpop.f32.mrb[71].mxu1 }
 0x821   : > { %v9140_v43 = vpop.f32.mrb[72].mxu0 }
 0x822   : > { %v7396_v60 = vpop.f32.mrb[73].mxu0 }
 0x823   : > { %v3025_v17 = vpop.f32.mrb[74].mxu0 }
 0x824   : > { %v7397_v50 = vpop.f32.mrb[75].mxu0 }
 0x829   : > { %v3121_v53 = vpop.f32.mrb[76].mxu0 }
 0x82a   : > { %v9143_v55 = vadd.f32 %v3121_v53, %v8663_v54  ;;  %v7408_v3 = vpop.f32.mrb[77].mxu0 }
 0x82b   : > { %v3124_v12 = vpop.f32.mrb[78].mxu0 }
 0x82c   : > { %v7409_v30 = vpop.f32.mrb[79].mxu0  ;;  %v3477_v35 = vsel %vm1707_vm3, %v9143_v55, -inf }
 0x82d   : > { %3478 = vmax.xlane.f32.xlu0 %v3477_v35 }
 0x831   : > { %v3221_v11 = vpop.f32.mrb[80].mxu0 }
 0x832   : > { %v3222_v14 = vadd.f32 %v3221_v11, %v8674_v8  ;;  %v7420_v59 = vpop.f32.mrb[81].mxu0 }
 0x833   : > { %v3224_v15 = vpop.f32.mrb[82].mxu0 }
 0x834   : > { %v7421_v48 = vpop.f32.mrb[83].mxu0  ;;  %v3483_v60 = vsel %vm1707_vm3, %v3222_v14, -inf }
 0x835   : > { %3484 = vmax.xlane.f32.xlu0 %v3483_v60 }
 0x839   : > { %v3321_v17 = vpop.f32.mrb[84].mxu0 }
 0x83a   : > { %v7432_v50 = vpop.f32.mrb[85].mxu0  ;;  %v3322_v51 = vadd.f32 %v3321_v17, %v8690_v36 }
 0x83b   : > { %v3324_v53 = vpop.f32.mrb[86].mxu0 }
 0x83c   : > { %v7433_v18 = vpop.f32.mrb[87].mxu0 }
 0x841   : > { %v3421_v3 = vpop.f32.mrb[88].mxu0 }
 0x842   : > { %v7444_v12 = vpop.f32.mrb[89].mxu0 }
 0x843   : > { %v3424_v30 = vpop.f32.mrb[90].mxu0 }
 0x844   : > { %v7445_v13 = vpop.f32.mrb[91].mxu0 }
 0x852   : > { %v9149_v44 = vpop.f32.mrb[72].mxu1 }
 0x853   : > { %v7402_v11 = vpop.f32.mrb[73].mxu1 }
 0x854   : > { %v3074_v59 = vpop.f32.mrb[74].mxu1 }
 0x855   : > { %v7403_v15 = vpop.f32.mrb[75].mxu1  ;;  %v9159_v59 = vadd.f32 %v3421_v3, %v8700_v29 }
 0x85a   : > { %v3171_v48 = vpop.f32.mrb[76].mxu1 }
 0x85b   : > { %v3172_v19 = vadd.f32 %v3171_v48, %v8671_v6  ;;  %v7414_v60 = vpop.f32.mrb[77].mxu1 }
 0x85c   : > { %v3174_v63 = vpop.f32.mrb[78].mxu1 }
 0x85d   : > { %v7415_v50 = vpop.f32.mrb[79].mxu1  ;;  %v3480_v18 = vsel %vm1707_vm3, %v3172_v19, -inf  ;;  %v3489_v63 = vsel %vm1707_vm3, %v3322_v51, -inf }
 0x85e   : > { %3481 = vmax.xlane.f32.xlu1 %v3480_v18 }
 0x862   : > { %v3271_v53 = vpop.f32.mrb[80].mxu1 }
 0x863   : > { %v3272_v13 = vadd.f32 %v3271_v53, %v8687_v47  ;;  %v7426_v12 = vpop.f32.mrb[81].mxu1  ;;  %v3495_v53 = vsel %vm1707_vm3, %v9159_v59, -inf }
 0x864   : > { %v3274_v30 = vpop.f32.mrb[82].mxu1 }
 0x865   : > { %v7427_v35 = vpop.f32.mrb[83].mxu1  ;;  %v3486_v11 = vsel %vm1707_vm3, %v3272_v13, -inf }
 0x866   : > { %3487 = vmax.xlane.f32.xlu0 %v3486_v11 }
 0x86a   : > { %3490 = vmax.xlane.f32.xlu0 %v3489_v63  ;;  %v3371_v15 = vpop.f32.mrb[84].mxu1 }
 0x86b   : > { %v3372_v48 = vadd.f32 %v3371_v15, %v8697_v10  ;;  %v7438_v60 = vpop.f32.mrb[85].mxu1 }
 0x86c   : > { %v3374_v50 = vpop.f32.mrb[86].mxu1 }
 0x86d   : > { %v7439_v18 = vpop.f32.mrb[87].mxu1  ;;  %v3492_v17 = vsel %vm1707_vm3, %v3372_v48, -inf }
 0x86e   : > { %3496 = vmax.xlane.f32.xlu0 %v3495_v53  ;;  %3493 = vmax.xlane.f32.xlu1 %v3492_v17 }
 0x872   : > { %v3471_v35 = vpop.f32.mrb[88].mxu1 }
 0x873   : > { %v7450_v12 = vpop.f32.mrb[89].mxu1  ;;  %v9171_v11 = vadd.f32 %v3471_v35, %v8707_v62 }
 0x874   : > { %v3474_v3 = vpop.f32.mrb[90].mxu1 }
 0x875   : > { %v7451_v30 = vpop.f32.mrb[91].mxu1  ;;  %v3498_v63 = vsel %vm1707_vm3, %v9171_v11, -inf }
 0x87f   : > { %3813 = vrot.lane.b32.xlu1 %v8830_v28, %s8191_s29 }
 0x884   : > { %3765 = vrot.lane.b32.xlu0 %v8807_v49, %s8191_s29 }
 0x8a3   : > { %3499 = vmax.xlane.f32.xlu1 %v3498_v63  ;;  %v3670_v63 = vpop.permute.xlu1 %3669 }
 0x8ba   : > { %v3479_v15 = vpop.xlane.xlu0 %3478 }
 0x8bb   : > { %v3501_v60 = vsub.f32 %v9143_v55, %v3479_v15  ;;  %v9184_v55 = vpop.permute.xlu1 %3717 }
 0x8bd   : > { %v3509_v50 = vmul.f32 1.442695, %v3501_v60 }
 0x8bf   : > { %7962 = vpow2.f32 %v3509_v50 }
 0x8c2   : > { %v3485_v18 = vpop.xlane.xlu0 %3484 }
 0x8c3   : > { %v3503_v53 = vsub.f32 %v3222_v14, %v3485_v18 }
 0x8c5   : > { %v3513_v17 = vmul.f32 1.442695, %v3503_v53 }
 0x8c7   : > { %7964 = vpow2.f32 %v3513_v17 }
 0x8c9   : > { %v9176_v12 = vpop.eup %7962 }
 0x8ca   : > { %v3525_v3 = vsel %vm1707_vm3, %v9176_v12, 0.0 }
 0x8cb   : > { %3526 = vadd.xlane.f32.xlu0 %v3525_v3 }
 0x8d1   : > { %v9180_v35 = vpop.eup %7964 }
 0x8d2   : > { %v3531_v30 = vsel %vm1707_vm3, %v9180_v35, 0.0 }
 0x8d3   : > { %3532 = vadd.xlane.f32.xlu0 %v3531_v30 }
 0x8eb   : > { %v3482_v15 = vpop.xlane.xlu1 %3481 }
 0x8ec   : > { %v3502_v60 = vsub.f32 %v3172_v19, %v3482_v15 }
 0x8ee   : > { %v3511_v14 = vmul.f32 1.442695, %v3502_v60 }
 0x8f0   : > { %7966 = vpow2.f32 %v3511_v14 }
 0x8f3   : > { %v3488_v50 = vpop.xlane.xlu0 %3487 }
 0x8f4   : > { %v3504_v18 = vsub.f32 %v3272_v13, %v3488_v50 }
 0x8f6   : > { %v3515_v53 = vmul.f32 1.442695, %v3504_v18 }
 0x8f7   : > { %v3491_v17 = vpop.xlane.xlu0 %3490 }
 0x8f8   : > { %7968 = vpow2.f32 %v3515_v53  ;;  %v3505_v23 = vsub.f32 %v3322_v51, %v3491_v17 }
 0x8fa   : > { %v9186_v3 = vpop.eup %7966  ;;  %v3517_v26 = vmul.f32 1.442695, %v3505_v23 }
 0x8fb   : > { %v3528_v46 = vsel %vm1707_vm3, %v9186_v3, 0.0  ;;  %v3494_v23 = vpop.xlane.xlu1 %3493 }
 0x8fc   : > { %7970 = vpow2.f32 %v3517_v26  ;;  %3529 = vadd.xlane.f32.xlu1 %v3528_v46  ;;  %v3506_v46 = vsub.f32 %v3372_v48, %v3494_v23  ;;  %v3497_v26 = vpop.xlane.xlu0 %3496 }
 0x8fd   : > { %v3507_v51 = vsub.f32 %v9159_v59, %v3497_v26 }
 0x8fe   : > { %v3519_v60 = vmul.f32 1.442695, %v3506_v46 }
 0x8ff   : > { %v3521_v14 = vmul.f32 1.442695, %v3507_v51  ;;  %v3814_v59 = vpop.permute.xlu1 %3813 }
 0x900   : > { %7972 = vpow2.f32 %v3519_v60  ;;  %v3766_v48 = vpop.permute.xlu0 %3765  ;;  %v3819_v60 = vsel %vm1807_vm2, %v3814_v59, 0 }
 0x901   : > { %7974 = vpow2.f32 %v3521_v14 }
 0x902   : > { %v9190_v30 = vpop.eup %7968 }
 0x903   : > { %v3534_v19 = vsel %vm1707_vm3, %v9190_v30, 0.0 }
 0x904   : > { %3535 = vadd.xlane.f32.xlu1 %v3534_v19 }
 0x906   : > { %v9194_v15 = vpop.eup %7970 }
 0x907   : > { %v3537_v13 = vsel %vm1707_vm3, %v9194_v15, 0.0 }
 0x908   : > { %3538 = vadd.xlane.f32.xlu0 %v3537_v13 }
 0x90a   : > { %v9203_v50 = vpop.eup %7972 }
 0x90b   : > { %v3540_v18 = vsel %vm1707_vm3, %v9203_v50, 0.0  ;;  %v9207_v53 = vpop.eup %7974 }
 0x90c   : > { %v3543_v17 = vsel %vm1707_vm3, %v9207_v53, 0.0 }
 0x915   : > { %3909 = vrot.lane.b32.xlu1 %v8848_v31, %s8191_s29 }
 0x91e   : > { %3861 = vrot.lane.b32.xlu0 %v8824_v5, %s8191_s29 }
 0x930   : > { %v3500_v19 = vpop.xlane.xlu1 %3499 }
 0x931   : > { %v3508_v13 = vsub.f32 %v9171_v11, %v3500_v19  ;;  %v3675_v11 = vsel %vm1807_vm2, %v3670_v63, 0  ;;  %v3771_v63 = vsel %vm1807_vm2, %v3766_v48, 0 }
 0x933   : > { %v3523_v46 = vmul.f32 1.442695, %v3508_v13 }
 0x939   : > { %3541 = vadd.xlane.f32.xlu1 %v3540_v18 }
 0x93d   : > { %3544 = vadd.xlane.f32.xlu0 %v3543_v17 }
 0x94a   : > { %4009 = vrot.lane.b32.xlu1 %v8524_v34, %s8192_s20 }
 0x953   : > { %3959 = vrot.lane.b32.xlu0 %v8516_v27, %s8192_s20 }
 0x957   : > { %3957 = vrot.lane.b32.xlu0 %v8531_v37, %s8192_s20 }
 0x958   : > { %v3527_v23 = vpop.xlane.xlu0 %3526 }
 0x959   : > { %7976 = vrcp.f32 %v3527_v23 }
 0x95a   : > { %7978 = vpow2.f32 %v3523_v46 }
 0x95b   : > { %4059 = vrot.lane.b32.xlu0 %v8533_v38, %s8192_s20 }
 0x95f   : > { %4057 = vrot.lane.b32.xlu0 %v8563_v57, %s8192_s20 }
 0x960   : > { %v3533_v34 = vpop.xlane.xlu0 %3532 }
 0x961   : > { %7980 = vrcp.f32 %v3533_v34 }
 0x963   : > { %v7977_v27 = vpop.eup %7976  ;;  %4159 = vrot.lane.b32.xlu0 %v8565_v58, %s8192_s20 }
 0x964   : > { %v3557_v37 = vmul.f32 %v7977_v27, %v9176_v12  ;;  %v9231_v38 = vpop.eup %7978 }
 0x966   : > { %v3565_v26 = vpack.c.bf16 %v3557_v37, %v3557_v37 }
 0x967   : > { %4157 = vrot.lane.b32.xlu0 %v8601_v21, %s8192_s20  ;;  %v3546_v21 = vsel %vm1707_vm3, %v9231_v38, 0.0 }
 0x968   : > { %7455 = vmatmul.mubr.msk.bf16.vlgmr.msra.gmra.mrb[92].mxu0 %vm1707_vm3, %v3565_v26 }
 0x969   : > { %7465 = vmatpush3.bf16.msra.mxu0 %v3675_v11  ;;  %7466 = vmatprep.mubr.msk.bf16.mxu0 %vm8188_vm0, %v10382_v1 }
 0x96a   : > { %7476 = vmatprep.subr.bf16.mxu0 %v10382_v1 }
 0x96b   : > { %v7981_v57 = vpop.eup %7980  ;;  %4259 = vrot.lane.b32.xlu0 %v8603_v22, %s8192_s20 }
 0x96c   : > { %v3559_v58 = vmul.f32 %v7981_v57, %v9180_v35 }
 0x96e   : > { %3547 = vadd.xlane.f32.xlu1 %v3546_v21  ;;  %v3567_v12 = vpack.c.bf16 %v3559_v58, %v3559_v58 }
 0x96f   : > { %4257 = vrot.lane.b32.xlu0 %v8624_v16, %s8192_s20 }
 0x970   : > { %7467 = vmatmul.mubr.msk.bf16.vlgmr.msra.gmra.mrb[96].mxu0 %vm1707_vm3, %v3567_v12 }
 0x971   : > { %7477 = vmatpush3.bf16.msra.mxu0 %v3771_v63  ;;  %7478 = vmatprep.mubr.msk.bf16.mxu0 %vm8188_vm0, %v10382_v1 }
 0x972   : > { %7488 = vmatprep.subr.bf16.mxu0 %v10382_v1 }
 0x97f   : > { %4007 = vrot.lane.b32.xlu1 %v8561_v56, %s8192_s20 }
 0x983   : > { %4109 = vrot.lane.b32.xlu1 %v8558_v52, %s8192_s20 }
 0x987   : > { %4107 = vrot.lane.b32.xlu1 %v8599_v20, %s8192_s20 }
 0x989   : > { %v3530_v22 = vpop.xlane.xlu1 %3529 }
 0x98a   : > { %7982 = vrcp.f32 %v3530_v22 }
 0x98b   : > { %4209 = vrot.lane.b32.xlu1 %v8593_v9, %s8192_s20  ;;  %v3723_v9 = vsel %vm1807_vm2, %v9184_v55, 0 }
 0x98f   : > { %4207 = vrot.lane.b32.xlu1 %v8626_v24, %s8192_s20 }
 0x991   : > { %v3536_v16 = vpop.xlane.xlu1 %3535 }
 0x992   : > { %7984 = vrcp.f32 %v3536_v16 }
 0x993   : > { %4309 = vrot.lane.b32.xlu1 %v8616_v33, %s8192_s20 }
 0x994   : > { %v7983_v56 = vpop.eup %7982 }
 0x995   : > { %v3558_v35 = vmul.f32 %v7983_v56, %v9186_v3  ;;  %v3539_v52 = vpop.xlane.xlu0 %3538 }
 0x996   : > { %7986 = vrcp.f32 %v3539_v52 }
 0x997   : > { %4307 = vrot.lane.b32.xlu1 %v8640_v32, %s8192_s20  ;;  %v3566_v20 = vpack.c.bf16 %v3558_v35, %v3558_v35 }
 0x999   : > { %7461 = vmatmul.mubr.msk.bf16.vlgmr.msra.gmra.mrb[92].mxu1 %vm1707_vm3, %v3566_v20  ;;  %v3862_v55 = vpop.permute.xlu0 %3861 }
 0x99a   : > { %7471 = vmatpush3.bf16.msra.mxu1 %v3723_v9  ;;  %7472 = vmatprep.mubr.msk.bf16.mxu1 %vm8188_vm0, %v10382_v1  ;;  %v3867_v18 = vsel %vm1807_vm2, %v3862_v55, 0 }
 0x99b   : > { %7482 = vmatprep.subr.bf16.mxu1 %v10382_v1 }
 0x99c   : > { %v7985_v33 = vpop.eup %7984 }
 0x99d   : > { %v3560_v24 = vmul.f32 %v7985_v33, %v9190_v30  ;;  %v3910_v30 = vpop.permute.xlu1 %3909 }
 0x99e   : > { %v3915_v34 = vsel %vm1807_vm2, %v3910_v30, 0 }
 0x99f   : > { %v3568_v3 = vpack.c.bf16 %v3560_v24, %v3560_v24 }
 0x9a0   : > { %v7987_v51 = vpop.eup %7986 }
 0x9a1   : > { %v3561_v32 = vmul.f32 %v7987_v51, %v9194_v15  ;;  %7473 = vmatmul.mubr.msk.bf16.vlgmr.msra.gmra.mrb[96].mxu1 %vm1707_vm3, %v3568_v3 }
 0x9a2   : > { %7483 = vmatpush3.bf16.msra.mxu1 %v3819_v60  ;;  %7484 = vmatprep.mubr.msk.bf16.mxu1 %vm8188_vm0, %v10382_v1 }
 0x9a3   : > { %v3569_v14 = vpack.c.bf16 %v3561_v32, %v3561_v32  ;;  %7494 = vmatprep.subr.bf16.mxu1 %v10382_v1 }
 0x9a5   : > { %7479 = vmatmul.mubr.msk.bf16.vlgmr.msra.gmra.mrb[100].mxu0 %vm1707_vm3, %v3569_v14 }
 0x9a6   : > { %7489 = vmatpush3.bf16.msra.mxu0 %v3867_v18  ;;  %7490 = vmatprep.mubr.msk.bf16.mxu0 %vm8188_vm0, %v10382_v1 }
 0x9a7   : > { %7500 = vmatprep.subr.bf16.mxu0 %v10382_v1 }
 0x9c6   : > { %v3542_v15 = vpop.xlane.xlu1 %3541 }
 0x9c7   : > { %7988 = vrcp.f32 %v3542_v15 }
 0x9ca   : > { %v3545_v17 = vpop.xlane.xlu0 %3544  ;;  %v4010_v22 = vpop.permute.xlu1 %4009 }
 0x9cb   : > { %7990 = vrcp.f32 %v3545_v17  ;;  %v4015_v24 = vsel %vm1338_vm1, %v4010_v22, 0 }
 0x9ce   : > { %v3960_v59 = vpop.permute.xlu0 %3959 }
 0x9cf   : > { %v3965_v11 = vsel %vm1338_vm1, %v3960_v59, 0 }
 0x9d1   : > { %v7989_v48 = vpop.eup %7988 }
 0x9d2   : > { %v3562_v19 = vmul.f32 %v7989_v48, %v9203_v50  ;;  %v3958_v13 = vpop.permute.xlu0 %3957 }
 0x9d4   : > { %v3570_v23 = vpack.c.bf16 %v3562_v19, %v3562_v19 }
 0x9d5   : > { %v7991_v46 = vpop.eup %7990 }
 0x9d6   : > { %v3563_v27 = vmul.f32 %v7991_v46, %v9207_v53  ;;  %7485 = vmatmul.mubr.msk.bf16.vlgmr.msra.gmra.mrb[100].mxu1 %vm1707_vm3, %v3570_v23  ;;  %v4060_v37 = vpop.permute.xlu0 %4059 }
 0x9d7   : > { %7495 = vmatpush3.bf16.msra.mxu1 %v3915_v34  ;;  %7496 = vmatprep.mubr.msk.bf16.mxu1 %vm8188_vm0, %v10382_v1  ;;  %v4065_v53 = vsel %vm1338_vm1, %v4060_v37, 0 }
 0x9d8   : > { %v3571_v26 = vpack.c.bf16 %v3563_v27, %v3563_v27  ;;  %7506 = vmatprep.subr.bf16.mxu1 %v10382_v1 }
 0x9da   : > { %7491 = vmatmul.mubr.msk.bf16.vlgmr.msra.gmra.mrb[104].mxu0 %vm1707_vm3, %v3571_v26  ;;  %v4058_v50 = vpop.permute.xlu0 %4057 }
 0x9db   : > { %7501 = vmatpush3.bf16.xpose.msra.mxu0 %v3965_v11  ;;  %7502 = vmatprep.mubr.msk.bf16.mxu0 %vm8188_vm0, %v10382_v1 }
 0x9dc   : > { %7512 = vmatprep.subr.bf16.mxu0 %v10382_v1 }
 0x9de   : > { %v4160_v57 = vpop.permute.xlu0 %4159 }
 0x9df   : > { %v4165_v21 = vsel %vm1338_vm1, %v4160_v57, 0 }
 0x9e2   : > { %7503 = vmatmul.mubr.msk.bf16.vlgmr.msra.gmra.mrb[108].mxu0 %vm1338_vm1, %v3958_v13  ;;  %v4158_v58 = vpop.permute.xlu0 %4157 }
 0x9e3   : > { %7513 = vmatpush3.bf16.xpose.msra.mxu0 %v4065_v53  ;;  %7514 = vmatprep.mubr.msk.bf16.mxu0 %vm8188_vm0, %v10382_v1 }
 0x9e4   : > { %7524 = vmatprep.subr.bf16.mxu0 %v10382_v1 }
 0x9e6   : > { %v4260_v12 = vpop.permute.xlu0 %4259 }
 0x9e7   : > { %v4265_v63 = vsel %vm1338_vm1, %v4260_v12, 0 }
 0x9ea   : > { %7515 = vmatmul.mubr.msk.bf16.vlgmr.msra.gmra.mrb[112].mxu0 %vm1338_vm1, %v4058_v50  ;;  %v4258_v16 = vpop.permute.xlu0 %4257 }
 0x9eb   : > { %7525 = vmatpush3.bf16.xpose.msra.mxu0 %v4165_v21  ;;  %7526 = vmatprep.mubr.msk.bf16.mxu0 %vm8188_vm0, %v10382_v1 }
 0x9ec   : > { %7536 = vmatprep.subr.bf16.mxu0 %v10382_v1 }
 0x9f2   : > { %7527 = vmatmul.mubr.msk.bf16.vlgmr.msra.gmra.mrb[116].mxu0 %vm1338_vm1, %v4158_v58 }
 0x9f3   : > { %7537 = vmatpush3.bf16.xpose.msra.mxu0 %v4265_v63  ;;  %7538 = vmatprep.mubr.msk.bf16.mxu0 %vm8188_vm0, %v10382_v1 }
 0x9f4   : > { %7548 = vmatprep.subr.bf16.mxu0 %v10382_v1 }
 0x9fa   : > { %7539 = vmatmul.mubr.msk.bf16.vlgmr.msra.gmra.mrb[120].mxu0 %vm1338_vm1, %v4258_v16 }
 0x9fb   : > { %v3548_v56 = vpop.xlane.xlu1 %3547  ;;  %7550 = vmatprep.mubr.msk.bf16.mxu0 %vm8188_vm0, %v10382_v1 }
 0x9fc   : > { %7992 = vrcp.f32 %v3548_v56 }
 0x9ff   : > { %v4008_v35 = vpop.permute.xlu1 %4007 }
 0xa03   : > { %v4110_v9 = vpop.permute.xlu1 %4109 }
 0xa04   : > { %v4115_v51 = vsel %vm1338_vm1, %v4110_v9, 0 }
 0xa06   : > { %v7993_v52 = vpop.eup %7992 }
 0xa07   : > { %v3564_v20 = vmul.f32 %v7993_v52, %v9231_v38  ;;  %v4108_v3 = vpop.permute.xlu1 %4107 }
 0xa09   : > { %v3572_v33 = vpack.c.bf16 %v3564_v20, %v3564_v20 }
 0xa0b   : > { %7497 = vmatmul.mubr.msk.bf16.vlgmr.msra.gmra.mrb[104].mxu1 %vm1707_vm3, %v3572_v33  ;;  %v4210_v60 = vpop.permute.xlu1 %4209 }
 0xa0c   : > { %7507 = vmatpush3.bf16.xpose.msra.mxu1 %v4015_v24  ;;  %7508 = vmatprep.mubr.msk.bf16.mxu1 %vm8188_vm0, %v10382_v1  ;;  %v4215_v32 = vsel %vm1338_vm1, %v4210_v60, 0 }
 0xa0d   : > { %7518 = vmatprep.subr.bf16.mxu1 %v10382_v1 }
 0xa0f   : > { %v4208_v38 = vpop.permute.xlu1 %4207 }
 0xa13   : > { %7509 = vmatmul.mubr.msk.bf16.vlgmr.msra.gmra.mrb[108].mxu1 %vm1338_vm1, %v4008_v35  ;;  %v4310_v55 = vpop.permute.xlu1 %4309 }
 0xa14   : > { %7519 = vmatpush3.bf16.xpose.msra.mxu1 %v4115_v51  ;;  %7520 = vmatprep.mubr.msk.bf16.mxu1 %vm8188_vm0, %v10382_v1  ;;  %v4315_v14 = vsel %vm1338_vm1, %v4310_v55, 0 }
 0xa15   : > { %7530 = vmatprep.subr.bf16.mxu1 %v10382_v1 }
 0xa17   : > { %v4308_v18 = vpop.permute.xlu1 %4307 }
 0xa1b   : > { %7521 = vmatmul.mubr.msk.bf16.vlgmr.msra.gmra.mrb[112].mxu1 %vm1338_vm1, %v4108_v3 }
 0xa1c   : > { %7531 = vmatpush3.bf16.xpose.msra.mxu1 %v4215_v32  ;;  %7532 = vmatprep.mubr.msk.bf16.mxu1 %vm8188_vm0, %v10382_v1 }
 0xa1d   : > { %7542 = vmatprep.subr.bf16.mxu1 %v10382_v1 }
 0xa23   : > { %7533 = vmatmul.mubr.msk.bf16.vlgmr.msra.gmra.mrb[116].mxu1 %vm1338_vm1, %v4208_v38 }
 0xa24   : > { %7543 = vmatpush3.bf16.xpose.msra.mxu1 %v4315_v14  ;;  %7544 = vmatprep.mubr.msk.bf16.mxu1 %vm8188_vm0, %v10382_v1 }
 0xa25   : > { %7554 = vmatprep.subr.bf16.mxu1 %v10382_v1 }
 0xa2b   : > { %7545 = vmatmul.mubr.msk.bf16.vlgmr.msra.gmra.mrb[120].mxu1 %vm1338_vm1, %v4308_v18 }
 0xa2c   : > { %7556 = vmatprep.mubr.msk.bf16.mxu1 %vm8188_vm0, %v10382_v1 }
 0xa3b   : > { %v9333_v30 = vpop.f32.mrb[92].mxu0 }
 0xa3c   : > { %v7456_v15 = vpop.f32.mrb[93].mxu0 }
 0xa3d   : > { %v3618_v17 = vpop.f32.mrb[94].mxu0 }
 0xa3e   : > { %v7457_v59 = vpop.f32.mrb[95].mxu0 }
 0xa43   : > { %v9335_v48 = vpop.f32.mrb[96].mxu0 }
 0xa44   : > { %v7468_v19 = vpop.f32.mrb[97].mxu0 }
 0xa45   : > { %v3714_v13 = vpop.f32.mrb[98].mxu0 }
 0xa46   : > { %v7469_v23 = vpop.f32.mrb[99].mxu0 }
 0xa6c   : > { %v9337_v46 = vpop.f32.mrb[92].mxu1 }
 0xa6d   : > { %v7727_v34 = vpack.i.bf16 %v9337_v46, %v9333_v30  ;;  %v7462_v27 = vpop.f32.mrb[93].mxu1 }
 0xa6e   : > { %v3666_v37 = vpop.f32.mrb[94].mxu1 }
 0xa6f   : > { %v7463_v26 = vpop.f32.mrb[95].mxu1 }
 0xa74   : > { %v9341_v11 = vpop.f32.mrb[96].mxu1 }
 0xa75   : > { %v7732_v50 = vpack.i.bf16 %v9341_v11, %v9335_v48  ;;  %v7474_v53 = vpop.f32.mrb[97].mxu1 }
 0xa76   : > { %v3762_v57 = vpop.f32.mrb[98].mxu1 }
 0xa77   : > { %v7475_v58 = vpop.f32.mrb[99].mxu1 }
 0xa78   : > { %v9345_v21 = vpop.f32.mrb[100].mxu0 }
 0xa79   : > { %v7480_v12 = vpop.f32.mrb[101].mxu0 }
 0xa7a   : > { %v3810_v63 = vpop.f32.mrb[102].mxu0 }
 0xa7b   : > { %v7481_v22 = vpop.f32.mrb[103].mxu0 }
 0xaa9   : > { %v9347_v16 = vpop.f32.mrb[100].mxu1 }
 0xaaa   : > { %v7757_v56 = vpack.i.bf16 %v9347_v16, %v9345_v21  ;;  %v7486_v35 = vpop.f32.mrb[101].mxu1  ;;  %v7817_v21 = vld [vmem:[%s8361_s22 + $0x38] sm:$0xff]  }
 0xaab   : > { %v3858_v52 = vpop.f32.mrb[102].mxu1 }
 0xaac   : > { %v7487_v20 = vpop.f32.mrb[103].mxu1 }
 0xaad   : > { %v9351_v9 = vpop.f32.mrb[104].mxu0 }
 0xaae   : > { %v7492_v33 = vpop.f32.mrb[105].mxu0 }
 0xaaf   : > { %v3906_v24 = vpop.f32.mrb[106].mxu0 }
 0xab0   : > { %v7493_v3 = vpop.f32.mrb[107].mxu0 }
 0xab5   : > { %v4001_v51 = vpop.f32.mrb[108].mxu0 }
 0xab6   : > { %v9354_v60 = vadd.f32 %v4001_v51, %v8663_v54  ;;  %v7504_v38 = vpop.f32.mrb[109].mxu0 }
 0xab7   : > { %v4004_v32 = vpop.f32.mrb[110].mxu0 }
 0xab8   : > { %v7505_v55 = vpop.f32.mrb[111].mxu0  ;;  %v4357_v14 = vsel %vm1707_vm3, %v9354_v60, -inf }
 0xab9   : > { %4358 = vmax.xlane.f32.xlu0 %v4357_v14 }
 0xabd   : > { %v4101_v18 = vpop.f32.mrb[112].mxu0 }
 0xabe   : > { %v9359_v15 = vadd.f32 %v4101_v18, %v8674_v8  ;;  %v7516_v17 = vpop.f32.mrb[113].mxu0 }
 0xabf   : > { %v4104_v59 = vpop.f32.mrb[114].mxu0 }
 0xac0   : > { %v7517_v19 = vpop.f32.mrb[115].mxu0  ;;  %v4363_v13 = vsel %vm1707_vm3, %v9359_v15, -inf }
 0xac1   : > { %4364 = vmax.xlane.f32.xlu0 %v4363_v13 }
 0xac5   : > { %v4201_v54 = vpop.f32.mrb[116].mxu0 }
 0xac6   : > { %v7528_v23 = vpop.f32.mrb[117].mxu0  ;;  %v4202_v18 = vadd.f32 %v4201_v54, %v8690_v36 }
 0xac7   : > { %v4204_v27 = vpop.f32.mrb[118].mxu0 }
 0xac8   : > { %v7529_v37 = vpop.f32.mrb[119].mxu0  ;;  %v4369_v19 = vsel %vm1707_vm3, %v4202_v18, -inf }
 0xacd   : > { %v4301_v26 = vpop.f32.mrb[120].mxu0 }
 0xace   : > { %v7540_v53 = vpop.f32.mrb[121].mxu0 }
 0xacf   : > { %v4304_v57 = vpop.f32.mrb[122].mxu0 }
 0xad0   : > { %v7541_v58 = vpop.f32.mrb[123].mxu0 }
 0xade   : > { %v9363_v12 = vpop.f32.mrb[104].mxu1 }
 0xadf   : > { %v7762_v8 = vpack.i.bf16 %v9363_v12, %v9351_v9  ;;  %v7498_v63 = vpop.f32.mrb[105].mxu1  ;;  %v10388_v12 = vld [vmem:[#allocation18_spill] sm:$0xff] }
 0xae0   : > { %v3954_v22 = vpop.f32.mrb[106].mxu1 }
 0xae1   : > { %v7499_v35 = vpop.f32.mrb[107].mxu1 }
 0xae6   : > { %v4051_v52 = vpop.f32.mrb[108].mxu1 }
 0xae7   : > { %v4052_v20 = vadd.f32 %v4051_v52, %v8671_v6  ;;  %v7510_v33 = vpop.f32.mrb[109].mxu1  ;;  %v4302_v6 = vadd.f32 %v4301_v26, %v8700_v29 }
 0xae8   : > { %v4054_v24 = vpop.f32.mrb[110].mxu1 }
 0xae9   : > { %v7511_v3 = vpop.f32.mrb[111].mxu1  ;;  %v4360_v51 = vsel %vm1707_vm3, %v4052_v20, -inf  ;;  %v4375_v53 = vsel %vm1707_vm3, %v4302_v6, -inf }
 0xaea   : > { %4361 = vmax.xlane.f32.xlu1 %v4360_v51 }
 0xaee   : > { %v4151_v38 = vpop.f32.mrb[112].mxu1 }
 0xaef   : > { %v9370_v32 = vadd.f32 %v4151_v38, %v8687_v47  ;;  %v7522_v55 = vpop.f32.mrb[113].mxu1 }
 0xaf0   : > { %v4154_v14 = vpop.f32.mrb[114].mxu1 }
 0xaf1   : > { %v7523_v17 = vpop.f32.mrb[115].mxu1  ;;  %v4366_v59 = vsel %vm1707_vm3, %v9370_v32, -inf }
 0xaf2   : > { %4367 = vmax.xlane.f32.xlu0 %v4366_v59 }
 0xaf6   : > { %4370 = vmax.xlane.f32.xlu0 %v4369_v19  ;;  %v4251_v13 = vpop.f32.mrb[116].mxu1 }
 0xaf7   : > { %v9378_v23 = vadd.f32 %v4251_v13, %v8697_v10  ;;  %v7534_v47 = vpop.f32.mrb[117].mxu1 }
 0xaf8   : > { %v4254_v27 = vpop.f32.mrb[118].mxu1 }
 0xaf9   : > { %v7535_v37 = vpop.f32.mrb[119].mxu1  ;;  %v4372_v36 = vsel %vm1707_vm3, %v9378_v23, -inf }
 0xafa   : > { %4376 = vmax.xlane.f32.xlu0 %v4375_v53  ;;  %4373 = vmax.xlane.f32.xlu1 %v4372_v36 }
 0xafe   : > { %v4351_v54 = vpop.f32.mrb[120].mxu1 }
 0xaff   : > { %v7546_v57 = vpop.f32.mrb[121].mxu1  ;;  %v9390_v10 = vadd.f32 %v4351_v54, %v8707_v62 }
 0xb00   : > { %v4354_v29 = vpop.f32.mrb[122].mxu1 }
 0xb01   : > { %v7547_v26 = vpop.f32.mrb[123].mxu1  ;;  %v4378_v58 = vsel %vm1707_vm3, %v9390_v10, -inf }
 0xb0b   : > { %4501 = vrot.lane.b32.xlu1 %v8652_v42, %s8192_s20 }
 0xb0f   : > { %4549 = vrot.lane.b32.xlu1 %v8788_v2, %s8192_s20 }
 0xb10   : > { %4453 = vrot.lane.b32.xlu0 %v8650_v40, %s8192_s20 }
 0xb33   : > { %4379 = vmax.xlane.f32.xlu1 %v4378_v58  ;;  %v10383_v58 = vpack.i.bf16 %v9126_v7, %v9122_v39 }
 0xb44   : > { %4597 = vrot.lane.b32.xlu1 %v8794_v0, %s8192_s20 }
 0xb46   : > { %v4359_v63 = vpop.xlane.xlu0 %4358 }
 0xb47   : > { %v4381_v22 = vsub.f32 %v9354_v60, %v4359_v63 }
 0xb49   : > { %v4389_v42 = vmul.f32 1.442695, %v4381_v22 }
 0xb4b   : > { %7994 = vpow2.f32 %v4389_v42  ;;  %v10384_v42 = vpack.i.bf16 %v9130_v45, %v9124_v4 }
 0xb4e   : > { %v4365_v35 = vpop.xlane.xlu0 %4364 }
 0xb4f   : > { %v4383_v2 = vsub.f32 %v9359_v15, %v4365_v35 }
 0xb51   : > { %v4393_v52 = vmul.f32 1.442695, %v4383_v2 }
 0xb53   : > { %7996 = vpow2.f32 %v4393_v52 }
 0xb55   : > { %v9398_v40 = vpop.eup %7994 }
 0xb56   : > { %v4405_v62 = vsel %vm1707_vm3, %v9398_v40, 0.0 }
 0xb57   : > { %4406 = vadd.xlane.f32.xlu0 %v4405_v62 }
 0xb5d   : > { %v9402_v33 = vpop.eup %7996 }
 0xb5e   : > { %v4411_v0 = vsel %vm1707_vm3, %v9402_v33, 0.0 }
 0xb5f   : > { %4412 = vadd.xlane.f32.xlu0 %v4411_v0 }
 0xb75   : > { %4645 = vrot.lane.b32.xlu0 %v8807_v49, %s8192_s20 }
 0xb77   : > { %v4362_v60 = vpop.xlane.xlu1 %4361 }
 0xb78   : > { %v4382_v24 = vsub.f32 %v4052_v20, %v4362_v60 }
 0xb7a   : > { %v4391_v15 = vmul.f32 1.442695, %v4382_v24 }
 0xb7c   : > { %7998 = vpow2.f32 %v4391_v15 }
 0xb7f   : > { %v4368_v3 = vpop.xlane.xlu0 %4367 }
 0xb80   : > { %v4384_v54 = vsub.f32 %v9370_v32, %v4368_v3 }
 0xb82   : > { %v4395_v57 = vmul.f32 1.442695, %v4384_v54 }
 0xb83   : > { %v4371_v51 = vpop.xlane.xlu0 %4370 }
 0xb84   : > { %v4385_v38 = vsub.f32 %v4202_v18, %v4371_v51 }
 0xb86   : > { %v9408_v55 = vpop.eup %7998  ;;  %v4397_v14 = vmul.f32 1.442695, %v4385_v38 }
 0xb87   : > { %v4377_v17 = vpop.xlane.xlu0 %4376  ;;  %v4374_v59 = vpop.xlane.xlu1 %4373  ;;  %v4408_v19 = vsel %vm1707_vm3, %v9408_v55, 0.0 }
 0xb88   : > { %8000 = vpow2.f32 %v4397_v14  ;;  %v4387_v13 = vsub.f32 %v4302_v6, %v4377_v17  ;;  %4409 = vadd.xlane.f32.xlu1 %v4408_v19  ;;  %v4386_v29 = vsub.f32 %v9378_v23, %v4374_v59 }
 0xb8a   : > { %v4401_v47 = vmul.f32 1.442695, %v4387_v13  ;;  %v4399_v26 = vmul.f32 1.442695, %v4386_v29 }
 0xb8b   : > { %v4454_v49 = vpop.permute.xlu0 %4453  ;;  %v4502_v27 = vpop.permute.xlu1 %4501 }
 0xb8c   : > { %8002 = vpow2.f32 %v4401_v47  ;;  %v4459_v20 = vsel %vm1807_vm2, %v4454_v49, 0  ;;  %v4507_v37 = vsel %vm1807_vm2, %v4502_v27, 0 }
 0xb8d   : > { %7549 = vmatpush3.bf16.msra.mxu0 %v4459_v20  ;;  %7555 = vmatpush3.bf16.msra.mxu1 %v4507_v37  ;;  %8004 = vpow2.f32 %v4395_v57 }
 0xb8e   : > { %7560 = vmatprep.subr.bf16.mxu0 %v10382_v1  ;;  %7566 = vmatprep.subr.bf16.mxu1 %v10382_v1  ;;  %8006 = vpow2.f32 %v4399_v26 }
 0xb8f   : > { %v4550_v32 = vpop.permute.xlu1 %4549 }
 0xb92   : > { %v9416_v18 = vpop.eup %8000 }
 0xb93   : > { %v4417_v6 = vsel %vm1707_vm3, %v9416_v18, 0.0 }
 0xb94   : > { %4418 = vadd.xlane.f32.xlu0 %v4417_v6 }
 0xb96   : > { %v9420_v53 = vpop.eup %8002 }
 0xb97   : > { %v4423_v36 = vsel %vm1707_vm3, %v9420_v53, 0.0 }
 0xb98   : > { %4424 = vadd.xlane.f32.xlu0 %v4423_v36 }
 0xb99   : > { %4693 = vrot.lane.b32.xlu1 %v8830_v28, %s8192_s20  ;;  %v9438_v28 = vpop.eup %8004 }
 0xb9a   : > { %v4414_v23 = vsel %vm1707_vm3, %v9438_v28, 0.0 }
 0xbae   : > { %4741 = vrot.lane.b32.xlu0 %v8824_v5, %s8192_s20  ;;  %v9442_v5 = vpop.eup %8006 }
 0xbaf   : > { %v4420_v39 = vsel %vm1707_vm3, %v9442_v5, 0.0 }
 0xbb2   : > { %7718 = vrot.lane.b32.xlu0 %v10383_v58, %s8192_s20 }
 0xbb6   : > { %7728 = vrot.lane.b32.xlu0 %v7727_v34, %s8191_s29 }
 0xbbd   : > { %4415 = vadd.xlane.f32.xlu1 %v4414_v23  ;;  %v10385_v23 = vmov 0  }
 0xbc0   : > { %v4380_v63 = vpop.xlane.xlu1 %4379 }
 0xbc1   : > { %v4388_v7 = vsub.f32 %v9390_v10, %v4380_v63  ;;  %4421 = vadd.xlane.f32.xlu1 %v4420_v39 }
 0xbc3   : > { %v4403_v22 = vmul.f32 1.442695, %v4388_v7 }
 0xbc5   : > { %8008 = vpow2.f32 %v4403_v22 }
 0xbcf   : > { %v9447_v30 = vpop.eup %8008 }
 0xbd0   : > { %v4426_v46 = vsel %vm1707_vm3, %v9447_v30, 0.0 }
 0xbd1   : > { %4427 = vadd.xlane.f32.xlu1 %v4426_v46 }
 0xbe2   : > { %4789 = vrot.lane.b32.xlu1 %v8848_v31, %s8192_s20  ;;  %v4555_v31 = vsel %vm1807_vm2, %v4550_v32, 0 }
 0xbe4   : > { %v4407_v34 = vpop.xlane.xlu0 %4406 }
 0xbe5   : > { %8010 = vrcp.f32 %v4407_v34 }
 0xbe6   : > { %7723 = vrot.lane.b32.xlu1 %v10384_v42, %s8192_s20 }
 0xbea   : > { %7733 = vrot.lane.b32.xlu1 %v7732_v50, %s8191_s29 }
 0xbec   : > { %v4413_v10 = vpop.xlane.xlu0 %4412 }
 0xbed   : > { %8012 = vrcp.f32 %v4413_v10  ;;  %v7810_v10 = vld [vmem:[%s8361_s22] sm:$0xff]  }
 0xbef   : > { %v8011_v35 = vpop.eup %8010 }
 0xbf0   : > { %v4437_v2 = vmul.f32 %v8011_v35, %v9398_v40  ;;  %v4646_v48 = vpop.permute.xlu0 %4645  ;;  %v4598_v40 = vpop.permute.xlu1 %4597  ;;  %v7811_v35 = vld [vmem:[%s8361_s22 + $0x8] sm:$0xff]  }
 0xbf1   : > { %v4651_v50 = vsel %vm1807_vm2, %v4646_v48, 0  ;;  %v4603_v15 = vsel %vm1807_vm2, %v4598_v40, 0  ;;  %v7813_v48 = vld [vmem:[%s8361_s22 + $0x18] sm:$0xff]  }
 0xbf2   : > { %v4445_v52 = vpack.c.bf16 %v4437_v2, %v4437_v2 }
 0xbf4   : > { %7551 = vmatmul.mubr.msk.bf16.vlgmr.msra.gmra.mrb[124].mxu0 %vm1707_vm3, %v4445_v52 }
 0xbf5   : > { %7561 = vmatpush3.bf16.msra.mxu0 %v4555_v31  ;;  %7562 = vmatprep.mubr.msk.bf16.mxu0 %vm8188_vm0, %v10382_v1 }
 0xbf6   : > { %7572 = vmatprep.subr.bf16.mxu0 %v10382_v1 }
 0xbf7   : > { %v8013_v4 = vpop.eup %8012 }
 0xbf8   : > { %v4439_v45 = vmul.f32 %v8013_v4, %v9402_v33  ;;  %v7812_v4 = vld [vmem:[%s8361_s22 + $0x10] sm:$0xff]  }
 0xbfa   : > { %v4447_v11 = vpack.c.bf16 %v4439_v45, %v4439_v45  ;;  %v10386_v45 = vpack.i.bf16 %v9136_v41, %v9134_v61  ;;  %v7815_v61 = vld [vmem:[%s8361_s22 + $0x28] sm:$0xff]  }
 0xbfc   : > { %7563 = vmatmul.mubr.msk.bf16.vlgmr.msra.gmra.mrb[128].mxu0 %vm1707_vm3, %v4447_v11 }
 0xbfd   : > { %7573 = vmatpush3.bf16.msra.mxu0 %v4651_v50  ;;  %7574 = vmatprep.mubr.msk.bf16.mxu0 %vm8188_vm0, %v10382_v1  ;;  %v7814_v50 = vld [vmem:[%s8361_s22 + $0x20] sm:$0xff]  }
 0xbfe   : > { %7584 = vmatprep.subr.bf16.mxu0 %v10382_v1 }
 0xc15   : > { %v4410_v62 = vpop.xlane.xlu1 %4409 }
 0xc16   : > { %8014 = vrcp.f32 %v4410_v62 }
 0xc19   : > { %v4694_v47 = vpop.permute.xlu1 %4693 }
 0xc1a   : > { %v4699_v36 = vsel %vm1807_vm2, %v4694_v47, 0 }
 0xc20   : > { %v8015_v0 = vpop.eup %8014 }
 0xc21   : > { %v4438_v60 = vmul.f32 %v8015_v0, %v9408_v55  ;;  %v4419_v24 = vpop.xlane.xlu0 %4418 }
 0xc22   : > { %8016 = vrcp.f32 %v4419_v24 }
 0xc23   : > { %v4446_v33 = vpack.c.bf16 %v4438_v60, %v4438_v60  ;;  %v7816_v60 = vld [vmem:[%s8361_s22 + $0x30] sm:$0xff]  }
 0xc25   : > { %v4425_v3 = vpop.xlane.xlu0 %4424  ;;  %7557 = vmatmul.mubr.msk.bf16.vlgmr.msra.gmra.mrb[124].mxu1 %vm1707_vm3, %v4446_v33 }
 0xc26   : > { %8018 = vrcp.f32 %v4425_v3  ;;  %7567 = vmatpush3.bf16.msra.mxu1 %v4603_v15  ;;  %7568 = vmatprep.mubr.msk.bf16.mxu1 %vm8188_vm0, %v10382_v1 }
 0xc27   : > { %7578 = vmatprep.subr.bf16.mxu1 %v10382_v1 }
 0xc29   : > { %v4742_v14 = vpop.permute.xlu0 %4741 }
 0xc2a   : > { %v4747_v59 = vsel %vm1807_vm2, %v4742_v14, 0  ;;  %v10387_v14 = vpack.i.bf16 %v9149_v44, %v9140_v43 }
 0xc2c   : > { %v8017_v51 = vpop.eup %8016 }
 0xc2d   : > { %v4441_v38 = vmul.f32 %v8017_v51, %v9416_v18  ;;  %v7719_v43 = vpop.permute.xlu0 %7718 }
 0xc2f   : > { %v4449_v55 = vpack.c.bf16 %v4441_v38, %v4441_v38 }
 0xc30   : > { %v8019_v17 = vpop.eup %8018 }
 0xc31   : > { %7575 = vmatmul.mubr.msk.bf16.vlgmr.msra.gmra.mrb[132].mxu0 %vm1707_vm3, %v4449_v55  ;;  %v4443_v19 = vmul.f32 %v8019_v17, %v9420_v53 }
 0xc32   : > { %7585 = vmatpush3.bf16.msra.mxu0 %v4747_v59  ;;  %7586 = vmatprep.mubr.msk.bf16.mxu0 %vm8188_vm0, %v10382_v1 }
 0xc33   : > { %v4451_v13 = vpack.c.bf16 %v4443_v19, %v4443_v19  ;;  %7596 = vmatprep.subr.bf16.mxu0 %v7810_v10 }
 0xc39   : > { %7587 = vmatmul.mubr.msk.bf16.vlgmr.msra.gmra.mrb[136].mxu0 %vm1707_vm3, %v4451_v13 }
 0xc3a   : > { %7597 = vmatpush3.bf16.msra.mxu0 %v7810_v10 }
 0xc3b   : > { %7598 = vmatprep.subr.bf16.mxu0 %v7811_v35 }
 0xc3e   : > { %7599 = vmatpush3.bf16.msra.mxu0 %v7811_v35  ;;  %v10390_v35 = vld [vmem:[#allocation19_spill] sm:$0xff] }
 0xc3f   : > { %7600 = vmatprep.subr.bf16.mxu0 %v7812_v4 }
 0xc42   : > { %7601 = vmatpush3.bf16.msra.mxu0 %v7812_v4 }
 0xc43   : > { %7602 = vmatprep.subr.bf16.mxu0 %v7813_v48 }
 0xc46   : > { %7603 = vmatpush3.bf16.msra.mxu0 %v7813_v48 }
 0xc47   : > { %7604 = vmatprep.subr.bf16.mxu0 %v7814_v50 }
 0xc4a   : > { %v4416_v49 = vpop.xlane.xlu1 %4415  ;;  %7605 = vmatpush3.bf16.msra.mxu0 %v7814_v50 }
 0xc4b   : > { %8020 = vrcp.f32 %v4416_v49  ;;  %7606 = vmatprep.subr.bf16.mxu0 %v7815_v61 }
 0xc4e   : > { %v4422_v27 = vpop.xlane.xlu1 %4421  ;;  %7607 = vmatpush3.bf16.msra.mxu0 %v7815_v61 }
 0xc4f   : > { %8022 = vrcp.f32 %v4422_v27  ;;  %7608 = vmatprep.subr.bf16.mxu0 %v7816_v60 }
 0xc52   : > { %7609 = vmatpush3.bf16.msra.mxu0 %v7816_v60  ;;  %v10391_v60 = vld [vmem:[#allocation23_spill] sm:$0xff] }
 0xc53   : > { %7610 = vmatprep.subr.bf16.mxu0 %v7817_v21 }
 0xc55   : > { %v8021_v20 = vpop.eup %8020 }
 0xc56   : > { %v4440_v37 = vmul.f32 %v8021_v20, %v9438_v28  ;;  %7611 = vmatpush3.bf16.msra.mxu0 %v7817_v21 }
 0xc58   : > { %v4448_v18 = vpack.c.bf16 %v4440_v37, %v4440_v37  ;;  %v7729_v37 = vpop.permute.xlu0 %7728 }
 0xc59   : > { %v8023_v6 = vpop.eup %8022 }
 0xc5a   : > { %7569 = vmatmul.mubr.msk.bf16.vlgmr.msra.gmra.mrb[128].mxu1 %vm1707_vm3, %v4448_v18  ;;  %v4442_v53 = vmul.f32 %v8023_v6, %v9442_v5  ;;  %v7721_v18 = vunpack.i.h.bf16 %v7719_v43  ;;  %v7720_v6 = vunpack.i.l.bf16 %v7719_v43 }
 0xc5b   : > { %7579 = vmatpush3.bf16.msra.mxu1 %v4699_v36  ;;  %7580 = vmatprep.mubr.msk.bf16.mxu1 %vm8188_vm0, %v10382_v1  ;;  %v7731_v36 = vunpack.i.h.bf16 %v7729_v37 }
 0xc5c   : > { %7590 = vmatprep.subr.bf16.mxu1 %v10382_v1  ;;  %v4450_v57 = vpack.c.bf16 %v4442_v53, %v4442_v53  ;;  %v7730_v53 = vunpack.i.l.bf16 %v7729_v37  ;;  %v4934_v9 = vsel %vm1338_vm1, %v8912_v25, %v7721_v18 }
 0xc5e   : > { %v4428_v54 = vpop.xlane.xlu1 %4427 }
 0xc5f   : > { %8024 = vrcp.f32 %v4428_v54 }
 0xc62   : > { %7581 = vmatmul.mubr.msk.bf16.vlgmr.msra.gmra.mrb[132].mxu1 %vm1707_vm3, %v4450_v57  ;;  %v4790_v29 = vpop.permute.xlu1 %4789 }
 0xc63   : > { %v4795_v26 = vsel %vm1807_vm2, %v4790_v29, 0  ;;  %7592 = vmatprep.mubr.msk.bf16.mxu1 %vm8188_vm0, %v10382_v1 }
 0xc64   : > { %7591 = vmatpush3.bf16.msra.mxu1 %v4795_v26 }
 0xc69   : > { %v8025_v58 = vpop.eup %8024 }
 0xc6a   : > { %v4444_v28 = vmul.f32 %v8025_v58, %v9447_v30  ;;  %v4943_v58 = vsel %vm4941_vm4, %v4934_v9, %v7731_v36 }
 0xc6c   : > { %v4452_v32 = vpack.c.bf16 %v4444_v28, %v4444_v28 }
 0xc6e   : > { %7593 = vmatmul.mubr.msk.bf16.vlgmr.msra.gmra.mrb[136].mxu1 %vm1707_vm3, %v4452_v32 }
 0xc6f   : > { %5476 = vmatprep.mubr.bf16.mxu1 %v10385_v23 }
 0xcc7   : > { %v4495_v5 = vpop.f32.mrb[124].mxu0 }
 0xcc8   : > { %v7552_v63 = vpop.f32.mrb[125].mxu0 }
 0xcc9   : > { %v4498_v39 = vpop.f32.mrb[126].mxu0  ;;  %v7724_v63 = vpop.permute.xlu1 %7723 }
 0xcca   : > { %v7553_v7 = vpop.f32.mrb[127].mxu0 }
 0xccb   : > { %v7726_v7 = vunpack.i.h.bf16 %v7724_v63 }
 0xccd   : > { %v7734_v39 = vpop.permute.xlu1 %7733 }
 0xccf   : > { %v4591_v22 = vpop.f32.mrb[128].mxu0 }
 0xcd0   : > { %v7564_v46 = vpop.f32.mrb[129].mxu0 }
 0xcd1   : > { %v4594_v34 = vpop.f32.mrb[130].mxu0  ;;  %v7736_v46 = vunpack.i.h.bf16 %v7734_v39 }
 0xcd2   : > { %v7565_v1 = vpop.f32.mrb[131].mxu0  ;;  %v7735_v34 = vunpack.i.l.bf16 %v7734_v39  ;;  %v8123_v39 = vld [vmem:[#allocation2 + $0x8] sm:$0xff] }
 0xcf8   : > { %v4543_v42 = vpop.f32.mrb[124].mxu1 }
 0xcf9   : > { %v7737_v2 = vpack.i.bf16 %v4543_v42, %v4495_v5  ;;  %v7558_v30 = vpop.f32.mrb[125].mxu1  ;;  %v10389_v42 = vld [vmem:[#allocation21_spill] sm:$0xff] }
 0xcfa   : > { %v4546_v52 = vpop.f32.mrb[126].mxu1  ;;  %v4936_v10 = vsel %vm1338_vm1, %v10389_v42, %v7726_v7 }
 0xcfb   : > { %7738 = vrot.lane.b32.xlu0 %v7737_v2, %s8190_s18  ;;  %v7559_v31 = vpop.f32.mrb[127].mxu1  ;;  %v4945_v4 = vsel %vm4941_vm4, %v4936_v10, %v7736_v46 }
 0xcff   : > { %7748 = vrot.lane.b32.xlu0 %v10386_v45, %s8192_s20 }
 0xd03   : > { %7758 = vrot.lane.b32.xlu0 %v7757_v56, %s8191_s29 }
 0xd04   : > { %v4687_v11 = vpop.f32.mrb[132].mxu0 }
 0xd05   : > { %v7576_v40 = vpop.f32.mrb[133].mxu0 }
 0xd06   : > { %v4690_v62 = vpop.f32.mrb[134].mxu0 }
 0xd07   : > { %v7577_v0 = vpop.f32.mrb[135].mxu0 }
 0xd0c   : > { %v4783_v41 = vpop.f32.mrb[136].mxu0 }
 0xd0d   : > { %v7588_v24 = vpop.f32.mrb[137].mxu0 }
 0xd0e   : > { %v4786_v33 = vpop.f32.mrb[138].mxu0 }
 0xd0f   : > { %v7589_v15 = vpop.f32.mrb[139].mxu0  ;;  %v10392_v33 = vld [vmem:[#allocation20_spill] sm:$0xff] }
 0xd2d   : > { %v4639_v16 = vpop.f32.mrb[128].mxu1 }
 0xd2e   : > { %v7742_v56 = vpack.i.bf16 %v4639_v16, %v4591_v22  ;;  %v7570_v3 = vpop.f32.mrb[129].mxu1  ;;  %v7725_v22 = vunpack.i.l.bf16 %v7724_v63 }
 0xd2f   : > { %v4642_v51 = vpop.f32.mrb[130].mxu1 }
 0xd30   : > { %7743 = vrot.lane.b32.xlu1 %v7742_v56, %s8190_s18  ;;  %v7571_v38 = vpop.f32.mrb[131].mxu1  ;;  %v4935_v2 = vsel %vm1338_vm1, %v10390_v35, %v7725_v22  ;;  %v8124_v22 = vld [vmem:[#allocation2 + $0x10] sm:$0xff] }
 0xd31   : > { %v4944_v31 = vsel %vm4941_vm4, %v4935_v2, %v7735_v34  ;;  %v8125_v34 = vld [vmem:[#allocation2 + $0x18] sm:$0xff] }
 0xd34   : > { %7753 = vrot.lane.b32.xlu1 %v10387_v14, %s8192_s20 }
 0xd35   : > { %v4735_v55 = vpop.f32.mrb[132].mxu1 }
 0xd36   : > { %v7767_v17 = vpack.i.bf16 %v4735_v55, %v4687_v11  ;;  %v7582_v59 = vpop.f32.mrb[133].mxu1 }
 0xd37   : > { %v4738_v19 = vpop.f32.mrb[134].mxu1 }
 0xd38   : > { %7763 = vrot.lane.b32.xlu1 %v7762_v8, %s8191_s29  ;;  %7768 = vrot.lane.b32.xlu0 %v7767_v17, %s8190_s18  ;;  %v7583_v13 = vpop.f32.mrb[135].mxu1  ;;  %v4933_v8 = vsel %vm1338_vm1, %v10388_v12, %v7720_v6  ;;  %v6826_v12 = vld [vmem:[%s10395_s0] ss:$0 sm:$0xff] }
 0xd39   : > { %v4942_v26 = vsel %vm4941_vm4, %v4933_v8, %v7730_v53 }
 0xd41   : > { %v4831_v47 = vpop.f32.mrb[136].mxu1 }
 0xd42   : > { %v7772_v49 = vpack.i.bf16 %v4831_v47, %v4783_v41  ;;  %v7594_v27 = vpop.f32.mrb[137].mxu1 }
 0xd43   : > { %v4834_v20 = vpop.f32.mrb[138].mxu1  ;;  %v10393_v27 = vld [vmem:[#allocation24_spill] sm:$0xff] }
 0xd44   : > { %7773 = vrot.lane.b32.xlu1 %v7772_v49, %s8190_s18  ;;  %v7595_v44 = vpop.f32.mrb[139].mxu1 }
 0xd45   : > { %v10394_v44 = vld [vmem:[#allocation22_spill] sm:$0xff] }
 0xd6d   : > { %v7739_v54 = vpop.permute.xlu0 %7738 }
 0xd6e   : > { %v7741_v57 = vunpack.i.h.bf16 %v7739_v54  ;;  %v7740_v29 = vunpack.i.l.bf16 %v7739_v54 }
 0xd70   : > { %v4951_v28 = vsel %vm4950_vm5, %v4942_v26, %v7740_v29  ;;  %v4952_v32 = vsel %vm4950_vm5, %v4943_v58, %v7741_v57 }
 0xd71   : > { %v4959_v5 = vpack.c.bf16 %v4952_v32, %v4951_v28  ;;  %v7749_v25 = vpop.permute.xlu0 %7748  ;;  %v8122_v32 = vld [vmem:[#allocation2] sm:$0xff] }
 0xd72   : > { %v7751_v40 = vunpack.i.h.bf16 %v7749_v25  ;;  %v7750_v62 = vunpack.i.l.bf16 %v7749_v25 }
 0xd73   : > { %7612 = vmatprep.mubr.bf16.mxu0 %v4959_v5 }
 0xd74   : > { %v4938_v24 = vsel %vm1338_vm1, %v10391_v60, %v7751_v40  ;;  %v4937_v15 = vsel %vm1338_vm1, %v10392_v33, %v7750_v62  ;;  %v8128_v40 = vld [vmem:[#allocation2 + $0x30] sm:$0xff]  ;;  %v7823_v33 = vld [vmem:[%s8389_s4 + $0xc] ss:$16 sps:$4 sm:$0xff]  }
 0xd75   : > { %v7759_v45 = vpop.permute.xlu0 %7758  ;;  %v7820_v60 = vld [vmem:[%s8389_s4 + $0x4] ss:$16 sps:$4 sm:$0xff]   ;;  %5517 = vmatprep.subr.bf16.mxu0 %v7823_v33 }
 0xd76   : > { %v7761_v0 = vunpack.i.h.bf16 %v7759_v45  ;;  %v7760_v61 = vunpack.i.l.bf16 %v7759_v45  ;;  %5444 = vmatprep.subr.bf16.mxu1 %v7820_v60 }
 0xd78   : > { %v4946_v3 = vsel %vm4941_vm4, %v4937_v15, %v7760_v61  ;;  %v4947_v51 = vsel %vm4941_vm4, %v4938_v24, %v7761_v0  ;;  %v8129_v0 = vld [vmem:[#allocation2 + $0x38] sm:$0xff]  ;;  %v7826_v15 = vld [vmem:[%s8389_s4 + $0x24] ss:$16 sps:$4 sm:$0xff]  }
 0xd79   : > { %v7821_v24 = vld [vmem:[%s8389_s4 + $0x8] ss:$16 sps:$4 sm:$0xff]  }
 0xda2   : > { %v7744_v1 = vpop.permute.xlu1 %7743 }
 0xda3   : > { %v7746_v30 = vunpack.i.h.bf16 %v7744_v1  ;;  %v7745_v52 = vunpack.i.l.bf16 %v7744_v1 }
 0xda5   : > { %v4954_v48 = vsel %vm4950_vm5, %v4945_v4, %v7746_v30  ;;  %v4953_v11 = vsel %vm4950_vm5, %v4944_v31, %v7745_v52  ;;  %v8126_v31 = vld [vmem:[#allocation2 + $0x20] sm:$0xff] }
 0xda6   : > { %v4960_v50 = vpack.c.bf16 %v4954_v48, %v4953_v11  ;;  %v7754_v21 = vpop.permute.xlu1 %7753  ;;  %v8127_v11 = vld [vmem:[#allocation2 + $0x28] sm:$0xff] }
 0xda7   : > { %v7756_v59 = vunpack.i.h.bf16 %v7754_v21  ;;  %v7755_v19 = vunpack.i.l.bf16 %v7754_v21  ;;  %v7829_v21 = vld [vmem:[%s8389_s4 + $0x2c] ss:$16 sps:$4 sm:$0xff]  }
 0xda8   : > { %7613 = vmatmul.mubr.bf16.vlgmr.msra.gmra.mrb[140].mxu0 %v4960_v50 }
 0xda9   : > { %v4940_v20 = vsel %vm1338_vm1, %v10393_v27, %v7756_v59  ;;  %v4939_v43 = vsel %vm1338_vm1, %v10394_v44, %v7755_v19  ;;  %5518 = vmatpush1.bf16.msra.mxu0 %v7821_v24 }
 0xdaa   : > { %v7769_v41 = vpop.permute.xlu0 %7768  ;;  %v7764_v17 = vpop.permute.xlu1 %7763  ;;  %5519 = vmatprep.subr.bf16.mxu0 %v7829_v21 }
 0xdab   : > { %v7771_v16 = vunpack.i.h.bf16 %v7769_v41  ;;  %v7770_v56 = vunpack.i.l.bf16 %v7769_v41  ;;  %v7766_v13 = vunpack.i.h.bf16 %v7764_v17  ;;  %v7765_v47 = vunpack.i.l.bf16 %v7764_v17  ;;  %v7818_v41 = vld [vmem:[%s8389_s4] ss:$16 sps:$4 sm:$0xff]  }
 0xdac   : > { %5445 = vmatpush1.bf16.msra.mxu1 %v7818_v41  ;;  %v7863_v41 = vld [vmem:[%s8389_s4 + $0xe8] ss:$16 sps:$4 sm:$0xff]  }
 0xdad   : > { %v4955_v38 = vsel %vm4950_vm5, %v4946_v3, %v7770_v56  ;;  %v4956_v14 = vsel %vm4950_vm5, %v4947_v51, %v7771_v16  ;;  %v4948_v6 = vsel %vm4941_vm4, %v4939_v43, %v7765_v47  ;;  %v4949_v36 = vsel %vm4941_vm4, %v4940_v20, %v7766_v13  ;;  %v7824_v16 = vld [vmem:[%s8389_s4 + $0x20] ss:$16 sps:$4 sm:$0xff]   ;;  %5446 = vmatprep.subr.bf16.mxu1 %v7826_v15  ;;  %v7827_v56 = vld [vmem:[%s8389_s4 + $0x28] ss:$16 sps:$4 sm:$0xff]  }
 0xdae   : > { %v4961_v55 = vpack.c.bf16 %v4956_v14, %v4955_v38  ;;  %5520 = vmatpush1.bf16.msra.mxu0 %v7827_v56 }
 0xdb0   : > { %7616 = vmatprep.mubr.bf16.mxu0 %v4961_v55  ;;  %5447 = vmatpush1.bf16.msra.mxu1 %v7824_v16 }
 0xdb6   : > { %v7774_v49 = vpop.permute.xlu1 %7773 }
 0xdb7   : > { %v7776_v37 = vunpack.i.h.bf16 %v7774_v49  ;;  %v7775_v18 = vunpack.i.l.bf16 %v7774_v49 }
 0xdb9   : > { %v4957_v53 = vsel %vm4950_vm5, %v4948_v6, %v7775_v18  ;;  %v4958_v54 = vsel %vm4950_vm5, %v4949_v36, %v7776_v37  ;;  %v7832_v36 = vld [vmem:[%s8389_s4 + $0x44] ss:$16 sps:$4 sm:$0xff]  }
 0xdba   : > { %v4962_v9 = vpack.c.bf16 %v4958_v54, %v4957_v53  ;;  %v7835_v53 = vld [vmem:[%s8389_s4 + $0x4c] ss:$16 sps:$4 sm:$0xff]   ;;  %5448 = vmatprep.subr.bf16.mxu1 %v7832_v36 }
 0xdbb   : > { %5521 = vmatprep.subr.bf16.mxu0 %v7835_v53 }
 0xdbc   : > { %7617 = vmatmul.mubr.bf16.gmra.mrb[144].mxu0 %v4962_v9  ;;  %v7830_v9 = vld [vmem:[%s8389_s4 + $0x40] ss:$16 sps:$4 sm:$0xff]  }
 0xdbd   : > { %5549 = vmatprep.mubr.bf16.mxu0 %v10385_v23  ;;  %5449 = vmatpush1.bf16.msra.mxu1 %v7830_v9 }
 0xe7b   : > { %v7614_v8 = vpop.f32.mrb[140].mxu0 }
 0xe7c   : > { %v5068_v57 = vpop.f32.mrb[141].mxu0  ;;  %v5077_v28 = vadd.f32 %v7614_v8, %v6826_v12 }
 0xe7d   : > { %v5069_v29 = vadd.f32 %v6826_v12, %v5068_v57  ;;  %v7615_v26 = vpop.f32.mrb[142].mxu0 }
 0xe7e   : > { %v5071_v58 = vpop.f32.mrb[143].mxu0  ;;  %v5101_v25 = vadd.f32 %v8124_v22, %v5077_v28  ;;  %v5080_v46 = vadd.f32 %v7615_v26, %v6826_v12 }
 0xe7f   : > { %v5099_v5 = vadd.f32 %v8122_v32, %v5069_v29  ;;  %v5072_v63 = vadd.f32 %v6826_v12, %v5071_v58  ;;  %v7838_v32 = vld [vmem:[%s8389_s4 + $0x64] ss:$16 sps:$4 sm:$0xff]  }
 0xe80   : > { %v5102_v1 = vadd.f32 %v8125_v34, %v5080_v46  ;;  %5450 = vmatprep.subr.bf16.mxu1 %v7838_v32 }
 0xe81   : > { %v5100_v7 = vadd.f32 %v8123_v39, %v5072_v63  ;;  %5109 = vadd.xlane.f32.xlu0 %v5099_v5  ;;  %v7836_v39 = vld [vmem:[%s8389_s4 + $0x60] ss:$16 sps:$4 sm:$0xff]  }
 0xe82   : > { %5451 = vmatpush1.bf16.msra.mxu1 %v7836_v39 }
 0xe83   : > { %5111 = vadd.xlane.f32.xlu1 %v5100_v7 }
 0xe85   : > { %5113 = vadd.xlane.f32.xlu0 %v5101_v25 }
 0xe89   : > { %5115 = vadd.xlane.f32.xlu0 %v5102_v1 }
 0xe8f   : > { %v7618_v42 = vpop.f32.mrb[144].mxu0 }
 0xe90   : > { %v5084_v10 = vpop.f32.mrb[145].mxu0  ;;  %v5093_v52 = vadd.f32 %v7618_v42, %v6826_v12  ;;  %v7844_v42 = vld [vmem:[%s8389_s4 + $0x84] ss:$16 sps:$4 sm:$0xff]  }
 0xe91   : > { %v5085_v35 = vadd.f32 %v6826_v12, %v5084_v10  ;;  %v7619_v2 = vpop.f32.mrb[146].mxu0  ;;  %v7847_v10 = vld [vmem:[%s8389_s4 + $0x8c] ss:$16 sps:$4 sm:$0xff]   ;;  %5452 = vmatprep.subr.bf16.mxu1 %v7844_v42 }
 0xe92   : > { %v5087_v30 = vpop.f32.mrb[147].mxu0  ;;  %v5096_v48 = vadd.f32 %v7619_v2, %v6826_v12  ;;  %v9566_v62 = vadd.f32 %v8128_v40, %v5093_v52  ;;  %v7845_v2 = vld [vmem:[%s8389_s4 + $0x88] ss:$16 sps:$4 sm:$0xff]   ;;  %v7850_v52 = vld [vmem:[%s8389_s4 + $0xa4] ss:$16 sps:$4 sm:$0xff]  }
 0xe93   : > { %v5103_v4 = vadd.f32 %v8126_v31, %v5085_v35  ;;  %v5088_v45 = vadd.f32 %v6826_v12, %v5087_v30  ;;  %v7833_v12 = vld [vmem:[%s8389_s4 + $0x48] ss:$16 sps:$4 sm:$0xff]   ;;  %v7842_v35 = vld [vmem:[%s8389_s4 + $0x80] ss:$16 sps:$4 sm:$0xff]   ;;  %v7853_v31 = vld [vmem:[%s8389_s4 + $0xac] ss:$16 sps:$4 sm:$0xff]  }
 0xe94   : > { %v9568_v61 = vadd.f32 %v8129_v0, %v5096_v48  ;;  %5522 = vmatpush1.bf16.msra.mxu0 %v7833_v12  ;;  %5453 = vmatpush1.bf16.msra.mxu1 %v7842_v35  ;;  %v7856_v48 = vld [vmem:[%s8389_s4 + $0xc4] ss:$16 sps:$4 sm:$0xff]   ;;  %v7857_v40 = vld [vmem:[%s8389_s4 + $0xc8] ss:$16 sps:$4 sm:$0xff]   ;;  %v7865_v0 = vld [vmem:[%s8389_s4 + $0xec] ss:$16 sps:$4 sm:$0xff]  }
 0xe95   : > { %v5104_v50 = vadd.f32 %v8127_v11, %v5088_v45  ;;  %5117 = vadd.xlane.f32.xlu0 %v5103_v4  ;;  %v7851_v45 = vld [vmem:[%s8389_s4 + $0xa8] ss:$16 sps:$4 sm:$0xff]   ;;  %5454 = vmatprep.subr.bf16.mxu1 %v7850_v52  ;;  %v7859_v11 = vld [vmem:[%s8389_s4 + $0xcc] ss:$16 sps:$4 sm:$0xff]  }
 0xe97   : > { %5119 = vadd.xlane.f32.xlu1 %v5104_v50 }
 0xe99   : > { %5121 = vadd.xlane.f32.xlu0 %v9566_v62 }
 0xe9b   : > { %5123 = vadd.xlane.f32.xlu1 %v9568_v61 }
 0xf0e   : > { %v5110_v3 = vpop.xlane.xlu0 %5109 }
 0xf0f   : > { %v5126_v51 = vmul.f32 0.0078125, %v5110_v3 }
 0xf10   : > { %v5112_v38 = vpop.xlane.xlu1 %5111 }
 0xf11   : > { %v9580_v14 = vsub.f32 %v5099_v5, %v5126_v51  ;;  %v5127_v55 = vmul.f32 0.0078125, %v5112_v38  ;;  %v7841_v5 = vld [vmem:[%s8389_s4 + $0x6c] ss:$16 sps:$4 sm:$0xff]  }
 0xf12   : > { %v5114_v17 = vpop.xlane.xlu0 %5113  ;;  %5523 = vmatprep.subr.bf16.mxu0 %v7841_v5 }
 0xf13   : > { %v9582_v59 = vsub.f32 %v5100_v7, %v5127_v55  ;;  %v5128_v19 = vmul.f32 0.0078125, %v5114_v17  ;;  %v5142_v13 = vmul.f32 %v9580_v14, %v9580_v14  ;;  %v7839_v7 = vld [vmem:[%s8389_s4 + $0x68] ss:$16 sps:$4 sm:$0xff]  }
 0xf14   : > { %5524 = vmatpush1.bf16.msra.mxu0 %v7839_v7 }
 0xf15   : > { %v9586_v47 = vsub.f32 %v5101_v25, %v5128_v19  ;;  %5150 = vadd.xlane.f32.xlu0 %v5142_v13  ;;  %v5143_v49 = vmul.f32 %v9582_v59, %v9582_v59  ;;  %5525 = vmatprep.subr.bf16.mxu0 %v7847_v10  ;;  %v6835_v13 = vld [vmem:[%s10396_s19] ss:$0 sm:$0xff] }
 0xf16   : > { %v5116_v27 = vpop.xlane.xlu0 %5115 }
 0xf17   : > { %v5129_v20 = vmul.f32 0.0078125, %v5116_v27  ;;  %5152 = vadd.xlane.f32.xlu1 %v5143_v49  ;;  %v5144_v44 = vmul.f32 %v9586_v47, %v9586_v47 }
 0xf18   : > { %5526 = vmatpush1.bf16.msra.mxu0 %v7845_v2 }
 0xf19   : > { %v9592_v43 = vsub.f32 %v5102_v1, %v5129_v20  ;;  %5154 = vadd.xlane.f32.xlu0 %v5144_v44  ;;  %5527 = vmatprep.subr.bf16.mxu0 %v7853_v31 }
 0xf1b   : > { %v5145_v37 = vmul.f32 %v9592_v43, %v9592_v43 }
 0xf1c   : > { %5528 = vmatpush1.bf16.msra.mxu0 %v7851_v45 }
 0xf1d   : > { %5156 = vadd.xlane.f32.xlu1 %v5145_v37  ;;  %5529 = vmatprep.subr.bf16.mxu0 %v7859_v11 }
 0xf20   : > { %5530 = vmatpush1.bf16.msra.mxu0 %v7857_v40 }
 0xf21   : > { %5531 = vmatprep.subr.bf16.mxu0 %v7865_v0 }
 0xf22   : > { %v5118_v18 = vpop.xlane.xlu0 %5117 }
 0xf23   : > { %v5130_v6 = vmul.f32 0.0078125, %v5118_v18  ;;  %v6836_v18 = vld [vmem:[%s10397_s25] ss:$0 sm:$0xff] }
 0xf24   : > { %v5120_v54 = vpop.xlane.xlu1 %5119  ;;  %5532 = vmatpush1.bf16.msra.mxu0 %v7863_v41  ;;  %v7866_v41 = vld [vmem:[%s8400_s23 + $0x40] sm:$0xff]  }
 0xf25   : > { %v9600_v8 = vsub.f32 %v5103_v4, %v5130_v6  ;;  %v5131_v57 = vmul.f32 0.0078125, %v5120_v54  ;;  %v7848_v4 = vld [vmem:[%s8389_s4 + $0xa0] ss:$16 sps:$4 sm:$0xff]  }
 0xf26   : > { %v5122_v29 = vpop.xlane.xlu0 %5121  ;;  %5455 = vmatpush1.bf16.msra.mxu1 %v7848_v4 }
 0xf27   : > { %v9602_v26 = vsub.f32 %v5104_v50, %v5131_v57  ;;  %v5132_v58 = vmul.f32 0.0078125, %v5122_v29  ;;  %v5146_v28 = vmul.f32 %v9600_v8, %v9600_v8  ;;  %v7854_v50 = vld [vmem:[%s8389_s4 + $0xc0] ss:$16 sps:$4 sm:$0xff]   ;;  %5456 = vmatprep.subr.bf16.mxu1 %v7856_v48 }
 0xf28   : > { %v5124_v63 = vpop.xlane.xlu1 %5123 }
 0xf29   : > { %v9611_v22 = vsub.f32 %v9566_v62, %v5132_v58  ;;  %v5133_v25 = vmul.f32 0.0078125, %v5124_v63  ;;  %5158 = vadd.xlane.f32.xlu0 %v5146_v28  ;;  %v5147_v46 = vmul.f32 %v9602_v26, %v9602_v26  ;;  %v7862_v62 = vld [vmem:[%s8389_s4 + $0xe4] ss:$16 sps:$4 sm:$0xff]  }
 0xf2a   : > { %5457 = vmatpush1.bf16.msra.mxu1 %v7854_v50 }
 0xf2b   : > { %v9616_v34 = vsub.f32 %v9568_v61, %v5133_v25  ;;  %5160 = vadd.xlane.f32.xlu1 %v5147_v46  ;;  %v5148_v1 = vmul.f32 %v9611_v22, %v9611_v22  ;;  %v7860_v61 = vld [vmem:[%s8389_s4 + $0xe0] ss:$16 sps:$4 sm:$0xff]   ;;  %5458 = vmatprep.subr.bf16.mxu1 %v7862_v62 }
 0xf2d   : > { %5162 = vadd.xlane.f32.xlu0 %v5148_v1  ;;  %v5149_v30 = vmul.f32 %v9616_v34, %v9616_v34 }
 0xf2e   : > { %5459 = vmatpush1.bf16.msra.mxu1 %v7860_v61 }
 0xf2f   : > { %5164 = vadd.xlane.f32.xlu1 %v5149_v30  ;;  %7108 = vmatprep.subr.bf16.mxu1 %v7866_v41 }
 0xfa2   : > { %v5151_v60 = vpop.xlane.xlu0 %5150 }
 0xfa3   : > { %v5166_v24 = vmul.f32 0.0078125, %v5151_v60  ;;  %v7867_v60 = vld [vmem:[%s8400_s23 + $0xc0] sm:$0xff]  }
 0xfa4   : > { %v5153_v33 = vpop.xlane.xlu1 %5152  ;;  %7148 = vmatprep.subr.bf16.mxu0 %v7867_v60 }
 0xfa5   : > { %v5174_v15 = vadd.f32 1e-12, %v5166_v24  ;;  %v5167_v21 = vmul.f32 0.0078125, %v5153_v33  ;;  %v7868_v24 = vld [vmem:[%s8400_s23] sm:$0xff]  }
 0xfa6   : > { %v5155_v16 = vpop.xlane.xlu0 %5154  ;;  %v9690_v33 = vld [vmem:[%s8400_s23 + $0x80] sm:$0xff]  }
 0xfa7   : > { %8026 = vrsqrt.f32 %v5174_v15  ;;  %v5175_v56 = vadd.f32 1e-12, %v5167_v21  ;;  %v5168_v3 = vmul.f32 0.0078125, %v5155_v16  ;;  %v9695_v15 = vld [vmem:[%s8400_s23 + $0xc8] sm:$0xff]  }
 0xfa8   : > { %v7872_v21 = vld [vmem:[%s8400_s23 + $0x8] sm:$0xff]  }
 0xfa9   : > { %8028 = vrsqrt.f32 %v5175_v56  ;;  %v5176_v51 = vadd.f32 1e-12, %v5168_v3  ;;  %v9700_v16 = vld [vmem:[%s8400_s23 + $0x88] sm:$0xff]   ;;  %v7874_v56 = vld [vmem:[%s8400_s23 + $0x50] sm:$0xff]  }
 0xfaa   : > { %v5157_v38 = vpop.xlane.xlu1 %5156  ;;  %v9705_v3 = vld [vmem:[%s8400_s23 + $0xd0] sm:$0xff]  }
 0xfab   : > { %8030 = vrsqrt.f32 %v5176_v51  ;;  %v5169_v55 = vmul.f32 0.0078125, %v5157_v38  ;;  %10406 = vst [vmem:[#allocation26_spill] sm:$0xff] %v9705_v3  ;;  %v7876_v51 = vld [vmem:[%s8400_s23 + $0x10] sm:$0xff]  }
 0xfac   : > { %v9709_v38 = vld [vmem:[%s8400_s23 + $0x90] sm:$0xff]  }
 0xfad   : > { %v5177_v17 = vadd.f32 1e-12, %v5169_v55  ;;  %10407 = vst [vmem:[#allocation27_spill] sm:$0xff] %v9709_v38  ;;  %v7878_v55 = vld [vmem:[%s8400_s23 + $0x58] sm:$0xff]  }
 0xfaf   : > { %8032 = vrsqrt.f32 %v5177_v17  ;;  %v9715_v17 = vld [vmem:[%s8400_s23 + $0xd8] sm:$0xff]  }
 0xfb0   : > { %10408 = vst [vmem:[#allocation28_spill] sm:$0xff] %v9715_v17 }
 0xfb1   : > { %v8027_v19 = vpop.eup %8026 }
 0xfb2   : > { %v5190_v49 = vmul.f32 %v8027_v19, %v9580_v14  ;;  %v7880_v19 = vld [vmem:[%s8400_s23 + $0x18] sm:$0xff]  }
 0xfb3   : > { %v8029_v27 = vpop.eup %8028 }
 0xfb4   : > { %v5191_v20 = vmul.f32 %v8029_v27, %v9582_v59  ;;  %v5204_v44 = vmul.f32 %v6835_v13, %v5190_v49  ;;  %v7882_v49 = vld [vmem:[%s8400_s23 + $0x60] sm:$0xff]  }
 0xfb5   : > { %v8031_v37 = vpop.eup %8030  ;;  %v9725_v27 = vld [vmem:[%s8400_s23 + $0xe0] sm:$0xff]  }
 0xfb6   : > { %v5159_v6 = vpop.xlane.xlu0 %5158  ;;  %v5205_v36 = vmul.f32 %v6835_v13, %v5191_v20  ;;  %v9650_v9 = vadd.f32 %v6836_v18, %v5204_v44  ;;  %v5192_v14 = vmul.f32 %v8031_v37, %v9586_v47  ;;  %10410 = vst [vmem:[#allocation30_spill] sm:$0xff] %v9725_v27  ;;  %v7884_v20 = vld [vmem:[%s8400_s23 + $0x20] sm:$0xff]   ;;  %v7886_v37 = vld [vmem:[%s8400_s23 + $0x68] sm:$0xff]  }
 0xfb7   : > { %v5170_v53 = vmul.f32 0.0078125, %v5159_v6  ;;  %v9729_v44 = vld [vmem:[%s8400_s23 + $0xa0] sm:$0xff]   ;;  %v7888_v6 = vld [vmem:[%s8400_s23 + $0x28] sm:$0xff]  }
 0xfb8   : > { %v5161_v54 = vpop.xlane.xlu1 %5160  ;;  %10398 = vst [vmem:[#allocation18_spill] sm:$0xff] %v9650_v9  ;;  %v9652_v12 = vadd.f32 %v6836_v18, %v5205_v36  ;;  %v5206_v7 = vmul.f32 %v6835_v13, %v5192_v14  ;;  %10411 = vst [vmem:[#allocation31_spill] sm:$0xff] %v9729_v44  ;;  %v9739_v36 = vld [vmem:[%s8400_s23 + $0xa8] sm:$0xff]   ;;  %v7892_v14 = vld [vmem:[%s8400_s23 + $0x30] sm:$0xff]  }
 0xfb9   : > { %v8033_v57 = vpop.eup %8032  ;;  %v5178_v29 = vadd.f32 1e-12, %v5170_v53  ;;  %v5171_v59 = vmul.f32 0.0078125, %v5161_v54  ;;  %10413 = vst [vmem:[#allocation33_spill] sm:$0xff] %v9739_v36  ;;  %v7890_v53 = vld [vmem:[%s8400_s23 + $0x70] sm:$0xff]  }
 0xfba   : > { %10399 = vst [vmem:[#allocation21_spill] sm:$0xff] %v9652_v12  ;;  %v5163_v58 = vpop.xlane.xlu0 %5162  ;;  %v5226_v28 = vpack.c.bf16 %v9652_v12, %v9650_v9  ;;  %v5193_v32 = vmul.f32 %v8033_v57, %v9592_v43  ;;  %v9662_v43 = vadd.f32 %v6836_v18, %v5206_v7  ;;  %v9745_v54 = vld [vmem:[%s8400_s23 + $0xf0] sm:$0xff]  }
 0xfbb   : > { %8034 = vrsqrt.f32 %v5178_v29  ;;  %v5179_v5 = vadd.f32 1e-12, %v5171_v59  ;;  %v5172_v63 = vmul.f32 0.0078125, %v5163_v58  ;;  %10414 = vst [vmem:[#allocation34_spill] sm:$0xff] %v9745_v54  ;;  %v9750_v57 = vld [vmem:[%s8400_s23 + $0xb0] sm:$0xff]   ;;  %v7894_v29 = vld [vmem:[%s8400_s23 + $0x78] sm:$0xff]  }
 0xfbc   : > { %v5165_v39 = vpop.xlane.xlu1 %5164  ;;  %5477 = vmatmul.mubr.bf16.vlgmr.msra.gmra.mrb[140].mxu1 %v5226_v28  ;;  %5550 = vmatmul.mubr.bf16.vlgmr.msra.gmra.mrb[148].mxu0 %v5226_v28  ;;  %v5207_v25 = vmul.f32 %v6835_v13, %v5193_v32  ;;  %10401 = vst [vmem:[#allocation23_spill] sm:$0xff] %v9662_v43  ;;  %10415 = vst [vmem:[#allocation35_spill] sm:$0xff] %v9750_v57  ;;  %v9755_v59 = vld [vmem:[%s8400_s23 + $0xf8] sm:$0xff]   ;;  %v5262_v32 = vld [vmem:[%s8395_s3] sm:$0xf] }
 0xfbd   : > { %8036 = vrsqrt.f32 %v5179_v5  ;;  %v5180_v46 = vadd.f32 1e-12, %v5172_v63  ;;  %v5173_v47 = vmul.f32 0.0078125, %v5165_v39  ;;  %5486 = vmatprep.mubr.bf16.mxu1 %v10385_v23  ;;  %5559 = vmatprep.mubr.bf16.mxu0 %v10385_v23  ;;  %10416 = vst [vmem:[#allocation36_spill] sm:$0xff] %v9755_v59  ;;  %v7896_v58 = vld [vmem:[%s8400_s23 + $0x38] sm:$0xff]   ;;  %v10418_v5 = vld [vmem:[#allocation16_spill] sm:$0xff] }
 0xfbe   : > { %v9660_v1 = vadd.f32 %v6836_v18, %v5207_v25  ;;  %7109 = vmatpush3.bf16.msra.mxu1 %v7868_v24  ;;  %7149 = vmatpush3.bf16.msra.mxu0 %v9690_v33  ;;  %v9759_v28 = vld [vmem:[%s8400_s23 + $0xb8] sm:$0xff]   ;;  %v5278_v63 = vsub.s32 3, %v10418_v5  ;;  %v10419_v39 = vld [vmem:[#allocation17_spill] sm:$0xff]  ;;  %v10420_v25 = vsub.s32 2, %v10418_v5 }
 0xfbf   : > { %8038 = vrsqrt.f32 %v5180_v46  ;;  %v5181_v42 = vadd.f32 1e-12, %v5173_v47  ;;  %7150 = vmatprep.subr.bf16.mxu0 %v9695_v15  ;;  %10417 = vst [vmem:[#allocation37_spill] sm:$0xff] %v9759_v28  ;;  %v9766_v7 = vrot.slane %v5262_v32, %v10419_v39  ;;  %v10421_v47 = vsub.s32 1, %v10418_v5 }
 0xfc0   : > { %10400 = vst [vmem:[#allocation19_spill] sm:$0xff] %v9660_v1  ;;  %v5227_v10 = vpack.c.bf16 %v9660_v1, %v9662_v43  ;;  %v9770_v46 = vrot.slane %v5262_v32, %v10420_v25 }
 0xfc1   : > { %8040 = vrsqrt.f32 %v5181_v42  ;;  %v9774_v42 = vrot.slane %v5262_v32, %v10421_v47 }
 0xfc2   : > { %7151 = vmatpush3.bf16.msra.mxu0 %v9700_v16 }
 0xfc3   : > { %7152 = vmatprep.subr.bf16.mxu0 %v9705_v3 }
 0xfc4   : > { %5487 = vmatmul.mubr.bf16.gmra.mrb[144].mxu1 %v5227_v10  ;;  %5560 = vmatmul.mubr.bf16.gmra.mrb[152].mxu0 %v5227_v10  ;;  %v9776_v10 = vrot.slane %v5262_v32, %v5278_v63 }
 0xfc5   : > { %v8035_v35 = vpop.eup %8034  ;;  %5496 = vmatprep.mubr.bf16.mxu1 %v10385_v23  ;;  %5569 = vmatprep.mubr.bf16.mxu0 %v10385_v23 }
 0xfc6   : > { %v5194_v2 = vmul.f32 %v8035_v35, %v9600_v8  ;;  %7153 = vmatpush3.bf16.msra.mxu0 %v9709_v38 }
 0xfc7   : > { %v8037_v30 = vpop.eup %8036  ;;  %7154 = vmatprep.subr.bf16.mxu0 %v9715_v17 }
 0xfc8   : > { %v5195_v52 = vmul.f32 %v8037_v30, %v9602_v26  ;;  %v5208_v31 = vmul.f32 %v6835_v13, %v5194_v2 }
 0xfc9   : > { %v8039_v4 = vpop.eup %8038 }
 0xfca   : > { %v5209_v45 = vmul.f32 %v6835_v13, %v5195_v52  ;;  %v9670_v11 = vadd.f32 %v6836_v18, %v5208_v31  ;;  %v5196_v40 = vmul.f32 %v8039_v4, %v9611_v22 }
 0xfcb   : > { %v8041_v48 = vpop.eup %8040 }
 0xfcc   : > { %10402 = vst [vmem:[#allocation20_spill] sm:$0xff] %v9670_v11  ;;  %v9672_v50 = vadd.f32 %v6836_v18, %v5209_v45  ;;  %v5197_v62 = vmul.f32 %v8041_v48, %v9616_v34  ;;  %v5210_v0 = vmul.f32 %v6835_v13, %v5196_v40 }
 0xfce   : > { %10403 = vst [vmem:[#allocation24_spill] sm:$0xff] %v9672_v50  ;;  %v5228_v8 = vpack.c.bf16 %v9672_v50, %v9670_v11  ;;  %v5211_v26 = vmul.f32 %v6835_v13, %v5197_v62  ;;  %v9682_v22 = vadd.f32 %v6836_v18, %v5210_v0  ;;  %v9719_v13 = vld [vmem:[%s8400_s23 + $0x98] sm:$0xff]  }
 0xfcf   : > { %10409 = vst [vmem:[#allocation29_spill] sm:$0xff] %v9719_v13  ;;  %7155 = vmatpush3.bf16.msra.mxu0 %v9719_v13 }
 0xfd0   : > { %5497 = vmatmul.mubr.bf16.gmra.mrb[148].mxu1 %v5228_v8  ;;  %5570 = vmatmul.mubr.bf16.gmra.mrb[156].mxu0 %v5228_v8  ;;  %v9680_v61 = vadd.f32 %v6836_v18, %v5211_v26  ;;  %10405 = vst [vmem:[#allocation25_spill] sm:$0xff] %v9682_v22  ;;  %v9735_v18 = vld [vmem:[%s8400_s23 + $0xe8] sm:$0xff]  }
 0xfd1   : > { %5506 = vmatprep.mubr.bf16.mxu1 %v10385_v23  ;;  %5579 = vmatprep.mubr.bf16.mxu0 %v10385_v23  ;;  %v7870_v23 = vld [vmem:[%s8400_s23 + $0x48] sm:$0xff]   ;;  %10412 = vst [vmem:[#allocation32_spill] sm:$0xff] %v9735_v18 }
 0xfd2   : > { %10404 = vst [vmem:[#allocation22_spill] sm:$0xff] %v9680_v61  ;;  %v5229_v34 = vpack.c.bf16 %v9680_v61, %v9682_v22  ;;  %7110 = vmatprep.subr.bf16.mxu1 %v7870_v23  ;;  %7156 = vmatprep.subr.bf16.mxu0 %v9725_v27 }
 0xfd3   : > { %7111 = vmatpush3.bf16.msra.mxu1 %v7872_v21  ;;  %7157 = vmatpush3.bf16.msra.mxu0 %v9729_v44 }
 0xfd4   : > { %7112 = vmatprep.subr.bf16.mxu1 %v7874_v56  ;;  %7158 = vmatprep.subr.bf16.mxu0 %v9735_v18 }
 0xfd7   : > { %7113 = vmatpush3.bf16.msra.mxu1 %v7876_v51  ;;  %7159 = vmatpush3.bf16.msra.mxu0 %v9739_v36 }
 0xfd8   : > { %5507 = vmatmul.mubr.bf16.gmra.mrb[152].mxu1 %v5229_v34  ;;  %5580 = vmatmul.mubr.bf16.gmra.mrb[160].mxu0 %v5229_v34 }
 0xfd9   : > { %7114 = vmatprep.subr.bf16.mxu1 %v7878_v55  ;;  %7160 = vmatprep.subr.bf16.mxu0 %v9745_v54 }
 0xfdb   : > { %7115 = vmatpush3.bf16.msra.mxu1 %v7880_v19  ;;  %7161 = vmatpush3.bf16.msra.mxu0 %v9750_v57 }
 0xfdc   : > { %7116 = vmatprep.subr.bf16.mxu1 %v7882_v49  ;;  %7162 = vmatprep.subr.bf16.mxu0 %v9755_v59 }
 0xfdf   : > { %7117 = vmatpush3.bf16.msra.mxu1 %v7884_v20  ;;  %7163 = vmatpush3.bf16.msra.mxu0 %v9759_v28 }
 0xfe0   : > { %7118 = vmatprep.subr.bf16.mxu1 %v7886_v37 }
 0xfe3   : > { %7119 = vmatpush3.bf16.msra.mxu1 %v7888_v6 }
 0xfe4   : > { %7120 = vmatprep.subr.bf16.mxu1 %v7890_v53 }
 0xfe7   : > { %7121 = vmatpush3.bf16.msra.mxu1 %v7892_v14 }
 0xfe8   : > { %7122 = vmatprep.subr.bf16.mxu1 %v7894_v29 }
 0xfeb   : > { %7123 = vmatpush3.bf16.msra.mxu1 %v7896_v58 }
 0xfec   : > { %7620 = vmatprep.subr.bf16.mxu1 %v7867_v60 }
0x108f   : > { %v5478_v35 = vpop.f32.mrb[140].mxu1  ;;  %v5551_v2 = vpop.f32.mrb[148].mxu0 }
0x1090   : > { %v9779_v30 = vadd.f32 %v5478_v35, %v9766_v7  ;;  %v9782_v52 = vadd.f32 %v5551_v2, %v9770_v46  ;;  %v5480_v31 = vpop.f32.mrb[141].mxu1  ;;  %v5553_v4 = vpop.f32.mrb[149].mxu0 }
0x1091   : > { %v9785_v45 = vadd.f32 %v5480_v31, %v9774_v42  ;;  %v9788_v48 = vadd.f32 %v5553_v4, %v9776_v10  ;;  %v5482_v40 = vpop.f32.mrb[142].mxu1  ;;  %v5555_v62 = vpop.f32.mrb[150].mxu0 }
0x1092   : > { %v5590_v8 = vmul.f32 %v9779_v30, %v9779_v30  ;;  %v5592_v26 = vmul.f32 %v9782_v52, %v9782_v52  ;;  %v9795_v0 = vadd.f32 %v5482_v40, %v9766_v7  ;;  %v9798_v34 = vadd.f32 %v5555_v62, %v9770_v46  ;;  %v5484_v41 = vpop.f32.mrb[143].mxu1  ;;  %v5557_v60 = vpop.f32.mrb[151].mxu0 }
0x1093   : > { %v5591_v24 = vmul.f32 %v9785_v45, %v9785_v45  ;;  %v5593_v23 = vmul.f32 %v9788_v48, %v9788_v48  ;;  %v9805_v21 = vadd.f32 %v5484_v41, %v9774_v42  ;;  %v9808_v56 = vadd.f32 %v5557_v60, %v9776_v10 }
0x1094   : > { %v5622_v51 = vmul.f32 %v5590_v8, %v9779_v30  ;;  %v5624_v55 = vmul.f32 %v5592_v26, %v9782_v52  ;;  %v5594_v19 = vmul.f32 %v9795_v0, %v9795_v0  ;;  %v5596_v49 = vmul.f32 %v9798_v34, %v9798_v34 }
0x1095   : > { %v5623_v20 = vmul.f32 %v5591_v24, %v9785_v45  ;;  %v5625_v37 = vmul.f32 %v5593_v23, %v9788_v48  ;;  %v5595_v6 = vmul.f32 %v9805_v21, %v9805_v21  ;;  %v5597_v53 = vmul.f32 %v9808_v56, %v9808_v56 }
0x1096   : > { %v5654_v14 = vmul.f32 0.044715, %v5622_v51  ;;  %v5656_v29 = vmul.f32 0.044715, %v5624_v55  ;;  %v5626_v58 = vmul.f32 %v5594_v19, %v9795_v0  ;;  %v5628_v32 = vmul.f32 %v5596_v49, %v9798_v34 }
0x1097   : > { %v5655_v5 = vmul.f32 0.044715, %v5623_v20  ;;  %v5657_v63 = vmul.f32 0.044715, %v5625_v37  ;;  %v5627_v39 = vmul.f32 %v5595_v6, %v9805_v21  ;;  %v5629_v25 = vmul.f32 %v5597_v53, %v9808_v56  ;;  %v5488_v47 = vpop.f32.mrb[144].mxu1  ;;  %v5561_v35 = vpop.f32.mrb[152].mxu0 }
0x1098   : > { %v5686_v2 = vadd.f32 %v5654_v14, %v9779_v30  ;;  %v5688_v31 = vadd.f32 %v5656_v29, %v9782_v52  ;;  %v5658_v4 = vmul.f32 0.044715, %v5626_v58  ;;  %v5660_v40 = vmul.f32 0.044715, %v5628_v32  ;;  %v5490_v62 = vpop.f32.mrb[145].mxu1  ;;  %v5563_v8 = vpop.f32.mrb[153].mxu0 }
0x1099   : > { %v5687_v26 = vadd.f32 %v5655_v5, %v9785_v45  ;;  %v5689_v41 = vadd.f32 %v5657_v63, %v9788_v48  ;;  %v5659_v60 = vmul.f32 0.044715, %v5627_v39  ;;  %v5661_v24 = vmul.f32 0.044715, %v5629_v25  ;;  %v5492_v23 = vpop.f32.mrb[146].mxu1  ;;  %v5565_v51 = vpop.f32.mrb[154].mxu0 }
0x109a   : > { %v5718_v55 = vmul.f32 0.7978846, %v5686_v2  ;;  %v5720_v19 = vmul.f32 0.7978846, %v5688_v31  ;;  %v5690_v49 = vadd.f32 %v5658_v4, %v9795_v0  ;;  %v5692_v20 = vadd.f32 %v5660_v40, %v9798_v34  ;;  %v5494_v37 = vpop.f32.mrb[147].mxu1  ;;  %v5567_v6 = vpop.f32.mrb[155].mxu0 }
0x109b   : > { %v5719_v53 = vmul.f32 0.7978846, %v5687_v26  ;;  %v5721_v14 = vmul.f32 0.7978846, %v5689_v41  ;;  %v5691_v29 = vadd.f32 %v5659_v60, %v9805_v21  ;;  %v5693_v58 = vadd.f32 %v5661_v24, %v9808_v56 }
0x109c   : > { %8042 = vtanh.f32 %v5718_v55  ;;  %v5722_v32 = vmul.f32 0.7978846, %v5690_v49  ;;  %v5724_v5 = vmul.f32 0.7978846, %v5692_v20  ;;  %v9835_v63 = vadd.f32 %v5488_v47, %v9766_v7 }
0x109d   : > { %8044 = vtanh.f32 %v5720_v19  ;;  %v5723_v39 = vmul.f32 0.7978846, %v5691_v29  ;;  %v5725_v25 = vmul.f32 0.7978846, %v5693_v58  ;;  %v9838_v2 = vadd.f32 %v5561_v35, %v9770_v46 }
0x109e   : > { %8046 = vtanh.f32 %v5719_v53  ;;  %v5598_v31 = vmul.f32 %v9835_v63, %v9835_v63  ;;  %v9843_v4 = vadd.f32 %v5490_v62, %v9774_v42  ;;  %v9846_v40 = vadd.f32 %v5563_v8, %v9776_v10 }
0x109f   : > { %8048 = vtanh.f32 %v5721_v14  ;;  %v5600_v47 = vmul.f32 %v9838_v2, %v9838_v2  ;;  %v9851_v26 = vadd.f32 %v5492_v23, %v9766_v7  ;;  %v9854_v35 = vadd.f32 %v5565_v51, %v9770_v46 }
0x10a0   : > { %8050 = vtanh.f32 %v5722_v32  ;;  %v5630_v41 = vmul.f32 %v5598_v31, %v9835_v63  ;;  %v5599_v62 = vmul.f32 %v9843_v4, %v9843_v4  ;;  %v5601_v8 = vmul.f32 %v9846_v40, %v9846_v40 }
0x10a1   : > { %8052 = vtanh.f32 %v5724_v5  ;;  %v5632_v60 = vmul.f32 %v5600_v47, %v9838_v2  ;;  %v5602_v24 = vmul.f32 %v9851_v26, %v9851_v26  ;;  %v5604_v23 = vmul.f32 %v9854_v35, %v9854_v35 }
0x10a2   : > { %8054 = vtanh.f32 %v5723_v39  ;;  %v5662_v51 = vmul.f32 0.044715, %v5630_v41  ;;  %v5631_v55 = vmul.f32 %v5599_v62, %v9843_v4  ;;  %v5633_v19 = vmul.f32 %v5601_v8, %v9846_v40 }
0x10a3   : > { %8056 = vtanh.f32 %v5725_v25  ;;  %v5664_v49 = vmul.f32 0.044715, %v5632_v60  ;;  %v5634_v20 = vmul.f32 %v5602_v24, %v9851_v26  ;;  %v5636_v53 = vmul.f32 %v5604_v23, %v9854_v35  ;;  %v5498_v14 = vpop.f32.mrb[148].mxu1  ;;  %v9870_v29 = vpop.f32.mrb[156].mxu0 }
0x10a4   : > { %v5694_v58 = vadd.f32 %v5662_v51, %v9835_v63  ;;  %v5663_v32 = vmul.f32 0.044715, %v5631_v55  ;;  %v5665_v5 = vmul.f32 0.044715, %v5633_v19  ;;  %v9874_v39 = vadd.f32 %v5494_v37, %v9774_v42  ;;  %v5500_v31 = vpop.f32.mrb[149].mxu1  ;;  %v9876_v47 = vpop.f32.mrb[157].mxu0 }
0x10a5   : > { %v5696_v25 = vadd.f32 %v5664_v49, %v9838_v2  ;;  %v5666_v41 = vmul.f32 0.044715, %v5634_v20  ;;  %v5668_v62 = vmul.f32 0.044715, %v5636_v53  ;;  %v9880_v8 = vadd.f32 %v5567_v6, %v9776_v10  ;;  %v9882_v60 = vpop.f32.mrb[150].mxu1  ;;  %v9884_v24 = vpop.f32.mrb[158].mxu0 }
0x10a6   : > { %v8043_v23 = vpop.eup %8042  ;;  %v5726_v51 = vmul.f32 0.7978846, %v5694_v58  ;;  %v5695_v55 = vadd.f32 %v5663_v32, %v9843_v4  ;;  %v5697_v37 = vadd.f32 %v5665_v5, %v9846_v40  ;;  %v5603_v19 = vmul.f32 %v9874_v39, %v9874_v39  ;;  %v9890_v61 = vpop.f32.mrb[151].mxu1 }
0x10a7   : > { %v9892_v49 = vpop.f32.mrb[159].mxu0  ;;  %v8045_v20 = vpop.eup %8044  ;;  %v5782_v6 = vadd.f32 1.0, %v8043_v23  ;;  %v5728_v53 = vmul.f32 0.7978846, %v5696_v25  ;;  %v5698_v22 = vadd.f32 %v5666_v41, %v9851_v26  ;;  %v5700_v50 = vadd.f32 %v5668_v62, %v9854_v35 }
0x10a8   : > { %v9896_v11 = vpop.eup %8046  ;;  %v5784_v58 = vadd.f32 1.0, %v8045_v20  ;;  %8058 = vtanh.f32 %v5726_v51  ;;  %v5727_v32 = vmul.f32 0.7978846, %v5695_v55  ;;  %v5729_v5 = vmul.f32 0.7978846, %v5697_v37 }
0x10a9   : > { %v9898_v1 = vpop.eup %8048  ;;  %v5814_v43 = vmul.f32 0.5, %v5782_v6  ;;  %8060 = vtanh.f32 %v5728_v53  ;;  %v5730_v12 = vmul.f32 0.7978846, %v5698_v22  ;;  %v5732_v9 = vmul.f32 0.7978846, %v5700_v50 }
0x10aa   : > { %v8051_v28 = vpop.eup %8050  ;;  %v5816_v59 = vmul.f32 0.5, %v5784_v58  ;;  %8062 = vtanh.f32 %v5727_v32  ;;  %v5635_v25 = vmul.f32 %v5603_v19, %v9874_v39  ;;  %v5605_v41 = vmul.f32 %v9880_v8, %v9880_v8 }
0x10ab   : > { %v8053_v62 = vpop.eup %8052  ;;  %v9904_v23 = vmul.f32 %v5814_v43, %v9779_v30  ;;  %v5786_v51 = vadd.f32 1.0, %v8051_v28  ;;  %8064 = vtanh.f32 %v5729_v5  ;;  %v9907_v55 = vadd.f32 %v5498_v14, %v9766_v7  ;;  %v9909_v37 = vpop.f32.mrb[152].mxu1 }
0x10ac   : > { %v9911_v50 = vpop.f32.mrb[160].mxu0  ;;  %v9913_v22 = vpop.eup %8054  ;;  %v9916_v19 = vmul.f32 %v5816_v59, %v9782_v52  ;;  %v5788_v20 = vadd.f32 1.0, %v8053_v62  ;;  %8066 = vtanh.f32 %v5730_v12  ;;  %v5667_v6 = vmul.f32 0.044715, %v5635_v25 }
0x10ad   : > { %10422 = vst [vmem:[#allocation16_spill] sm:$0xff] %v9907_v55  ;;  %v9918_v53 = vpop.f32.mrb[153].mxu1  ;;  %v9920_v43 = vpop.f32.mrb[161].mxu0  ;;  %v5818_v30 = vmul.f32 0.5, %v5786_v51  ;;  %8068 = vtanh.f32 %v5732_v9  ;;  %v5637_v14 = vmul.f32 %v5605_v41, %v9880_v8  ;;  %v5606_v58 = vmul.f32 %v9907_v55, %v9907_v55 }
0x10ae   : > { %v9922_v28 = vpop.eup %8056  ;;  %v9927_v32 = vpop.f32.mrb[154].mxu1  ;;  %v5820_v52 = vmul.f32 0.5, %v5788_v20  ;;  %v5699_v12 = vadd.f32 %v5667_v6, %v9874_v39  ;;  %v9934_v5 = vadd.f32 %v9870_v29, %v9770_v46  ;;  %v9937_v25 = vadd.f32 %v5500_v31, %v9774_v42 }
0x10af   : > { %v9929_v59 = vpop.f32.mrb[162].mxu0  ;;  %v9939_v9 = vpop.f32.mrb[155].mxu1  ;;  %v9944_v62 = vmul.f32 %v5818_v30, %v9795_v0  ;;  %v5669_v51 = vmul.f32 0.044715, %v5637_v14  ;;  %v5638_v57 = vmul.f32 %v5606_v58, %v9907_v55  ;;  %v9949_v20 = vadd.f32 %v9876_v47, %v9776_v10 }
0x10b0   : > { %10423 = vst [vmem:[#allocation17_spill] sm:$0xff] %v9937_v25  ;;  %v9941_v41 = vpop.f32.mrb[163].mxu0  ;;  %v9952_v29 = vmul.f32 %v5820_v52, %v9798_v34  ;;  %v5731_v6 = vmul.f32 0.7978846, %v5699_v12  ;;  %v5608_v31 = vmul.f32 %v9934_v5, %v9934_v5  ;;  %v5607_v54 = vmul.f32 %v9937_v25, %v9937_v25 }
0x10b1   : > { %10424 = vst [vmem:[#allocation38_spill] sm:$0xff] %v9949_v20  ;;  %v5701_v30 = vadd.f32 %v5669_v51, %v9880_v8  ;;  %v5670_v14 = vmul.f32 0.044715, %v5638_v57  ;;  %v5609_v47 = vmul.f32 %v9949_v20, %v9949_v20  ;;  %v9975_v51 = vadd.f32 %v9882_v60, %v9766_v7 }
0x10b2   : > { %v9963_v58 = vpop.eup %8058  ;;  %8070 = vtanh.f32 %v5731_v6  ;;  %v5640_v52 = vmul.f32 %v5608_v31, %v9934_v5  ;;  %v5639_v12 = vmul.f32 %v5607_v54, %v9937_v25  ;;  %v9981_v6 = vadd.f32 %v9884_v24, %v9770_v46 }
0x10b3   : > { %v9969_v36 = vpop.eup %8060  ;;  %v5733_v18 = vmul.f32 0.7978846, %v5701_v30  ;;  %v5702_v0 = vadd.f32 %v5670_v14, %v9907_v55  ;;  %v5641_v57 = vmul.f32 %v5609_v47, %v9949_v20  ;;  %v9985_v54 = vadd.f32 %v9890_v61, %v9774_v42 }
0x10b4   : > { %v9977_v44 = vpop.eup %8062  ;;  %v5672_v27 = vmul.f32 0.044715, %v5640_v52  ;;  %v5671_v34 = vmul.f32 0.044715, %v5639_v12  ;;  %v5610_v60 = vmul.f32 %v9975_v51, %v9975_v51  ;;  %v5612_v24 = vmul.f32 %v9981_v6, %v9981_v6 }
0x10b5   : > { %v9987_v31 = vpop.eup %8064  ;;  %8072 = vtanh.f32 %v5733_v18  ;;  %v5734_v30 = vmul.f32 0.7978846, %v5702_v0  ;;  %v5673_v14 = vmul.f32 0.044715, %v5641_v57  ;;  %v5611_v61 = vmul.f32 %v9985_v54, %v9985_v54 }
0x10b6   : > { %v9991_v47 = vpop.eup %8066  ;;  %v5704_v52 = vadd.f32 %v5672_v27, %v9934_v5  ;;  %v5703_v12 = vadd.f32 %v5671_v34, %v9937_v25  ;;  %v5642_v0 = vmul.f32 %v5610_v60, %v9975_v51  ;;  %v10005_v57 = vadd.f32 %v9892_v49, %v9776_v10 }
0x10b7   : > { %v9999_v13 = vpop.eup %8068  ;;  %8074 = vtanh.f32 %v5734_v30  ;;  %v5705_v18 = vadd.f32 %v5673_v14, %v9949_v20  ;;  %v5644_v34 = vmul.f32 %v5612_v24, %v9981_v6  ;;  %v5643_v55 = vmul.f32 %v5611_v61, %v9985_v54 }
0x10b8   : > { %10425 = vst [vmem:[#allocation39_spill] sm:$0xff] %v10005_v57  ;;  %v5736_v27 = vmul.f32 0.7978846, %v5704_v52  ;;  %v5735_v17 = vmul.f32 0.7978846, %v5703_v12  ;;  %v5613_v3 = vmul.f32 %v10005_v57, %v10005_v57  ;;  %v10013_v30 = vadd.f32 %v9909_v37, %v9766_v7 }
0x10b9   : > { %v5737_v38 = vmul.f32 0.7978846, %v5705_v18  ;;  %v5674_v25 = vmul.f32 0.044715, %v5642_v0  ;;  %v5676_v14 = vmul.f32 0.044715, %v5644_v34  ;;  %v10017_v49 = vadd.f32 %v9911_v50, %v9770_v46 }
0x10ba   : > { %8076 = vtanh.f32 %v5736_v27  ;;  %v5675_v60 = vmul.f32 0.044715, %v5643_v55  ;;  %v5645_v12 = vmul.f32 %v5613_v3, %v10005_v57  ;;  %v5614_v24 = vmul.f32 %v10013_v30, %v10013_v30 }
0x10bb   : > { %10426 = vst [vmem:[#allocation40_spill] sm:$0xff] %v10017_v49  ;;  %8078 = vtanh.f32 %v5735_v17  ;;  %v5706_v52 = vadd.f32 %v5674_v25, %v9975_v51  ;;  %v5708_v37 = vadd.f32 %v5676_v14, %v9981_v6  ;;  %v5616_v55 = vmul.f32 %v10017_v49, %v10017_v49 }
0x10bc   : > { %v10023_v61 = vpop.eup %8070  ;;  %8080 = vtanh.f32 %v5737_v38  ;;  %v5707_v18 = vadd.f32 %v5675_v60, %v9985_v54  ;;  %v5677_v0 = vmul.f32 0.044715, %v5645_v12  ;;  %v5646_v17 = vmul.f32 %v5614_v24, %v10013_v30 }
0x10bd   : > { %v5738_v50 = vmul.f32 0.7978846, %v5706_v52  ;;  %v10032_v3 = vadd.f32 %v9918_v53, %v9774_v42  ;;  %v5740_v25 = vmul.f32 0.7978846, %v5708_v37  ;;  %v5648_v34 = vmul.f32 %v5616_v55, %v10017_v49 }
0x10be   : > { %v5739_v27 = vmul.f32 0.7978846, %v5707_v18  ;;  %v10037_v38 = vadd.f32 %v9920_v43, %v9776_v10  ;;  %v5709_v60 = vadd.f32 %v5677_v0, %v10005_v57  ;;  %v5678_v52 = vmul.f32 0.044715, %v5646_v17 }
0x10bf   : > { %v10039_v14 = vpop.eup %8072  ;;  %8082 = vtanh.f32 %v5738_v50  ;;  %v5615_v12 = vmul.f32 %v10032_v3, %v10032_v3  ;;  %v5680_v53 = vmul.f32 0.044715, %v5648_v34  ;;  %v10048_v37 = vadd.f32 %v9927_v32, %v9766_v7 }
0x10c0   : > { %8084 = vtanh.f32 %v5740_v25  ;;  %v5617_v24 = vmul.f32 %v10037_v38, %v10037_v38  ;;  %v5741_v18 = vmul.f32 0.7978846, %v5709_v60  ;;  %v5710_v55 = vadd.f32 %v5678_v52, %v10013_v30 }
0x10c1   : > { %v10050_v43 = vpop.eup %8074  ;;  %8086 = vtanh.f32 %v5739_v27  ;;  %v5647_v50 = vmul.f32 %v5615_v12, %v10032_v3  ;;  %v5712_v0 = vadd.f32 %v5680_v53, %v10017_v49  ;;  %v5618_v25 = vmul.f32 %v10048_v37, %v10048_v37 }
0x10c2   : > { %v5649_v17 = vmul.f32 %v5617_v24, %v10037_v38  ;;  %v10060_v34 = vadd.f32 %v9929_v59, %v9770_v46  ;;  %8088 = vtanh.f32 %v5741_v18  ;;  %v5742_v7 = vmul.f32 0.7978846, %v5710_v55 }
0x10c3   : > { %v5679_v32 = vmul.f32 0.044715, %v5647_v50  ;;  %v10064_v27 = vadd.f32 %v9939_v9, %v9774_v42  ;;  %v5744_v52 = vmul.f32 0.7978846, %v5712_v0  ;;  %v5650_v53 = vmul.f32 %v5618_v25, %v10048_v37 }
0x10c4   : > { %10427 = vst [vmem:[#allocation41_spill] sm:$0xff] %v10060_v34  ;;  %v8077_v60 = vpop.eup %8076  ;;  %v5681_v12 = vmul.f32 0.044715, %v5649_v17  ;;  %v5620_v24 = vmul.f32 %v10060_v34, %v10060_v34  ;;  %8090 = vtanh.f32 %v5742_v7  ;;  %v10081_v25 = vadd.f32 %v9941_v41, %v9776_v10 }
0x10c5   : > { %v10069_v49 = vpop.eup %8078  ;;  %v5800_v57 = vadd.f32 1.0, %v8077_v60  ;;  %v5711_v46 = vadd.f32 %v5679_v32, %v10032_v3  ;;  %v5619_v59 = vmul.f32 %v10064_v27, %v10064_v27  ;;  %8092 = vtanh.f32 %v5744_v52 }
0x10c6   : > { %v10074_v18 = vpop.eup %8080  ;;  %v5713_v42 = vadd.f32 %v5681_v12, %v10037_v38  ;;  %v5682_v9 = vmul.f32 0.044715, %v5650_v53  ;;  %v5652_v55 = vmul.f32 %v5620_v24, %v10060_v34  ;;  %v5783_v20 = vadd.f32 1.0, %v9896_v11 }
0x10c7   : > { %v5832_v50 = vmul.f32 0.5, %v5800_v57  ;;  %v5743_v0 = vmul.f32 0.7978846, %v5711_v46  ;;  %v5651_v17 = vmul.f32 %v5619_v59, %v10064_v27  ;;  %v5621_v53 = vmul.f32 %v10081_v25, %v10081_v25 }
0x10c8   : > { %v5745_v7 = vmul.f32 0.7978846, %v5713_v42  ;;  %v5714_v32 = vadd.f32 %v5682_v9, %v10048_v37  ;;  %v5684_v60 = vmul.f32 0.044715, %v5652_v55  ;;  %v5787_v46 = vadd.f32 1.0, %v9913_v22 }
0x10c9   : > { %v10085_v52 = vpop.eup %8082  ;;  %v10088_v12 = vmul.f32 %v5832_v50, %v9934_v5  ;;  %8094 = vtanh.f32 %v5743_v0  ;;  %v5683_v57 = vmul.f32 0.044715, %v5651_v17  ;;  %v5653_v5 = vmul.f32 %v5621_v53, %v10081_v25 }
0x10ca   : > { %v8085_v24 = vpop.eup %8084  ;;  %8096 = vtanh.f32 %v5745_v7  ;;  %v5746_v10 = vmul.f32 0.7978846, %v5714_v32  ;;  %v5716_v41 = vadd.f32 %v5684_v60, %v10060_v34  ;;  %v5815_v9 = vmul.f32 0.5, %v5783_v20 }
0x10cb   : > { %v10094_v59 = vpop.eup %8086  ;;  %v5804_v11 = vadd.f32 1.0, %v8085_v24  ;;  %v5715_v42 = vadd.f32 %v5683_v57, %v10064_v27  ;;  %v5819_v50 = vmul.f32 0.5, %v5787_v46  ;;  %v5785_v0 = vadd.f32 1.0, %v9898_v1 }
0x10cc   : > { %8098 = vtanh.f32 %v5746_v10  ;;  %v5748_v55 = vmul.f32 0.7978846, %v5716_v41  ;;  %v10099_v17 = vpop.eup %8088  ;;  %v5685_v60 = vmul.f32 0.044715, %v5653_v5  ;;  %v5847_v22 = vmul.f32 %v5815_v9, %v9785_v45 }
0x10cd   : > { %v5836_v7 = vmul.f32 0.5, %v5804_v11  ;;  %v5747_v32 = vmul.f32 0.7978846, %v5715_v42  ;;  %v5851_v24 = vmul.f32 %v5819_v50, %v9805_v21  ;;  %v5789_v57 = vadd.f32 1.0, %v9922_v28 }
0x10ce   : > { %8100 = vtanh.f32 %v5748_v55  ;;  %v5817_v34 = vmul.f32 0.5, %v5785_v0  ;;  %v10104_v53 = vpop.eup %8090  ;;  %v5717_v1 = vadd.f32 %v5685_v60, %v10081_v25  ;;  %v5791_v10 = vadd.f32 1.0, %v9977_v44 }
0x10cf   : > { %v10107_v20 = vmul.f32 %v5836_v7, %v9981_v6  ;;  %8102 = vtanh.f32 %v5747_v32  ;;  %v10111_v41 = vpop.eup %8092  ;;  %v5879_v46 = vpack.c.bf16 %v5851_v24, %v5847_v22  ;;  %v5821_v45 = vmul.f32 0.5, %v5789_v57 }
0x10d0   : > { %v5849_v11 = vmul.f32 %v5817_v34, %v9788_v48  ;;  %v5795_v21 = vadd.f32 1.0, %v10023_v61  ;;  %v5749_v42 = vmul.f32 0.7978846, %v5717_v1  ;;  %v5823_v5 = vmul.f32 0.5, %v5791_v10 }
0x10d1   : > { %v5888_v28 = vpack.c.bf16 %v10107_v20, %v10088_v12  ;;  %v5793_v6 = vadd.f32 1.0, %v9987_v31  ;;  %6189 = vmatprep.mubr.bf16.mxu1 %v5879_v46  ;;  %v5853_v9 = vmul.f32 %v5821_v45, %v9808_v56  ;;  %v5797_v44 = vadd.f32 1.0, %v10039_v14 }
0x10d2   : > { %v5827_v55 = vmul.f32 0.5, %v5795_v21  ;;  %v5790_v50 = vadd.f32 1.0, %v9963_v58  ;;  %8104 = vtanh.f32 %v5749_v42  ;;  %v10428_v48 = vpack.c.bf16 %v9944_v62, %v9904_v23 }
0x10d3   : > { %v8095_v0 = vpop.eup %8094  ;;  %v5855_v61 = vmul.f32 %v5823_v5, %v9843_v4  ;;  %v5825_v34 = vmul.f32 0.5, %v5793_v6  ;;  %v5794_v7 = vadd.f32 1.0, %v9991_v47  ;;  %v5881_v32 = vpack.c.bf16 %v5853_v9, %v5849_v11 }
0x10d4   : > { %6190 = vmatmul.mubr.bf16.vlgmr.msra.gmra.mrb[156].mxu1 %v10428_v48  ;;  %v10126_v31 = vpop.eup %8096  ;;  %v5859_v56 = vmul.f32 %v5827_v55, %v9874_v39  ;;  %v5829_v14 = vmul.f32 0.5, %v5797_v44  ;;  %v5822_v58 = vmul.f32 0.5, %v5790_v50  ;;  %v5792_v23 = vadd.f32 1.0, %v9969_v36  ;;  %v10432_v55 = vld [vmem:[#allocation27_spill] sm:$0xff] }
0x10d5   : > { %7628 = vmatpush3.bf16.msra.mxu1 %v9690_v33  ;;  %v5857_v60 = vmul.f32 %v5825_v34, %v9846_v40  ;;  %v5826_v22 = vmul.f32 0.5, %v5794_v7  ;;  %v5796_v4 = vadd.f32 1.0, %v9999_v13  ;;  %6254 = vmatprep.mubr.bf16.mxu0 %v5881_v32  ;;  %v5799_v39 = vadd.f32 1.0, %v10069_v49  ;;  %v10434_v34 = vld [vmem:[#allocation28_spill] sm:$0xff] }
0x10d6   : > { %7621 = vmatprep.subr.bf16.mxu1 %v9695_v15  ;;  %v8099_v62 = vpop.eup %8098  ;;  %v5883_v47 = vpack.c.bf16 %v5859_v56, %v5855_v61  ;;  %v5861_v24 = vmul.f32 %v5829_v14, %v9880_v8  ;;  %v5854_v33 = vmul.f32 %v5822_v58, %v9835_v63  ;;  %v10429_v57 = vpack.c.bf16 %v9952_v29, %v9916_v19  ;;  %v10430_v29 = vld [vmem:[#allocation26_spill] sm:$0xff] }
0x10d7   : > { %v5858_v40 = vmul.f32 %v5826_v22, %v9851_v26  ;;  %v5824_v15 = vmul.f32 0.5, %v5792_v23  ;;  %v5828_v1 = vmul.f32 0.5, %v5796_v4  ;;  %v5803_v36 = vadd.f32 1.0, %v10094_v59  ;;  %v10431_v59 = vld [vmem:[#allocation17_spill] sm:$0xff] }
0x10d8   : > { %6255 = vmatmul.mubr.bf16.vlgmr.msra.gmra.mrb[164].mxu0 %v10429_v57  ;;  %v8101_v13 = vpop.eup %8100  ;;  %6197 = vmatprep.mubr.bf16.mxu1 %v5883_v47  ;;  %v5885_v10 = vpack.c.bf16 %v5861_v24, %v5857_v60  ;;  %v5831_v8 = vmul.f32 0.5, %v5799_v39  ;;  %v5798_v63 = vadd.f32 1.0, %v10050_v43  ;;  %v5802_v49 = vadd.f32 1.0, %v10085_v52  ;;  %v10435_v4 = vld [vmem:[#allocation29_spill] sm:$0xff]  ;;  %v10436_v24 = vld [vmem:[#allocation30_spill] sm:$0xff] }
0x10d9   : > { %7629 = vmatpush3.bf16.msra.mxu1 %v9700_v16  ;;  %v8103_v46 = vpop.eup %8102  ;;  %v5882_v45 = vpack.c.bf16 %v5858_v40, %v5854_v33  ;;  %v5856_v19 = vmul.f32 %v5824_v15, %v9838_v2  ;;  %v5860_v26 = vmul.f32 %v5828_v1, %v9854_v35  ;;  %v5835_v11 = vmul.f32 0.5, %v5803_v36  ;;  %v10433_v2 = vld [vmem:[#allocation16_spill] sm:$0xff]  ;;  %v10437_v33 = vld [vmem:[#allocation38_spill] sm:$0xff] }
0x10da   : > { %7622 = vmatprep.subr.bf16.mxu1 %v10430_v29  ;;  %6262 = vmatprep.mubr.bf16.mxu0 %v5885_v10  ;;  %v5863_v21 = vmul.f32 %v5831_v8, %v10431_v59  ;;  %v5830_v42 = vmul.f32 0.5, %v5798_v63  ;;  %v5834_v5 = vmul.f32 0.5, %v5802_v49  ;;  %v5807_v16 = vadd.f32 1.0, %v8095_v0  ;;  %v10439_v10 = vld [vmem:[#allocation31_spill] sm:$0xff]  ;;  %v10440_v63 = vld [vmem:[#allocation32_spill] sm:$0xff]  ;;  %v10443_v29 = vld [vmem:[#allocation33_spill] sm:$0xff] }
0x10db   : > { %v5884_v6 = vpack.c.bf16 %v5860_v26, %v5856_v19  ;;  %v5867_v43 = vmul.f32 %v5835_v11, %v9985_v54  ;;  %v5811_v52 = vadd.f32 1.0, %v8103_v46  ;;  %v5806_v9 = vadd.f32 1.0, %v10104_v53  ;;  %v10441_v49 = vld [vmem:[#allocation40_spill] sm:$0xff]  ;;  %v10442_v46 = vld [vmem:[#allocation41_spill] sm:$0xff]  ;;  %v10444_v11 = vld [vmem:[#allocation34_spill] sm:$0xff] }
0x10dc   : > { %6198 = vmatmul.mubr.bf16.gmra.mrb[160].mxu1 %v5882_v45  ;;  %v5862_v35 = vmul.f32 %v5830_v42, %v10433_v2  ;;  %v5866_v44 = vmul.f32 %v5834_v5, %v9975_v51  ;;  %v5839_v50 = vmul.f32 0.5, %v5807_v16  ;;  %v5810_v48 = vadd.f32 1.0, %v8099_v62  ;;  %v8105_v61 = vpop.eup %8104  ;;  %v10445_v59 = vld [vmem:[#allocation35_spill] sm:$0xff]  ;;  %v10186_v42 = vld [vmem:[%s740_s16] ss:$0 sm:$0xff] }
0x10dd   : > { %7630 = vmatpush3.bf16.msra.mxu1 %v10432_v55  ;;  %v5887_v7 = vpack.c.bf16 %v5867_v43, %v5863_v21  ;;  %v5843_v0 = vmul.f32 0.5, %v5811_v52  ;;  %v5838_v32 = vmul.f32 0.5, %v5806_v9  ;;  %v5801_v56 = vadd.f32 1.0, %v10074_v18 }
0x10de   : > { %7623 = vmatprep.subr.bf16.mxu1 %v10434_v34  ;;  %v5886_v54 = vpack.c.bf16 %v5866_v44, %v5862_v35  ;;  %v5871_v14 = vmul.f32 %v5839_v50, %v10032_v3  ;;  %v5842_v53 = vmul.f32 0.5, %v5810_v48  ;;  %v5805_v58 = vadd.f32 1.0, %v10099_v17 }
0x10df   : > { %6205 = vmatprep.mubr.bf16.mxu1 %v5887_v7  ;;  %v5875_v51 = vmul.f32 %v5843_v0, %v10064_v27  ;;  %v5870_v60 = vmul.f32 %v5838_v32, %v10013_v30  ;;  %v5833_v22 = vmul.f32 0.5, %v5801_v56  ;;  %v5809_v23 = vadd.f32 1.0, %v10126_v31  ;;  %v10438_v30 = vld [vmem:[#allocation39_spill] sm:$0xff]  ;;  %v10448_v32 = vld [vmem:[#allocation18_spill] sm:$0xff] }
0x10e0   : > { %6263 = vmatmul.mubr.bf16.gmra.mrb[168].mxu0 %v5884_v6  ;;  %v5874_v62 = vmul.f32 %v5842_v53, %v10048_v37  ;;  %v5837_v18 = vmul.f32 0.5, %v5805_v58  ;;  %v5813_v47 = vadd.f32 1.0, %v8105_v61  ;;  %v5808_v3 = vadd.f32 1.0, %v10111_v41 }
0x10e1   : > { %7631 = vmatpush3.bf16.msra.mxu1 %v10435_v4  ;;  %v5891_v17 = vpack.c.bf16 %v5875_v51, %v5871_v14  ;;  %v5865_v39 = vmul.f32 %v5833_v22, %v10437_v33  ;;  %v5841_v57 = vmul.f32 0.5, %v5809_v23  ;;  %v5812_v27 = vadd.f32 1.0, %v8101_v13  ;;  %v10449_v51 = vld [vmem:[#allocation21_spill] sm:$0xff] }
0x10e2   : > { %7624 = vmatprep.subr.bf16.mxu1 %v10436_v24  ;;  %v5890_v40 = vpack.c.bf16 %v5874_v62, %v5870_v60  ;;  %v5869_v15 = vmul.f32 %v5837_v18, %v10438_v30  ;;  %v5845_v1 = vmul.f32 0.5, %v5813_v47  ;;  %v5840_v31 = vmul.f32 0.5, %v5808_v3 }
0x10e3   : > { %v5844_v36 = vmul.f32 0.5, %v5812_v27  ;;  %v5873_v41 = vmul.f32 %v5841_v57, %v10037_v38  ;;  %v10446_v38 = vld [vmem:[#allocation36_spill] sm:$0xff] }
0x10e4   : > { %6206 = vmatmul.mubr.bf16.gmra.mrb[164].mxu1 %v5886_v54  ;;  %v5889_v37 = vpack.c.bf16 %v5869_v15, %v5865_v39  ;;  %v5877_v8 = vmul.f32 %v5845_v1, %v10081_v25  ;;  %v5872_v13 = vmul.f32 %v5840_v31, %v10441_v49  ;;  %v10447_v25 = vld [vmem:[#allocation37_spill] sm:$0xff]  ;;  %v10450_v39 = vld [vmem:[#allocation23_spill] sm:$0xff] }
0x10e5   : > { %7632 = vmatpush3.bf16.msra.mxu1 %v10439_v10  ;;  %6213 = vmatprep.mubr.bf16.mxu1 %v5891_v17  ;;  %v5876_v45 = vmul.f32 %v5844_v36, %v10442_v46  ;;  %v10451_v15 = vld [vmem:[#allocation19_spill] sm:$0xff] }
0x10e6   : > { %7625 = vmatprep.subr.bf16.mxu1 %v10440_v63  ;;  %v5893_v19 = vpack.c.bf16 %v5877_v8, %v5873_v41 }
0x10e7   : > { %v5892_v26 = vpack.c.bf16 %v5876_v45, %v5872_v13 }
0x10e9   : > { %7633 = vmatpush3.bf16.msra.mxu1 %v10443_v29 }
0x10ea   : > { %7626 = vmatprep.subr.bf16.mxu1 %v10444_v11 }
0x10ec   : > { %6214 = vmatmul.mubr.bf16.gmra.mrb[168].mxu1 %v5890_v40 }
0x10ed   : > { %7634 = vmatpush3.bf16.msra.mxu1 %v10445_v59  ;;  %6270 = vmatprep.mubr.bf16.mxu1 %v5889_v37 }
0x10ee   : > { %7627 = vmatprep.subr.bf16.mxu1 %v10446_v38 }
0x10f1   : > { %7635 = vmatpush3.bf16.msra.mxu1 %v10447_v25  ;;  %v10452_v25 = vld [vmem:[#allocation20_spill] sm:$0xff] }
0x10f4   : > { %6271 = vmatmul.mubr.bf16.vlgmr.msra.gmra.mrb[172].mxu1 %v5888_v28 }
0x10f5   : > { %6278 = vmatprep.mubr.bf16.mxu1 %v5893_v19 }
0x10fc   : > { %6279 = vmatmul.mubr.bf16.gmra.mrb[176].mxu1 %v5892_v26 }
0x11a7   : > { %v7124_v21 = vpop.f32.mrb[156].mxu1 }
0x11a8   : > { %v7125_v5 = vpop.f32.mrb[157].mxu1 }
0x11a9   : > { %v7126_v16 = vadd.f32 %v7125_v5, %v7124_v21  ;;  %v7127_v6 = vpop.f32.mrb[158].mxu1 }
0x11aa   : > { %v7128_v43 = vpop.f32.mrb[159].mxu1 }
0x11ab   : > { %v7164_v52 = vpop.f32.mrb[164].mxu0  ;;  %v6192_v9 = vadd.f32 %v7126_v16, %v10186_v42  ;;  %v7129_v55 = vadd.f32 %v7128_v43, %v7127_v6  ;;  %v10453_v16 = vld [vmem:[#allocation24_spill] sm:$0xff] }
0x11ac   : > { %v7165_v2 = vpop.f32.mrb[165].mxu0 }
0x11ad   : > { %v7166_v12 = vadd.f32 %v7165_v2, %v7164_v52  ;;  %v7167_v20 = vpop.f32.mrb[166].mxu0  ;;  %v6195_v28 = vadd.f32 %v7129_v55, %v10186_v42 }
0x11ae   : > { %v7168_v35 = vpop.f32.mrb[167].mxu0 }
0x11af   : > { %v6257_v44 = vadd.f32 %v7166_v12, %v6192_v9  ;;  %v7169_v50 = vadd.f32 %v7168_v35, %v7167_v20  ;;  %v7130_v48 = vpop.f32.mrb[160].mxu1 }
0x11b0   : > { %v7131_v61 = vpop.f32.mrb[161].mxu1 }
0x11b1   : > { %v6260_v34 = vadd.f32 %v7169_v50, %v6195_v28  ;;  %v7132_v7 = vadd.f32 %v7131_v61, %v7130_v48  ;;  %v7133_v0 = vpop.f32.mrb[162].mxu1  ;;  %v10191_v56 = vadd.f32 %v6257_v44, %v10448_v32  ;;  %v10454_v44 = vld [vmem:[#allocation25_spill] sm:$0xff]  ;;  %v10455_v48 = vld [vmem:[#allocation22_spill] sm:$0xff] }
0x11b2   : > { %v7134_v54 = vpop.f32.mrb[163].mxu1 }
0x11b3   : > { %v7170_v14 = vpop.f32.mrb[168].mxu0  ;;  %v6200_v53 = vadd.f32 %v7132_v7, %v10186_v42  ;;  %6297 = vadd.xlane.f32.xlu0 %v10191_v56  ;;  %v7135_v58 = vadd.f32 %v7134_v54, %v7133_v0  ;;  %v6288_v60 = vadd.f32 %v6260_v34, %v10449_v51 }
0x11b4   : > { %v7171_v22 = vpop.f32.mrb[169].mxu0 }
0x11b5   : > { %v7172_v23 = vadd.f32 %v7171_v22, %v7170_v14  ;;  %v7173_v4 = vpop.f32.mrb[170].mxu0  ;;  %v6203_v62 = vadd.f32 %v7135_v58, %v10186_v42  ;;  %6299 = vadd.xlane.f32.xlu1 %v6288_v60 }
0x11b6   : > { %v7174_v18 = vpop.f32.mrb[171].mxu0 }
0x11b7   : > { %v6265_v47 = vadd.f32 %v7172_v23, %v6200_v53  ;;  %v7175_v3 = vadd.f32 %v7174_v18, %v7173_v4  ;;  %v7136_v24 = vpop.f32.mrb[164].mxu1 }
0x11b8   : > { %v7137_v17 = vpop.f32.mrb[165].mxu1 }
0x11b9   : > { %v6268_v33 = vadd.f32 %v7175_v3, %v6203_v62  ;;  %v6289_v57 = vadd.f32 %v6265_v47, %v10450_v39  ;;  %v7138_v27 = vadd.f32 %v7137_v17, %v7136_v24  ;;  %v7139_v40 = vpop.f32.mrb[166].mxu1 }
0x11ba   : > { %v7140_v30 = vpop.f32.mrb[167].mxu1 }
0x11bb   : > { %6301 = vadd.xlane.f32.xlu0 %v6289_v57  ;;  %v6290_v1 = vadd.f32 %v6268_v33, %v10451_v15  ;;  %v7141_v31 = vadd.f32 %v7140_v30, %v7139_v40  ;;  %v6208_v46 = vadd.f32 %v7138_v27, %v10186_v42 }
0x11bd   : > { %6303 = vadd.xlane.f32.xlu1 %v6290_v1  ;;  %v6211_v29 = vadd.f32 %v7141_v31, %v10186_v42 }
0x11bf   : > { %v7142_v36 = vpop.f32.mrb[168].mxu1 }
0x11c0   : > { %v7143_v10 = vpop.f32.mrb[169].mxu1 }
0x11c1   : > { %v7144_v37 = vadd.f32 %v7143_v10, %v7142_v36  ;;  %v7145_v41 = vpop.f32.mrb[170].mxu1 }
0x11c2   : > { %v7146_v8 = vpop.f32.mrb[171].mxu1 }
0x11c3   : > { %v7147_v63 = vadd.f32 %v7146_v8, %v7145_v41  ;;  %v6216_v52 = vadd.f32 %v7144_v37, %v10186_v42 }
0x11c5   : > { %v6219_v12 = vadd.f32 %v7147_v63, %v10186_v42 }
0x11c7   : > { %v7176_v49 = vpop.f32.mrb[172].mxu1 }
0x11c8   : > { %v7177_v13 = vpop.f32.mrb[173].mxu1 }
0x11c9   : > { %v7178_v45 = vadd.f32 %v7177_v13, %v7176_v49  ;;  %v7179_v19 = vpop.f32.mrb[174].mxu1 }
0x11ca   : > { %v7180_v26 = vpop.f32.mrb[175].mxu1 }
0x11cb   : > { %v6273_v11 = vadd.f32 %v7178_v45, %v6208_v46  ;;  %v7181_v59 = vadd.f32 %v7180_v26, %v7179_v19 }
0x11cd   : > { %v6276_v38 = vadd.f32 %v7181_v59, %v6211_v29  ;;  %v6291_v21 = vadd.f32 %v6273_v11, %v10452_v25 }
0x11cf   : > { %v7182_v5 = vpop.f32.mrb[176].mxu1  ;;  %6305 = vadd.xlane.f32.xlu0 %v6291_v21  ;;  %v6292_v6 = vadd.f32 %v6276_v38, %v10453_v16  ;;  %v6902_v38 = vld [vmem:[%s743_s28] ss:$0 sm:$0xff]  ;;  %s10458_s28 = sld [smem:[#allocation5_spill]] (%p8324_p5) }
0x11d0   : > { %v7183_v43 = vpop.f32.mrb[177].mxu1 }
0x11d1   : > { %v7184_v9 = vadd.f32 %v7183_v43, %v7182_v5  ;;  %v7185_v55 = vpop.f32.mrb[178].mxu1  ;;  %6307 = vadd.xlane.f32.xlu1 %v6292_v6  ;;  %v6903_v5 = vld [vmem:[%s746_s10] ss:$0 sm:$0xff] }
0x11d2   : > { %v7186_v2 = vpop.f32.mrb[179].mxu1 }
0x11d3   : > { %v6281_v20 = vadd.f32 %v7184_v9, %v6216_v52  ;;  %v7187_v28 = vadd.f32 %v7186_v2, %v7185_v55 }
0x11d5   : > { %v6284_v35 = vadd.f32 %v7187_v28, %v6219_v12  ;;  %v6293_v50 = vadd.f32 %v6281_v20, %v10454_v44  ;;  %s6446_s18 = sadd.s32 (%p8324_p5), %s10458_s28, %s6913_s2 }
0x11d6   : > { %s6907_s29 = sshll.u32 (%p8324_p5), %s6446_s18, 2 }
0x11d7   : > { %6309 = vadd.xlane.f32.xlu0 %v6293_v50  ;;  %v6294_v61 = vadd.f32 %v6284_v35, %v10455_v48  ;;  %s6448_s0 = scalar_lea.vmem (%p8324_p5), %s10459_s27, %s6907_s29 }
0x11d9   : > { %6311 = vadd.xlane.f32.xlu1 %v6294_v61 }
0x1240   : > { %v6298_v34 = vpop.xlane.xlu0 %6297 }
0x1241   : > { %v6313_v7 = vmul.f32 0.0078125, %v6298_v34 }
0x1242   : > { %v6300_v0 = vpop.xlane.xlu1 %6299 }
0x1243   : > { %v6321_v32 = vsub.f32 %v10191_v56, %v6313_v7  ;;  %v6314_v54 = vmul.f32 0.0078125, %v6300_v0 }
0x1245   : > { %v6322_v14 = vsub.f32 %v6288_v60, %v6314_v54  ;;  %v6329_v53 = vmul.f32 %v6321_v32, %v6321_v32 }
0x1247   : > { %6337 = vadd.xlane.f32.xlu0 %v6329_v53  ;;  %v6330_v58 = vmul.f32 %v6322_v14, %v6322_v14 }
0x1248   : > { %v6302_v42 = vpop.xlane.xlu0 %6301 }
0x1249   : > { %v6315_v51 = vmul.f32 0.0078125, %v6302_v42  ;;  %6339 = vadd.xlane.f32.xlu1 %v6330_v58 }
0x124a   : > { %v6304_v22 = vpop.xlane.xlu1 %6303 }
0x124b   : > { %v6323_v23 = vsub.f32 %v6289_v57, %v6315_v51  ;;  %v6316_v4 = vmul.f32 0.0078125, %v6304_v22 }
0x124d   : > { %v6324_v62 = vsub.f32 %v6290_v1, %v6316_v4  ;;  %v6331_v18 = vmul.f32 %v6323_v23, %v6323_v23 }
0x124f   : > { %6341 = vadd.xlane.f32.xlu0 %v6331_v18  ;;  %v6332_v47 = vmul.f32 %v6324_v62, %v6324_v62 }
0x1251   : > { %6343 = vadd.xlane.f32.xlu1 %v6332_v47 }
0x125c   : > { %v6306_v3 = vpop.xlane.xlu0 %6305 }
0x125d   : > { %v6317_v24 = vmul.f32 0.0078125, %v6306_v3 }
0x125e   : > { %v6308_v17 = vpop.xlane.xlu1 %6307 }
0x125f   : > { %v10208_v56 = vsub.f32 %v6291_v21, %v6317_v24  ;;  %v6318_v60 = vmul.f32 0.0078125, %v6308_v17 }
0x1261   : > { %v10210_v33 = vsub.f32 %v6292_v6, %v6318_v60  ;;  %v6333_v39 = vmul.f32 %v10208_v56, %v10208_v56 }
0x1263   : > { %6345 = vadd.xlane.f32.xlu0 %v6333_v39  ;;  %v6334_v57 = vmul.f32 %v10210_v33, %v10210_v33 }
0x1264   : > { %v6310_v27 = vpop.xlane.xlu0 %6309 }
0x1265   : > { %v6319_v40 = vmul.f32 0.0078125, %v6310_v27  ;;  %6347 = vadd.xlane.f32.xlu1 %v6334_v57 }
0x1266   : > { %v6312_v30 = vpop.xlane.xlu1 %6311 }
0x1267   : > { %v10216_v15 = vsub.f32 %v6293_v50, %v6319_v40  ;;  %v6320_v1 = vmul.f32 0.0078125, %v6312_v30 }
0x1269   : > { %v10218_v31 = vsub.f32 %v6294_v61, %v6320_v1  ;;  %v6335_v36 = vmul.f32 %v10216_v15, %v10216_v15 }
0x126b   : > { %6349 = vadd.xlane.f32.xlu0 %v6335_v36  ;;  %v6336_v10 = vmul.f32 %v10218_v31, %v10218_v31 }
0x126d   : > { %6351 = vadd.xlane.f32.xlu1 %v6336_v10 }
0x12d4   : > { %v6338_v37 = vpop.xlane.xlu0 %6337 }
0x12d5   : > { %v6353_v41 = vmul.f32 0.0078125, %v6338_v37 }
0x12d6   : > { %v6340_v8 = vpop.xlane.xlu1 %6339 }
0x12d7   : > { %v6361_v63 = vadd.f32 1e-12, %v6353_v41  ;;  %v6354_v49 = vmul.f32 0.0078125, %v6340_v8 }
0x12d9   : > { %8106 = vrsqrt.f32 %v6361_v63  ;;  %v6362_v13 = vadd.f32 1e-12, %v6354_v49 }
0x12db   : > { %8108 = vrsqrt.f32 %v6362_v13 }
0x12dc   : > { %v6342_v46 = vpop.xlane.xlu0 %6341 }
0x12dd   : > { %v6355_v45 = vmul.f32 0.0078125, %v6342_v46 }
0x12de   : > { %v6344_v19 = vpop.xlane.xlu1 %6343 }
0x12df   : > { %v6363_v26 = vadd.f32 1e-12, %v6355_v45  ;;  %v6356_v29 = vmul.f32 0.0078125, %v6344_v19 }
0x12e1   : > { %8110 = vrsqrt.f32 %v6363_v26  ;;  %v6364_v11 = vadd.f32 1e-12, %v6356_v29 }
0x12e3   : > { %v8107_v59 = vpop.eup %8106  ;;  %8112 = vrsqrt.f32 %v6364_v11 }
0x12e4   : > { %v6377_v25 = vmul.f32 %v8107_v59, %v6321_v32 }
0x12e5   : > { %v8109_v21 = vpop.eup %8108 }
0x12e6   : > { %v6391_v16 = vmul.f32 %v6902_v38, %v6377_v25  ;;  %v6378_v6 = vmul.f32 %v8109_v21, %v6322_v14 }
0x12e8   : > { %v6405_v43 = vadd.f32 %v6903_v5, %v6391_v16  ;;  %v6392_v52 = vmul.f32 %v6902_v38, %v6378_v6 }
0x12ea   : > { %6413 = vst [vmem:[#allocation2] sm:$0xff] %v6405_v43  ;;  %v6406_v9 = vadd.f32 %v6903_v5, %v6392_v52 }
0x12eb   : > { %v8111_v55 = vpop.eup %8110 }
0x12ec   : > { %6414 = vst [vmem:[#allocation2 + $0x8] sm:$0xff] %v6406_v9  ;;  %v6933_v2 = vpack.c.bf16 %v6406_v9, %v6405_v43  ;;  %v6379_v12 = vmul.f32 %v8111_v55, %v6323_v23 }
0x12ed   : > { %v8113_v20 = vpop.eup %8112 }
0x12ee   : > { %6934 = vst [vmem:[%s8414_s24] sm:$0xff] %v6933_v2   ;;  %v6393_v28 = vmul.f32 %v6902_v38, %v6379_v12  ;;  %v6380_v35 = vmul.f32 %v8113_v20, %v6324_v62 }
0x12f0   : > { %v6407_v44 = vadd.f32 %v6903_v5, %v6393_v28  ;;  %v6394_v50 = vmul.f32 %v6902_v38, %v6380_v35  ;;  %v6346_v48 = vpop.xlane.xlu0 %6345 }
0x12f1   : > { %v6357_v61 = vmul.f32 0.0078125, %v6346_v48 }
0x12f2   : > { %6415 = vst [vmem:[#allocation2 + $0x10] sm:$0xff] %v6407_v44  ;;  %v6408_v34 = vadd.f32 %v6903_v5, %v6394_v50  ;;  %v6348_v7 = vpop.xlane.xlu1 %6347 }
0x12f3   : > { %v6365_v0 = vadd.f32 1e-12, %v6357_v61  ;;  %v6358_v32 = vmul.f32 0.0078125, %v6348_v7 }
0x12f4   : > { %6416 = vst [vmem:[#allocation2 + $0x18] sm:$0xff] %v6408_v34  ;;  %v6938_v54 = vpack.c.bf16 %v6408_v34, %v6407_v44 }
0x12f5   : > { %8114 = vrsqrt.f32 %v6365_v0  ;;  %v6366_v14 = vadd.f32 1e-12, %v6358_v32 }
0x12f6   : > { %6953 = vst [vmem:[%s8414_s24 + $0x8] sm:$0xff] %v6938_v54  }
0x12f7   : > { %8116 = vrsqrt.f32 %v6366_v14 }
0x12f8   : > { %v6350_v53 = vpop.xlane.xlu0 %6349 }
0x12f9   : > { %v6359_v58 = vmul.f32 0.0078125, %v6350_v53 }
0x12fa   : > { %v6352_v42 = vpop.xlane.xlu1 %6351 }
0x12fb   : > { %v6367_v51 = vadd.f32 1e-12, %v6359_v58  ;;  %v6360_v22 = vmul.f32 0.0078125, %v6352_v42 }
0x12fd   : > { %8118 = vrsqrt.f32 %v6367_v51  ;;  %v6368_v23 = vadd.f32 1e-12, %v6360_v22  ;;  %v6468_v37 = vld [vmem:[%s8414_s24 + $0x8] sm:$0xf] (%p8324_p5)  ;;  %v6470_v41 = vld [vmem:[%s8414_s24 + $0xc] sm:$0xf] (%p8324_p5) }
0x12fe   : > { %6469 = vst [vmem:[%s6448_s0 + $0x10] sm:$0xf] (%p8324_p5), %v6468_v37  ;;  %6471 = vst [vmem:[%s6448_s0 + $0x18] sm:$0xf] (%p8324_p5), %v6470_v41 }
0x12ff   : > { %v8115_v4 = vpop.eup %8114  ;;  %8120 = vrsqrt.f32 %v6368_v23 }
0x1300   : > { %v6381_v62 = vmul.f32 %v8115_v4, %v10208_v56 }
0x1301   : > { %v8117_v18 = vpop.eup %8116 }
0x1302   : > { %v6395_v47 = vmul.f32 %v6902_v38, %v6381_v62  ;;  %v6382_v3 = vmul.f32 %v8117_v18, %v10210_v33 }
0x1304   : > { %v6409_v24 = vadd.f32 %v6903_v5, %v6395_v47  ;;  %v6396_v17 = vmul.f32 %v6902_v38, %v6382_v3 }
0x1306   : > { %6417 = vst [vmem:[#allocation2 + $0x20] sm:$0xff] %v6409_v24  ;;  %v6410_v60 = vadd.f32 %v6903_v5, %v6396_v17 }
0x1307   : > { %v8119_v39 = vpop.eup %8118 }
0x1308   : > { %6418 = vst [vmem:[#allocation2 + $0x28] sm:$0xff] %v6410_v60  ;;  %v6943_v57 = vpack.c.bf16 %v6410_v60, %v6409_v24  ;;  %v6383_v27 = vmul.f32 %v8119_v39, %v10216_v15  ;;  %v6464_v15 = vld [vmem:[%s8414_s24] sm:$0xf] (%p8324_p5) }
0x1309   : > { %v8121_v40 = vpop.eup %8120  ;;  %6465 = vst [vmem:[%s6448_s0] sm:$0xf] (%p8324_p5), %v6464_v15 }
0x130a   : > { %6954 = vst [vmem:[%s8414_s24 + $0x10] sm:$0xff] %v6943_v57   ;;  %v6397_v30 = vmul.f32 %v6902_v38, %v6383_v27  ;;  %v6384_v1 = vmul.f32 %v8121_v40, %v10218_v31  ;;  %v6466_v31 = vld [vmem:[%s8414_s24 + $0x4] sm:$0xf] (%p8324_p5) }
0x130b   : > { %6467 = vst [vmem:[%s6448_s0 + $0x8] sm:$0xf] (%p8324_p5), %v6466_v31 }
0x130c   : > { %v6411_v56 = vadd.f32 %v6903_v5, %v6397_v30  ;;  %v6398_v36 = vmul.f32 %v6902_v38, %v6384_v1  ;;  %6443 = sbr.rel (!%p8324_p5) target bundleno = 4891 (0x131b), region = 92 }
0x130e   : > { %6419 = vst [vmem:[#allocation2 + $0x30] sm:$0xff] %v6411_v56  ;;  %v6412_v10 = vadd.f32 %v6903_v5, %v6398_v36 }
0x1310   : > { %6420 = vst [vmem:[#allocation2 + $0x38] sm:$0xff] %v6412_v10  ;;  %v6948_v33 = vpack.c.bf16 %v6412_v10, %v6411_v56 }
0x1311   : > { %v6472_v8 = vld [vmem:[%s8414_s24 + $0x10] sm:$0xf] (%p8324_p5)  ;;  %v6474_v63 = vld [vmem:[%s8414_s24 + $0x14] sm:$0xf] (%p8324_p5) }
0x1312   : > { %6955 = vst [vmem:[%s8414_s24 + $0x18] sm:$0xff] %v6948_v33   ;;  %6473 = vst [vmem:[%s6448_s0 + $0x20] sm:$0xf] (%p8324_p5), %v6472_v8 }
0x1313   : > { %6475 = vst [vmem:[%s6448_s0 + $0x28] sm:$0xf] %v6474_v63 }
0x1319   : > { %v6476_v49 = vld [vmem:[%s8414_s24 + $0x18] sm:$0xf]  ;;  %v6478_v13 = vld [vmem:[%s8414_s24 + $0x1c] sm:$0xf] }
0x131a   : > { %6477 = vst [vmem:[%s6448_s0 + $0x30] sm:$0xf] %v6476_v49  ;;  %6479 = vst [vmem:[%s6448_s0 + $0x38] sm:$0xf] %v6478_v13 }
0x131b PF: > { %s10460_s4 = sld [smem:[#allocation9_spill]]  ;;  %s10461_s21 = sld [smem:[#allocation4_spill]] }
0x131c   : > { %s10462_s22 = sld [smem:[#allocation13_spill]]  ;;  %s10463_s23 = sld [smem:[#allocation7_spill]] }
0x131d   : > { %s10464_s24 = sld [smem:[#allocation8_spill]]  ;;  %s10465_s25 = sld [smem:[#allocation10_spill]] }
0x131e   : > { %s10466_s26 = sld [smem:[#allocation12_spill]] }
0x1321   : > { %s26_s27 = sadd.s32 1, %s10460_s4  }
0x1322   : > { %p23_p13 = scmp.ge.s32.totalorder %s26_s27, 6  }
0x1324   :  { %25 = sbr.rel (!%p23_p13) target bundleno = 14 (0xe), region = 198 }

</bundles_post_ra>
